<compile_context>
chip_gen: v6e
topology: v6e:2x2x1
jax: 0.10.0
libtpu: 0.0.40
codegen_flags: <defaults>
</compile_context>

<pallas_src>
import jax
import jax.numpy as jnp
from jax.experimental import pallas as pl
from jax.experimental.pallas import tpu as pltpu

KH = KW = 8
STRIDE = 6
C_IN, C_OUT = 3, 30
IMG = 64
OH = OW = (IMG - KH) // STRIDE + 1          # 10 conv output pixels per side
PH = PW = OH // 2                           # 5  after 2x2 max-pool
NPOS = PH * PW                              # 25 pooled positions per image
NMEM = 4                                    # 2x2 pool members
CONV_PIX = NMEM * NPOS                      # 100 conv-output pixels per image
K = C_IN * KH * KW                          # 192 im2col contraction depth
FEAT = C_OUT * NPOS                         # 750 flattened features
CPAD = 32                                   # channels padded 30 -> 32 in staging
FEAT_PAD = NPOS * CPAD                      # 800 staged feature rows
H1, H2 = 400, 200

# bf16 matmul operands, f32 accumulation.  Set to jnp.float32 for numerics
# bit-closer to the f32 PyTorch reference.
COMPUTE_DTYPE = jnp.bfloat16

# Batch tile (images per grid step).  128 keeps every lane slice/store in the
# kernel 128-aligned, amortizes the ~0.35 us/step grid overhead and needs
# ~15-20 MiB VMEM/step (fits v7x's 64 MiB; v5e/v6e could go to 256 but 128 is
# kept so batches >= 256 still give >= 2 grid steps for both v7x TensorCores).
BT = 128


def _round_up(v, m):
    return (v + m - 1) // m * m


# ------------------------------ Pallas kernel -------------------------------

def fused_net_kernel(p_ref, wc_ref, bc_ref, w1_ref, b1_ref, w2_ref, b2_ref,
                     o_ref, act_ref):
    """conv (transposed im2col matmul) -> 2x2 max-pool -> +bias -> ReLU ->
    staged fc1 (single 800-deep matmul) -> ReLU -> (dropout = identity) ->
    fc2 -> log_softmax, for one tile of `bt` images.  Batch lives on lanes.

    p_ref : (K, CONV_PIX*bt) bf16, col = ((dh*2+dw)*25 + ph*5+pw)*bt + b
    wc_ref: (C_OUT, K)        bc_ref: (C_OUT, 1)
    w1_ref: (H1, FEAT_PAD)    b1_ref: (H1, 1)     (fc1 weight, (pos,chan) cols)
    w2_ref: (H2, H1)          b2_ref: (H2, 1)
    o_ref : (H2, bt)          log-probs, transposed (wrapper transposes back)
    act_ref: (FEAT_PAD, bt) bf16 staging scratch for the pooled activation.
    """
    bt = o_ref.shape[1]
    nb = NPOS * bt

    # Padding rows (c = 30, 31 of each position) must be zero every step:
    # scratch persists per-core and 0 * garbage-NaN would poison fc1.
    act_ref[...] = jnp.zeros_like(act_ref)

    # conv1 as one transposed im2col matmul: (30, 192) @ (192, 100*bt).
    y = jnp.dot(wc_ref[...], p_ref[...],
                preferred_element_type=jnp.float32)                 # (30, 4*nb)

    # 2x2 max-pool == max over the four pool-member lane blocks, then bias+ReLU
    # (bias is per-channel, so max/bias commute; applying it post-pool is 4x
    # less VPU work).
    m = jnp.maximum(jnp.maximum(y[:, 0:nb], y[:, nb:2 * nb]),
                    jnp.maximum(y[:, 2 * nb:3 * nb], y[:, 3 * nb:4 * nb]))
    a = jnp.maximum(m + bc_ref[...], 0.0).astype(act_ref.dtype)     # (30, 25*bt)

    # Stage pooled features into (pos*32 + c, b): 25 lane-aligned reads
    # (offsets are multiples of bt=128) and sublane-aligned stores (offsets are
    # multiples of 32), so fc1 becomes ONE 800-deep matmul instead of 25 K=30
    # dots that under-fill the 256-deep MXU.
    for pos in range(NPOS):
        act_ref[pos * CPAD:pos * CPAD + C_OUT, :] = a[:, pos * bt:(pos + 1) * bt]

    # fc1 + ReLU  (single (400,800)@(800,bt) matmul).
    h = jnp.maximum(jnp.dot(w1_ref[...], act_ref[...],
                            preferred_element_type=jnp.float32) + b1_ref[...],
                    0.0)                                             # (H1, bt)

    # TODO(synk): F.dropout(training=True) is implemented as identity
    # (eval-mode semantics); no RNG dropout mask is applied in-kernel.
    z = jnp.dot(w2_ref[...], h.astype(w2_ref.dtype),
                preferred_element_type=jnp.float32) + b2_ref[...]    # (H2, bt)

    # log_softmax over classes (sublane axis in this transposed layout).
    s = z - jnp.max(z, axis=0, keepdims=True)
    o_ref[...] = s - jnp.log(jnp.sum(jnp.exp(s), axis=0, keepdims=True))


# -------------------------------- JAX glue ----------------------------------

def _im2col_transposed(xp, bt):
    """NCHW [n_pad, 3, 64, 64] bf16 -> patch matrix (K, n_tiles*CONV_PIX*bt).

    Row  r   = ci*KH*KW + kh*KW + kw        (== conv1.weight.view(30,-1) cols)
    Col      = tile*(100*bt) + (dh*2+dw)*(25*bt) + (ph*5+pw)*bt + b_local
    Built from static strided slices + one transpose (no gather chain).
    """
    n_pad = xp.shape[0]
    n_tiles = n_pad // bt
    slabs = []
    for kh in range(KH):
        rows = xp[:, :, kh:kh + OH * STRIDE:STRIDE, :]                  # (n,3,10,64)
        for kw in range(KW):
            slabs.append(rows[:, :, :, kw:kw + OW * STRIDE:STRIDE])     # (n,3,10,10)
    pt = jnp.stack(slabs, axis=2)                                       # (n,3,64,10,10)
    pt = pt.reshape(n_tiles, bt, C_IN, KH * KW, PH, 2, PW, 2)
    # (tile, b, ci, kk, ph, dh, pw, dw) -> (ci, kk, tile, dh, dw, ph, pw, b)
    pt = pt.transpose(2, 3, 0, 5, 7, 4, 6, 1)
    return pt.reshape(K, n_tiles * CONV_PIX * bt)


def net_forward(x, params):
    n = x.shape[0]
    bt = BT
    n_pad = _round_up(n, bt)
    n_tiles = n_pad // bt

    wc, bc, w1, b1, w2, b2 = params
    # conv weight as the matmul LHS (30, 192), torch weight.view(30,-1) order.
    wc_k = wc.reshape(C_OUT, K).astype(COMPUTE_DTYPE)
    bc_k = bc.reshape(C_OUT, 1).astype(jnp.float32)
    # fc1 weight: torch feature f = c*25 + pos  ->  column pos*32 + c,
    # zero-padded at c in {30, 31} to match the staged activation layout.
    w1_k = jnp.pad(w1.reshape(H1, C_OUT, NPOS).transpose(0, 2, 1),
                   ((0, 0), (0, 0), (0, CPAD - C_OUT)))
    w1_k = w1_k.reshape(H1, FEAT_PAD).astype(COMPUTE_DTYPE)             # (400, 800)
    b1_k = b1.reshape(H1, 1).astype(jnp.float32)
    w2_k = w2.astype(COMPUTE_DTYPE)                                     # (200, 400)
    b2_k = b2.reshape(H2, 1).astype(jnp.float32)

    # NOTE: bf16 operands (f32 accumulation) deviate ~1e-2 relative from the
    # f32 PyTorch reference; flip COMPUTE_DTYPE to float32 for bit-closer math.
    x = x.astype(COMPUTE_DTYPE)                  # bf16 before the im2col path
    if n_pad != n:
        x = jnp.pad(x, ((0, n_pad - n), (0, 0), (0, 0), (0, 0)))
    patches = _im2col_transposed(x, bt)          # (192, n_tiles*100*bt)

    flops = 2 * n_pad * (CONV_PIX * K * C_OUT + FEAT * H1 + H1 * H2)
    bytes_accessed = (patches.size * patches.dtype.itemsize
                      + (wc_k.size + w1_k.size + w2_k.size) * 2
                      + (bc_k.size + b1_k.size + b2_k.size) * 4
                      + n_pad * H2 * 4)

    out_t = pl.pallas_call(
        fused_net_kernel,
        out_shape=jax.ShapeDtypeStruct((H2, n_pad), jnp.float32),
        grid=(n_tiles,),
        in_specs=[
            pl.BlockSpec((K, CONV_PIX * bt), lambda i: (0, i)),   # per-tile patches
            pl.BlockSpec((C_OUT, K), lambda i: (0, 0)),           # grid-invariant weights
            pl.BlockSpec((C_OUT, 1), lambda i: (0, 0)),
            pl.BlockSpec((H1, FEAT_PAD), lambda i: (0, 0)),
            pl.BlockSpec((H1, 1), lambda i: (0, 0)),
            pl.BlockSpec((H2, H1), lambda i: (0, 0)),
            pl.BlockSpec((H2, 1), lambda i: (0, 0)),
        ],
        out_specs=pl.BlockSpec((H2, bt), lambda i: (0, i)),
        scratch_shapes=[pltpu.VMEM((FEAT_PAD, bt), COMPUTE_DTYPE)],
        compiler_params=pltpu.CompilerParams(
            dimension_semantics=("parallel",),
            # ~15-20 MiB/step actually used; explicit limit so the 16 MiB v5e
            # default does not bite, and still well under v7x's 64 MiB.
            vmem_limit_bytes=40 * 1024 * 1024,
            # Let XLA fuse the im2col producer into the patch input DMA instead
            # of materializing a second activation copy in HBM (v5e/v6e are
            # DMA-bound here).
            allow_input_fusion=[True, False, False, False, False, False, False],
        ),
        cost_estimate=pl.CostEstimate(flops=flops, transcendentals=n_pad * H2,
                                      bytes_accessed=bytes_accessed),
    )(patches, wc_k, bc_k, w1_k, b1_k, w2_k, b2_k)

    # Kernel output is (classes, batch); transpose the tiny result back.
    return out_t[:, :n].T


# ------------------------- f32 reference (for checks) ------------------------

def reference_forward(x, params):
    wc, bc, w1, b1, w2, b2 = params
    y = jax.lax.conv_general_dilated(
        x, wc, window_strides=(STRIDE, STRIDE), padding="VALID",
        dimension_numbers=("NCHW", "OIHW", "NCHW")) + bc[None, :, None, None]
    p = jax.lax.reduce_window(y, -jnp.inf, jax.lax.max,
                              (1, 1, 2, 2), (1, 1, 2, 2), "VALID")
    a = jnp.maximum(p, 0.0).reshape(x.shape[0], FEAT)
    h = jnp.maximum(a @ w1.T + b1, 0.0)
    # dropout(training) omitted to match the kernel's eval-mode semantics.
    z = h @ w2.T + b2
    return jax.nn.log_softmax(z, axis=1)


def init_params(key):
    """Deterministic PyTorch-style uniform(-1/sqrt(fan_in), 1/sqrt(fan_in)) init."""
    ks = jax.random.split(key, 6)

    def u(kk, shape, fan_in):
        b = 1.0 / (fan_in ** 0.5)
        return jax.random.uniform(kk, shape, jnp.float32, -b, b)

    wc = u(ks[0], (C_OUT, C_IN, KH, KW), C_IN * KH * KW)   # conv1.weight
    bc = u(ks[1], (C_OUT,), C_IN * KH * KW)                # conv1.bias
    w1 = u(ks[2], (H1, FEAT), FEAT)                        # fc1.weight
    b1 = u(ks[3], (H1,), FEAT)                             # fc1.bias
    w2 = u(ks[4], (H2, H1), H1)                            # fc2.weight
    b2 = u(ks[5], (H2,), H1)                               # fc2.bias
    return wc, bc, w1, b1, w2, b2


if __name__ == "__main__":
    key = jax.random.PRNGKey(0)
    kx, kp = jax.random.split(key)
    x = jax.random.normal(kx, (2, C_IN, IMG, IMG), jnp.float32)   # NCHW
    params = init_params(kp)

    out = jax.block_until_ready(jax.jit(net_forward)(x, params))

    assert out.shape == (2, H2), out.shape
    assert bool(jnp.all(jnp.isfinite(out)))
    # log_softmax rows should exp-sum to ~1
    assert bool(jnp.allclose(jnp.sum(jnp.exp(out), axis=1), 1.0, atol=1e-3))
    # bf16-operand kernel vs f32 XLA reference (documented tolerance).
    ref = reference_forward(x, params)
    err = float(jnp.max(jnp.abs(out - ref)))
    assert err < 5e-2, f"max |pallas - reference| = {err}"
    print("KERNEL_OK")
</pallas_src>

<mosaic_0001>
module attributes {stable_mosaic.version = 11 : i64} {
  func.func @fused_net_kernel(%arg0: i32, %arg1: memref<192x12800xbf16, #tpu.memory_space<vmem>>, %arg2: memref<30x192xbf16, #tpu.memory_space<vmem>>, %arg3: memref<30x1xf32, #tpu.memory_space<vmem>>, %arg4: memref<400x800xbf16, #tpu.memory_space<vmem>>, %arg5: memref<400x1xf32, #tpu.memory_space<vmem>>, %arg6: memref<200x400xbf16, #tpu.memory_space<vmem>>, %arg7: memref<200x1xf32, #tpu.memory_space<vmem>>, %arg8: memref<200x128xf32, #tpu.memory_space<vmem>>, %arg9: memref<800x128xbf16, #tpu.memory_space<vmem>>) attributes {dimension_semantics = [#tpu.dimension_semantics<parallel>], iteration_bounds = array<i64: 1>, scalar_prefetch = 0 : i64, scratch_operands = 1 : i64, tpu.core_type = #tpu.core_type<tc>, window_params = [{transform_indices = @transform_0, window_bounds = array<i64: 192, 12800>}, {pipeline_mode = #tpu.pipeline_mode<synchronous>, transform_indices = @transform_1, window_bounds = array<i64: 30, 192>}, {pipeline_mode = #tpu.pipeline_mode<synchronous>, transform_indices = @transform_2, window_bounds = array<i64: 30, 1>}, {pipeline_mode = #tpu.pipeline_mode<synchronous>, transform_indices = @transform_3, window_bounds = array<i64: 400, 800>}, {pipeline_mode = #tpu.pipeline_mode<synchronous>, transform_indices = @transform_4, window_bounds = array<i64: 400, 1>}, {pipeline_mode = #tpu.pipeline_mode<synchronous>, transform_indices = @transform_5, window_bounds = array<i64: 200, 400>}, {pipeline_mode = #tpu.pipeline_mode<synchronous>, transform_indices = @transform_6, window_bounds = array<i64: 200, 1>}, {transform_indices = @transform_7, window_bounds = array<i64: 200, 128>}]} {
    %cst = arith.constant 0.000000e+00 : bf16
    %0 = vector.broadcast %cst : bf16 to vector<800x128xbf16>
    %c0 = arith.constant 0 : index
    %c0_0 = arith.constant 0 : index
    %1 = vector.load %arg9[%c0, %c0_0] : memref<800x128xbf16, #tpu.memory_space<vmem>>, vector<800x128xbf16>
    tpu.vector_store %arg9[%c0, %c0_0], %0 {strides = array<i32>} : memref<800x128xbf16, #tpu.memory_space<vmem>>, vector<800x128xbf16>,
    %c0_1 = arith.constant 0 : index
    %c0_2 = arith.constant 0 : index
    %2 = vector.load %arg2[%c0_1, %c0_2] : memref<30x192xbf16, #tpu.memory_space<vmem>>, vector<30x192xbf16>
    %c0_3 = arith.constant 0 : index
    %c0_4 = arith.constant 0 : index
    %3 = vector.load %arg1[%c0_3, %c0_4] : memref<192x12800xbf16, #tpu.memory_space<vmem>>, vector<192x12800xbf16>
    %cst_5 = arith.constant dense<0.000000e+00> : vector<30x12800xf32>
    %4 = tpu.matmul %2, %3, %cst_5 {dimension_numbers = #tpu.dot_dimension_numbers<[1], [0], [0], [1], [0, 0, 1, 1], [], []>} : vector<30x192xbf16>, vector<192x12800xbf16>, vector<30x12800xf32> -> vector<30x12800xf32>
    %5 = vector.extract_strided_slice %4 {offsets = [0, 0], sizes = [30, 3200], strides = [1, 1]} : vector<30x12800xf32> to vector<30x3200xf32>
    %6 = vector.extract_strided_slice %4 {offsets = [0, 3200], sizes = [30, 3200], strides = [1, 1]} : vector<30x12800xf32> to vector<30x3200xf32>
    %7 = arith.maximumf %5, %6 : vector<30x3200xf32>
    %8 = vector.extract_strided_slice %4 {offsets = [0, 6400], sizes = [30, 3200], strides = [1, 1]} : vector<30x12800xf32> to vector<30x3200xf32>
    %9 = vector.extract_strided_slice %4 {offsets = [0, 9600], sizes = [30, 3200], strides = [1, 1]} : vector<30x12800xf32> to vector<30x3200xf32>
    %10 = arith.maximumf %8, %9 : vector<30x3200xf32>
    %11 = arith.maximumf %7, %10 : vector<30x3200xf32>
    %c0_6 = arith.constant 0 : index
    %c0_7 = arith.constant 0 : index
    %12 = vector.load %arg3[%c0_6, %c0_7] : memref<30x1xf32, #tpu.memory_space<vmem>>, vector<30x1xf32>
    %13 = vector.broadcast %12 : vector<30x1xf32> to vector<30x3200xf32>
    %14 = arith.addf %11, %13 : vector<30x3200xf32>
    %cst_8 = arith.constant 0.000000e+00 : f32
    %15 = vector.broadcast %cst_8 : f32 to vector<30x3200xf32>
    %16 = arith.maximumf %14, %15 : vector<30x3200xf32>
    %17 = arith.truncf %16 : vector<30x3200xf32> to vector<30x3200xbf16>
    %18 = vector.extract_strided_slice %17 {offsets = [0, 0], sizes = [30, 128], strides = [1, 1]} : vector<30x3200xbf16> to vector<30x128xbf16>
    %c0_9 = arith.constant 0 : index
    %c0_10 = arith.constant 0 : index
    %19 = vector.load %arg9[%c0_9, %c0_10] : memref<800x128xbf16, #tpu.memory_space<vmem>>, vector<30x128xbf16>
    tpu.vector_store %arg9[%c0_9, %c0_10], %18 {strides = array<i32>} : memref<800x128xbf16, #tpu.memory_space<vmem>>, vector<30x128xbf16>,
    %20 = vector.extract_strided_slice %17 {offsets = [0, 128], sizes = [30, 128], strides = [1, 1]} : vector<30x3200xbf16> to vector<30x128xbf16>
    %c32 = arith.constant 32 : index
    %c0_11 = arith.constant 0 : index
    %21 = vector.load %arg9[%c32, %c0_11] : memref<800x128xbf16, #tpu.memory_space<vmem>>, vector<30x128xbf16>
    tpu.vector_store %arg9[%c32, %c0_11], %20 {strides = array<i32>} : memref<800x128xbf16, #tpu.memory_space<vmem>>, vector<30x128xbf16>,
    %22 = vector.extract_strided_slice %17 {offsets = [0, 256], sizes = [30, 128], strides = [1, 1]} : vector<30x3200xbf16> to vector<30x128xbf16>
    %c64 = arith.constant 64 : index
    %c0_12 = arith.constant 0 : index
    %23 = vector.load %arg9[%c64, %c0_12] : memref<800x128xbf16, #tpu.memory_space<vmem>>, vector<30x128xbf16>
    tpu.vector_store %arg9[%c64, %c0_12], %22 {strides = array<i32>} : memref<800x128xbf16, #tpu.memory_space<vmem>>, vector<30x128xbf16>,
    %24 = vector.extract_strided_slice %17 {offsets = [0, 384], sizes = [30, 128], strides = [1, 1]} : vector<30x3200xbf16> to vector<30x128xbf16>
    %c96 = arith.constant 96 : index
    %c0_13 = arith.constant 0 : index
    %25 = vector.load %arg9[%c96, %c0_13] : memref<800x128xbf16, #tpu.memory_space<vmem>>, vector<30x128xbf16>
    tpu.vector_store %arg9[%c96, %c0_13], %24 {strides = array<i32>} : memref<800x128xbf16, #tpu.memory_space<vmem>>, vector<30x128xbf16>,
    %26 = vector.extract_strided_slice %17 {offsets = [0, 512], sizes = [30, 128], strides = [1, 1]} : vector<30x3200xbf16> to vector<30x128xbf16>
    %c128 = arith.constant 128 : index
    %c0_14 = arith.constant 0 : index
    %27 = vector.load %arg9[%c128, %c0_14] : memref<800x128xbf16, #tpu.memory_space<vmem>>, vector<30x128xbf16>
    tpu.vector_store %arg9[%c128, %c0_14], %26 {strides = array<i32>} : memref<800x128xbf16, #tpu.memory_space<vmem>>, vector<30x128xbf16>,
    %28 = vector.extract_strided_slice %17 {offsets = [0, 640], sizes = [30, 128], strides = [1, 1]} : vector<30x3200xbf16> to vector<30x128xbf16>
    %c160 = arith.constant 160 : index
    %c0_15 = arith.constant 0 : index
    %29 = vector.load %arg9[%c160, %c0_15] : memref<800x128xbf16, #tpu.memory_space<vmem>>, vector<30x128xbf16>
    tpu.vector_store %arg9[%c160, %c0_15], %28 {strides = array<i32>} : memref<800x128xbf16, #tpu.memory_space<vmem>>, vector<30x128xbf16>,
    %30 = vector.extract_strided_slice %17 {offsets = [0, 768], sizes = [30, 128], strides = [1, 1]} : vector<30x3200xbf16> to vector<30x128xbf16>
    %c192 = arith.constant 192 : index
    %c0_16 = arith.constant 0 : index
    %31 = vector.load %arg9[%c192, %c0_16] : memref<800x128xbf16, #tpu.memory_space<vmem>>, vector<30x128xbf16>
    tpu.vector_store %arg9[%c192, %c0_16], %30 {strides = array<i32>} : memref<800x128xbf16, #tpu.memory_space<vmem>>, vector<30x128xbf16>,
    %32 = vector.extract_strided_slice %17 {offsets = [0, 896], sizes = [30, 128], strides = [1, 1]} : vector<30x3200xbf16> to vector<30x128xbf16>
    %c224 = arith.constant 224 : index
    %c0_17 = arith.constant 0 : index
    %33 = vector.load %arg9[%c224, %c0_17] : memref<800x128xbf16, #tpu.memory_space<vmem>>, vector<30x128xbf16>
    tpu.vector_store %arg9[%c224, %c0_17], %32 {strides = array<i32>} : memref<800x128xbf16, #tpu.memory_space<vmem>>, vector<30x128xbf16>,
    %34 = vector.extract_strided_slice %17 {offsets = [0, 1024], sizes = [30, 128], strides = [1, 1]} : vector<30x3200xbf16> to vector<30x128xbf16>
    %c256 = arith.constant 256 : index
    %c0_18 = arith.constant 0 : index
    %35 = vector.load %arg9[%c256, %c0_18] : memref<800x128xbf16, #tpu.memory_space<vmem>>, vector<30x128xbf16>
    tpu.vector_store %arg9[%c256, %c0_18], %34 {strides = array<i32>} : memref<800x128xbf16, #tpu.memory_space<vmem>>, vector<30x128xbf16>,
    %36 = vector.extract_strided_slice %17 {offsets = [0, 1152], sizes = [30, 128], strides = [1, 1]} : vector<30x3200xbf16> to vector<30x128xbf16>
    %c288 = arith.constant 288 : index
    %c0_19 = arith.constant 0 : index
    %37 = vector.load %arg9[%c288, %c0_19] : memref<800x128xbf16, #tpu.memory_space<vmem>>, vector<30x128xbf16>
    tpu.vector_store %arg9[%c288, %c0_19], %36 {strides = array<i32>} : memref<800x128xbf16, #tpu.memory_space<vmem>>, vector<30x128xbf16>,
    %38 = vector.extract_strided_slice %17 {offsets = [0, 1280], sizes = [30, 128], strides = [1, 1]} : vector<30x3200xbf16> to vector<30x128xbf16>
    %c320 = arith.constant 320 : index
    %c0_20 = arith.constant 0 : index
    %39 = vector.load %arg9[%c320, %c0_20] : memref<800x128xbf16, #tpu.memory_space<vmem>>, vector<30x128xbf16>
    tpu.vector_store %arg9[%c320, %c0_20], %38 {strides = array<i32>} : memref<800x128xbf16, #tpu.memory_space<vmem>>, vector<30x128xbf16>,
    %40 = vector.extract_strided_slice %17 {offsets = [0, 1408], sizes = [30, 128], strides = [1, 1]} : vector<30x3200xbf16> to vector<30x128xbf16>
    %c352 = arith.constant 352 : index
    %c0_21 = arith.constant 0 : index
    %41 = vector.load %arg9[%c352, %c0_21] : memref<800x128xbf16, #tpu.memory_space<vmem>>, vector<30x128xbf16>
    tpu.vector_store %arg9[%c352, %c0_21], %40 {strides = array<i32>} : memref<800x128xbf16, #tpu.memory_space<vmem>>, vector<30x128xbf16>,
    %42 = vector.extract_strided_slice %17 {offsets = [0, 1536], sizes = [30, 128], strides = [1, 1]} : vector<30x3200xbf16> to vector<30x128xbf16>
    %c384 = arith.constant 384 : index
    %c0_22 = arith.constant 0 : index
    %43 = vector.load %arg9[%c384, %c0_22] : memref<800x128xbf16, #tpu.memory_space<vmem>>, vector<30x128xbf16>
    tpu.vector_store %arg9[%c384, %c0_22], %42 {strides = array<i32>} : memref<800x128xbf16, #tpu.memory_space<vmem>>, vector<30x128xbf16>,
    %44 = vector.extract_strided_slice %17 {offsets = [0, 1664], sizes = [30, 128], strides = [1, 1]} : vector<30x3200xbf16> to vector<30x128xbf16>
    %c416 = arith.constant 416 : index
    %c0_23 = arith.constant 0 : index
    %45 = vector.load %arg9[%c416, %c0_23] : memref<800x128xbf16, #tpu.memory_space<vmem>>, vector<30x128xbf16>
    tpu.vector_store %arg9[%c416, %c0_23], %44 {strides = array<i32>} : memref<800x128xbf16, #tpu.memory_space<vmem>>, vector<30x128xbf16>,
    %46 = vector.extract_strided_slice %17 {offsets = [0, 1792], sizes = [30, 128], strides = [1, 1]} : vector<30x3200xbf16> to vector<30x128xbf16>
    %c448 = arith.constant 448 : index
    %c0_24 = arith.constant 0 : index
    %47 = vector.load %arg9[%c448, %c0_24] : memref<800x128xbf16, #tpu.memory_space<vmem>>, vector<30x128xbf16>
    tpu.vector_store %arg9[%c448, %c0_24], %46 {strides = array<i32>} : memref<800x128xbf16, #tpu.memory_space<vmem>>, vector<30x128xbf16>,
    %48 = vector.extract_strided_slice %17 {offsets = [0, 1920], sizes = [30, 128], strides = [1, 1]} : vector<30x3200xbf16> to vector<30x128xbf16>
    %c480 = arith.constant 480 : index
    %c0_25 = arith.constant 0 : index
    %49 = vector.load %arg9[%c480, %c0_25] : memref<800x128xbf16, #tpu.memory_space<vmem>>, vector<30x128xbf16>
    tpu.vector_store %arg9[%c480, %c0_25], %48 {strides = array<i32>} : memref<800x128xbf16, #tpu.memory_space<vmem>>, vector<30x128xbf16>,
    %50 = vector.extract_strided_slice %17 {offsets = [0, 2048], sizes = [30, 128], strides = [1, 1]} : vector<30x3200xbf16> to vector<30x128xbf16>
    %c512 = arith.constant 512 : index
    %c0_26 = arith.constant 0 : index
    %51 = vector.load %arg9[%c512, %c0_26] : memref<800x128xbf16, #tpu.memory_space<vmem>>, vector<30x128xbf16>
    tpu.vector_store %arg9[%c512, %c0_26], %50 {strides = array<i32>} : memref<800x128xbf16, #tpu.memory_space<vmem>>, vector<30x128xbf16>,
    %52 = vector.extract_strided_slice %17 {offsets = [0, 2176], sizes = [30, 128], strides = [1, 1]} : vector<30x3200xbf16> to vector<30x128xbf16>
    %c544 = arith.constant 544 : index
    %c0_27 = arith.constant 0 : index
    %53 = vector.load %arg9[%c544, %c0_27] : memref<800x128xbf16, #tpu.memory_space<vmem>>, vector<30x128xbf16>
    tpu.vector_store %arg9[%c544, %c0_27], %52 {strides = array<i32>} : memref<800x128xbf16, #tpu.memory_space<vmem>>, vector<30x128xbf16>,
    %54 = vector.extract_strided_slice %17 {offsets = [0, 2304], sizes = [30, 128], strides = [1, 1]} : vector<30x3200xbf16> to vector<30x128xbf16>
    %c576 = arith.constant 576 : index
    %c0_28 = arith.constant 0 : index
    %55 = vector.load %arg9[%c576, %c0_28] : memref<800x128xbf16, #tpu.memory_space<vmem>>, vector<30x128xbf16>
    tpu.vector_store %arg9[%c576, %c0_28], %54 {strides = array<i32>} : memref<800x128xbf16, #tpu.memory_space<vmem>>, vector<30x128xbf16>,
    %56 = vector.extract_strided_slice %17 {offsets = [0, 2432], sizes = [30, 128], strides = [1, 1]} : vector<30x3200xbf16> to vector<30x128xbf16>
    %c608 = arith.constant 608 : index
    %c0_29 = arith.constant 0 : index
    %57 = vector.load %arg9[%c608, %c0_29] : memref<800x128xbf16, #tpu.memory_space<vmem>>, vector<30x128xbf16>
    tpu.vector_store %arg9[%c608, %c0_29], %56 {strides = array<i32>} : memref<800x128xbf16, #tpu.memory_space<vmem>>, vector<30x128xbf16>,
    %58 = vector.extract_strided_slice %17 {offsets = [0, 2560], sizes = [30, 128], strides = [1, 1]} : vector<30x3200xbf16> to vector<30x128xbf16>
    %c640 = arith.constant 640 : index
    %c0_30 = arith.constant 0 : index
    %59 = vector.load %arg9[%c640, %c0_30] : memref<800x128xbf16, #tpu.memory_space<vmem>>, vector<30x128xbf16>
    tpu.vector_store %arg9[%c640, %c0_30], %58 {strides = array<i32>} : memref<800x128xbf16, #tpu.memory_space<vmem>>, vector<30x128xbf16>,
    %60 = vector.extract_strided_slice %17 {offsets = [0, 2688], sizes = [30, 128], strides = [1, 1]} : vector<30x3200xbf16> to vector<30x128xbf16>
    %c672 = arith.constant 672 : index
    %c0_31 = arith.constant 0 : index
    %61 = vector.load %arg9[%c672, %c0_31] : memref<800x128xbf16, #tpu.memory_space<vmem>>, vector<30x128xbf16>
    tpu.vector_store %arg9[%c672, %c0_31], %60 {strides = array<i32>} : memref<800x128xbf16, #tpu.memory_space<vmem>>, vector<30x128xbf16>,
    %62 = vector.extract_strided_slice %17 {offsets = [0, 2816], sizes = [30, 128], strides = [1, 1]} : vector<30x3200xbf16> to vector<30x128xbf16>
    %c704 = arith.constant 704 : index
    %c0_32 = arith.constant 0 : index
    %63 = vector.load %arg9[%c704, %c0_32] : memref<800x128xbf16, #tpu.memory_space<vmem>>, vector<30x128xbf16>
    tpu.vector_store %arg9[%c704, %c0_32], %62 {strides = array<i32>} : memref<800x128xbf16, #tpu.memory_space<vmem>>, vector<30x128xbf16>,
    %64 = vector.extract_strided_slice %17 {offsets = [0, 2944], sizes = [30, 128], strides = [1, 1]} : vector<30x3200xbf16> to vector<30x128xbf16>
    %c736 = arith.constant 736 : index
    %c0_33 = arith.constant 0 : index
    %65 = vector.load %arg9[%c736, %c0_33] : memref<800x128xbf16, #tpu.memory_space<vmem>>, vector<30x128xbf16>
    tpu.vector_store %arg9[%c736, %c0_33], %64 {strides = array<i32>} : memref<800x128xbf16, #tpu.memory_space<vmem>>, vector<30x128xbf16>,
    %66 = vector.extract_strided_slice %17 {offsets = [0, 3072], sizes = [30, 128], strides = [1, 1]} : vector<30x3200xbf16> to vector<30x128xbf16>
    %c768 = arith.constant 768 : index
    %c0_34 = arith.constant 0 : index
    %67 = vector.load %arg9[%c768, %c0_34] : memref<800x128xbf16, #tpu.memory_space<vmem>>, vector<30x128xbf16>
    tpu.vector_store %arg9[%c768, %c0_34], %66 {strides = array<i32>} : memref<800x128xbf16, #tpu.memory_space<vmem>>, vector<30x128xbf16>,
    %c0_35 = arith.constant 0 : index
    %c0_36 = arith.constant 0 : index
    %68 = vector.load %arg4[%c0_35, %c0_36] : memref<400x800xbf16, #tpu.memory_space<vmem>>, vector<400x800xbf16>
    %c0_37 = arith.constant 0 : index
    %c0_38 = arith.constant 0 : index
    %69 = vector.load %arg9[%c0_37, %c0_38] : memref<800x128xbf16, #tpu.memory_space<vmem>>, vector<800x128xbf16>
    %cst_39 = arith.constant dense<0.000000e+00> : vector<400x128xf32>
    %70 = tpu.matmul %68, %69, %cst_39 {dimension_numbers = #tpu.dot_dimension_numbers<[1], [0], [0], [1], [0, 0, 1, 1], [], []>} : vector<400x800xbf16>, vector<800x128xbf16>, vector<400x128xf32> -> vector<400x128xf32>
    %c0_40 = arith.constant 0 : index
    %c0_41 = arith.constant 0 : index
    %71 = vector.load %arg5[%c0_40, %c0_41] : memref<400x1xf32, #tpu.memory_space<vmem>>, vector<400x1xf32>
    %72 = vector.broadcast %71 : vector<400x1xf32> to vector<400x128xf32>
    %73 = arith.addf %70, %72 : vector<400x128xf32>
    %cst_42 = arith.constant 0.000000e+00 : f32
    %74 = vector.broadcast %cst_42 : f32 to vector<400x128xf32>
    %75 = arith.maximumf %73, %74 : vector<400x128xf32>
    %c0_43 = arith.constant 0 : index
    %c0_44 = arith.constant 0 : index
    %76 = vector.load %arg6[%c0_43, %c0_44] : memref<200x400xbf16, #tpu.memory_space<vmem>>, vector<200x400xbf16>
    %77 = arith.truncf %75 : vector<400x128xf32> to vector<400x128xbf16>
    %cst_45 = arith.constant dense<0.000000e+00> : vector<200x128xf32>
    %78 = tpu.matmul %76, %77, %cst_45 {dimension_numbers = #tpu.dot_dimension_numbers<[1], [0], [0], [1], [0, 0, 1, 1], [], []>} : vector<200x400xbf16>, vector<400x128xbf16>, vector<200x128xf32> -> vector<200x128xf32>
    %c0_46 = arith.constant 0 : index
    %c0_47 = arith.constant 0 : index
    %79 = vector.load %arg7[%c0_46, %c0_47] : memref<200x1xf32, #tpu.memory_space<vmem>>, vector<200x1xf32>
    %80 = vector.broadcast %79 : vector<200x1xf32> to vector<200x128xf32>
    %81 = arith.addf %78, %80 : vector<200x128xf32>
    %cst_48 = arith.constant dense<0xFF800000> : vector<128xf32>
    %82 = vector.multi_reduction <maximumf>, %81, %cst_48 [0] : vector<200x128xf32> to vector<128xf32>
    %83 = vector.shape_cast %82 : vector<128xf32> to vector<1x128xf32>
    %84 = vector.broadcast %83 : vector<1x128xf32> to vector<200x128xf32>
    %85 = arith.subf %81, %84 : vector<200x128xf32>
    %86 = math.exp %85 : vector<200x128xf32>
    %cst_49 = arith.constant dense<0.000000e+00> : vector<128xf32>
    %87 = vector.multi_reduction <add>, %86, %cst_49 [0] : vector<200x128xf32> to vector<128xf32>
    %88 = vector.shape_cast %87 : vector<128xf32> to vector<1x128xf32>
    %89 = math.log %88 : vector<1x128xf32>
    %90 = vector.broadcast %89 : vector<1x128xf32> to vector<200x128xf32>
    %91 = arith.subf %85, %90 : vector<200x128xf32>
    %c0_50 = arith.constant 0 : index
    %c0_51 = arith.constant 0 : index
    %92 = vector.load %arg8[%c0_50, %c0_51] : memref<200x128xf32, #tpu.memory_space<vmem>>, vector<200x128xf32>
    tpu.vector_store %arg8[%c0_50, %c0_51], %91 {strides = array<i32>} : memref<200x128xf32, #tpu.memory_space<vmem>>, vector<200x128xf32>,
    return
  }
  func.func @transform_0(%arg0: i32) -> (i32, i32) {
    %c0_i32 = arith.constant 0 : i32
    %c0_i32_0 = arith.constant 0 : i32
    return %c0_i32, %arg0 : i32, i32
  }
  func.func @transform_1(%arg0: i32) -> (i32, i32) {
    %c0_i32 = arith.constant 0 : i32
    %c0_i32_0 = arith.constant 0 : i32
    %c0_i32_1 = arith.constant 0 : i32
    return %c0_i32, %c0_i32_0 : i32, i32
  }
  func.func @transform_2(%arg0: i32) -> (i32, i32) {
    %c0_i32 = arith.constant 0 : i32
    %c0_i32_0 = arith.constant 0 : i32
    %c0_i32_1 = arith.constant 0 : i32
    return %c0_i32, %c0_i32_0 : i32, i32
  }
  func.func @transform_3(%arg0: i32) -> (i32, i32) {
    %c0_i32 = arith.constant 0 : i32
    %c0_i32_0 = arith.constant 0 : i32
    %c0_i32_1 = arith.constant 0 : i32
    return %c0_i32, %c0_i32_0 : i32, i32
  }
  func.func @transform_4(%arg0: i32) -> (i32, i32) {
    %c0_i32 = arith.constant 0 : i32
    %c0_i32_0 = arith.constant 0 : i32
    %c0_i32_1 = arith.constant 0 : i32
    return %c0_i32, %c0_i32_0 : i32, i32
  }
  func.func @transform_5(%arg0: i32) -> (i32, i32) {
    %c0_i32 = arith.constant 0 : i32
    %c0_i32_0 = arith.constant 0 : i32
    %c0_i32_1 = arith.constant 0 : i32
    return %c0_i32, %c0_i32_0 : i32, i32
  }
  func.func @transform_6(%arg0: i32) -> (i32, i32) {
    %c0_i32 = arith.constant 0 : i32
    %c0_i32_0 = arith.constant 0 : i32
    %c0_i32_1 = arith.constant 0 : i32
    return %c0_i32, %c0_i32_0 : i32, i32
  }
  func.func @transform_7(%arg0: i32) -> (i32, i32) {
    %c0_i32 = arith.constant 0 : i32
    %c0_i32_0 = arith.constant 0 : i32
    return %c0_i32, %arg0 : i32, i32
  }
}

</mosaic_0001>

<bundles_post_ra>
// kernel: net_forward.1
= control target key start
LH: loop header
LB: loop body
LE: loop exit
PB: predicated region body
PF: predicated region fallthrough
CT: control target
= control target key end

     0   :  { %vm7349_vm0 = vcmask 523264   ;;  %vm19294_vm1 = vmmov 0   ;;  %vm12805_vm2 = vcmask 261120   ;;  %vm14329_vm3 = vcmask 130048   ;;  %s26643_s0 = inlined_call_operand.vmem [shape: bf16[192,12800], index: 0, kind: input, shape index: {}]   ;;  %s26644_s1 = inlined_call_operand.vmem [shape: bf16[30,192], index: 1, kind: input, shape index: {}]   ;;  %s26645_s2 = inlined_call_operand.vmem [shape: f32[30,1], index: 2, kind: input, shape index: {}]   ;;  %s26646_s4 = inlined_call_operand.vmem [shape: f32[400,1], index: 4, kind: input, shape index: {}]   ;;  %s26647_s6 = inlined_call_operand.vmem [shape: f32[200,1], index: 6, kind: input, shape index: {}]   ;;  %s26648_s3 = inlined_call_operand.vmem [shape: bf16[400,800], index: 3, kind: input, shape index: {}]   ;;  %s26649_s5 = inlined_call_operand.vmem [shape: bf16[200,400], index: 5, kind: input, shape index: {}]   ;;  %s26650_s7 = inlined_call_operand.vmem [shape: f32[200,128], index: 7, kind: output, shape index: {}]  }
   0x1   :  { %v17030_v0 = vld [vmem:[%s26643_s0 + $0x15e4] ss:$400 sps:$4 sm:$0xff]   ;;  %v17032_v1 = vld [vmem:[%s26643_s0 + $0x15ec] ss:$400 sps:$4 sm:$0xff]   ;;  %v17034_v2 = vld [vmem:[%s26643_s0 + $0x15e0] ss:$400 sps:$4 sm:$0xff]  }
   0x2   :  { %7356 = vmatprep.subr.bf16.mxu0 %v17030_v0  ;;  %v17035_v3 = vld [vmem:[%s26643_s0 + $0x15e8] ss:$400 sps:$4 sm:$0xff]   ;;  %7409 = vmatprep.subr.bf16.mxu1 %v17032_v1  ;;  %v17036_v4 = vld [vmem:[%s26643_s0 + $0x12c4] ss:$400 sps:$4 sm:$0xff]   ;;  %v17038_v5 = vld [vmem:[%s26643_s0 + $0x12cc] ss:$400 sps:$4 sm:$0xff]  }
   0x3   :  { %7357 = vmatpush1.bf16.msra.mxu0 %v17034_v2  ;;  %7410 = vmatpush1.bf16.msra.mxu1 %v17035_v3  ;;  %v17040_v6 = vld [vmem:[%s26643_s0 + $0x12c0] ss:$400 sps:$4 sm:$0xff]   ;;  %v17041_v7 = vld [vmem:[%s26643_s0 + $0x12c8] ss:$400 sps:$4 sm:$0xff]   ;;  %v17042_v8 = vld [vmem:[%s26643_s0 + $0xfa4] ss:$400 sps:$4 sm:$0xff]  }
   0x4   :  { %7358 = vmatprep.subr.bf16.mxu0 %v17036_v4  ;;  %7411 = vmatprep.subr.bf16.mxu1 %v17038_v5  ;;  %v17044_v9 = vld [vmem:[%s26643_s0 + $0xfac] ss:$400 sps:$4 sm:$0xff]   ;;  %v17046_v10 = vld [vmem:[%s26643_s0 + $0xfa0] ss:$400 sps:$4 sm:$0xff]   ;;  %v17047_v11 = vld [vmem:[%s26643_s0 + $0xfa8] ss:$400 sps:$4 sm:$0xff]  }
   0x5   :  { %v17048_v12 = vld [vmem:[%s26643_s0 + $0xc84] ss:$400 sps:$4 sm:$0xff]   ;;  %v17050_v13 = vld [vmem:[%s26643_s0 + $0xc8c] ss:$400 sps:$4 sm:$0xff]   ;;  %v17052_v14 = vld [vmem:[%s26643_s0 + $0xc80] ss:$400 sps:$4 sm:$0xff]  }
   0x6   :  { %v17053_v15 = vld [vmem:[%s26643_s0 + $0xc88] ss:$400 sps:$4 sm:$0xff]   ;;  %v17054_v16 = vld [vmem:[%s26643_s0 + $0x964] ss:$400 sps:$4 sm:$0xff]   ;;  %v17056_v17 = vld [vmem:[%s26643_s0 + $0x96c] ss:$400 sps:$4 sm:$0xff]  }
   0x7   :  { %7359 = vmatpush1.bf16.msra.mxu0 %v17040_v6  ;;  %7412 = vmatpush1.bf16.msra.mxu1 %v17041_v7  ;;  %v17058_v18 = vld [vmem:[%s26643_s0 + $0x960] ss:$400 sps:$4 sm:$0xff]   ;;  %v17059_v19 = vld [vmem:[%s26643_s0 + $0x968] ss:$400 sps:$4 sm:$0xff]   ;;  %v17060_v20 = vld [vmem:[%s26643_s0 + $0x644] ss:$400 sps:$4 sm:$0xff]  }
   0x8   :  { %7360 = vmatprep.subr.bf16.mxu0 %v17042_v8  ;;  %7413 = vmatprep.subr.bf16.mxu1 %v17044_v9  ;;  %v17062_v21 = vld [vmem:[%s26643_s0 + $0x64c] ss:$400 sps:$4 sm:$0xff]   ;;  %v17064_v22 = vld [vmem:[%s26643_s0 + $0x640] ss:$400 sps:$4 sm:$0xff]   ;;  %v17065_v23 = vld [vmem:[%s26643_s0 + $0x648] ss:$400 sps:$4 sm:$0xff]  }
   0x9   :  { %v17066_v24 = vld [vmem:[%s26643_s0 + $0x324] ss:$400 sps:$4 sm:$0xff]   ;;  %v17068_v25 = vld [vmem:[%s26643_s0 + $0x32c] ss:$400 sps:$4 sm:$0xff]   ;;  %v17070_v26 = vld [vmem:[%s26643_s0 + $0x320] ss:$400 sps:$4 sm:$0xff]  }
   0xa   :  { %v17071_v27 = vld [vmem:[%s26643_s0 + $0x328] ss:$400 sps:$4 sm:$0xff]   ;;  %v17072_v28 = vld [vmem:[%s26643_s0 + $0x4] ss:$400 sps:$4 sm:$0xff]   ;;  %v17074_v29 = vld [vmem:[%s26643_s0 + $0xc] ss:$400 sps:$4 sm:$0xff]  }
   0xb   :  { %7361 = vmatpush1.bf16.msra.mxu0 %v17046_v10  ;;  %7414 = vmatpush1.bf16.msra.mxu1 %v17047_v11  ;;  %v17076_v30 = vld [vmem:[%s26643_s0] ss:$400 sps:$4 sm:$0xff]   ;;  %v17077_v31 = vld [vmem:[%s26643_s0 + $0x8] ss:$400 sps:$4 sm:$0xff]   ;;  %v17078_v32 = vld [vmem:[%s26643_s0 + $0x2264] ss:$400 sps:$4 sm:$0xff]  }
   0xc   :  { %7362 = vmatprep.subr.bf16.mxu0 %v17048_v12  ;;  %7415 = vmatprep.subr.bf16.mxu1 %v17050_v13  ;;  %v17080_v33 = vld [vmem:[%s26643_s0 + $0x226c] ss:$400 sps:$4 sm:$0xff]   ;;  %v17082_v34 = vld [vmem:[%s26643_s0 + $0x2260] ss:$400 sps:$4 sm:$0xff]   ;;  %v17083_v35 = vld [vmem:[%s26643_s0 + $0x2268] ss:$400 sps:$4 sm:$0xff]  }
   0xd   :  { %v17084_v36 = vld [vmem:[%s26643_s0 + $0x1f44] ss:$400 sps:$4 sm:$0xff]   ;;  %v17086_v38 = vld [vmem:[%s26643_s0 + $0x1f4c] ss:$400 sps:$4 sm:$0xff]   ;;  %v17088_v39 = vld [vmem:[%s26643_s0 + $0x1f40] ss:$400 sps:$4 sm:$0xff]  }
   0xe   :  { %v19449_v37 = vld [vmem:[%s26644_s1 + $0x4] ss:$8 sps:$4 sm:$0xff]   ;;  %v17089_v40 = vld [vmem:[%s26643_s0 + $0x1f48] ss:$400 sps:$4 sm:$0xff]   ;;  %v17094_v43 = vld [vmem:[%s26643_s0 + $0x1c20] ss:$400 sps:$4 sm:$0xff]  }
   0xf   :  { %7363 = vmatpush1.bf16.msra.mxu0 %v17052_v14  ;;  %7416 = vmatpush1.bf16.msra.mxu1 %v17053_v15  ;;  %v17090_v41 = vld [vmem:[%s26643_s0 + $0x1c24] ss:$400 sps:$4 sm:$0xff]   ;;  %v17092_v42 = vld [vmem:[%s26643_s0 + $0x1c2c] ss:$400 sps:$4 sm:$0xff]   ;;  %v17095_v44 = vld [vmem:[%s26643_s0 + $0x1c28] ss:$400 sps:$4 sm:$0xff]  }
  0x10   :  { %7364 = vmatprep.subr.bf16.mxu0 %v17054_v16  ;;  %7417 = vmatprep.subr.bf16.mxu1 %v17056_v17  ;;  %v17096_v45 = vld [vmem:[%s26643_s0 + $0x1904] ss:$400 sps:$4 sm:$0xff]   ;;  %v17098_v46 = vld [vmem:[%s26643_s0 + $0x190c] ss:$400 sps:$4 sm:$0xff]   ;;  %v17100_v47 = vld [vmem:[%s26643_s0 + $0x1900] ss:$400 sps:$4 sm:$0xff]  }
  0x11   :  { %16038 = vmatprep.mubr.msk.bf16.mxu1 %vm7349_vm0, %v19449_v37  ;;  %16036 = vmatprep.mubr.msk.bf16.mxu0 %vm7349_vm0, %v19449_v37  ;;  %v17101_v48 = vld [vmem:[%s26643_s0 + $0x1908] ss:$400 sps:$4 sm:$0xff]   ;;  %v17107_v49 = vld [vmem:[%s26643_s0 + $0x15f4] ss:$400 sps:$4 sm:$0xff]   ;;  %v17110_v50 = vld [vmem:[%s26643_s0 + $0x15fc] ss:$400 sps:$4 sm:$0xff]  }
  0x12   :  { %v19497_v51 = vld [vmem:[%s26644_s1] ss:$8 sps:$4 sm:$0xff]   ;;  %v17113_v54 = vld [vmem:[%s26643_s0 + $0x12d4] ss:$400 sps:$4 sm:$0xff]   ;;  %v17116_v55 = vld [vmem:[%s26643_s0 + $0x12dc] ss:$400 sps:$4 sm:$0xff]  }
  0x13   :  { %7365 = vmatpush1.bf16.msra.mxu0 %v17058_v18  ;;  %7418 = vmatpush1.bf16.msra.mxu1 %v17059_v19  ;;  %v17105_v52 = vld [vmem:[%s26643_s0 + $0x15f0] ss:$400 sps:$4 sm:$0xff]   ;;  %v17108_v53 = vld [vmem:[%s26643_s0 + $0x15f8] ss:$400 sps:$4 sm:$0xff]   ;;  %v17119_v58 = vld [vmem:[%s26643_s0 + $0xfb4] ss:$400 sps:$4 sm:$0xff]  }
  0x14   :  { %7366 = vmatprep.subr.bf16.mxu0 %v17060_v20  ;;  %7419 = vmatprep.subr.bf16.mxu1 %v17062_v21  ;;  %v17111_v56 = vld [vmem:[%s26643_s0 + $0x12d0] ss:$400 sps:$4 sm:$0xff]   ;;  %v17114_v57 = vld [vmem:[%s26643_s0 + $0x12d8] ss:$400 sps:$4 sm:$0xff]   ;;  %v17122_v59 = vld [vmem:[%s26643_s0 + $0xfbc] ss:$400 sps:$4 sm:$0xff]  }
  0x15   :  { %v17117_v60 = vld [vmem:[%s26643_s0 + $0xfb0] ss:$400 sps:$4 sm:$0xff]   ;;  %v17120_v61 = vld [vmem:[%s26643_s0 + $0xfb8] ss:$400 sps:$4 sm:$0xff]   ;;  %v17125_v62 = vld [vmem:[%s26643_s0 + $0xc94] ss:$400 sps:$4 sm:$0xff]  }
  0x16   :  { %v17128_v63 = vld [vmem:[%s26643_s0 + $0xc9c] ss:$400 sps:$4 sm:$0xff]   ;;  %v17123_v0 = vld [vmem:[%s26643_s0 + $0xc90] ss:$400 sps:$4 sm:$0xff]   ;;  %v17126_v3 = vld [vmem:[%s26643_s0 + $0xc98] ss:$400 sps:$4 sm:$0xff]  }
  0x17   :  { %7367 = vmatpush1.bf16.msra.mxu0 %v17064_v22  ;;  %7420 = vmatpush1.bf16.msra.mxu1 %v17065_v23  ;;  %v19543_v1 = vld [vmem:[%s26644_s1 + $0x14] ss:$8 sps:$4 sm:$0x7f]   ;;  %v19548_v2 = vld [vmem:[%s26644_s1 + $0x10] ss:$8 sps:$4 sm:$0x7f]  }
  0x18   :  { %7368 = vmatprep.subr.bf16.mxu0 %v17066_v24  ;;  %7421 = vmatprep.subr.bf16.mxu1 %v17068_v25  ;;  %v17131_v4 = vld [vmem:[%s26643_s0 + $0x974] ss:$400 sps:$4 sm:$0xff]   ;;  %v17134_v5 = vld [vmem:[%s26643_s0 + $0x97c] ss:$400 sps:$4 sm:$0xff]   ;;  %v17129_v6 = vld [vmem:[%s26643_s0 + $0x970] ss:$400 sps:$4 sm:$0xff]  }
  0x19   :  { %v17132_v7 = vld [vmem:[%s26643_s0 + $0x978] ss:$400 sps:$4 sm:$0xff]   ;;  %v17137_v8 = vld [vmem:[%s26643_s0 + $0x654] ss:$400 sps:$4 sm:$0xff]   ;;  %v17140_v9 = vld [vmem:[%s26643_s0 + $0x65c] ss:$400 sps:$4 sm:$0xff]  }
  0x1a   :  { %v17135_v10 = vld [vmem:[%s26643_s0 + $0x650] ss:$400 sps:$4 sm:$0xff]   ;;  %v17138_v11 = vld [vmem:[%s26643_s0 + $0x658] ss:$400 sps:$4 sm:$0xff]   ;;  %v17143_v12 = vld [vmem:[%s26643_s0 + $0x334] ss:$400 sps:$4 sm:$0xff]  }
  0x1b   :  { %7369 = vmatpush1.bf16.msra.mxu0 %v17070_v26  ;;  %7422 = vmatpush1.bf16.msra.mxu1 %v17071_v27  ;;  %v17146_v13 = vld [vmem:[%s26643_s0 + $0x33c] ss:$400 sps:$4 sm:$0xff]   ;;  %v17141_v14 = vld [vmem:[%s26643_s0 + $0x330] ss:$400 sps:$4 sm:$0xff]   ;;  %v17144_v15 = vld [vmem:[%s26643_s0 + $0x338] ss:$400 sps:$4 sm:$0xff]  }
  0x1c   :  { %7370 = vmatprep.subr.bf16.mxu0 %v17072_v28  ;;  %7423 = vmatprep.subr.bf16.mxu1 %v17074_v29  ;;  %v17149_v16 = vld [vmem:[%s26643_s0 + $0x14] ss:$400 sps:$4 sm:$0xff]   ;;  %v17152_v17 = vld [vmem:[%s26643_s0 + $0x1c] ss:$400 sps:$4 sm:$0xff]   ;;  %v17147_v18 = vld [vmem:[%s26643_s0 + $0x10] ss:$400 sps:$4 sm:$0xff]  }
  0x1d   :  { %v17150_v19 = vld [vmem:[%s26643_s0 + $0x18] ss:$400 sps:$4 sm:$0xff]   ;;  %v17155_v20 = vld [vmem:[%s26643_s0 + $0x2274] ss:$400 sps:$4 sm:$0xff]   ;;  %v17158_v21 = vld [vmem:[%s26643_s0 + $0x227c] ss:$400 sps:$4 sm:$0xff]  }
  0x1e   :  { %v17153_v22 = vld [vmem:[%s26643_s0 + $0x2270] ss:$400 sps:$4 sm:$0xff]   ;;  %v17156_v23 = vld [vmem:[%s26643_s0 + $0x2278] ss:$400 sps:$4 sm:$0xff]   ;;  %v17164_v24 = vld [vmem:[%s26643_s0 + $0x1f54] ss:$400 sps:$4 sm:$0xff]  }
  0x1f   :  { %7371 = vmatpush1.bf16.msra.mxu0 %v17076_v30  ;;  %7424 = vmatpush1.bf16.msra.mxu1 %v17077_v31  ;;  %v17167_v25 = vld [vmem:[%s26643_s0 + $0x1f5c] ss:$400 sps:$4 sm:$0xff]   ;;  %v17162_v26 = vld [vmem:[%s26643_s0 + $0x1f50] ss:$400 sps:$4 sm:$0xff]   ;;  %v17165_v27 = vld [vmem:[%s26643_s0 + $0x1f58] ss:$400 sps:$4 sm:$0xff]  }
  0x20   :  { %7380 = vmatprep.subr.bf16.mxu0 %v17078_v32  ;;  %7433 = vmatprep.subr.bf16.mxu1 %v17080_v33  ;;  %v17170_v28 = vld [vmem:[%s26643_s0 + $0x1c34] ss:$400 sps:$4 sm:$0xff]   ;;  %v17173_v29 = vld [vmem:[%s26643_s0 + $0x1c3c] ss:$400 sps:$4 sm:$0xff]   ;;  %v17168_v30 = vld [vmem:[%s26643_s0 + $0x1c30] ss:$400 sps:$4 sm:$0xff]  }
  0x21   :  { %v17171_v31 = vld [vmem:[%s26643_s0 + $0x1c38] ss:$400 sps:$4 sm:$0xff]   ;;  %v17176_v32 = vld [vmem:[%s26643_s0 + $0x1914] ss:$400 sps:$4 sm:$0xff]   ;;  %v17179_v33 = vld [vmem:[%s26643_s0 + $0x191c] ss:$400 sps:$4 sm:$0xff]  }
  0x23   :  { %7381 = vmatpush2.bf16.msra.mxu0 %v17082_v34  ;;  %7434 = vmatpush2.bf16.msra.mxu1 %v17083_v35  ;;  %v17174_v34 = vld [vmem:[%s26643_s0 + $0x1910] ss:$400 sps:$4 sm:$0xff]   ;;  %v17177_v35 = vld [vmem:[%s26643_s0 + $0x1918] ss:$400 sps:$4 sm:$0xff]  }
  0x24   :  { %7382 = vmatprep.subr.bf16.mxu0 %v17084_v36  ;;  %7435 = vmatprep.subr.bf16.mxu1 %v17086_v38  ;;  %v17182_v36 = vld [vmem:[%s26643_s0 + $0x1604] ss:$400 sps:$4 sm:$0xff]   ;;  %v17185_v38 = vld [vmem:[%s26643_s0 + $0x160c] ss:$400 sps:$4 sm:$0xff]  }
  0x27   :  { %7383 = vmatpush2.bf16.msra.mxu0 %v17088_v39  ;;  %7436 = vmatpush2.bf16.msra.mxu1 %v17089_v40  ;;  %v17180_v39 = vld [vmem:[%s26643_s0 + $0x1600] ss:$400 sps:$4 sm:$0xff]   ;;  %v17183_v40 = vld [vmem:[%s26643_s0 + $0x1608] ss:$400 sps:$4 sm:$0xff]  }
  0x28   :  { %7384 = vmatprep.subr.bf16.mxu0 %v17090_v41  ;;  %7437 = vmatprep.subr.bf16.mxu1 %v17092_v42  ;;  %v17188_v41 = vld [vmem:[%s26643_s0 + $0x12e4] ss:$400 sps:$4 sm:$0xff]   ;;  %v17191_v42 = vld [vmem:[%s26643_s0 + $0x12ec] ss:$400 sps:$4 sm:$0xff]  }
  0x2b   :  { %7385 = vmatpush2.bf16.msra.mxu0 %v17094_v43  ;;  %7438 = vmatpush2.bf16.msra.mxu1 %v17095_v44  ;;  %v17186_v43 = vld [vmem:[%s26643_s0 + $0x12e0] ss:$400 sps:$4 sm:$0xff]   ;;  %v17189_v44 = vld [vmem:[%s26643_s0 + $0x12e8] ss:$400 sps:$4 sm:$0xff]  }
  0x2c   :  { %7386 = vmatprep.subr.bf16.mxu0 %v17096_v45  ;;  %7439 = vmatprep.subr.bf16.mxu1 %v17098_v46  ;;  %v17194_v45 = vld [vmem:[%s26643_s0 + $0xfc4] ss:$400 sps:$4 sm:$0xff]   ;;  %v17197_v46 = vld [vmem:[%s26643_s0 + $0xfcc] ss:$400 sps:$4 sm:$0xff]  }
  0x2f   :  { %7387 = vmatpush2.bf16.msra.mxu0 %v17100_v47  ;;  %7440 = vmatpush2.bf16.msra.mxu1 %v17101_v48  ;;  %v17192_v47 = vld [vmem:[%s26643_s0 + $0xfc0] ss:$400 sps:$4 sm:$0xff]   ;;  %v17195_v48 = vld [vmem:[%s26643_s0 + $0xfc8] ss:$400 sps:$4 sm:$0xff]  }
  0x30   :  { %7462 = vmatprep.subr.bf16.mxu0 %v17107_v49  ;;  %7515 = vmatprep.subr.bf16.mxu1 %v17110_v50  ;;  %v17200_v49 = vld [vmem:[%s26643_s0 + $0xca4] ss:$400 sps:$4 sm:$0xff]   ;;  %v17203_v50 = vld [vmem:[%s26643_s0 + $0xcac] ss:$400 sps:$4 sm:$0xff]  }
  0x32   :  { %7442 = vmatmul.mubr.bf16.vlgmr.msra.gmra.mxu1 %v19497_v51  ;;  %7389 = vmatmul.mubr.bf16.vlgmr.msra.gmra.mxu0 %v19497_v51 }
  0x33   :  { %7463 = vmatpush1.bf16.msra.mxu0 %v17105_v52  ;;  %7516 = vmatpush1.bf16.msra.mxu1 %v17108_v53  ;;  %v17198_v52 = vld [vmem:[%s26643_s0 + $0xca0] ss:$400 sps:$4 sm:$0xff]   ;;  %v17201_v53 = vld [vmem:[%s26643_s0 + $0xca8] ss:$400 sps:$4 sm:$0xff]  }
  0x34   :  { %7464 = vmatprep.subr.bf16.mxu0 %v17113_v54  ;;  %7517 = vmatprep.subr.bf16.mxu1 %v17116_v55  ;;  %v17206_v54 = vld [vmem:[%s26643_s0 + $0x984] ss:$400 sps:$4 sm:$0xff]   ;;  %v17209_v55 = vld [vmem:[%s26643_s0 + $0x98c] ss:$400 sps:$4 sm:$0xff]  }
  0x35   :  { %16039 = vmatprep.mubr.msk.bf16.mxu1 %vm7349_vm0, %v19543_v1  ;;  %16037 = vmatprep.mubr.msk.bf16.mxu0 %vm7349_vm0, %v19543_v1 }
  0x37   :  { %7465 = vmatpush1.bf16.msra.mxu0 %v17111_v56  ;;  %7518 = vmatpush1.bf16.msra.mxu1 %v17114_v57  ;;  %v17204_v56 = vld [vmem:[%s26643_s0 + $0x980] ss:$400 sps:$4 sm:$0xff]   ;;  %v17207_v57 = vld [vmem:[%s26643_s0 + $0x988] ss:$400 sps:$4 sm:$0xff]  }
  0x38   :  { %7466 = vmatprep.subr.bf16.mxu0 %v17119_v58  ;;  %7519 = vmatprep.subr.bf16.mxu1 %v17122_v59  ;;  %v17212_v58 = vld [vmem:[%s26643_s0 + $0x664] ss:$400 sps:$4 sm:$0xff]   ;;  %v17215_v59 = vld [vmem:[%s26643_s0 + $0x66c] ss:$400 sps:$4 sm:$0xff]  }
  0x3a   :  { %7452 = vmatmul.mubr.bf16.gmra.mxu1 %v19548_v2  ;;  %7399 = vmatmul.mubr.bf16.gmra.mxu0 %v19548_v2 }
  0x3b   :  { %7467 = vmatpush1.bf16.msra.mxu0 %v17117_v60  ;;  %7520 = vmatpush1.bf16.msra.mxu1 %v17120_v61  ;;  %v17210_v60 = vld [vmem:[%s26643_s0 + $0x660] ss:$400 sps:$4 sm:$0xff]   ;;  %v17213_v61 = vld [vmem:[%s26643_s0 + $0x668] ss:$400 sps:$4 sm:$0xff]  }
  0x3c   :  { %7468 = vmatprep.subr.bf16.mxu0 %v17125_v62  ;;  %7521 = vmatprep.subr.bf16.mxu1 %v17128_v63  ;;  %v17218_v62 = vld [vmem:[%s26643_s0 + $0x344] ss:$400 sps:$4 sm:$0xff]   ;;  %v17221_v63 = vld [vmem:[%s26643_s0 + $0x34c] ss:$400 sps:$4 sm:$0xff]  }
  0x3d   :  { %16042 = vmatprep.mubr.msk.bf16.mxu1 %vm7349_vm0, %v19449_v37  ;;  %16040 = vmatprep.mubr.msk.bf16.mxu0 %vm7349_vm0, %v19449_v37 }
  0x3f   :  { %7469 = vmatpush1.bf16.msra.mxu0 %v17123_v0  ;;  %7522 = vmatpush1.bf16.msra.mxu1 %v17126_v3  ;;  %v17216_v0 = vld [vmem:[%s26643_s0 + $0x340] ss:$400 sps:$4 sm:$0xff]   ;;  %v17219_v3 = vld [vmem:[%s26643_s0 + $0x348] ss:$400 sps:$4 sm:$0xff]  }
  0x40   :  { %7470 = vmatprep.subr.bf16.mxu0 %v17131_v4  ;;  %7523 = vmatprep.subr.bf16.mxu1 %v17134_v5  ;;  %v17224_v4 = vld [vmem:[%s26643_s0 + $0x24] ss:$400 sps:$4 sm:$0xff]   ;;  %v17227_v5 = vld [vmem:[%s26643_s0 + $0x2c] ss:$400 sps:$4 sm:$0xff]  }
  0x43   :  { %7471 = vmatpush1.bf16.msra.mxu0 %v17129_v6  ;;  %7524 = vmatpush1.bf16.msra.mxu1 %v17132_v7  ;;  %v17222_v6 = vld [vmem:[%s26643_s0 + $0x20] ss:$400 sps:$4 sm:$0xff]   ;;  %v17225_v7 = vld [vmem:[%s26643_s0 + $0x28] ss:$400 sps:$4 sm:$0xff]  }
  0x44   :  { %7472 = vmatprep.subr.bf16.mxu0 %v17137_v8  ;;  %7525 = vmatprep.subr.bf16.mxu1 %v17140_v9  ;;  %v17230_v8 = vld [vmem:[%s26643_s0 + $0x2284] ss:$400 sps:$4 sm:$0xff]   ;;  %v17233_v9 = vld [vmem:[%s26643_s0 + $0x228c] ss:$400 sps:$4 sm:$0xff]  }
  0x47   :  { %7473 = vmatpush1.bf16.msra.mxu0 %v17135_v10  ;;  %7526 = vmatpush1.bf16.msra.mxu1 %v17138_v11  ;;  %v17228_v10 = vld [vmem:[%s26643_s0 + $0x2280] ss:$400 sps:$4 sm:$0xff]   ;;  %v17231_v11 = vld [vmem:[%s26643_s0 + $0x2288] ss:$400 sps:$4 sm:$0xff]  }
  0x48   :  { %7474 = vmatprep.subr.bf16.mxu0 %v17143_v12  ;;  %7527 = vmatprep.subr.bf16.mxu1 %v17146_v13  ;;  %v17236_v12 = vld [vmem:[%s26643_s0 + $0x1f64] ss:$400 sps:$4 sm:$0xff]   ;;  %v17239_v13 = vld [vmem:[%s26643_s0 + $0x1f6c] ss:$400 sps:$4 sm:$0xff]  }
  0x4b   :  { %7475 = vmatpush1.bf16.msra.mxu0 %v17141_v14  ;;  %7528 = vmatpush1.bf16.msra.mxu1 %v17144_v15  ;;  %v17234_v14 = vld [vmem:[%s26643_s0 + $0x1f60] ss:$400 sps:$4 sm:$0xff]   ;;  %v17237_v15 = vld [vmem:[%s26643_s0 + $0x1f68] ss:$400 sps:$4 sm:$0xff]  }
  0x4c   :  { %7476 = vmatprep.subr.bf16.mxu0 %v17149_v16  ;;  %7529 = vmatprep.subr.bf16.mxu1 %v17152_v17  ;;  %v17242_v16 = vld [vmem:[%s26643_s0 + $0x1c44] ss:$400 sps:$4 sm:$0xff]   ;;  %v17245_v17 = vld [vmem:[%s26643_s0 + $0x1c4c] ss:$400 sps:$4 sm:$0xff]  }
  0x4f   :  { %7477 = vmatpush1.bf16.msra.mxu0 %v17147_v18  ;;  %7530 = vmatpush1.bf16.msra.mxu1 %v17150_v19  ;;  %v17240_v18 = vld [vmem:[%s26643_s0 + $0x1c40] ss:$400 sps:$4 sm:$0xff]   ;;  %v17243_v19 = vld [vmem:[%s26643_s0 + $0x1c48] ss:$400 sps:$4 sm:$0xff]  }
  0x50   :  { %7486 = vmatprep.subr.bf16.mxu0 %v17155_v20  ;;  %7539 = vmatprep.subr.bf16.mxu1 %v17158_v21  ;;  %v17248_v20 = vld [vmem:[%s26643_s0 + $0x1924] ss:$400 sps:$4 sm:$0xff]   ;;  %v17251_v21 = vld [vmem:[%s26643_s0 + $0x192c] ss:$400 sps:$4 sm:$0xff]  }
  0x53   :  { %7487 = vmatpush2.bf16.msra.mxu0 %v17153_v22  ;;  %7540 = vmatpush2.bf16.msra.mxu1 %v17156_v23  ;;  %v17246_v22 = vld [vmem:[%s26643_s0 + $0x1920] ss:$400 sps:$4 sm:$0xff]   ;;  %v17249_v23 = vld [vmem:[%s26643_s0 + $0x1928] ss:$400 sps:$4 sm:$0xff]  }
  0x54   :  { %7488 = vmatprep.subr.bf16.mxu0 %v17164_v24  ;;  %7541 = vmatprep.subr.bf16.mxu1 %v17167_v25  ;;  %v17254_v24 = vld [vmem:[%s26643_s0 + $0x1614] ss:$400 sps:$4 sm:$0xff]   ;;  %v17257_v25 = vld [vmem:[%s26643_s0 + $0x161c] ss:$400 sps:$4 sm:$0xff]  }
  0x57   :  { %7489 = vmatpush2.bf16.msra.mxu0 %v17162_v26  ;;  %7542 = vmatpush2.bf16.msra.mxu1 %v17165_v27  ;;  %v17252_v26 = vld [vmem:[%s26643_s0 + $0x1610] ss:$400 sps:$4 sm:$0xff]   ;;  %v17255_v27 = vld [vmem:[%s26643_s0 + $0x1618] ss:$400 sps:$4 sm:$0xff]  }
  0x58   :  { %7490 = vmatprep.subr.bf16.mxu0 %v17170_v28  ;;  %7543 = vmatprep.subr.bf16.mxu1 %v17173_v29  ;;  %v17260_v28 = vld [vmem:[%s26643_s0 + $0x12f4] ss:$400 sps:$4 sm:$0xff]   ;;  %v17263_v29 = vld [vmem:[%s26643_s0 + $0x12fc] ss:$400 sps:$4 sm:$0xff]  }
  0x5b   :  { %7491 = vmatpush2.bf16.msra.mxu0 %v17168_v30  ;;  %7544 = vmatpush2.bf16.msra.mxu1 %v17171_v31  ;;  %v17258_v30 = vld [vmem:[%s26643_s0 + $0x12f0] ss:$400 sps:$4 sm:$0xff]   ;;  %v17261_v31 = vld [vmem:[%s26643_s0 + $0x12f8] ss:$400 sps:$4 sm:$0xff]  }
  0x5c   :  { %7492 = vmatprep.subr.bf16.mxu0 %v17176_v32  ;;  %7545 = vmatprep.subr.bf16.mxu1 %v17179_v33  ;;  %v17266_v32 = vld [vmem:[%s26643_s0 + $0xfd4] ss:$400 sps:$4 sm:$0xff]   ;;  %v17264_v33 = vld [vmem:[%s26643_s0 + $0xfd0] ss:$400 sps:$4 sm:$0xff]  }
  0x5f   :  { %7493 = vmatpush2.bf16.msra.mxu0 %v17174_v34  ;;  %7546 = vmatpush2.bf16.msra.mxu1 %v17177_v35  ;;  %v17267_v34 = vld [vmem:[%s26643_s0 + $0xfd8] ss:$400 sps:$4 sm:$0xff]   ;;  %v17272_v35 = vld [vmem:[%s26643_s0 + $0xcb4] ss:$400 sps:$4 sm:$0xff]  }
  0x60   :  { %7568 = vmatprep.subr.bf16.mxu0 %v17182_v36  ;;  %7621 = vmatprep.subr.bf16.mxu1 %v17185_v38  ;;  %v17270_v36 = vld [vmem:[%s26643_s0 + $0xcb0] ss:$400 sps:$4 sm:$0xff]   ;;  %v17273_v38 = vld [vmem:[%s26643_s0 + $0xcb8] ss:$400 sps:$4 sm:$0xff]  }
  0x62   :  { %7548 = vmatmul.mubr.bf16.vlgmr.msra.gmra.mxu1 %v19497_v51  ;;  %7495 = vmatmul.mubr.bf16.vlgmr.msra.gmra.mxu0 %v19497_v51 }
  0x63   :  { %7569 = vmatpush1.bf16.msra.mxu0 %v17180_v39  ;;  %7622 = vmatpush1.bf16.msra.mxu1 %v17183_v40  ;;  %v17278_v39 = vld [vmem:[%s26643_s0 + $0x994] ss:$400 sps:$4 sm:$0xff]   ;;  %v17281_v40 = vld [vmem:[%s26643_s0 + $0x99c] ss:$400 sps:$4 sm:$0xff]  }
  0x64   :  { %7570 = vmatprep.subr.bf16.mxu0 %v17188_v41  ;;  %7623 = vmatprep.subr.bf16.mxu1 %v17191_v42  ;;  %v17279_v41 = vld [vmem:[%s26643_s0 + $0x998] ss:$400 sps:$4 sm:$0xff]   ;;  %v17284_v42 = vld [vmem:[%s26643_s0 + $0x674] ss:$400 sps:$4 sm:$0xff]  }
  0x65   :  { %16043 = vmatprep.mubr.msk.bf16.mxu1 %vm7349_vm0, %v19543_v1  ;;  %16041 = vmatprep.mubr.msk.bf16.mxu0 %vm7349_vm0, %v19543_v1 }
  0x67   :  { %7571 = vmatpush1.bf16.msra.mxu0 %v17186_v43  ;;  %7624 = vmatpush1.bf16.msra.mxu1 %v17189_v44  ;;  %v17282_v43 = vld [vmem:[%s26643_s0 + $0x670] ss:$400 sps:$4 sm:$0xff]   ;;  %v17285_v44 = vld [vmem:[%s26643_s0 + $0x678] ss:$400 sps:$4 sm:$0xff]  }
  0x68   :  { %7572 = vmatprep.subr.bf16.mxu0 %v17194_v45  ;;  %7625 = vmatprep.subr.bf16.mxu1 %v17197_v46  ;;  %v17290_v45 = vld [vmem:[%s26643_s0 + $0x354] ss:$400 sps:$4 sm:$0xff]   ;;  %v17293_v46 = vld [vmem:[%s26643_s0 + $0x35c] ss:$400 sps:$4 sm:$0xff]  }
  0x6a   :  { %7558 = vmatmul.mubr.bf16.gmra.mxu1 %v19548_v2  ;;  %7505 = vmatmul.mubr.bf16.gmra.mxu0 %v19548_v2 }
  0x6b   :  { %7573 = vmatpush1.bf16.msra.mxu0 %v17192_v47  ;;  %7626 = vmatpush1.bf16.msra.mxu1 %v17195_v48  ;;  %v17288_v47 = vld [vmem:[%s26643_s0 + $0x350] ss:$400 sps:$4 sm:$0xff]   ;;  %v17291_v48 = vld [vmem:[%s26643_s0 + $0x358] ss:$400 sps:$4 sm:$0xff]  }
  0x6c   :  { %7574 = vmatprep.subr.bf16.mxu0 %v17200_v49  ;;  %7627 = vmatprep.subr.bf16.mxu1 %v17203_v50  ;;  %v17296_v49 = vld [vmem:[%s26643_s0 + $0x34] ss:$400 sps:$4 sm:$0xff]   ;;  %v17299_v50 = vld [vmem:[%s26643_s0 + $0x3c] ss:$400 sps:$4 sm:$0xff]  }
  0x6d   :  { %16046 = vmatprep.mubr.msk.bf16.mxu1 %vm7349_vm0, %v19449_v37  ;;  %16044 = vmatprep.mubr.msk.bf16.mxu0 %vm7349_vm0, %v19449_v37 }
  0x6f   :  { %7575 = vmatpush1.bf16.msra.mxu0 %v17198_v52  ;;  %7628 = vmatpush1.bf16.msra.mxu1 %v17201_v53  ;;  %v17294_v52 = vld [vmem:[%s26643_s0 + $0x30] ss:$400 sps:$4 sm:$0xff]   ;;  %v17297_v53 = vld [vmem:[%s26643_s0 + $0x38] ss:$400 sps:$4 sm:$0xff]  }
  0x70   :  { %7576 = vmatprep.subr.bf16.mxu0 %v17206_v54  ;;  %7629 = vmatprep.subr.bf16.mxu1 %v17209_v55  ;;  %v17302_v54 = vld [vmem:[%s26643_s0 + $0x2294] ss:$400 sps:$4 sm:$0xff]   ;;  %v17305_v55 = vld [vmem:[%s26643_s0 + $0x229c] ss:$400 sps:$4 sm:$0xff]  }
  0x73   :  { %7577 = vmatpush1.bf16.msra.mxu0 %v17204_v56  ;;  %7630 = vmatpush1.bf16.msra.mxu1 %v17207_v57  ;;  %v17300_v56 = vld [vmem:[%s26643_s0 + $0x2290] ss:$400 sps:$4 sm:$0xff]   ;;  %v17303_v57 = vld [vmem:[%s26643_s0 + $0x2298] ss:$400 sps:$4 sm:$0xff]  }
  0x74   :  { %7578 = vmatprep.subr.bf16.mxu0 %v17212_v58  ;;  %7631 = vmatprep.subr.bf16.mxu1 %v17215_v59  ;;  %v17308_v58 = vld [vmem:[%s26643_s0 + $0x1f74] ss:$400 sps:$4 sm:$0xff]   ;;  %v17311_v59 = vld [vmem:[%s26643_s0 + $0x1f7c] ss:$400 sps:$4 sm:$0xff]  }
  0x77   :  { %7579 = vmatpush1.bf16.msra.mxu0 %v17210_v60  ;;  %7632 = vmatpush1.bf16.msra.mxu1 %v17213_v61  ;;  %v17306_v60 = vld [vmem:[%s26643_s0 + $0x1f70] ss:$400 sps:$4 sm:$0xff]   ;;  %v17309_v61 = vld [vmem:[%s26643_s0 + $0x1f78] ss:$400 sps:$4 sm:$0xff]  }
  0x78   :  { %7580 = vmatprep.subr.bf16.mxu0 %v17218_v62  ;;  %7633 = vmatprep.subr.bf16.mxu1 %v17221_v63  ;;  %v17314_v62 = vld [vmem:[%s26643_s0 + $0x1c54] ss:$400 sps:$4 sm:$0xff]   ;;  %v17317_v63 = vld [vmem:[%s26643_s0 + $0x1c5c] ss:$400 sps:$4 sm:$0xff]  }
  0x7b   :  { %7581 = vmatpush1.bf16.msra.mxu0 %v17216_v0  ;;  %7634 = vmatpush1.bf16.msra.mxu1 %v17219_v3  ;;  %v17312_v0 = vld [vmem:[%s26643_s0 + $0x1c50] ss:$400 sps:$4 sm:$0xff]   ;;  %v17315_v3 = vld [vmem:[%s26643_s0 + $0x1c58] ss:$400 sps:$4 sm:$0xff]  }
  0x7c   :  { %7582 = vmatprep.subr.bf16.mxu0 %v17224_v4  ;;  %7635 = vmatprep.subr.bf16.mxu1 %v17227_v5  ;;  %v17320_v4 = vld [vmem:[%s26643_s0 + $0x1934] ss:$400 sps:$4 sm:$0xff]   ;;  %v17323_v5 = vld [vmem:[%s26643_s0 + $0x193c] ss:$400 sps:$4 sm:$0xff]  }
  0x7f   :  { %7583 = vmatpush1.bf16.msra.mxu0 %v17222_v6  ;;  %7636 = vmatpush1.bf16.msra.mxu1 %v17225_v7  ;;  %v17318_v6 = vld [vmem:[%s26643_s0 + $0x1930] ss:$400 sps:$4 sm:$0xff]   ;;  %v17321_v7 = vld [vmem:[%s26643_s0 + $0x1938] ss:$400 sps:$4 sm:$0xff]  }
  0x80   :  { %7592 = vmatprep.subr.bf16.mxu0 %v17230_v8  ;;  %7645 = vmatprep.subr.bf16.mxu1 %v17233_v9  ;;  %v17326_v8 = vld [vmem:[%s26643_s0 + $0x1624] ss:$400 sps:$4 sm:$0xff]   ;;  %v17329_v9 = vld [vmem:[%s26643_s0 + $0x162c] ss:$400 sps:$4 sm:$0xff]  }
  0x83   :  { %7593 = vmatpush2.bf16.msra.mxu0 %v17228_v10  ;;  %7646 = vmatpush2.bf16.msra.mxu1 %v17231_v11  ;;  %v17324_v10 = vld [vmem:[%s26643_s0 + $0x1620] ss:$400 sps:$4 sm:$0xff]   ;;  %v17327_v11 = vld [vmem:[%s26643_s0 + $0x1628] ss:$400 sps:$4 sm:$0xff]  }
  0x84   :  { %7594 = vmatprep.subr.bf16.mxu0 %v17236_v12  ;;  %7647 = vmatprep.subr.bf16.mxu1 %v17239_v13  ;;  %v17332_v12 = vld [vmem:[%s26643_s0 + $0x1304] ss:$400 sps:$4 sm:$0xff]   ;;  %v17335_v13 = vld [vmem:[%s26643_s0 + $0x130c] ss:$400 sps:$4 sm:$0xff]  }
  0x87   :  { %7595 = vmatpush2.bf16.msra.mxu0 %v17234_v14  ;;  %7648 = vmatpush2.bf16.msra.mxu1 %v17237_v15  ;;  %v19992_v14 = vld [vmem:[%s26644_s1] ss:$8 sps:$4 sm:$0xff]  }
  0x88   :  { %7596 = vmatprep.subr.bf16.mxu0 %v17242_v16  ;;  %7649 = vmatprep.subr.bf16.mxu1 %v17245_v17  ;;  %v17330_v15 = vld [vmem:[%s26643_s0 + $0x1300] ss:$400 sps:$4 sm:$0xff]   ;;  %v17333_v16 = vld [vmem:[%s26643_s0 + $0x1308] ss:$400 sps:$4 sm:$0xff]   ;;  %v17338_v17 = vld [vmem:[%s26643_s0 + $0xfe4] ss:$400 sps:$4 sm:$0xff]  }
  0x8b   :  { %7597 = vmatpush2.bf16.msra.mxu0 %v17240_v18  ;;  %7650 = vmatpush2.bf16.msra.mxu1 %v17243_v19  ;;  %v17341_v18 = vld [vmem:[%s26643_s0 + $0xfec] ss:$400 sps:$4 sm:$0xff]  }
  0x8c   :  { %7598 = vmatprep.subr.bf16.mxu0 %v17248_v20  ;;  %7651 = vmatprep.subr.bf16.mxu1 %v17251_v21  ;;  %v20011_v19 = vld [vmem:[%s26644_s1 + $0x14] ss:$8 sps:$4 sm:$0x7f]   ;;  %v17336_v20 = vld [vmem:[%s26643_s0 + $0xfe0] ss:$400 sps:$4 sm:$0xff]  }
  0x8d   :  { %v17339_v21 = vld [vmem:[%s26643_s0 + $0xfe8] ss:$400 sps:$4 sm:$0xff]  }
  0x8f   :  { %7599 = vmatpush2.bf16.msra.mxu0 %v17246_v22  ;;  %7652 = vmatpush2.bf16.msra.mxu1 %v17249_v23  ;;  %v17344_v22 = vld [vmem:[%s26643_s0 + $0xcc4] ss:$400 sps:$4 sm:$0xff]   ;;  %v17347_v23 = vld [vmem:[%s26643_s0 + $0xccc] ss:$400 sps:$4 sm:$0xff]  }
  0x90   :  { %7674 = vmatprep.subr.bf16.mxu0 %v17254_v24  ;;  %7727 = vmatprep.subr.bf16.mxu1 %v17257_v25  ;;  %v17342_v24 = vld [vmem:[%s26643_s0 + $0xcc0] ss:$400 sps:$4 sm:$0xff]  }
  0x91   :  { %v20035_v25 = vld [vmem:[%s26644_s1 + $0x10] ss:$8 sps:$4 sm:$0x7f]  }
  0x92   :  { %7654 = vmatmul.mubr.bf16.vlgmr.msra.gmra.mxu1 %v19497_v51  ;;  %7601 = vmatmul.mubr.bf16.vlgmr.msra.gmra.mxu0 %v19497_v51  ;;  %v17269_v51 = vld [vmem:[%s26643_s0 + $0xfdc] ss:$400 sps:$4 sm:$0xff]  }
  0x93   :  { %7675 = vmatpush1.bf16.msra.mxu0 %v17252_v26  ;;  %7728 = vmatpush1.bf16.msra.mxu1 %v17255_v27  ;;  %v17345_v26 = vld [vmem:[%s26643_s0 + $0xcc8] ss:$400 sps:$4 sm:$0xff]   ;;  %v17350_v27 = vld [vmem:[%s26643_s0 + $0x9a4] ss:$400 sps:$4 sm:$0xff]  }
  0x94   :  { %7676 = vmatprep.subr.bf16.mxu0 %v17260_v28  ;;  %7729 = vmatprep.subr.bf16.mxu1 %v17263_v29  ;;  %v17353_v28 = vld [vmem:[%s26643_s0 + $0x9ac] ss:$400 sps:$4 sm:$0xff]  }
  0x95   :  { %16047 = vmatprep.mubr.msk.bf16.mxu1 %vm7349_vm0, %v19543_v1  ;;  %16045 = vmatprep.mubr.msk.bf16.mxu0 %vm7349_vm0, %v19543_v1  ;;  %v17275_v1 = vld [vmem:[%s26643_s0 + $0xcbc] ss:$400 sps:$4 sm:$0xff]  }
  0x96   :  { %v20051_v29 = vld [vmem:[%s26644_s1 + $0x4] ss:$8 sps:$4 sm:$0xff]  }
  0x97   :  { %7677 = vmatpush1.bf16.msra.mxu0 %v17258_v30  ;;  %7730 = vmatpush1.bf16.msra.mxu1 %v17261_v31  ;;  %v17348_v30 = vld [vmem:[%s26643_s0 + $0x9a0] ss:$400 sps:$4 sm:$0xff]   ;;  %v17351_v31 = vld [vmem:[%s26643_s0 + $0x9a8] ss:$400 sps:$4 sm:$0xff]  }
  0x98   :  { %7678 = vmatprep.subr.bf16.mxu0 %v17266_v32  ;;  %7731 = vmatprep.subr.bf16.mxu1 %v17269_v51  ;;  %v17356_v32 = vld [vmem:[%s26643_s0 + $0x684] ss:$400 sps:$4 sm:$0xff]   ;;  %v17359_v51 = vld [vmem:[%s26643_s0 + $0x68c] ss:$400 sps:$4 sm:$0xff]  }
  0x9a   :  { %7664 = vmatmul.mubr.bf16.gmra.mxu1 %v19548_v2  ;;  %7611 = vmatmul.mubr.bf16.gmra.mxu0 %v19548_v2  ;;  %v17276_v2 = vld [vmem:[%s26643_s0 + $0x990] ss:$400 sps:$4 sm:$0xff]  }
  0x9b   :  { %7679 = vmatpush1.bf16.msra.mxu0 %v17264_v33  ;;  %7732 = vmatpush1.bf16.msra.mxu1 %v17267_v34  ;;  %v17354_v33 = vld [vmem:[%s26643_s0 + $0x680] ss:$400 sps:$4 sm:$0xff]   ;;  %v17357_v34 = vld [vmem:[%s26643_s0 + $0x688] ss:$400 sps:$4 sm:$0xff]  }
  0x9c   :  { %7680 = vmatprep.subr.bf16.mxu0 %v17272_v35  ;;  %7733 = vmatprep.subr.bf16.mxu1 %v17275_v1  ;;  %v17362_v35 = vld [vmem:[%s26643_s0 + $0x364] ss:$400 sps:$4 sm:$0xff]   ;;  %v17365_v1 = vld [vmem:[%s26643_s0 + $0x36c] ss:$400 sps:$4 sm:$0xff]  }
  0x9d   :  { %16050 = vmatprep.mubr.msk.bf16.mxu1 %vm7349_vm0, %v19449_v37  ;;  %16048 = vmatprep.mubr.msk.bf16.mxu0 %vm7349_vm0, %v19449_v37  ;;  %v17287_v37 = vld [vmem:[%s26643_s0 + $0x67c] ss:$400 sps:$4 sm:$0xff]  }
  0x9f   :  { %7681 = vmatpush1.bf16.msra.mxu0 %v17270_v36  ;;  %7734 = vmatpush1.bf16.msra.mxu1 %v17273_v38  ;;  %v17360_v36 = vld [vmem:[%s26643_s0 + $0x360] ss:$400 sps:$4 sm:$0xff]   ;;  %v17363_v38 = vld [vmem:[%s26643_s0 + $0x368] ss:$400 sps:$4 sm:$0xff]  }
  0xa0   :  { %7682 = vmatprep.subr.bf16.mxu0 %v17278_v39  ;;  %7735 = vmatprep.subr.bf16.mxu1 %v17281_v40  ;;  %v17368_v39 = vld [vmem:[%s26643_s0 + $0x44] ss:$400 sps:$4 sm:$0xff]   ;;  %v17371_v40 = vld [vmem:[%s26643_s0 + $0x4c] ss:$400 sps:$4 sm:$0xff]  }
  0xa3   :  { %7683 = vmatpush1.bf16.msra.mxu0 %v17276_v2  ;;  %7736 = vmatpush1.bf16.msra.mxu1 %v17279_v41  ;;  %v17366_v2 = vld [vmem:[%s26643_s0 + $0x40] ss:$400 sps:$4 sm:$0xff]   ;;  %v17369_v41 = vld [vmem:[%s26643_s0 + $0x48] ss:$400 sps:$4 sm:$0xff]  }
  0xa4   :  { %7684 = vmatprep.subr.bf16.mxu0 %v17284_v42  ;;  %7737 = vmatprep.subr.bf16.mxu1 %v17287_v37  ;;  %v17374_v42 = vld [vmem:[%s26643_s0 + $0x22a4] ss:$400 sps:$4 sm:$0xff]   ;;  %v17377_v37 = vld [vmem:[%s26643_s0 + $0x22ac] ss:$400 sps:$4 sm:$0xff]  }
  0xa7   :  { %7685 = vmatpush1.bf16.msra.mxu0 %v17282_v43  ;;  %7738 = vmatpush1.bf16.msra.mxu1 %v17285_v44  ;;  %v17372_v43 = vld [vmem:[%s26643_s0 + $0x22a0] ss:$400 sps:$4 sm:$0xff]   ;;  %v17375_v44 = vld [vmem:[%s26643_s0 + $0x22a8] ss:$400 sps:$4 sm:$0xff]  }
  0xa8   :  { %7686 = vmatprep.subr.bf16.mxu0 %v17290_v45  ;;  %7739 = vmatprep.subr.bf16.mxu1 %v17293_v46  ;;  %v17380_v45 = vld [vmem:[%s26643_s0 + $0x1f84] ss:$400 sps:$4 sm:$0xff]   ;;  %v17383_v46 = vld [vmem:[%s26643_s0 + $0x1f8c] ss:$400 sps:$4 sm:$0xff]  }
  0xab   :  { %7687 = vmatpush1.bf16.msra.mxu0 %v17288_v47  ;;  %7740 = vmatpush1.bf16.msra.mxu1 %v17291_v48  ;;  %v17378_v47 = vld [vmem:[%s26643_s0 + $0x1f80] ss:$400 sps:$4 sm:$0xff]   ;;  %v17381_v48 = vld [vmem:[%s26643_s0 + $0x1f88] ss:$400 sps:$4 sm:$0xff]  }
  0xac   :  { %7688 = vmatprep.subr.bf16.mxu0 %v17296_v49  ;;  %7741 = vmatprep.subr.bf16.mxu1 %v17299_v50  ;;  %v17386_v49 = vld [vmem:[%s26643_s0 + $0x1c64] ss:$400 sps:$4 sm:$0xff]   ;;  %v17389_v50 = vld [vmem:[%s26643_s0 + $0x1c6c] ss:$400 sps:$4 sm:$0xff]  }
  0xaf   :  { %7689 = vmatpush1.bf16.msra.mxu0 %v17294_v52  ;;  %7742 = vmatpush1.bf16.msra.mxu1 %v17297_v53  ;;  %v17384_v52 = vld [vmem:[%s26643_s0 + $0x1c60] ss:$400 sps:$4 sm:$0xff]   ;;  %v17387_v53 = vld [vmem:[%s26643_s0 + $0x1c68] ss:$400 sps:$4 sm:$0xff]  }
  0xb0   :  { %7698 = vmatprep.subr.bf16.mxu0 %v17302_v54  ;;  %7751 = vmatprep.subr.bf16.mxu1 %v17305_v55  ;;  %v17392_v54 = vld [vmem:[%s26643_s0 + $0x1944] ss:$400 sps:$4 sm:$0xff]   ;;  %v17395_v55 = vld [vmem:[%s26643_s0 + $0x194c] ss:$400 sps:$4 sm:$0xff]  }
  0xb3   :  { %7699 = vmatpush2.bf16.msra.mxu0 %v17300_v56  ;;  %7752 = vmatpush2.bf16.msra.mxu1 %v17303_v57  ;;  %v17390_v56 = vld [vmem:[%s26643_s0 + $0x1940] ss:$400 sps:$4 sm:$0xff]   ;;  %v17393_v57 = vld [vmem:[%s26643_s0 + $0x1948] ss:$400 sps:$4 sm:$0xff]  }
  0xb4   :  { %7700 = vmatprep.subr.bf16.mxu0 %v17308_v58  ;;  %7753 = vmatprep.subr.bf16.mxu1 %v17311_v59  ;;  %v17398_v58 = vld [vmem:[%s26643_s0 + $0x1634] ss:$400 sps:$4 sm:$0xff]   ;;  %v17401_v59 = vld [vmem:[%s26643_s0 + $0x163c] ss:$400 sps:$4 sm:$0xff]  }
  0xb7   :  { %7701 = vmatpush2.bf16.msra.mxu0 %v17306_v60  ;;  %7754 = vmatpush2.bf16.msra.mxu1 %v17309_v61  ;;  %v17396_v60 = vld [vmem:[%s26643_s0 + $0x1630] ss:$400 sps:$4 sm:$0xff]   ;;  %v17399_v61 = vld [vmem:[%s26643_s0 + $0x1638] ss:$400 sps:$4 sm:$0xff]  }
  0xb8   :  { %7702 = vmatprep.subr.bf16.mxu0 %v17314_v62  ;;  %7755 = vmatprep.subr.bf16.mxu1 %v17317_v63  ;;  %v17404_v62 = vld [vmem:[%s26643_s0 + $0x1314] ss:$400 sps:$4 sm:$0xff]   ;;  %v17407_v63 = vld [vmem:[%s26643_s0 + $0x131c] ss:$400 sps:$4 sm:$0xff]  }
  0xbb   :  { %7703 = vmatpush2.bf16.msra.mxu0 %v17312_v0  ;;  %7756 = vmatpush2.bf16.msra.mxu1 %v17315_v3  ;;  %v17402_v0 = vld [vmem:[%s26643_s0 + $0x1310] ss:$400 sps:$4 sm:$0xff]   ;;  %v17405_v3 = vld [vmem:[%s26643_s0 + $0x1318] ss:$400 sps:$4 sm:$0xff]  }
  0xbc   :  { %7704 = vmatprep.subr.bf16.mxu0 %v17320_v4  ;;  %7757 = vmatprep.subr.bf16.mxu1 %v17323_v5  ;;  %v17410_v4 = vld [vmem:[%s26643_s0 + $0xff4] ss:$400 sps:$4 sm:$0xff]   ;;  %v17413_v5 = vld [vmem:[%s26643_s0 + $0xffc] ss:$400 sps:$4 sm:$0xff]  }
  0xbf   :  { %7705 = vmatpush2.bf16.msra.mxu0 %v17318_v6  ;;  %7758 = vmatpush2.bf16.msra.mxu1 %v17321_v7  ;;  %v17408_v6 = vld [vmem:[%s26643_s0 + $0xff0] ss:$400 sps:$4 sm:$0xff]   ;;  %v17411_v7 = vld [vmem:[%s26643_s0 + $0xff8] ss:$400 sps:$4 sm:$0xff]  }
  0xc0   :  { %7780 = vmatprep.subr.bf16.mxu0 %v17326_v8  ;;  %7833 = vmatprep.subr.bf16.mxu1 %v17329_v9  ;;  %v17416_v8 = vld [vmem:[%s26643_s0 + $0xcd4] ss:$400 sps:$4 sm:$0xff]   ;;  %v17419_v9 = vld [vmem:[%s26643_s0 + $0xcdc] ss:$400 sps:$4 sm:$0xff]  }
  0xc2   :  { %7760 = vmatmul.mubr.bf16.vlgmr.msra.gmra.mxu1 %v19992_v14  ;;  %7707 = vmatmul.mubr.bf16.vlgmr.msra.gmra.mxu0 %v19992_v14 }
  0xc3   :  { %7781 = vmatpush1.bf16.msra.mxu0 %v17324_v10  ;;  %7834 = vmatpush1.bf16.msra.mxu1 %v17327_v11  ;;  %v17414_v10 = vld [vmem:[%s26643_s0 + $0xcd0] ss:$400 sps:$4 sm:$0xff]   ;;  %v17417_v11 = vld [vmem:[%s26643_s0 + $0xcd8] ss:$400 sps:$4 sm:$0xff]  }
  0xc4   :  { %7782 = vmatprep.subr.bf16.mxu0 %v17332_v12  ;;  %7835 = vmatprep.subr.bf16.mxu1 %v17335_v13  ;;  %v17422_v12 = vld [vmem:[%s26643_s0 + $0x9b4] ss:$400 sps:$4 sm:$0xff]   ;;  %v17425_v13 = vld [vmem:[%s26643_s0 + $0x9bc] ss:$400 sps:$4 sm:$0xff]  }
  0xc5   :  { %16051 = vmatprep.mubr.msk.bf16.mxu1 %vm7349_vm0, %v20011_v19  ;;  %16049 = vmatprep.mubr.msk.bf16.mxu0 %vm7349_vm0, %v20011_v19 }
  0xc7   :  { %7783 = vmatpush1.bf16.msra.mxu0 %v17330_v15  ;;  %7836 = vmatpush1.bf16.msra.mxu1 %v17333_v16  ;;  %v17420_v15 = vld [vmem:[%s26643_s0 + $0x9b0] ss:$400 sps:$4 sm:$0xff]   ;;  %v17423_v16 = vld [vmem:[%s26643_s0 + $0x9b8] ss:$400 sps:$4 sm:$0xff]  }
  0xc8   :  { %7784 = vmatprep.subr.bf16.mxu0 %v17338_v17  ;;  %7837 = vmatprep.subr.bf16.mxu1 %v17341_v18  ;;  %v17428_v17 = vld [vmem:[%s26643_s0 + $0x694] ss:$400 sps:$4 sm:$0xff]   ;;  %v17431_v18 = vld [vmem:[%s26643_s0 + $0x69c] ss:$400 sps:$4 sm:$0xff]  }
  0xca   :  { %7770 = vmatmul.mubr.bf16.gmra.mxu1 %v20035_v25  ;;  %7717 = vmatmul.mubr.bf16.gmra.mxu0 %v20035_v25 }
  0xcb   :  { %7785 = vmatpush1.bf16.msra.mxu0 %v17336_v20  ;;  %7838 = vmatpush1.bf16.msra.mxu1 %v17339_v21  ;;  %v17426_v20 = vld [vmem:[%s26643_s0 + $0x690] ss:$400 sps:$4 sm:$0xff]   ;;  %v17429_v21 = vld [vmem:[%s26643_s0 + $0x698] ss:$400 sps:$4 sm:$0xff]  }
  0xcc   :  { %7786 = vmatprep.subr.bf16.mxu0 %v17344_v22  ;;  %7839 = vmatprep.subr.bf16.mxu1 %v17347_v23  ;;  %v17434_v22 = vld [vmem:[%s26643_s0 + $0x374] ss:$400 sps:$4 sm:$0xff]   ;;  %v17437_v23 = vld [vmem:[%s26643_s0 + $0x37c] ss:$400 sps:$4 sm:$0xff]  }
  0xcd   :  { %16054 = vmatprep.mubr.msk.bf16.mxu1 %vm7349_vm0, %v20051_v29  ;;  %16052 = vmatprep.mubr.msk.bf16.mxu0 %vm7349_vm0, %v20051_v29 }
  0xcf   :  { %7787 = vmatpush1.bf16.msra.mxu0 %v17342_v24  ;;  %7840 = vmatpush1.bf16.msra.mxu1 %v17345_v26  ;;  %v17432_v24 = vld [vmem:[%s26643_s0 + $0x370] ss:$400 sps:$4 sm:$0xff]   ;;  %v17435_v26 = vld [vmem:[%s26643_s0 + $0x378] ss:$400 sps:$4 sm:$0xff]  }
  0xd0   :  { %7788 = vmatprep.subr.bf16.mxu0 %v17350_v27  ;;  %7841 = vmatprep.subr.bf16.mxu1 %v17353_v28  ;;  %v17440_v27 = vld [vmem:[%s26643_s0 + $0x54] ss:$400 sps:$4 sm:$0xff]   ;;  %v17443_v28 = vld [vmem:[%s26643_s0 + $0x5c] ss:$400 sps:$4 sm:$0xff]  }
  0xd3   :  { %7789 = vmatpush1.bf16.msra.mxu0 %v17348_v30  ;;  %7842 = vmatpush1.bf16.msra.mxu1 %v17351_v31  ;;  %v17438_v30 = vld [vmem:[%s26643_s0 + $0x50] ss:$400 sps:$4 sm:$0xff]   ;;  %v17441_v31 = vld [vmem:[%s26643_s0 + $0x58] ss:$400 sps:$4 sm:$0xff]  }
  0xd4   :  { %7790 = vmatprep.subr.bf16.mxu0 %v17356_v32  ;;  %7843 = vmatprep.subr.bf16.mxu1 %v17359_v51  ;;  %v17446_v32 = vld [vmem:[%s26643_s0 + $0x22b4] ss:$400 sps:$4 sm:$0xff]   ;;  %v17449_v51 = vld [vmem:[%s26643_s0 + $0x22bc] ss:$400 sps:$4 sm:$0xff]  }
  0xd7   :  { %7791 = vmatpush1.bf16.msra.mxu0 %v17354_v33  ;;  %7844 = vmatpush1.bf16.msra.mxu1 %v17357_v34  ;;  %v17444_v33 = vld [vmem:[%s26643_s0 + $0x22b0] ss:$400 sps:$4 sm:$0xff]   ;;  %v17447_v34 = vld [vmem:[%s26643_s0 + $0x22b8] ss:$400 sps:$4 sm:$0xff]  }
  0xd8   :  { %7792 = vmatprep.subr.bf16.mxu0 %v17362_v35  ;;  %7845 = vmatprep.subr.bf16.mxu1 %v17365_v1  ;;  %v17452_v35 = vld [vmem:[%s26643_s0 + $0x1f94] ss:$400 sps:$4 sm:$0xff]   ;;  %v17455_v1 = vld [vmem:[%s26643_s0 + $0x1f9c] ss:$400 sps:$4 sm:$0xff]  }
  0xdb   :  { %7793 = vmatpush1.bf16.msra.mxu0 %v17360_v36  ;;  %7846 = vmatpush1.bf16.msra.mxu1 %v17363_v38  ;;  %v17450_v36 = vld [vmem:[%s26643_s0 + $0x1f90] ss:$400 sps:$4 sm:$0xff]   ;;  %v17453_v38 = vld [vmem:[%s26643_s0 + $0x1f98] ss:$400 sps:$4 sm:$0xff]  }
  0xdc   :  { %7794 = vmatprep.subr.bf16.mxu0 %v17368_v39  ;;  %7847 = vmatprep.subr.bf16.mxu1 %v17371_v40  ;;  %v17458_v39 = vld [vmem:[%s26643_s0 + $0x1c74] ss:$400 sps:$4 sm:$0xff]   ;;  %v17461_v40 = vld [vmem:[%s26643_s0 + $0x1c7c] ss:$400 sps:$4 sm:$0xff]  }
  0xdf   :  { %7795 = vmatpush1.bf16.msra.mxu0 %v17366_v2  ;;  %7848 = vmatpush1.bf16.msra.mxu1 %v17369_v41  ;;  %v17456_v2 = vld [vmem:[%s26643_s0 + $0x1c70] ss:$400 sps:$4 sm:$0xff]   ;;  %v17459_v41 = vld [vmem:[%s26643_s0 + $0x1c78] ss:$400 sps:$4 sm:$0xff]  }
  0xe0   :  { %7804 = vmatprep.subr.bf16.mxu0 %v17374_v42  ;;  %7857 = vmatprep.subr.bf16.mxu1 %v17377_v37  ;;  %v17464_v42 = vld [vmem:[%s26643_s0 + $0x1954] ss:$400 sps:$4 sm:$0xff]   ;;  %v17467_v37 = vld [vmem:[%s26643_s0 + $0x195c] ss:$400 sps:$4 sm:$0xff]  }
  0xe3   :  { %7805 = vmatpush2.bf16.msra.mxu0 %v17372_v43  ;;  %7858 = vmatpush2.bf16.msra.mxu1 %v17375_v44  ;;  %v17462_v43 = vld [vmem:[%s26643_s0 + $0x1950] ss:$400 sps:$4 sm:$0xff]   ;;  %v17465_v44 = vld [vmem:[%s26643_s0 + $0x1958] ss:$400 sps:$4 sm:$0xff]  }
  0xe4   :  { %7806 = vmatprep.subr.bf16.mxu0 %v17380_v45  ;;  %7859 = vmatprep.subr.bf16.mxu1 %v17383_v46  ;;  %v17470_v45 = vld [vmem:[%s26643_s0 + $0x1644] ss:$400 sps:$4 sm:$0xff]   ;;  %v17473_v46 = vld [vmem:[%s26643_s0 + $0x164c] ss:$400 sps:$4 sm:$0xff]  }
  0xe7   :  { %7807 = vmatpush2.bf16.msra.mxu0 %v17378_v47  ;;  %7860 = vmatpush2.bf16.msra.mxu1 %v17381_v48  ;;  %v17468_v47 = vld [vmem:[%s26643_s0 + $0x1640] ss:$400 sps:$4 sm:$0xff]   ;;  %v17471_v48 = vld [vmem:[%s26643_s0 + $0x1648] ss:$400 sps:$4 sm:$0xff]  }
  0xe8   :  { %7808 = vmatprep.subr.bf16.mxu0 %v17386_v49  ;;  %7861 = vmatprep.subr.bf16.mxu1 %v17389_v50  ;;  %v17476_v49 = vld [vmem:[%s26643_s0 + $0x1324] ss:$400 sps:$4 sm:$0xff]   ;;  %v17479_v50 = vld [vmem:[%s26643_s0 + $0x132c] ss:$400 sps:$4 sm:$0xff]  }
  0xeb   :  { %7809 = vmatpush2.bf16.msra.mxu0 %v17384_v52  ;;  %7862 = vmatpush2.bf16.msra.mxu1 %v17387_v53  ;;  %v17474_v52 = vld [vmem:[%s26643_s0 + $0x1320] ss:$400 sps:$4 sm:$0xff]   ;;  %v17477_v53 = vld [vmem:[%s26643_s0 + $0x1328] ss:$400 sps:$4 sm:$0xff]  }
  0xec   :  { %7810 = vmatprep.subr.bf16.mxu0 %v17392_v54  ;;  %7863 = vmatprep.subr.bf16.mxu1 %v17395_v55  ;;  %v17482_v54 = vld [vmem:[%s26643_s0 + $0x1004] ss:$400 sps:$4 sm:$0xff]   ;;  %v17480_v55 = vld [vmem:[%s26643_s0 + $0x1000] ss:$400 sps:$4 sm:$0xff]  }
  0xef   :  { %7811 = vmatpush2.bf16.msra.mxu0 %v17390_v56  ;;  %7864 = vmatpush2.bf16.msra.mxu1 %v17393_v57  ;;  %v17483_v56 = vld [vmem:[%s26643_s0 + $0x1008] ss:$400 sps:$4 sm:$0xff]   ;;  %v17488_v57 = vld [vmem:[%s26643_s0 + $0xce4] ss:$400 sps:$4 sm:$0xff]  }
  0xf0   :  { %7886 = vmatprep.subr.bf16.mxu0 %v17398_v58  ;;  %7939 = vmatprep.subr.bf16.mxu1 %v17401_v59  ;;  %v17486_v58 = vld [vmem:[%s26643_s0 + $0xce0] ss:$400 sps:$4 sm:$0xff]   ;;  %v17489_v59 = vld [vmem:[%s26643_s0 + $0xce8] ss:$400 sps:$4 sm:$0xff]  }
  0xf2   :  { %7866 = vmatmul.mubr.bf16.vlgmr.msra.gmra.mxu1 %v19992_v14  ;;  %7813 = vmatmul.mubr.bf16.vlgmr.msra.gmra.mxu0 %v19992_v14 }
  0xf3   :  { %7887 = vmatpush1.bf16.msra.mxu0 %v17396_v60  ;;  %7940 = vmatpush1.bf16.msra.mxu1 %v17399_v61  ;;  %v17494_v60 = vld [vmem:[%s26643_s0 + $0x9c4] ss:$400 sps:$4 sm:$0xff]   ;;  %v17492_v61 = vld [vmem:[%s26643_s0 + $0x9c0] ss:$400 sps:$4 sm:$0xff]  }
  0xf4   :  { %7888 = vmatprep.subr.bf16.mxu0 %v17404_v62  ;;  %7941 = vmatprep.subr.bf16.mxu1 %v17407_v63  ;;  %v17495_v62 = vld [vmem:[%s26643_s0 + $0x9c8] ss:$400 sps:$4 sm:$0xff]   ;;  %v17500_v63 = vld [vmem:[%s26643_s0 + $0x6a4] ss:$400 sps:$4 sm:$0xff]  }
  0xf5   :  { %16055 = vmatprep.mubr.msk.bf16.mxu1 %vm7349_vm0, %v20011_v19  ;;  %16053 = vmatprep.mubr.msk.bf16.mxu0 %vm7349_vm0, %v20011_v19 }
  0xf7   :  { %7889 = vmatpush1.bf16.msra.mxu0 %v17402_v0  ;;  %7942 = vmatpush1.bf16.msra.mxu1 %v17405_v3  ;;  %v17503_v0 = vld [vmem:[%s26643_s0 + $0x6ac] ss:$400 sps:$4 sm:$0xff]   ;;  %v17498_v3 = vld [vmem:[%s26643_s0 + $0x6a0] ss:$400 sps:$4 sm:$0xff]  }
  0xf8   :  { %7890 = vmatprep.subr.bf16.mxu0 %v17410_v4  ;;  %7943 = vmatprep.subr.bf16.mxu1 %v17413_v5  ;;  %v17506_v4 = vld [vmem:[%s26643_s0 + $0x384] ss:$400 sps:$4 sm:$0xff]   ;;  %v17509_v5 = vld [vmem:[%s26643_s0 + $0x38c] ss:$400 sps:$4 sm:$0xff]  }
  0xfa   :  { %7876 = vmatmul.mubr.bf16.gmra.mxu1 %v20035_v25  ;;  %7823 = vmatmul.mubr.bf16.gmra.mxu0 %v20035_v25 }
  0xfb   :  { %7891 = vmatpush1.bf16.msra.mxu0 %v17408_v6  ;;  %7944 = vmatpush1.bf16.msra.mxu1 %v17411_v7  ;;  %v17504_v6 = vld [vmem:[%s26643_s0 + $0x380] ss:$400 sps:$4 sm:$0xff]   ;;  %v17507_v7 = vld [vmem:[%s26643_s0 + $0x388] ss:$400 sps:$4 sm:$0xff]  }
  0xfc   :  { %7892 = vmatprep.subr.bf16.mxu0 %v17416_v8  ;;  %7945 = vmatprep.subr.bf16.mxu1 %v17419_v9  ;;  %v17512_v8 = vld [vmem:[%s26643_s0 + $0x64] ss:$400 sps:$4 sm:$0xff]   ;;  %v17515_v9 = vld [vmem:[%s26643_s0 + $0x6c] ss:$400 sps:$4 sm:$0xff]  }
  0xfd   :  { %16058 = vmatprep.mubr.msk.bf16.mxu1 %vm7349_vm0, %v20051_v29  ;;  %16056 = vmatprep.mubr.msk.bf16.mxu0 %vm7349_vm0, %v20051_v29 }
  0xff   :  { %7893 = vmatpush1.bf16.msra.mxu0 %v17414_v10  ;;  %7946 = vmatpush1.bf16.msra.mxu1 %v17417_v11  ;;  %v17510_v10 = vld [vmem:[%s26643_s0 + $0x60] ss:$400 sps:$4 sm:$0xff]   ;;  %v17513_v11 = vld [vmem:[%s26643_s0 + $0x68] ss:$400 sps:$4 sm:$0xff]  }
 0x100   :  { %7894 = vmatprep.subr.bf16.mxu0 %v17422_v12  ;;  %7947 = vmatprep.subr.bf16.mxu1 %v17425_v13  ;;  %v17518_v12 = vld [vmem:[%s26643_s0 + $0x22c4] ss:$400 sps:$4 sm:$0xff]   ;;  %v17521_v13 = vld [vmem:[%s26643_s0 + $0x22cc] ss:$400 sps:$4 sm:$0xff]  }
 0x103   :  { %7895 = vmatpush1.bf16.msra.mxu0 %v17420_v15  ;;  %7948 = vmatpush1.bf16.msra.mxu1 %v17423_v16  ;;  %v17516_v15 = vld [vmem:[%s26643_s0 + $0x22c0] ss:$400 sps:$4 sm:$0xff]   ;;  %v17519_v16 = vld [vmem:[%s26643_s0 + $0x22c8] ss:$400 sps:$4 sm:$0xff]  }
 0x104   :  { %7896 = vmatprep.subr.bf16.mxu0 %v17428_v17  ;;  %7949 = vmatprep.subr.bf16.mxu1 %v17431_v18  ;;  %v17524_v17 = vld [vmem:[%s26643_s0 + $0x1fa4] ss:$400 sps:$4 sm:$0xff]   ;;  %v17527_v18 = vld [vmem:[%s26643_s0 + $0x1fac] ss:$400 sps:$4 sm:$0xff]  }
 0x107   :  { %7897 = vmatpush1.bf16.msra.mxu0 %v17426_v20  ;;  %7950 = vmatpush1.bf16.msra.mxu1 %v17429_v21  ;;  %v17522_v20 = vld [vmem:[%s26643_s0 + $0x1fa0] ss:$400 sps:$4 sm:$0xff]   ;;  %v17525_v21 = vld [vmem:[%s26643_s0 + $0x1fa8] ss:$400 sps:$4 sm:$0xff]  }
 0x108   :  { %7898 = vmatprep.subr.bf16.mxu0 %v17434_v22  ;;  %7951 = vmatprep.subr.bf16.mxu1 %v17437_v23  ;;  %v17530_v22 = vld [vmem:[%s26643_s0 + $0x1c84] ss:$400 sps:$4 sm:$0xff]   ;;  %v17533_v23 = vld [vmem:[%s26643_s0 + $0x1c8c] ss:$400 sps:$4 sm:$0xff]  }
 0x10b   :  { %7899 = vmatpush1.bf16.msra.mxu0 %v17432_v24  ;;  %7952 = vmatpush1.bf16.msra.mxu1 %v17435_v26  ;;  %v17528_v24 = vld [vmem:[%s26643_s0 + $0x1c80] ss:$400 sps:$4 sm:$0xff]   ;;  %v17531_v26 = vld [vmem:[%s26643_s0 + $0x1c88] ss:$400 sps:$4 sm:$0xff]  }
 0x10c   :  { %7900 = vmatprep.subr.bf16.mxu0 %v17440_v27  ;;  %7953 = vmatprep.subr.bf16.mxu1 %v17443_v28  ;;  %v17536_v27 = vld [vmem:[%s26643_s0 + $0x1964] ss:$400 sps:$4 sm:$0xff]   ;;  %v17539_v28 = vld [vmem:[%s26643_s0 + $0x196c] ss:$400 sps:$4 sm:$0xff]  }
 0x10f   :  { %7901 = vmatpush1.bf16.msra.mxu0 %v17438_v30  ;;  %7954 = vmatpush1.bf16.msra.mxu1 %v17441_v31  ;;  %v17534_v30 = vld [vmem:[%s26643_s0 + $0x1960] ss:$400 sps:$4 sm:$0xff]   ;;  %v17537_v31 = vld [vmem:[%s26643_s0 + $0x1968] ss:$400 sps:$4 sm:$0xff]  }
 0x110   :  { %7910 = vmatprep.subr.bf16.mxu0 %v17446_v32  ;;  %7963 = vmatprep.subr.bf16.mxu1 %v17449_v51  ;;  %v17542_v32 = vld [vmem:[%s26643_s0 + $0x1654] ss:$400 sps:$4 sm:$0xff]   ;;  %v17545_v51 = vld [vmem:[%s26643_s0 + $0x165c] ss:$400 sps:$4 sm:$0xff]  }
 0x113   :  { %7911 = vmatpush2.bf16.msra.mxu0 %v17444_v33  ;;  %7964 = vmatpush2.bf16.msra.mxu1 %v17447_v34  ;;  %v17540_v33 = vld [vmem:[%s26643_s0 + $0x1650] ss:$400 sps:$4 sm:$0xff]   ;;  %v17543_v34 = vld [vmem:[%s26643_s0 + $0x1658] ss:$400 sps:$4 sm:$0xff]  }
 0x114   :  { %7912 = vmatprep.subr.bf16.mxu0 %v17452_v35  ;;  %7965 = vmatprep.subr.bf16.mxu1 %v17455_v1  ;;  %v17548_v35 = vld [vmem:[%s26643_s0 + $0x1334] ss:$400 sps:$4 sm:$0xff]   ;;  %v17551_v1 = vld [vmem:[%s26643_s0 + $0x133c] ss:$400 sps:$4 sm:$0xff]  }
 0x117   :  { %7913 = vmatpush2.bf16.msra.mxu0 %v17450_v36  ;;  %7966 = vmatpush2.bf16.msra.mxu1 %v17453_v38  ;;  %v20480_v36 = vld [vmem:[%s26644_s1] ss:$8 sps:$4 sm:$0xff]  }
 0x118   :  { %7914 = vmatprep.subr.bf16.mxu0 %v17458_v39  ;;  %7967 = vmatprep.subr.bf16.mxu1 %v17461_v40  ;;  %v17546_v38 = vld [vmem:[%s26643_s0 + $0x1330] ss:$400 sps:$4 sm:$0xff]   ;;  %v17549_v39 = vld [vmem:[%s26643_s0 + $0x1338] ss:$400 sps:$4 sm:$0xff]   ;;  %v17554_v40 = vld [vmem:[%s26643_s0 + $0x1014] ss:$400 sps:$4 sm:$0xff]  }
 0x11b   :  { %7915 = vmatpush2.bf16.msra.mxu0 %v17456_v2  ;;  %7968 = vmatpush2.bf16.msra.mxu1 %v17459_v41  ;;  %v17557_v2 = vld [vmem:[%s26643_s0 + $0x101c] ss:$400 sps:$4 sm:$0xff]  }
 0x11c   :  { %7916 = vmatprep.subr.bf16.mxu0 %v17464_v42  ;;  %7969 = vmatprep.subr.bf16.mxu1 %v17467_v37  ;;  %v20499_v41 = vld [vmem:[%s26644_s1 + $0x14] ss:$8 sps:$4 sm:$0x7f]   ;;  %v17552_v42 = vld [vmem:[%s26643_s0 + $0x1010] ss:$400 sps:$4 sm:$0xff]  }
 0x11d   :  { %v17555_v37 = vld [vmem:[%s26643_s0 + $0x1018] ss:$400 sps:$4 sm:$0xff]  }
 0x11f   :  { %7917 = vmatpush2.bf16.msra.mxu0 %v17462_v43  ;;  %7970 = vmatpush2.bf16.msra.mxu1 %v17465_v44  ;;  %v17560_v43 = vld [vmem:[%s26643_s0 + $0xcf4] ss:$400 sps:$4 sm:$0xff]   ;;  %v17563_v44 = vld [vmem:[%s26643_s0 + $0xcfc] ss:$400 sps:$4 sm:$0xff]  }
 0x120   :  { %7992 = vmatprep.subr.bf16.mxu0 %v17470_v45  ;;  %8045 = vmatprep.subr.bf16.mxu1 %v17473_v46  ;;  %v20520_v45 = vld [vmem:[%s26644_s1 + $0x10] ss:$8 sps:$4 sm:$0x7f]  }
 0x121   :  { %v17558_v46 = vld [vmem:[%s26643_s0 + $0xcf0] ss:$400 sps:$4 sm:$0xff]  }
 0x122   :  { %7972 = vmatmul.mubr.bf16.vlgmr.msra.gmra.mxu1 %v19992_v14  ;;  %7919 = vmatmul.mubr.bf16.vlgmr.msra.gmra.mxu0 %v19992_v14  ;;  %v17485_v14 = vld [vmem:[%s26643_s0 + $0x100c] ss:$400 sps:$4 sm:$0xff]  }
 0x123   :  { %7993 = vmatpush1.bf16.msra.mxu0 %v17468_v47  ;;  %8046 = vmatpush1.bf16.msra.mxu1 %v17471_v48  ;;  %v17561_v47 = vld [vmem:[%s26643_s0 + $0xcf8] ss:$400 sps:$4 sm:$0xff]   ;;  %v17566_v48 = vld [vmem:[%s26643_s0 + $0x9d4] ss:$400 sps:$4 sm:$0xff]  }
 0x124   :  { %7994 = vmatprep.subr.bf16.mxu0 %v17476_v49  ;;  %8047 = vmatprep.subr.bf16.mxu1 %v17479_v50  ;;  %v17569_v49 = vld [vmem:[%s26643_s0 + $0x9dc] ss:$400 sps:$4 sm:$0xff]   ;;  %v17564_v50 = vld [vmem:[%s26643_s0 + $0x9d0] ss:$400 sps:$4 sm:$0xff]  }
 0x125   :  { %16059 = vmatprep.mubr.msk.bf16.mxu1 %vm7349_vm0, %v20011_v19  ;;  %16057 = vmatprep.mubr.msk.bf16.mxu0 %vm7349_vm0, %v20011_v19  ;;  %v17491_v19 = vld [vmem:[%s26643_s0 + $0xcec] ss:$400 sps:$4 sm:$0xff]  }
 0x127   :  { %7995 = vmatpush1.bf16.msra.mxu0 %v17474_v52  ;;  %8048 = vmatpush1.bf16.msra.mxu1 %v17477_v53  ;;  %v17567_v52 = vld [vmem:[%s26643_s0 + $0x9d8] ss:$400 sps:$4 sm:$0xff]   ;;  %v20545_v53 = vld [vmem:[%s26644_s1 + $0x4] ss:$8 sps:$4 sm:$0xff]  }
 0x128   :  { %7996 = vmatprep.subr.bf16.mxu0 %v17482_v54  ;;  %8049 = vmatprep.subr.bf16.mxu1 %v17485_v14  ;;  %v17572_v54 = vld [vmem:[%s26643_s0 + $0x6b4] ss:$400 sps:$4 sm:$0xff]   ;;  %v17575_v14 = vld [vmem:[%s26643_s0 + $0x6bc] ss:$400 sps:$4 sm:$0xff]  }
 0x12a   :  { %7982 = vmatmul.mubr.bf16.gmra.mxu1 %v20035_v25  ;;  %7929 = vmatmul.mubr.bf16.gmra.mxu0 %v20035_v25  ;;  %v17497_v25 = vld [vmem:[%s26643_s0 + $0x9cc] ss:$400 sps:$4 sm:$0xff]  }
 0x12b   :  { %7997 = vmatpush1.bf16.msra.mxu0 %v17480_v55  ;;  %8050 = vmatpush1.bf16.msra.mxu1 %v17483_v56  ;;  %v17570_v55 = vld [vmem:[%s26643_s0 + $0x6b0] ss:$400 sps:$4 sm:$0xff]   ;;  %v17573_v56 = vld [vmem:[%s26643_s0 + $0x6b8] ss:$400 sps:$4 sm:$0xff]  }
 0x12c   :  { %7998 = vmatprep.subr.bf16.mxu0 %v17488_v57  ;;  %8051 = vmatprep.subr.bf16.mxu1 %v17491_v19  ;;  %v17578_v57 = vld [vmem:[%s26643_s0 + $0x394] ss:$400 sps:$4 sm:$0xff]   ;;  %v17581_v19 = vld [vmem:[%s26643_s0 + $0x39c] ss:$400 sps:$4 sm:$0xff]  }
 0x12d   :  { %16060 = vmatprep.mubr.msk.bf16.mxu0 %vm7349_vm0, %v20051_v29  ;;  %16062 = vmatprep.mubr.msk.bf16.mxu1 %vm7349_vm0, %v20051_v29  ;;  %v17501_v29 = vld [vmem:[%s26643_s0 + $0x6a8] ss:$400 sps:$4 sm:$0xff]  }
 0x12f   :  { %7999 = vmatpush1.bf16.msra.mxu0 %v17486_v58  ;;  %8052 = vmatpush1.bf16.msra.mxu1 %v17489_v59  ;;  %v17576_v58 = vld [vmem:[%s26643_s0 + $0x390] ss:$400 sps:$4 sm:$0xff]   ;;  %v17579_v59 = vld [vmem:[%s26643_s0 + $0x398] ss:$400 sps:$4 sm:$0xff]  }
 0x130   :  { %8000 = vmatprep.subr.bf16.mxu0 %v17494_v60  ;;  %8053 = vmatprep.subr.bf16.mxu1 %v17497_v25  ;;  %v17584_v60 = vld [vmem:[%s26643_s0 + $0x74] ss:$400 sps:$4 sm:$0xff]   ;;  %v17587_v25 = vld [vmem:[%s26643_s0 + $0x7c] ss:$400 sps:$4 sm:$0xff]  }
 0x133   :  { %8001 = vmatpush1.bf16.msra.mxu0 %v17492_v61  ;;  %8054 = vmatpush1.bf16.msra.mxu1 %v17495_v62  ;;  %v17582_v61 = vld [vmem:[%s26643_s0 + $0x70] ss:$400 sps:$4 sm:$0xff]   ;;  %v17585_v62 = vld [vmem:[%s26643_s0 + $0x78] ss:$400 sps:$4 sm:$0xff]  }
 0x134   :  { %8002 = vmatprep.subr.bf16.mxu0 %v17500_v63  ;;  %8055 = vmatprep.subr.bf16.mxu1 %v17503_v0  ;;  %v17590_v63 = vld [vmem:[%s26643_s0 + $0x22d4] ss:$400 sps:$4 sm:$0xff]   ;;  %v17593_v0 = vld [vmem:[%s26643_s0 + $0x22dc] ss:$400 sps:$4 sm:$0xff]  }
 0x137   :  { %8003 = vmatpush1.bf16.msra.mxu0 %v17498_v3  ;;  %8056 = vmatpush1.bf16.msra.mxu1 %v17501_v29  ;;  %v17588_v3 = vld [vmem:[%s26643_s0 + $0x22d0] ss:$400 sps:$4 sm:$0xff]   ;;  %v17591_v29 = vld [vmem:[%s26643_s0 + $0x22d8] ss:$400 sps:$4 sm:$0xff]  }
 0x138   :  { %8004 = vmatprep.subr.bf16.mxu0 %v17506_v4  ;;  %8057 = vmatprep.subr.bf16.mxu1 %v17509_v5  ;;  %v17596_v4 = vld [vmem:[%s26643_s0 + $0x1fb4] ss:$400 sps:$4 sm:$0xff]   ;;  %v17599_v5 = vld [vmem:[%s26643_s0 + $0x1fbc] ss:$400 sps:$4 sm:$0xff]  }
 0x13b   :  { %8005 = vmatpush1.bf16.msra.mxu0 %v17504_v6  ;;  %8058 = vmatpush1.bf16.msra.mxu1 %v17507_v7  ;;  %v17594_v6 = vld [vmem:[%s26643_s0 + $0x1fb0] ss:$400 sps:$4 sm:$0xff]   ;;  %v17597_v7 = vld [vmem:[%s26643_s0 + $0x1fb8] ss:$400 sps:$4 sm:$0xff]  }
 0x13c   :  { %8006 = vmatprep.subr.bf16.mxu0 %v17512_v8  ;;  %8059 = vmatprep.subr.bf16.mxu1 %v17515_v9  ;;  %v17602_v8 = vld [vmem:[%s26643_s0 + $0x1c94] ss:$400 sps:$4 sm:$0xff]   ;;  %v17605_v9 = vld [vmem:[%s26643_s0 + $0x1c9c] ss:$400 sps:$4 sm:$0xff]  }
 0x13f   :  { %8007 = vmatpush1.bf16.msra.mxu0 %v17510_v10  ;;  %8060 = vmatpush1.bf16.msra.mxu1 %v17513_v11  ;;  %v17600_v10 = vld [vmem:[%s26643_s0 + $0x1c90] ss:$400 sps:$4 sm:$0xff]   ;;  %v17603_v11 = vld [vmem:[%s26643_s0 + $0x1c98] ss:$400 sps:$4 sm:$0xff]  }
 0x140   :  { %8016 = vmatprep.subr.bf16.mxu0 %v17518_v12  ;;  %8069 = vmatprep.subr.bf16.mxu1 %v17521_v13  ;;  %v17608_v12 = vld [vmem:[%s26643_s0 + $0x1974] ss:$400 sps:$4 sm:$0xff]   ;;  %v17611_v13 = vld [vmem:[%s26643_s0 + $0x197c] ss:$400 sps:$4 sm:$0xff]  }
 0x143   :  { %8017 = vmatpush2.bf16.msra.mxu0 %v17516_v15  ;;  %8070 = vmatpush2.bf16.msra.mxu1 %v17519_v16  ;;  %v17606_v15 = vld [vmem:[%s26643_s0 + $0x1970] ss:$400 sps:$4 sm:$0xff]   ;;  %v17609_v16 = vld [vmem:[%s26643_s0 + $0x1978] ss:$400 sps:$4 sm:$0xff]  }
 0x144   :  { %8018 = vmatprep.subr.bf16.mxu0 %v17524_v17  ;;  %8071 = vmatprep.subr.bf16.mxu1 %v17527_v18  ;;  %v17614_v17 = vld [vmem:[%s26643_s0 + $0x1664] ss:$400 sps:$4 sm:$0xff]   ;;  %v17617_v18 = vld [vmem:[%s26643_s0 + $0x166c] ss:$400 sps:$4 sm:$0xff]  }
 0x147   :  { %8019 = vmatpush2.bf16.msra.mxu0 %v17522_v20  ;;  %8072 = vmatpush2.bf16.msra.mxu1 %v17525_v21  ;;  %v17612_v20 = vld [vmem:[%s26643_s0 + $0x1660] ss:$400 sps:$4 sm:$0xff]   ;;  %v17615_v21 = vld [vmem:[%s26643_s0 + $0x1668] ss:$400 sps:$4 sm:$0xff]  }
 0x148   :  { %8020 = vmatprep.subr.bf16.mxu0 %v17530_v22  ;;  %8073 = vmatprep.subr.bf16.mxu1 %v17533_v23  ;;  %v17620_v22 = vld [vmem:[%s26643_s0 + $0x1344] ss:$400 sps:$4 sm:$0xff]   ;;  %v17623_v23 = vld [vmem:[%s26643_s0 + $0x134c] ss:$400 sps:$4 sm:$0xff]  }
 0x14b   :  { %8021 = vmatpush2.bf16.msra.mxu0 %v17528_v24  ;;  %8074 = vmatpush2.bf16.msra.mxu1 %v17531_v26  ;;  %v17618_v24 = vld [vmem:[%s26643_s0 + $0x1340] ss:$400 sps:$4 sm:$0xff]   ;;  %v17621_v26 = vld [vmem:[%s26643_s0 + $0x1348] ss:$400 sps:$4 sm:$0xff]  }
 0x14c   :  { %8022 = vmatprep.subr.bf16.mxu0 %v17536_v27  ;;  %8075 = vmatprep.subr.bf16.mxu1 %v17539_v28  ;;  %v17626_v27 = vld [vmem:[%s26643_s0 + $0x1024] ss:$400 sps:$4 sm:$0xff]   ;;  %v17629_v28 = vld [vmem:[%s26643_s0 + $0x102c] ss:$400 sps:$4 sm:$0xff]  }
 0x14f   :  { %8023 = vmatpush2.bf16.msra.mxu0 %v17534_v30  ;;  %8076 = vmatpush2.bf16.msra.mxu1 %v17537_v31  ;;  %v17624_v30 = vld [vmem:[%s26643_s0 + $0x1020] ss:$400 sps:$4 sm:$0xff]   ;;  %v17627_v31 = vld [vmem:[%s26643_s0 + $0x1028] ss:$400 sps:$4 sm:$0xff]  }
 0x150   :  { %8098 = vmatprep.subr.bf16.mxu0 %v17542_v32  ;;  %8151 = vmatprep.subr.bf16.mxu1 %v17545_v51  ;;  %v17632_v32 = vld [vmem:[%s26643_s0 + $0xd04] ss:$400 sps:$4 sm:$0xff]   ;;  %v17635_v51 = vld [vmem:[%s26643_s0 + $0xd0c] ss:$400 sps:$4 sm:$0xff]  }
 0x152   :  { %8025 = vmatmul.mubr.bf16.vlgmr.msra.gmra.mxu0 %v20480_v36  ;;  %8078 = vmatmul.mubr.bf16.vlgmr.msra.gmra.mxu1 %v20480_v36 }
 0x153   :  { %8099 = vmatpush1.bf16.msra.mxu0 %v17540_v33  ;;  %8152 = vmatpush1.bf16.msra.mxu1 %v17543_v34  ;;  %v17630_v33 = vld [vmem:[%s26643_s0 + $0xd00] ss:$400 sps:$4 sm:$0xff]   ;;  %v17633_v34 = vld [vmem:[%s26643_s0 + $0xd08] ss:$400 sps:$4 sm:$0xff]  }
 0x154   :  { %8100 = vmatprep.subr.bf16.mxu0 %v17548_v35  ;;  %8153 = vmatprep.subr.bf16.mxu1 %v17551_v1  ;;  %v17638_v35 = vld [vmem:[%s26643_s0 + $0x9e4] ss:$400 sps:$4 sm:$0xff]   ;;  %v17641_v1 = vld [vmem:[%s26643_s0 + $0x9ec] ss:$400 sps:$4 sm:$0xff]  }
 0x155   :  { %16061 = vmatprep.mubr.msk.bf16.mxu0 %vm7349_vm0, %v20499_v41  ;;  %16063 = vmatprep.mubr.msk.bf16.mxu1 %vm7349_vm0, %v20499_v41 }
 0x157   :  { %8101 = vmatpush1.bf16.msra.mxu0 %v17546_v38  ;;  %8154 = vmatpush1.bf16.msra.mxu1 %v17549_v39  ;;  %v17636_v38 = vld [vmem:[%s26643_s0 + $0x9e0] ss:$400 sps:$4 sm:$0xff]   ;;  %v17639_v39 = vld [vmem:[%s26643_s0 + $0x9e8] ss:$400 sps:$4 sm:$0xff]  }
 0x158   :  { %8102 = vmatprep.subr.bf16.mxu0 %v17554_v40  ;;  %8155 = vmatprep.subr.bf16.mxu1 %v17557_v2  ;;  %v17644_v40 = vld [vmem:[%s26643_s0 + $0x6c4] ss:$400 sps:$4 sm:$0xff]   ;;  %v17647_v2 = vld [vmem:[%s26643_s0 + $0x6cc] ss:$400 sps:$4 sm:$0xff]  }
 0x15a   :  { %8035 = vmatmul.mubr.bf16.gmra.mxu0 %v20520_v45  ;;  %8088 = vmatmul.mubr.bf16.gmra.mxu1 %v20520_v45 }
 0x15b   :  { %8103 = vmatpush1.bf16.msra.mxu0 %v17552_v42  ;;  %8156 = vmatpush1.bf16.msra.mxu1 %v17555_v37  ;;  %v17642_v42 = vld [vmem:[%s26643_s0 + $0x6c0] ss:$400 sps:$4 sm:$0xff]   ;;  %v17645_v37 = vld [vmem:[%s26643_s0 + $0x6c8] ss:$400 sps:$4 sm:$0xff]  }
 0x15c   :  { %8104 = vmatprep.subr.bf16.mxu0 %v17560_v43  ;;  %8157 = vmatprep.subr.bf16.mxu1 %v17563_v44  ;;  %v17650_v43 = vld [vmem:[%s26643_s0 + $0x3a4] ss:$400 sps:$4 sm:$0xff]   ;;  %v17653_v44 = vld [vmem:[%s26643_s0 + $0x3ac] ss:$400 sps:$4 sm:$0xff]  }
 0x15d   :  { %16064 = vmatprep.mubr.msk.bf16.mxu0 %vm7349_vm0, %v20545_v53  ;;  %16066 = vmatprep.mubr.msk.bf16.mxu1 %vm7349_vm0, %v20545_v53 }
 0x15f   :  { %8105 = vmatpush1.bf16.msra.mxu0 %v17558_v46  ;;  %8158 = vmatpush1.bf16.msra.mxu1 %v17561_v47  ;;  %v17648_v46 = vld [vmem:[%s26643_s0 + $0x3a0] ss:$400 sps:$4 sm:$0xff]   ;;  %v17651_v47 = vld [vmem:[%s26643_s0 + $0x3a8] ss:$400 sps:$4 sm:$0xff]  }
 0x160   :  { %8106 = vmatprep.subr.bf16.mxu0 %v17566_v48  ;;  %8159 = vmatprep.subr.bf16.mxu1 %v17569_v49  ;;  %v17656_v48 = vld [vmem:[%s26643_s0 + $0x84] ss:$400 sps:$4 sm:$0xff]   ;;  %v17659_v49 = vld [vmem:[%s26643_s0 + $0x8c] ss:$400 sps:$4 sm:$0xff]  }
 0x163   :  { %8107 = vmatpush1.bf16.msra.mxu0 %v17564_v50  ;;  %8160 = vmatpush1.bf16.msra.mxu1 %v17567_v52  ;;  %v17654_v50 = vld [vmem:[%s26643_s0 + $0x80] ss:$400 sps:$4 sm:$0xff]   ;;  %v17657_v52 = vld [vmem:[%s26643_s0 + $0x88] ss:$400 sps:$4 sm:$0xff]  }
 0x164   :  { %8108 = vmatprep.subr.bf16.mxu0 %v17572_v54  ;;  %8161 = vmatprep.subr.bf16.mxu1 %v17575_v14  ;;  %v17662_v54 = vld [vmem:[%s26643_s0 + $0x22e4] ss:$400 sps:$4 sm:$0xff]   ;;  %v17665_v14 = vld [vmem:[%s26643_s0 + $0x22ec] ss:$400 sps:$4 sm:$0xff]  }
 0x167   :  { %8109 = vmatpush1.bf16.msra.mxu0 %v17570_v55  ;;  %8162 = vmatpush1.bf16.msra.mxu1 %v17573_v56  ;;  %v17660_v55 = vld [vmem:[%s26643_s0 + $0x22e0] ss:$400 sps:$4 sm:$0xff]   ;;  %v17663_v56 = vld [vmem:[%s26643_s0 + $0x22e8] ss:$400 sps:$4 sm:$0xff]  }
 0x168   :  { %8110 = vmatprep.subr.bf16.mxu0 %v17578_v57  ;;  %8163 = vmatprep.subr.bf16.mxu1 %v17581_v19  ;;  %v17668_v57 = vld [vmem:[%s26643_s0 + $0x1fc4] ss:$400 sps:$4 sm:$0xff]   ;;  %v17671_v19 = vld [vmem:[%s26643_s0 + $0x1fcc] ss:$400 sps:$4 sm:$0xff]  }
 0x16b   :  { %8111 = vmatpush1.bf16.msra.mxu0 %v17576_v58  ;;  %8164 = vmatpush1.bf16.msra.mxu1 %v17579_v59  ;;  %v17666_v58 = vld [vmem:[%s26643_s0 + $0x1fc0] ss:$400 sps:$4 sm:$0xff]   ;;  %v17669_v59 = vld [vmem:[%s26643_s0 + $0x1fc8] ss:$400 sps:$4 sm:$0xff]  }
 0x16c   :  { %8112 = vmatprep.subr.bf16.mxu0 %v17584_v60  ;;  %8165 = vmatprep.subr.bf16.mxu1 %v17587_v25  ;;  %v17674_v60 = vld [vmem:[%s26643_s0 + $0x1ca4] ss:$400 sps:$4 sm:$0xff]   ;;  %v17677_v25 = vld [vmem:[%s26643_s0 + $0x1cac] ss:$400 sps:$4 sm:$0xff]  }
 0x16f   :  { %8113 = vmatpush1.bf16.msra.mxu0 %v17582_v61  ;;  %8166 = vmatpush1.bf16.msra.mxu1 %v17585_v62  ;;  %v17672_v61 = vld [vmem:[%s26643_s0 + $0x1ca0] ss:$400 sps:$4 sm:$0xff]   ;;  %v17675_v62 = vld [vmem:[%s26643_s0 + $0x1ca8] ss:$400 sps:$4 sm:$0xff]  }
 0x170   :  { %8122 = vmatprep.subr.bf16.mxu0 %v17590_v63  ;;  %8175 = vmatprep.subr.bf16.mxu1 %v17593_v0  ;;  %v17680_v63 = vld [vmem:[%s26643_s0 + $0x1984] ss:$400 sps:$4 sm:$0xff]   ;;  %v17683_v0 = vld [vmem:[%s26643_s0 + $0x198c] ss:$400 sps:$4 sm:$0xff]  }
 0x173   :  { %8123 = vmatpush2.bf16.msra.mxu0 %v17588_v3  ;;  %8176 = vmatpush2.bf16.msra.mxu1 %v17591_v29  ;;  %v17678_v3 = vld [vmem:[%s26643_s0 + $0x1980] ss:$400 sps:$4 sm:$0xff]   ;;  %v17681_v29 = vld [vmem:[%s26643_s0 + $0x1988] ss:$400 sps:$4 sm:$0xff]  }
 0x174   :  { %8124 = vmatprep.subr.bf16.mxu0 %v17596_v4  ;;  %8177 = vmatprep.subr.bf16.mxu1 %v17599_v5  ;;  %v17686_v4 = vld [vmem:[%s26643_s0 + $0x1674] ss:$400 sps:$4 sm:$0xff]   ;;  %v17689_v5 = vld [vmem:[%s26643_s0 + $0x167c] ss:$400 sps:$4 sm:$0xff]  }
 0x177   :  { %8125 = vmatpush2.bf16.msra.mxu0 %v17594_v6  ;;  %8178 = vmatpush2.bf16.msra.mxu1 %v17597_v7  ;;  %v17684_v6 = vld [vmem:[%s26643_s0 + $0x1670] ss:$400 sps:$4 sm:$0xff]   ;;  %v17687_v7 = vld [vmem:[%s26643_s0 + $0x1678] ss:$400 sps:$4 sm:$0xff]  }
 0x178   :  { %8126 = vmatprep.subr.bf16.mxu0 %v17602_v8  ;;  %8179 = vmatprep.subr.bf16.mxu1 %v17605_v9  ;;  %v17692_v8 = vld [vmem:[%s26643_s0 + $0x1354] ss:$400 sps:$4 sm:$0xff]   ;;  %v17695_v9 = vld [vmem:[%s26643_s0 + $0x135c] ss:$400 sps:$4 sm:$0xff]  }
 0x17b   :  { %8127 = vmatpush2.bf16.msra.mxu0 %v17600_v10  ;;  %8180 = vmatpush2.bf16.msra.mxu1 %v17603_v11  ;;  %v17690_v10 = vld [vmem:[%s26643_s0 + $0x1350] ss:$400 sps:$4 sm:$0xff]   ;;  %v17693_v11 = vld [vmem:[%s26643_s0 + $0x1358] ss:$400 sps:$4 sm:$0xff]  }
 0x17c   :  { %8128 = vmatprep.subr.bf16.mxu0 %v17608_v12  ;;  %8181 = vmatprep.subr.bf16.mxu1 %v17611_v13  ;;  %v17698_v12 = vld [vmem:[%s26643_s0 + $0x1034] ss:$400 sps:$4 sm:$0xff]   ;;  %v17696_v13 = vld [vmem:[%s26643_s0 + $0x1030] ss:$400 sps:$4 sm:$0xff]  }
 0x17f   :  { %8129 = vmatpush2.bf16.msra.mxu0 %v17606_v15  ;;  %8182 = vmatpush2.bf16.msra.mxu1 %v17609_v16  ;;  %v17699_v15 = vld [vmem:[%s26643_s0 + $0x1038] ss:$400 sps:$4 sm:$0xff]   ;;  %v17704_v16 = vld [vmem:[%s26643_s0 + $0xd14] ss:$400 sps:$4 sm:$0xff]  }
 0x180   :  { %8204 = vmatprep.subr.bf16.mxu0 %v17614_v17  ;;  %8257 = vmatprep.subr.bf16.mxu1 %v17617_v18  ;;  %v17702_v17 = vld [vmem:[%s26643_s0 + $0xd10] ss:$400 sps:$4 sm:$0xff]   ;;  %v17705_v18 = vld [vmem:[%s26643_s0 + $0xd18] ss:$400 sps:$4 sm:$0xff]  }
 0x182   :  { %8131 = vmatmul.mubr.bf16.vlgmr.msra.gmra.mxu0 %v20480_v36  ;;  %8184 = vmatmul.mubr.bf16.vlgmr.msra.gmra.mxu1 %v20480_v36 }
 0x183   :  { %8205 = vmatpush1.bf16.msra.mxu0 %v17612_v20  ;;  %8258 = vmatpush1.bf16.msra.mxu1 %v17615_v21  ;;  %v17710_v20 = vld [vmem:[%s26643_s0 + $0x9f4] ss:$400 sps:$4 sm:$0xff]   ;;  %v17708_v21 = vld [vmem:[%s26643_s0 + $0x9f0] ss:$400 sps:$4 sm:$0xff]  }
 0x184   :  { %8206 = vmatprep.subr.bf16.mxu0 %v17620_v22  ;;  %8259 = vmatprep.subr.bf16.mxu1 %v17623_v23  ;;  %v17711_v22 = vld [vmem:[%s26643_s0 + $0x9f8] ss:$400 sps:$4 sm:$0xff]   ;;  %v17716_v23 = vld [vmem:[%s26643_s0 + $0x6d4] ss:$400 sps:$4 sm:$0xff]  }
 0x185   :  { %16065 = vmatprep.mubr.msk.bf16.mxu0 %vm7349_vm0, %v20499_v41  ;;  %16067 = vmatprep.mubr.msk.bf16.mxu1 %vm7349_vm0, %v20499_v41 }
 0x187   :  { %8207 = vmatpush1.bf16.msra.mxu0 %v17618_v24  ;;  %8260 = vmatpush1.bf16.msra.mxu1 %v17621_v26  ;;  %v17719_v24 = vld [vmem:[%s26643_s0 + $0x6dc] ss:$400 sps:$4 sm:$0xff]   ;;  %v17714_v26 = vld [vmem:[%s26643_s0 + $0x6d0] ss:$400 sps:$4 sm:$0xff]  }
 0x188   :  { %8208 = vmatprep.subr.bf16.mxu0 %v17626_v27  ;;  %8261 = vmatprep.subr.bf16.mxu1 %v17629_v28  ;;  %v17722_v27 = vld [vmem:[%s26643_s0 + $0x3b4] ss:$400 sps:$4 sm:$0xff]   ;;  %v17725_v28 = vld [vmem:[%s26643_s0 + $0x3bc] ss:$400 sps:$4 sm:$0xff]  }
 0x18a   :  { %8141 = vmatmul.mubr.bf16.gmra.mxu0 %v20520_v45  ;;  %8194 = vmatmul.mubr.bf16.gmra.mxu1 %v20520_v45 }
 0x18b   :  { %8209 = vmatpush1.bf16.msra.mxu0 %v17624_v30  ;;  %8262 = vmatpush1.bf16.msra.mxu1 %v17627_v31  ;;  %v17720_v30 = vld [vmem:[%s26643_s0 + $0x3b0] ss:$400 sps:$4 sm:$0xff]   ;;  %v17723_v31 = vld [vmem:[%s26643_s0 + $0x3b8] ss:$400 sps:$4 sm:$0xff]  }
 0x18c   :  { %8210 = vmatprep.subr.bf16.mxu0 %v17632_v32  ;;  %8263 = vmatprep.subr.bf16.mxu1 %v17635_v51  ;;  %v17728_v32 = vld [vmem:[%s26643_s0 + $0x94] ss:$400 sps:$4 sm:$0xff]   ;;  %v17731_v51 = vld [vmem:[%s26643_s0 + $0x9c] ss:$400 sps:$4 sm:$0xff]  }
 0x18d   :  { %16068 = vmatprep.mubr.msk.bf16.mxu0 %vm7349_vm0, %v20545_v53  ;;  %16070 = vmatprep.mubr.msk.bf16.mxu1 %vm7349_vm0, %v20545_v53 }
 0x18f   :  { %8211 = vmatpush1.bf16.msra.mxu0 %v17630_v33  ;;  %8264 = vmatpush1.bf16.msra.mxu1 %v17633_v34  ;;  %v17726_v33 = vld [vmem:[%s26643_s0 + $0x90] ss:$400 sps:$4 sm:$0xff]   ;;  %v17729_v34 = vld [vmem:[%s26643_s0 + $0x98] ss:$400 sps:$4 sm:$0xff]  }
 0x190   :  { %8212 = vmatprep.subr.bf16.mxu0 %v17638_v35  ;;  %8265 = vmatprep.subr.bf16.mxu1 %v17641_v1  ;;  %v17734_v35 = vld [vmem:[%s26643_s0 + $0x22f4] ss:$400 sps:$4 sm:$0xff]   ;;  %v17737_v1 = vld [vmem:[%s26643_s0 + $0x22fc] ss:$400 sps:$4 sm:$0xff]  }
 0x193   :  { %8213 = vmatpush1.bf16.msra.mxu0 %v17636_v38  ;;  %8266 = vmatpush1.bf16.msra.mxu1 %v17639_v39  ;;  %v17732_v38 = vld [vmem:[%s26643_s0 + $0x22f0] ss:$400 sps:$4 sm:$0xff]   ;;  %v17735_v39 = vld [vmem:[%s26643_s0 + $0x22f8] ss:$400 sps:$4 sm:$0xff]  }
 0x194   :  { %8214 = vmatprep.subr.bf16.mxu0 %v17644_v40  ;;  %8267 = vmatprep.subr.bf16.mxu1 %v17647_v2  ;;  %v17740_v40 = vld [vmem:[%s26643_s0 + $0x1fd4] ss:$400 sps:$4 sm:$0xff]   ;;  %v17743_v2 = vld [vmem:[%s26643_s0 + $0x1fdc] ss:$400 sps:$4 sm:$0xff]  }
 0x197   :  { %8215 = vmatpush1.bf16.msra.mxu0 %v17642_v42  ;;  %8268 = vmatpush1.bf16.msra.mxu1 %v17645_v37  ;;  %v17738_v42 = vld [vmem:[%s26643_s0 + $0x1fd0] ss:$400 sps:$4 sm:$0xff]   ;;  %v17741_v37 = vld [vmem:[%s26643_s0 + $0x1fd8] ss:$400 sps:$4 sm:$0xff]  }
 0x198   :  { %8216 = vmatprep.subr.bf16.mxu0 %v17650_v43  ;;  %8269 = vmatprep.subr.bf16.mxu1 %v17653_v44  ;;  %v17746_v43 = vld [vmem:[%s26643_s0 + $0x1cb4] ss:$400 sps:$4 sm:$0xff]   ;;  %v17749_v44 = vld [vmem:[%s26643_s0 + $0x1cbc] ss:$400 sps:$4 sm:$0xff]  }
 0x19b   :  { %8217 = vmatpush1.bf16.msra.mxu0 %v17648_v46  ;;  %8270 = vmatpush1.bf16.msra.mxu1 %v17651_v47  ;;  %v17744_v46 = vld [vmem:[%s26643_s0 + $0x1cb0] ss:$400 sps:$4 sm:$0xff]   ;;  %v17747_v47 = vld [vmem:[%s26643_s0 + $0x1cb8] ss:$400 sps:$4 sm:$0xff]  }
 0x19c   :  { %8218 = vmatprep.subr.bf16.mxu0 %v17656_v48  ;;  %8271 = vmatprep.subr.bf16.mxu1 %v17659_v49  ;;  %v17752_v48 = vld [vmem:[%s26643_s0 + $0x1994] ss:$400 sps:$4 sm:$0xff]   ;;  %v17755_v49 = vld [vmem:[%s26643_s0 + $0x199c] ss:$400 sps:$4 sm:$0xff]  }
 0x19f   :  { %8219 = vmatpush1.bf16.msra.mxu0 %v17654_v50  ;;  %8272 = vmatpush1.bf16.msra.mxu1 %v17657_v52  ;;  %v17750_v50 = vld [vmem:[%s26643_s0 + $0x1990] ss:$400 sps:$4 sm:$0xff]   ;;  %v17753_v52 = vld [vmem:[%s26643_s0 + $0x1998] ss:$400 sps:$4 sm:$0xff]  }
 0x1a0   :  { %8228 = vmatprep.subr.bf16.mxu0 %v17662_v54  ;;  %8281 = vmatprep.subr.bf16.mxu1 %v17665_v14  ;;  %v17758_v54 = vld [vmem:[%s26643_s0 + $0x1684] ss:$400 sps:$4 sm:$0xff]   ;;  %v17761_v14 = vld [vmem:[%s26643_s0 + $0x168c] ss:$400 sps:$4 sm:$0xff]  }
 0x1a3   :  { %8229 = vmatpush2.bf16.msra.mxu0 %v17660_v55  ;;  %8282 = vmatpush2.bf16.msra.mxu1 %v17663_v56  ;;  %v17756_v55 = vld [vmem:[%s26643_s0 + $0x1680] ss:$400 sps:$4 sm:$0xff]   ;;  %v17759_v56 = vld [vmem:[%s26643_s0 + $0x1688] ss:$400 sps:$4 sm:$0xff]  }
 0x1a4   :  { %8230 = vmatprep.subr.bf16.mxu0 %v17668_v57  ;;  %8283 = vmatprep.subr.bf16.mxu1 %v17671_v19  ;;  %v17764_v57 = vld [vmem:[%s26643_s0 + $0x1364] ss:$400 sps:$4 sm:$0xff]   ;;  %v17767_v19 = vld [vmem:[%s26643_s0 + $0x136c] ss:$400 sps:$4 sm:$0xff]  }
 0x1a7   :  { %8231 = vmatpush2.bf16.msra.mxu0 %v17666_v58  ;;  %8284 = vmatpush2.bf16.msra.mxu1 %v17669_v59  ;;  %v20968_v58 = vld [vmem:[%s26644_s1] ss:$8 sps:$4 sm:$0xff]  }
 0x1a8   :  { %8232 = vmatprep.subr.bf16.mxu0 %v17674_v60  ;;  %8285 = vmatprep.subr.bf16.mxu1 %v17677_v25  ;;  %v17762_v59 = vld [vmem:[%s26643_s0 + $0x1360] ss:$400 sps:$4 sm:$0xff]   ;;  %v17765_v60 = vld [vmem:[%s26643_s0 + $0x1368] ss:$400 sps:$4 sm:$0xff]   ;;  %v17770_v25 = vld [vmem:[%s26643_s0 + $0x1044] ss:$400 sps:$4 sm:$0xff]  }
 0x1ab   :  { %8233 = vmatpush2.bf16.msra.mxu0 %v17672_v61  ;;  %8286 = vmatpush2.bf16.msra.mxu1 %v17675_v62  ;;  %v17773_v61 = vld [vmem:[%s26643_s0 + $0x104c] ss:$400 sps:$4 sm:$0xff]  }
 0x1ac   :  { %8234 = vmatprep.subr.bf16.mxu0 %v17680_v63  ;;  %8287 = vmatprep.subr.bf16.mxu1 %v17683_v0  ;;  %v20987_v62 = vld [vmem:[%s26644_s1 + $0x14] ss:$8 sps:$4 sm:$0x7f]   ;;  %v17768_v63 = vld [vmem:[%s26643_s0 + $0x1040] ss:$400 sps:$4 sm:$0xff]  }
 0x1ad   :  { %v17771_v0 = vld [vmem:[%s26643_s0 + $0x1048] ss:$400 sps:$4 sm:$0xff]  }
 0x1af   :  { %8235 = vmatpush2.bf16.msra.mxu0 %v17678_v3  ;;  %8288 = vmatpush2.bf16.msra.mxu1 %v17681_v29  ;;  %v17776_v3 = vld [vmem:[%s26643_s0 + $0xd24] ss:$400 sps:$4 sm:$0xff]   ;;  %v17779_v29 = vld [vmem:[%s26643_s0 + $0xd2c] ss:$400 sps:$4 sm:$0xff]  }
 0x1b0   :  { %8310 = vmatprep.subr.bf16.mxu0 %v17686_v4  ;;  %8363 = vmatprep.subr.bf16.mxu1 %v17689_v5  ;;  %v21008_v4 = vld [vmem:[%s26644_s1 + $0x10] ss:$8 sps:$4 sm:$0x7f]  }
 0x1b1   :  { %v17774_v5 = vld [vmem:[%s26643_s0 + $0xd20] ss:$400 sps:$4 sm:$0xff]  }
 0x1b2   :  { %8237 = vmatmul.mubr.bf16.vlgmr.msra.gmra.mxu0 %v20480_v36  ;;  %8290 = vmatmul.mubr.bf16.vlgmr.msra.gmra.mxu1 %v20480_v36  ;;  %v17701_v36 = vld [vmem:[%s26643_s0 + $0x103c] ss:$400 sps:$4 sm:$0xff]  }
 0x1b3   :  { %8311 = vmatpush1.bf16.msra.mxu0 %v17684_v6  ;;  %8364 = vmatpush1.bf16.msra.mxu1 %v17687_v7  ;;  %v17777_v6 = vld [vmem:[%s26643_s0 + $0xd28] ss:$400 sps:$4 sm:$0xff]   ;;  %v17782_v7 = vld [vmem:[%s26643_s0 + $0xa04] ss:$400 sps:$4 sm:$0xff]  }
 0x1b4   :  { %8312 = vmatprep.subr.bf16.mxu0 %v17692_v8  ;;  %8365 = vmatprep.subr.bf16.mxu1 %v17695_v9  ;;  %v17785_v8 = vld [vmem:[%s26643_s0 + $0xa0c] ss:$400 sps:$4 sm:$0xff]   ;;  %v17780_v9 = vld [vmem:[%s26643_s0 + $0xa00] ss:$400 sps:$4 sm:$0xff]  }
 0x1b5   :  { %16069 = vmatprep.mubr.msk.bf16.mxu0 %vm7349_vm0, %v20499_v41  ;;  %16071 = vmatprep.mubr.msk.bf16.mxu1 %vm7349_vm0, %v20499_v41  ;;  %v17707_v41 = vld [vmem:[%s26643_s0 + $0xd1c] ss:$400 sps:$4 sm:$0xff]  }
 0x1b7   :  { %8313 = vmatpush1.bf16.msra.mxu0 %v17690_v10  ;;  %8366 = vmatpush1.bf16.msra.mxu1 %v17693_v11  ;;  %v17783_v10 = vld [vmem:[%s26643_s0 + $0xa08] ss:$400 sps:$4 sm:$0xff]   ;;  %v21033_v11 = vld [vmem:[%s26644_s1 + $0x4] ss:$8 sps:$4 sm:$0xff]  }
 0x1b8   :  { %8314 = vmatprep.subr.bf16.mxu0 %v17698_v12  ;;  %8367 = vmatprep.subr.bf16.mxu1 %v17701_v36  ;;  %v17788_v12 = vld [vmem:[%s26643_s0 + $0x6e4] ss:$400 sps:$4 sm:$0xff]   ;;  %v17791_v36 = vld [vmem:[%s26643_s0 + $0x6ec] ss:$400 sps:$4 sm:$0xff]  }
 0x1ba   :  { %8247 = vmatmul.mubr.bf16.gmra.mxu0 %v20520_v45  ;;  %8300 = vmatmul.mubr.bf16.gmra.mxu1 %v20520_v45  ;;  %v17713_v45 = vld [vmem:[%s26643_s0 + $0x9fc] ss:$400 sps:$4 sm:$0xff]  }
 0x1bb   :  { %8315 = vmatpush1.bf16.msra.mxu0 %v17696_v13  ;;  %8368 = vmatpush1.bf16.msra.mxu1 %v17699_v15  ;;  %v17786_v13 = vld [vmem:[%s26643_s0 + $0x6e0] ss:$400 sps:$4 sm:$0xff]   ;;  %v17789_v15 = vld [vmem:[%s26643_s0 + $0x6e8] ss:$400 sps:$4 sm:$0xff]  }
 0x1bc   :  { %8316 = vmatprep.subr.bf16.mxu0 %v17704_v16  ;;  %8369 = vmatprep.subr.bf16.mxu1 %v17707_v41  ;;  %v17794_v16 = vld [vmem:[%s26643_s0 + $0x3c4] ss:$400 sps:$4 sm:$0xff]   ;;  %v17797_v41 = vld [vmem:[%s26643_s0 + $0x3cc] ss:$400 sps:$4 sm:$0xff]  }
 0x1bd   :  { %16072 = vmatprep.mubr.msk.bf16.mxu0 %vm7349_vm0, %v20545_v53  ;;  %16074 = vmatprep.mubr.msk.bf16.mxu1 %vm7349_vm0, %v20545_v53  ;;  %v17717_v53 = vld [vmem:[%s26643_s0 + $0x6d8] ss:$400 sps:$4 sm:$0xff]  }
 0x1bf   :  { %8317 = vmatpush1.bf16.msra.mxu0 %v17702_v17  ;;  %8370 = vmatpush1.bf16.msra.mxu1 %v17705_v18  ;;  %v17792_v17 = vld [vmem:[%s26643_s0 + $0x3c0] ss:$400 sps:$4 sm:$0xff]   ;;  %v17795_v18 = vld [vmem:[%s26643_s0 + $0x3c8] ss:$400 sps:$4 sm:$0xff]  }
 0x1c0   :  { %8318 = vmatprep.subr.bf16.mxu0 %v17710_v20  ;;  %8371 = vmatprep.subr.bf16.mxu1 %v17713_v45  ;;  %v17800_v20 = vld [vmem:[%s26643_s0 + $0xa4] ss:$400 sps:$4 sm:$0xff]   ;;  %v17803_v45 = vld [vmem:[%s26643_s0 + $0xac] ss:$400 sps:$4 sm:$0xff]  }
 0x1c3   :  { %8319 = vmatpush1.bf16.msra.mxu0 %v17708_v21  ;;  %8372 = vmatpush1.bf16.msra.mxu1 %v17711_v22  ;;  %v17798_v21 = vld [vmem:[%s26643_s0 + $0xa0] ss:$400 sps:$4 sm:$0xff]   ;;  %v17801_v22 = vld [vmem:[%s26643_s0 + $0xa8] ss:$400 sps:$4 sm:$0xff]  }
 0x1c4   :  { %8320 = vmatprep.subr.bf16.mxu0 %v17716_v23  ;;  %8373 = vmatprep.subr.bf16.mxu1 %v17719_v24  ;;  %v17806_v23 = vld [vmem:[%s26643_s0 + $0x2304] ss:$400 sps:$4 sm:$0xff]   ;;  %v17809_v24 = vld [vmem:[%s26643_s0 + $0x230c] ss:$400 sps:$4 sm:$0xff]  }
 0x1c7   :  { %8321 = vmatpush1.bf16.msra.mxu0 %v17714_v26  ;;  %8374 = vmatpush1.bf16.msra.mxu1 %v17717_v53  ;;  %v17804_v26 = vld [vmem:[%s26643_s0 + $0x2300] ss:$400 sps:$4 sm:$0xff]   ;;  %v17807_v53 = vld [vmem:[%s26643_s0 + $0x2308] ss:$400 sps:$4 sm:$0xff]  }
 0x1c8   :  { %8322 = vmatprep.subr.bf16.mxu0 %v17722_v27  ;;  %8375 = vmatprep.subr.bf16.mxu1 %v17725_v28  ;;  %v17812_v27 = vld [vmem:[%s26643_s0 + $0x1fe4] ss:$400 sps:$4 sm:$0xff]   ;;  %v17815_v28 = vld [vmem:[%s26643_s0 + $0x1fec] ss:$400 sps:$4 sm:$0xff]  }
 0x1cb   :  { %8323 = vmatpush1.bf16.msra.mxu0 %v17720_v30  ;;  %8376 = vmatpush1.bf16.msra.mxu1 %v17723_v31  ;;  %v17810_v30 = vld [vmem:[%s26643_s0 + $0x1fe0] ss:$400 sps:$4 sm:$0xff]   ;;  %v17813_v31 = vld [vmem:[%s26643_s0 + $0x1fe8] ss:$400 sps:$4 sm:$0xff]  }
 0x1cc   :  { %8324 = vmatprep.subr.bf16.mxu0 %v17728_v32  ;;  %8377 = vmatprep.subr.bf16.mxu1 %v17731_v51  ;;  %v17818_v32 = vld [vmem:[%s26643_s0 + $0x1cc4] ss:$400 sps:$4 sm:$0xff]   ;;  %v17821_v51 = vld [vmem:[%s26643_s0 + $0x1ccc] ss:$400 sps:$4 sm:$0xff]  }
 0x1cf   :  { %8325 = vmatpush1.bf16.msra.mxu0 %v17726_v33  ;;  %8378 = vmatpush1.bf16.msra.mxu1 %v17729_v34  ;;  %v17816_v33 = vld [vmem:[%s26643_s0 + $0x1cc0] ss:$400 sps:$4 sm:$0xff]   ;;  %v17819_v34 = vld [vmem:[%s26643_s0 + $0x1cc8] ss:$400 sps:$4 sm:$0xff]  }
 0x1d0   :  { %8334 = vmatprep.subr.bf16.mxu0 %v17734_v35  ;;  %8387 = vmatprep.subr.bf16.mxu1 %v17737_v1  ;;  %v17824_v35 = vld [vmem:[%s26643_s0 + $0x19a4] ss:$400 sps:$4 sm:$0xff]   ;;  %v17827_v1 = vld [vmem:[%s26643_s0 + $0x19ac] ss:$400 sps:$4 sm:$0xff]  }
 0x1d3   :  { %8335 = vmatpush2.bf16.msra.mxu0 %v17732_v38  ;;  %8388 = vmatpush2.bf16.msra.mxu1 %v17735_v39  ;;  %v17822_v38 = vld [vmem:[%s26643_s0 + $0x19a0] ss:$400 sps:$4 sm:$0xff]   ;;  %v17825_v39 = vld [vmem:[%s26643_s0 + $0x19a8] ss:$400 sps:$4 sm:$0xff]  }
 0x1d4   :  { %8336 = vmatprep.subr.bf16.mxu0 %v17740_v40  ;;  %8389 = vmatprep.subr.bf16.mxu1 %v17743_v2  ;;  %v17830_v40 = vld [vmem:[%s26643_s0 + $0x1694] ss:$400 sps:$4 sm:$0xff]   ;;  %v17833_v2 = vld [vmem:[%s26643_s0 + $0x169c] ss:$400 sps:$4 sm:$0xff]  }
 0x1d7   :  { %8337 = vmatpush2.bf16.msra.mxu0 %v17738_v42  ;;  %8390 = vmatpush2.bf16.msra.mxu1 %v17741_v37  ;;  %v17828_v42 = vld [vmem:[%s26643_s0 + $0x1690] ss:$400 sps:$4 sm:$0xff]   ;;  %v17831_v37 = vld [vmem:[%s26643_s0 + $0x1698] ss:$400 sps:$4 sm:$0xff]  }
 0x1d8   :  { %8338 = vmatprep.subr.bf16.mxu0 %v17746_v43  ;;  %8391 = vmatprep.subr.bf16.mxu1 %v17749_v44  ;;  %v17836_v43 = vld [vmem:[%s26643_s0 + $0x1374] ss:$400 sps:$4 sm:$0xff]   ;;  %v17839_v44 = vld [vmem:[%s26643_s0 + $0x137c] ss:$400 sps:$4 sm:$0xff]  }
 0x1db   :  { %8339 = vmatpush2.bf16.msra.mxu0 %v17744_v46  ;;  %8392 = vmatpush2.bf16.msra.mxu1 %v17747_v47  ;;  %v17834_v46 = vld [vmem:[%s26643_s0 + $0x1370] ss:$400 sps:$4 sm:$0xff]   ;;  %v17837_v47 = vld [vmem:[%s26643_s0 + $0x1378] ss:$400 sps:$4 sm:$0xff]  }
 0x1dc   :  { %8340 = vmatprep.subr.bf16.mxu0 %v17752_v48  ;;  %8393 = vmatprep.subr.bf16.mxu1 %v17755_v49  ;;  %v17842_v48 = vld [vmem:[%s26643_s0 + $0x1054] ss:$400 sps:$4 sm:$0xff]   ;;  %v17845_v49 = vld [vmem:[%s26643_s0 + $0x105c] ss:$400 sps:$4 sm:$0xff]  }
 0x1df   :  { %8341 = vmatpush2.bf16.msra.mxu0 %v17750_v50  ;;  %8394 = vmatpush2.bf16.msra.mxu1 %v17753_v52  ;;  %v17840_v50 = vld [vmem:[%s26643_s0 + $0x1050] ss:$400 sps:$4 sm:$0xff]   ;;  %v17843_v52 = vld [vmem:[%s26643_s0 + $0x1058] ss:$400 sps:$4 sm:$0xff]  }
 0x1e0   :  { %8416 = vmatprep.subr.bf16.mxu0 %v17758_v54  ;;  %8469 = vmatprep.subr.bf16.mxu1 %v17761_v14  ;;  %v17848_v54 = vld [vmem:[%s26643_s0 + $0xd34] ss:$400 sps:$4 sm:$0xff]   ;;  %v17851_v14 = vld [vmem:[%s26643_s0 + $0xd3c] ss:$400 sps:$4 sm:$0xff]  }
 0x1e2   :  { %8343 = vmatmul.mubr.bf16.vlgmr.msra.gmra.mxu0 %v20968_v58  ;;  %8396 = vmatmul.mubr.bf16.vlgmr.msra.gmra.mxu1 %v20968_v58 }
 0x1e3   :  { %8417 = vmatpush1.bf16.msra.mxu0 %v17756_v55  ;;  %8470 = vmatpush1.bf16.msra.mxu1 %v17759_v56  ;;  %v17846_v55 = vld [vmem:[%s26643_s0 + $0xd30] ss:$400 sps:$4 sm:$0xff]   ;;  %v17849_v56 = vld [vmem:[%s26643_s0 + $0xd38] ss:$400 sps:$4 sm:$0xff]  }
 0x1e4   :  { %8418 = vmatprep.subr.bf16.mxu0 %v17764_v57  ;;  %8471 = vmatprep.subr.bf16.mxu1 %v17767_v19  ;;  %v17854_v57 = vld [vmem:[%s26643_s0 + $0xa14] ss:$400 sps:$4 sm:$0xff]   ;;  %v17857_v19 = vld [vmem:[%s26643_s0 + $0xa1c] ss:$400 sps:$4 sm:$0xff]  }
 0x1e5   :  { %16073 = vmatprep.mubr.msk.bf16.mxu0 %vm7349_vm0, %v20987_v62  ;;  %16075 = vmatprep.mubr.msk.bf16.mxu1 %vm7349_vm0, %v20987_v62 }
 0x1e7   :  { %8419 = vmatpush1.bf16.msra.mxu0 %v17762_v59  ;;  %8472 = vmatpush1.bf16.msra.mxu1 %v17765_v60  ;;  %v17852_v59 = vld [vmem:[%s26643_s0 + $0xa10] ss:$400 sps:$4 sm:$0xff]   ;;  %v17855_v60 = vld [vmem:[%s26643_s0 + $0xa18] ss:$400 sps:$4 sm:$0xff]  }
 0x1e8   :  { %8420 = vmatprep.subr.bf16.mxu0 %v17770_v25  ;;  %8473 = vmatprep.subr.bf16.mxu1 %v17773_v61  ;;  %v17860_v25 = vld [vmem:[%s26643_s0 + $0x6f4] ss:$400 sps:$4 sm:$0xff]   ;;  %v17863_v61 = vld [vmem:[%s26643_s0 + $0x6fc] ss:$400 sps:$4 sm:$0xff]  }
 0x1ea   :  { %8353 = vmatmul.mubr.bf16.gmra.mxu0 %v21008_v4  ;;  %8406 = vmatmul.mubr.bf16.gmra.mxu1 %v21008_v4 }
 0x1eb   :  { %8421 = vmatpush1.bf16.msra.mxu0 %v17768_v63  ;;  %8474 = vmatpush1.bf16.msra.mxu1 %v17771_v0  ;;  %v17858_v63 = vld [vmem:[%s26643_s0 + $0x6f0] ss:$400 sps:$4 sm:$0xff]   ;;  %v17861_v0 = vld [vmem:[%s26643_s0 + $0x6f8] ss:$400 sps:$4 sm:$0xff]  }
 0x1ec   :  { %8422 = vmatprep.subr.bf16.mxu0 %v17776_v3  ;;  %8475 = vmatprep.subr.bf16.mxu1 %v17779_v29  ;;  %v17866_v3 = vld [vmem:[%s26643_s0 + $0x3d4] ss:$400 sps:$4 sm:$0xff]   ;;  %v17869_v29 = vld [vmem:[%s26643_s0 + $0x3dc] ss:$400 sps:$4 sm:$0xff]  }
 0x1ed   :  { %16076 = vmatprep.mubr.msk.bf16.mxu0 %vm7349_vm0, %v21033_v11  ;;  %16078 = vmatprep.mubr.msk.bf16.mxu1 %vm7349_vm0, %v21033_v11 }
 0x1ef   :  { %8423 = vmatpush1.bf16.msra.mxu0 %v17774_v5  ;;  %8476 = vmatpush1.bf16.msra.mxu1 %v17777_v6  ;;  %v17864_v5 = vld [vmem:[%s26643_s0 + $0x3d0] ss:$400 sps:$4 sm:$0xff]   ;;  %v17867_v6 = vld [vmem:[%s26643_s0 + $0x3d8] ss:$400 sps:$4 sm:$0xff]  }
 0x1f0   :  { %8424 = vmatprep.subr.bf16.mxu0 %v17782_v7  ;;  %8477 = vmatprep.subr.bf16.mxu1 %v17785_v8  ;;  %v17872_v7 = vld [vmem:[%s26643_s0 + $0xb4] ss:$400 sps:$4 sm:$0xff]   ;;  %v17875_v8 = vld [vmem:[%s26643_s0 + $0xbc] ss:$400 sps:$4 sm:$0xff]  }
 0x1f3   :  { %8425 = vmatpush1.bf16.msra.mxu0 %v17780_v9  ;;  %8478 = vmatpush1.bf16.msra.mxu1 %v17783_v10  ;;  %v17870_v9 = vld [vmem:[%s26643_s0 + $0xb0] ss:$400 sps:$4 sm:$0xff]   ;;  %v17873_v10 = vld [vmem:[%s26643_s0 + $0xb8] ss:$400 sps:$4 sm:$0xff]  }
 0x1f4   :  { %8426 = vmatprep.subr.bf16.mxu0 %v17788_v12  ;;  %8479 = vmatprep.subr.bf16.mxu1 %v17791_v36  ;;  %v17878_v12 = vld [vmem:[%s26643_s0 + $0x2314] ss:$400 sps:$4 sm:$0xff]   ;;  %v17881_v36 = vld [vmem:[%s26643_s0 + $0x231c] ss:$400 sps:$4 sm:$0xff]  }
 0x1f7   :  { %8427 = vmatpush1.bf16.msra.mxu0 %v17786_v13  ;;  %8480 = vmatpush1.bf16.msra.mxu1 %v17789_v15  ;;  %v17876_v13 = vld [vmem:[%s26643_s0 + $0x2310] ss:$400 sps:$4 sm:$0xff]   ;;  %v17879_v15 = vld [vmem:[%s26643_s0 + $0x2318] ss:$400 sps:$4 sm:$0xff]  }
 0x1f8   :  { %8428 = vmatprep.subr.bf16.mxu0 %v17794_v16  ;;  %8481 = vmatprep.subr.bf16.mxu1 %v17797_v41  ;;  %v17884_v16 = vld [vmem:[%s26643_s0 + $0x1ff4] ss:$400 sps:$4 sm:$0xff]   ;;  %v17887_v41 = vld [vmem:[%s26643_s0 + $0x1ffc] ss:$400 sps:$4 sm:$0xff]  }
 0x1fb   :  { %8429 = vmatpush1.bf16.msra.mxu0 %v17792_v17  ;;  %8482 = vmatpush1.bf16.msra.mxu1 %v17795_v18  ;;  %v17882_v17 = vld [vmem:[%s26643_s0 + $0x1ff0] ss:$400 sps:$4 sm:$0xff]   ;;  %v17885_v18 = vld [vmem:[%s26643_s0 + $0x1ff8] ss:$400 sps:$4 sm:$0xff]  }
 0x1fc   :  { %8430 = vmatprep.subr.bf16.mxu0 %v17800_v20  ;;  %8483 = vmatprep.subr.bf16.mxu1 %v17803_v45  ;;  %v17890_v20 = vld [vmem:[%s26643_s0 + $0x1cd4] ss:$400 sps:$4 sm:$0xff]   ;;  %v17893_v45 = vld [vmem:[%s26643_s0 + $0x1cdc] ss:$400 sps:$4 sm:$0xff]  }
 0x1ff   :  { %8431 = vmatpush1.bf16.msra.mxu0 %v17798_v21  ;;  %8484 = vmatpush1.bf16.msra.mxu1 %v17801_v22  ;;  %v17888_v21 = vld [vmem:[%s26643_s0 + $0x1cd0] ss:$400 sps:$4 sm:$0xff]   ;;  %v17891_v22 = vld [vmem:[%s26643_s0 + $0x1cd8] ss:$400 sps:$4 sm:$0xff]  }
 0x200   :  { %8440 = vmatprep.subr.bf16.mxu0 %v17806_v23  ;;  %8493 = vmatprep.subr.bf16.mxu1 %v17809_v24  ;;  %v17896_v23 = vld [vmem:[%s26643_s0 + $0x19b4] ss:$400 sps:$4 sm:$0xff]   ;;  %v17899_v24 = vld [vmem:[%s26643_s0 + $0x19bc] ss:$400 sps:$4 sm:$0xff]  }
 0x203   :  { %8441 = vmatpush2.bf16.msra.mxu0 %v17804_v26  ;;  %8494 = vmatpush2.bf16.msra.mxu1 %v17807_v53  ;;  %v17894_v26 = vld [vmem:[%s26643_s0 + $0x19b0] ss:$400 sps:$4 sm:$0xff]   ;;  %v17897_v53 = vld [vmem:[%s26643_s0 + $0x19b8] ss:$400 sps:$4 sm:$0xff]  }
 0x204   :  { %8442 = vmatprep.subr.bf16.mxu0 %v17812_v27  ;;  %8495 = vmatprep.subr.bf16.mxu1 %v17815_v28  ;;  %v17902_v27 = vld [vmem:[%s26643_s0 + $0x16a4] ss:$400 sps:$4 sm:$0xff]   ;;  %v17905_v28 = vld [vmem:[%s26643_s0 + $0x16ac] ss:$400 sps:$4 sm:$0xff]  }
 0x207   :  { %8443 = vmatpush2.bf16.msra.mxu0 %v17810_v30  ;;  %8496 = vmatpush2.bf16.msra.mxu1 %v17813_v31  ;;  %v17900_v30 = vld [vmem:[%s26643_s0 + $0x16a0] ss:$400 sps:$4 sm:$0xff]   ;;  %v17903_v31 = vld [vmem:[%s26643_s0 + $0x16a8] ss:$400 sps:$4 sm:$0xff]  }
 0x208   :  { %8444 = vmatprep.subr.bf16.mxu0 %v17818_v32  ;;  %8497 = vmatprep.subr.bf16.mxu1 %v17821_v51  ;;  %v17908_v32 = vld [vmem:[%s26643_s0 + $0x1384] ss:$400 sps:$4 sm:$0xff]   ;;  %v17911_v51 = vld [vmem:[%s26643_s0 + $0x138c] ss:$400 sps:$4 sm:$0xff]  }
 0x20b   :  { %8445 = vmatpush2.bf16.msra.mxu0 %v17816_v33  ;;  %8498 = vmatpush2.bf16.msra.mxu1 %v17819_v34  ;;  %v17906_v33 = vld [vmem:[%s26643_s0 + $0x1380] ss:$400 sps:$4 sm:$0xff]   ;;  %v17909_v34 = vld [vmem:[%s26643_s0 + $0x1388] ss:$400 sps:$4 sm:$0xff]  }
 0x20c   :  { %8446 = vmatprep.subr.bf16.mxu0 %v17824_v35  ;;  %8499 = vmatprep.subr.bf16.mxu1 %v17827_v1  ;;  %v17914_v35 = vld [vmem:[%s26643_s0 + $0x1064] ss:$400 sps:$4 sm:$0xff]   ;;  %v17912_v1 = vld [vmem:[%s26643_s0 + $0x1060] ss:$400 sps:$4 sm:$0xff]  }
 0x20f   :  { %8447 = vmatpush2.bf16.msra.mxu0 %v17822_v38  ;;  %8500 = vmatpush2.bf16.msra.mxu1 %v17825_v39  ;;  %v17915_v38 = vld [vmem:[%s26643_s0 + $0x1068] ss:$400 sps:$4 sm:$0xff]   ;;  %v21321_v39 = vpop.f32.mrf.mxu0 }
 0x210   :  { %8522 = vmatprep.subr.bf16.mxu0 %v17830_v40  ;;  %8575 = vmatprep.subr.bf16.mxu1 %v17833_v2  ;;  %v17920_v40 = vld [vmem:[%s26643_s0 + $0xd44] ss:$400 sps:$4 sm:$0xff]   ;;  %v17918_v2 = vld [vmem:[%s26643_s0 + $0xd40] ss:$400 sps:$4 sm:$0xff]  }
 0x212   :  { %8449 = vmatmul.mubr.bf16.vlgmr.msra.gmra.mxu0 %v20968_v58  ;;  %8502 = vmatmul.mubr.bf16.vlgmr.msra.gmra.mxu1 %v20968_v58 }
 0x213   :  { %8523 = vmatpush1.bf16.msra.mxu0 %v17828_v42  ;;  %8576 = vmatpush1.bf16.msra.mxu1 %v17831_v37  ;;  %v17921_v42 = vld [vmem:[%s26643_s0 + $0xd48] ss:$400 sps:$4 sm:$0xff]   ;;  %v21337_v37 = vpop.f32.mrf.mxu0 }
 0x214   :  { %8524 = vmatprep.subr.bf16.mxu0 %v17836_v43  ;;  %8577 = vmatprep.subr.bf16.mxu1 %v17839_v44  ;;  %v17926_v43 = vld [vmem:[%s26643_s0 + $0xa24] ss:$400 sps:$4 sm:$0xff]   ;;  %v17924_v44 = vld [vmem:[%s26643_s0 + $0xa20] ss:$400 sps:$4 sm:$0xff]  }
 0x215   :  { %16077 = vmatprep.mubr.msk.bf16.mxu0 %vm7349_vm0, %v20987_v62  ;;  %16079 = vmatprep.mubr.msk.bf16.mxu1 %vm7349_vm0, %v20987_v62 }
 0x217   :  { %8525 = vmatpush1.bf16.msra.mxu0 %v17834_v46  ;;  %8578 = vmatpush1.bf16.msra.mxu1 %v17837_v47  ;;  %v17927_v46 = vld [vmem:[%s26643_s0 + $0xa28] ss:$400 sps:$4 sm:$0xff]   ;;  %v21355_v47 = vpop.f32.mrf.mxu1 }
 0x218   :  { %8526 = vmatprep.subr.bf16.mxu0 %v17842_v48  ;;  %8579 = vmatprep.subr.bf16.mxu1 %v17845_v49  ;;  %v21357_v48 = vpop.f32.mrf.mxu0  ;;  %v17932_v49 = vld [vmem:[%s26643_s0 + $0x704] ss:$400 sps:$4 sm:$0xff]  }
 0x21a   :  { %8459 = vmatmul.mubr.bf16.gmra.mxu0 %v21008_v4  ;;  %8512 = vmatmul.mubr.bf16.gmra.mxu1 %v21008_v4 }
 0x21b   :  { %8527 = vmatpush1.bf16.msra.mxu0 %v17840_v50  ;;  %8580 = vmatpush1.bf16.msra.mxu1 %v17843_v52  ;;  %v17935_v50 = vld [vmem:[%s26643_s0 + $0x70c] ss:$400 sps:$4 sm:$0xff]   ;;  %v17933_v52 = vld [vmem:[%s26643_s0 + $0x708] ss:$400 sps:$4 sm:$0xff]  }
 0x21c   :  { %8528 = vmatprep.subr.bf16.mxu0 %v17848_v54  ;;  %8581 = vmatprep.subr.bf16.mxu1 %v17851_v14  ;;  %v21371_v54 = vpop.f32.mrf.mxu1  ;;  %v21373_v14 = vpop.f32.mrf.mxu0 }
 0x21d   :  { %16080 = vmatprep.mubr.msk.bf16.mxu0 %vm7349_vm0, %v21033_v11  ;;  %16082 = vmatprep.mubr.msk.bf16.mxu1 %vm7349_vm0, %v21033_v11 }
 0x21f   :  { %8529 = vmatpush1.bf16.msra.mxu0 %v17846_v55  ;;  %8582 = vmatpush1.bf16.msra.mxu1 %v17849_v56  ;;  %v17938_v55 = vld [vmem:[%s26643_s0 + $0x3e4] ss:$400 sps:$4 sm:$0xff]   ;;  %v17941_v56 = vld [vmem:[%s26643_s0 + $0x3ec] ss:$400 sps:$4 sm:$0xff]  }
 0x220   :  { %8530 = vmatprep.subr.bf16.mxu0 %v17854_v57  ;;  %8583 = vmatprep.subr.bf16.mxu1 %v17857_v19  ;;  %v17936_v57 = vld [vmem:[%s26643_s0 + $0x3e0] ss:$400 sps:$4 sm:$0xff]   ;;  %v17939_v19 = vld [vmem:[%s26643_s0 + $0x3e8] ss:$400 sps:$4 sm:$0xff]  }
 0x223   :  { %8531 = vmatpush1.bf16.msra.mxu0 %v17852_v59  ;;  %8584 = vmatpush1.bf16.msra.mxu1 %v17855_v60  ;;  %v21387_v59 = vpop.f32.mrf.mxu1  ;;  %v21389_v60 = vpop.f32.mrf.mxu0 }
 0x224   :  { %8532 = vmatprep.subr.bf16.mxu0 %v17860_v25  ;;  %8585 = vmatprep.subr.bf16.mxu1 %v17863_v61  ;;  %v17944_v25 = vld [vmem:[%s26643_s0 + $0xc4] ss:$400 sps:$4 sm:$0xff]   ;;  %v17947_v61 = vld [vmem:[%s26643_s0 + $0xcc] ss:$400 sps:$4 sm:$0xff]  }
 0x227   :  { %8533 = vmatpush1.bf16.msra.mxu0 %v17858_v63  ;;  %8586 = vmatpush1.bf16.msra.mxu1 %v17861_v0  ;;  %v17942_v63 = vld [vmem:[%s26643_s0 + $0xc0] ss:$400 sps:$4 sm:$0xff]   ;;  %v17945_v0 = vld [vmem:[%s26643_s0 + $0xc8] ss:$400 sps:$4 sm:$0xff]  }
 0x228   :  { %8534 = vmatprep.subr.bf16.mxu0 %v17866_v3  ;;  %8587 = vmatprep.subr.bf16.mxu1 %v17869_v29  ;;  %v21403_v3 = vpop.f32.mrf.mxu1  ;;  %v21405_v29 = vpop.f32.mrf.mxu0 }
 0x22b   :  { %8535 = vmatpush1.bf16.msra.mxu0 %v17864_v5  ;;  %8588 = vmatpush1.bf16.msra.mxu1 %v17867_v6  ;;  %v21407_v5 = vpop.f32.mrf.mxu1  ;;  %v17950_v6 = vld [vmem:[%s26643_s0 + $0x2324] ss:$400 sps:$4 sm:$0xff]  }
 0x22c   :  { %8536 = vmatprep.subr.bf16.mxu0 %v17872_v7  ;;  %8589 = vmatprep.subr.bf16.mxu1 %v17875_v8  ;;  %v17953_v7 = vld [vmem:[%s26643_s0 + $0x232c] ss:$400 sps:$4 sm:$0xff]   ;;  %v17948_v8 = vld [vmem:[%s26643_s0 + $0x2320] ss:$400 sps:$4 sm:$0xff]  }
 0x22f   :  { %8537 = vmatpush1.bf16.msra.mxu0 %v17870_v9  ;;  %8590 = vmatpush1.bf16.msra.mxu1 %v17873_v10  ;;  %v17951_v9 = vld [vmem:[%s26643_s0 + $0x2328] ss:$400 sps:$4 sm:$0xff]   ;;  %v21421_v10 = vpop.f32.mrf.mxu0 }
 0x230   :  { %8546 = vmatprep.subr.bf16.mxu0 %v17878_v12  ;;  %8599 = vmatprep.subr.bf16.mxu1 %v17881_v36  ;;  %v21423_v12 = vpop.f32.mrf.mxu1  ;;  %v17956_v36 = vld [vmem:[%s26643_s0 + $0x2004] ss:$400 sps:$4 sm:$0xff]  }
 0x233   :  { %8547 = vmatpush2.bf16.msra.mxu0 %v17876_v13  ;;  %8600 = vmatpush2.bf16.msra.mxu1 %v17879_v15  ;;  %v17959_v13 = vld [vmem:[%s26643_s0 + $0x200c] ss:$400 sps:$4 sm:$0xff]   ;;  %v21431_v15 = vpop.f32.mrf.mxu0 }
 0x234   :  { %8548 = vmatprep.subr.bf16.mxu0 %v17884_v16  ;;  %8601 = vmatprep.subr.bf16.mxu1 %v17887_v41  ;;  %v17954_v16 = vld [vmem:[%s26643_s0 + $0x2000] ss:$400 sps:$4 sm:$0xff]   ;;  %v17957_v41 = vld [vmem:[%s26643_s0 + $0x2008] ss:$400 sps:$4 sm:$0xff]  }
 0x237   :  { %8549 = vmatpush2.bf16.msra.mxu0 %v17882_v17  ;;  %8602 = vmatpush2.bf16.msra.mxu1 %v17885_v18  ;;  %v21439_v17 = vpop.f32.mrf.mxu1  ;;  %v17962_v18 = vld [vmem:[%s26643_s0 + $0x1ce4] ss:$400 sps:$4 sm:$0xff]  }
 0x238   :  { %8550 = vmatprep.subr.bf16.mxu0 %v17890_v20  ;;  %8603 = vmatprep.subr.bf16.mxu1 %v17893_v45  ;;  %v17965_v20 = vld [vmem:[%s26643_s0 + $0x1cec] ss:$400 sps:$4 sm:$0xff]   ;;  %v21447_v45 = vpop.f32.mrf.mxu0 }
 0x23b   :  { %8551 = vmatpush2.bf16.msra.mxu0 %v17888_v21  ;;  %8604 = vmatpush2.bf16.msra.mxu1 %v17891_v22  ;;  %v17960_v21 = vld [vmem:[%s26643_s0 + $0x1ce0] ss:$400 sps:$4 sm:$0xff]   ;;  %v17963_v22 = vld [vmem:[%s26643_s0 + $0x1ce8] ss:$400 sps:$4 sm:$0xff]  }
 0x23c   :  { %8552 = vmatprep.subr.bf16.mxu0 %v17896_v23  ;;  %8605 = vmatprep.subr.bf16.mxu1 %v17899_v24  ;;  %v21455_v23 = vpop.f32.mrf.mxu1  ;;  %v17968_v24 = vld [vmem:[%s26643_s0 + $0x19c4] ss:$400 sps:$4 sm:$0xff]  }
 0x23f   :  { %8553 = vmatpush2.bf16.msra.mxu0 %v17894_v26  ;;  %8606 = vmatpush2.bf16.msra.mxu1 %v17897_v53  ;;  %v17971_v26 = vld [vmem:[%s26643_s0 + $0x19cc] ss:$400 sps:$4 sm:$0xff]   ;;  %v21463_v53 = vpop.f32.mrf.mxu1 }
 0x240   :  { %8628 = vmatprep.subr.bf16.mxu0 %v17902_v27  ;;  %8681 = vmatprep.subr.bf16.mxu1 %v17905_v28  ;;  %26716 = vst [vmem:[#allocation3_spill] sm:$0xff] %v21463_v53  ;;  %v21465_v27 = vpop.f32.mrf.mxu0  ;;  %v17966_v28 = vld [vmem:[%s26643_s0 + $0x19c0] ss:$400 sps:$4 sm:$0xff]   ;;  %v18496_v53 = vld [vmem:[%s26643_s0 + $0xdc4] ss:$400 sps:$4 sm:$0xff]  }
 0x241   :  { %26717 = vst [vmem:[#allocation4_spill] sm:$0xff] %v21465_v27  ;;  %v18503_v27 = vld [vmem:[%s26643_s0 + $0xaa8] ss:$400 sps:$4 sm:$0xff]  }
 0x242   :  { %8555 = vmatmul.mubr.bf16.vlgmr.msra.gmra.mxu0 %v20968_v58  ;;  %8608 = vmatmul.mubr.bf16.vlgmr.msra.gmra.mxu1 %v20968_v58  ;;  %v17917_v58 = vld [vmem:[%s26643_s0 + $0x106c] ss:$400 sps:$4 sm:$0xff]  }
 0x243   :  { %8629 = vmatpush1.bf16.msra.mxu0 %v17900_v30  ;;  %8682 = vmatpush1.bf16.msra.mxu1 %v17903_v31  ;;  %v17969_v30 = vld [vmem:[%s26643_s0 + $0x19c8] ss:$400 sps:$4 sm:$0xff]   ;;  %v17974_v31 = vld [vmem:[%s26643_s0 + $0x16b4] ss:$400 sps:$4 sm:$0xff]  }
 0x244   :  { %8630 = vmatprep.subr.bf16.mxu0 %v17908_v32  ;;  %8683 = vmatprep.subr.bf16.mxu1 %v17911_v51  ;;  %v17977_v32 = vld [vmem:[%s26643_s0 + $0x16bc] ss:$400 sps:$4 sm:$0xff]   ;;  %v21479_v51 = vpop.f32.mrf.mxu1 }
 0x245   :  { %16081 = vmatprep.mubr.msk.bf16.mxu0 %vm7349_vm0, %v20987_v62  ;;  %16083 = vmatprep.mubr.msk.bf16.mxu1 %vm7349_vm0, %v20987_v62  ;;  %v17923_v62 = vld [vmem:[%s26643_s0 + $0xd4c] ss:$400 sps:$4 sm:$0xff]   ;;  %26718 = vst [vmem:[#allocation5_spill] sm:$0xff] %v21479_v51  ;;  %v18286_v51 = vld [vmem:[%s26643_s0 + $0xa74] ss:$400 sps:$4 sm:$0xff]  }
 0x247   :  { %8631 = vmatpush1.bf16.msra.mxu0 %v17906_v33  ;;  %8684 = vmatpush1.bf16.msra.mxu1 %v17909_v34  ;;  %v21481_v33 = vpop.f32.mrf.mxu0  ;;  %v17972_v34 = vld [vmem:[%s26643_s0 + $0x16b0] ss:$400 sps:$4 sm:$0xff]  }
 0x248   :  { %8632 = vmatprep.subr.bf16.mxu0 %v17914_v35  ;;  %8685 = vmatprep.subr.bf16.mxu1 %v17917_v58  ;;  %v17975_v35 = vld [vmem:[%s26643_s0 + $0x16b8] ss:$400 sps:$4 sm:$0xff]   ;;  %v17980_v58 = vld [vmem:[%s26643_s0 + $0x1394] ss:$400 sps:$4 sm:$0xff]  }
 0x24a   :  { %8565 = vmatmul.mubr.bf16.gmra.mxu0 %v21008_v4  ;;  %8618 = vmatmul.mubr.bf16.gmra.mxu1 %v21008_v4  ;;  %v17929_v4 = vld [vmem:[%s26643_s0 + $0xa2c] ss:$400 sps:$4 sm:$0xff]  }
 0x24b   :  { %8633 = vmatpush1.bf16.msra.mxu0 %v17912_v1  ;;  %8686 = vmatpush1.bf16.msra.mxu1 %v17915_v38  ;;  %v17983_v1 = vld [vmem:[%s26643_s0 + $0x139c] ss:$400 sps:$4 sm:$0xff]   ;;  %v21495_v38 = vpop.f32.mrf.mxu1 }
 0x24c   :  { %8634 = vmatprep.subr.bf16.mxu0 %v17920_v40  ;;  %8687 = vmatprep.subr.bf16.mxu1 %v17923_v62  ;;  %26719 = vst [vmem:[#allocation6_spill] sm:$0xff] %v21495_v38  ;;  %v21497_v40 = vpop.f32.mrf.mxu0  ;;  %v21502_v62 = vld [vmem:[%s26644_s1] ss:$8 sps:$4 sm:$0xff]  }
 0x24d   :  { %16084 = vmatprep.mubr.msk.bf16.mxu0 %vm7349_vm0, %v21033_v11  ;;  %16086 = vmatprep.mubr.msk.bf16.mxu1 %vm7349_vm0, %v21033_v11  ;;  %v17930_v11 = vld [vmem:[%s26643_s0 + $0x700] ss:$400 sps:$4 sm:$0xff]   ;;  %26720 = vst [vmem:[#allocation7_spill] sm:$0xff] %v21497_v40  ;;  %v23259_v40 = vld [vmem:[%s26644_s1 + $0x14] ss:$8 sps:$4 sm:$0x7f]  }
 0x24f   :  { %8635 = vmatpush1.bf16.msra.mxu0 %v17918_v2  ;;  %8688 = vmatpush1.bf16.msra.mxu1 %v17921_v42  ;;  %v17978_v2 = vld [vmem:[%s26643_s0 + $0x1390] ss:$400 sps:$4 sm:$0xff]   ;;  %v17981_v42 = vld [vmem:[%s26643_s0 + $0x1398] ss:$400 sps:$4 sm:$0xff]  }
 0x250   :  { %8636 = vmatprep.subr.bf16.mxu0 %v17926_v43  ;;  %8689 = vmatprep.subr.bf16.mxu1 %v17929_v4  ;;  %v21512_v43 = vpop.f32.mrf.mxu0  ;;  %v17986_v4 = vld [vmem:[%s26643_s0 + $0x1074] ss:$400 sps:$4 sm:$0xff]  }
 0x253   :  { %8637 = vmatpush1.bf16.msra.mxu0 %v17924_v44  ;;  %8690 = vmatpush1.bf16.msra.mxu1 %v17927_v46  ;;  %v17989_v44 = vld [vmem:[%s26643_s0 + $0x107c] ss:$400 sps:$4 sm:$0xff]  }
 0x254   :  { %8638 = vmatprep.subr.bf16.mxu0 %v17932_v49  ;;  %8691 = vmatprep.subr.bf16.mxu1 %v17935_v50  ;;  %v21523_v46 = vld [vmem:[%s26644_s1 + $0x14] ss:$8 sps:$4 sm:$0x7f]   ;;  %v21529_v49 = vpop.f32.mrf.mxu1  ;;  %v17984_v50 = vld [vmem:[%s26643_s0 + $0x1070] ss:$400 sps:$4 sm:$0xff]  }
 0x255   :  { %26721 = vst [vmem:[#allocation8_spill] sm:$0xff] %v21529_v49 }
 0x257   :  { %8639 = vmatpush1.bf16.msra.mxu0 %v17930_v11  ;;  %8692 = vmatpush1.bf16.msra.mxu1 %v17933_v52  ;;  %v17987_v11 = vld [vmem:[%s26643_s0 + $0x1078] ss:$400 sps:$4 sm:$0xff]   ;;  %v21537_v52 = vpop.f32.mrf.mxu1 }
 0x258   :  { %8640 = vmatprep.subr.bf16.mxu0 %v17938_v55  ;;  %8693 = vmatprep.subr.bf16.mxu1 %v17941_v56  ;;  %26722 = vst [vmem:[#allocation9_spill] sm:$0xff] %v21537_v52  ;;  %v21539_v55 = vpop.f32.mrf.mxu0  ;;  %v17992_v56 = vld [vmem:[%s26643_s0 + $0xd54] ss:$400 sps:$4 sm:$0xff]  }
 0x259   :  { %26723 = vst [vmem:[#allocation10_spill] sm:$0xff] %v21539_v55  ;;  %v18292_v52 = vld [vmem:[%s26643_s0 + $0x754] ss:$400 sps:$4 sm:$0xff]  }
 0x25b   :  { %8641 = vmatpush1.bf16.msra.mxu0 %v17936_v57  ;;  %8694 = vmatpush1.bf16.msra.mxu1 %v17939_v19  ;;  %v17995_v57 = vld [vmem:[%s26643_s0 + $0xd5c] ss:$400 sps:$4 sm:$0xff]   ;;  %v21550_v19 = vld [vmem:[%s26644_s1 + $0x10] ss:$8 sps:$4 sm:$0x7f]  }
 0x25c   :  { %8642 = vmatprep.subr.bf16.mxu0 %v17944_v25  ;;  %8695 = vmatprep.subr.bf16.mxu1 %v17947_v61  ;;  %v17990_v25 = vld [vmem:[%s26643_s0 + $0xd50] ss:$400 sps:$4 sm:$0xff]   ;;  %v17993_v61 = vld [vmem:[%s26643_s0 + $0xd58] ss:$400 sps:$4 sm:$0xff]  }
 0x25f   :  { %8643 = vmatpush1.bf16.msra.mxu0 %v17942_v63  ;;  %8696 = vmatpush1.bf16.msra.mxu1 %v17945_v0  ;;  %v21560_v63 = vpop.f32.mrf.mxu1  ;;  %v21562_v0 = vpop.f32.mrf.mxu0 }
 0x260   :  { %8652 = vmatprep.subr.bf16.mxu0 %v17950_v6  ;;  %8705 = vmatprep.subr.bf16.mxu1 %v17953_v7  ;;  %26724 = vst [vmem:[#allocation11_spill] sm:$0xff] %v21560_v63  ;;  %v17998_v6 = vld [vmem:[%s26643_s0 + $0xa34] ss:$400 sps:$4 sm:$0xff]   ;;  %v18001_v7 = vld [vmem:[%s26643_s0 + $0xa3c] ss:$400 sps:$4 sm:$0xff]  }
 0x261   :  { %v18260_v63 = vld [vmem:[%s26643_s0 + $0x16f0] ss:$400 sps:$4 sm:$0xff]  }
 0x263   :  { %8653 = vmatpush2.bf16.msra.mxu0 %v17948_v8  ;;  %8706 = vmatpush2.bf16.msra.mxu1 %v17951_v9  ;;  %v17996_v8 = vld [vmem:[%s26643_s0 + $0xa30] ss:$400 sps:$4 sm:$0xff]   ;;  %v17999_v9 = vld [vmem:[%s26643_s0 + $0xa38] ss:$400 sps:$4 sm:$0xff]  }
 0x264   :  { %8654 = vmatprep.subr.bf16.mxu0 %v17956_v36  ;;  %8707 = vmatprep.subr.bf16.mxu1 %v17959_v13  ;;  %v21579_v36 = vld [vmem:[%s26644_s1 + $0x4] ss:$8 sps:$4 sm:$0xff]   ;;  %v21585_v13 = vpop.f32.mrf.mxu1 }
 0x265   :  { %26725 = vst [vmem:[#allocation12_spill] sm:$0xff] %v21585_v13  ;;  %v18277_v13 = vld [vmem:[%s26643_s0 + $0x10bc] ss:$400 sps:$4 sm:$0xff]  }
 0x267   :  { %8655 = vmatpush2.bf16.msra.mxu0 %v17954_v16  ;;  %8708 = vmatpush2.bf16.msra.mxu1 %v17957_v41  ;;  %v21587_v16 = vpop.f32.mrf.mxu0  ;;  %v18004_v41 = vld [vmem:[%s26643_s0 + $0x714] ss:$400 sps:$4 sm:$0xff]  }
 0x268   :  { %8656 = vmatprep.subr.bf16.mxu0 %v17962_v18  ;;  %8709 = vmatprep.subr.bf16.mxu1 %v17965_v20  ;;  %26726 = vst [vmem:[#allocation13_spill] sm:$0xff] %v21587_v16  ;;  %v18007_v18 = vld [vmem:[%s26643_s0 + $0x71c] ss:$400 sps:$4 sm:$0xff]   ;;  %v18002_v20 = vld [vmem:[%s26643_s0 + $0x710] ss:$400 sps:$4 sm:$0xff]  }
 0x26b   :  { %8657 = vmatpush2.bf16.msra.mxu0 %v17960_v21  ;;  %8710 = vmatpush2.bf16.msra.mxu1 %v17963_v22  ;;  %v18005_v21 = vld [vmem:[%s26643_s0 + $0x718] ss:$400 sps:$4 sm:$0xff]   ;;  %v21601_v22 = vpop.f32.mrf.mxu1 }
 0x26c   :  { %8658 = vmatprep.subr.bf16.mxu0 %v17968_v24  ;;  %8711 = vmatprep.subr.bf16.mxu1 %v17971_v26  ;;  %26727 = vst [vmem:[#allocation14_spill] sm:$0xff] %v21601_v22  ;;  %v21603_v24 = vpop.f32.mrf.mxu0  ;;  %v18010_v26 = vld [vmem:[%s26643_s0 + $0x3f4] ss:$400 sps:$4 sm:$0xff]   ;;  %v18254_v22 = vld [vmem:[%s26643_s0 + $0x1a00] ss:$400 sps:$4 sm:$0xff]  }
 0x26d   :  { %26728 = vst [vmem:[#allocation15_spill] sm:$0xff] %v21603_v24  ;;  %v22356_v24 = vld [vmem:[%s26644_s1] ss:$8 sps:$4 sm:$0xff]  }
 0x26f   :  { %8659 = vmatpush2.bf16.msra.mxu0 %v17966_v28  ;;  %8712 = vmatpush2.bf16.msra.mxu1 %v17969_v30  ;;  %v18013_v28 = vld [vmem:[%s26643_s0 + $0x3fc] ss:$400 sps:$4 sm:$0xff]   ;;  %v18008_v30 = vld [vmem:[%s26643_s0 + $0x3f0] ss:$400 sps:$4 sm:$0xff]  }
 0x270   :  { %8734 = vmatprep.subr.bf16.mxu0 %v17974_v31  ;;  %8787 = vmatprep.subr.bf16.mxu1 %v17977_v32  ;;  %v18011_v31 = vld [vmem:[%s26643_s0 + $0x3f8] ss:$400 sps:$4 sm:$0xff]   ;;  %v21617_v32 = vpop.f32.mrf.mxu1 }
 0x271   :  { %26729 = vst [vmem:[#allocation16_spill] sm:$0xff] %v21617_v32  ;;  %v18250_v32 = vld [vmem:[%s26643_s0 + $0x1d24] ss:$400 sps:$4 sm:$0xff]  }
 0x272   :  { %8661 = vmatmul.mubr.bf16.vlgmr.msra.gmra.mxu0 %v21502_v62  ;;  %8714 = vmatmul.mubr.bf16.vlgmr.msra.gmra.mxu1 %v21502_v62 }
 0x273   :  { %8735 = vmatpush1.bf16.msra.mxu0 %v17972_v34  ;;  %8788 = vmatpush1.bf16.msra.mxu1 %v17975_v35  ;;  %v21619_v34 = vpop.f32.mrf.mxu0  ;;  %v18016_v35 = vld [vmem:[%s26643_s0 + $0xd4] ss:$400 sps:$4 sm:$0xff]  }
 0x274   :  { %8736 = vmatprep.subr.bf16.mxu0 %v17980_v58  ;;  %8789 = vmatprep.subr.bf16.mxu1 %v17983_v1  ;;  %26730 = vst [vmem:[#allocation17_spill] sm:$0xff] %v21619_v34  ;;  %v18019_v58 = vld [vmem:[%s26643_s0 + $0xdc] ss:$400 sps:$4 sm:$0xff]   ;;  %v18014_v1 = vld [vmem:[%s26643_s0 + $0xd0] ss:$400 sps:$4 sm:$0xff]  }
 0x275   :  { %16085 = vmatprep.mubr.msk.bf16.mxu0 %vm7349_vm0, %v21523_v46  ;;  %16087 = vmatprep.mubr.msk.bf16.mxu1 %vm7349_vm0, %v21523_v46  ;;  %v18248_v34 = vld [vmem:[%s26643_s0 + $0x1d20] ss:$400 sps:$4 sm:$0xff]  }
 0x277   :  { %8737 = vmatpush1.bf16.msra.mxu0 %v17978_v2  ;;  %8790 = vmatpush1.bf16.msra.mxu1 %v17981_v42  ;;  %v18017_v2 = vld [vmem:[%s26643_s0 + $0xd8] ss:$400 sps:$4 sm:$0xff]   ;;  %v21633_v42 = vpop.f32.mrf.mxu1 }
 0x278   :  { %8738 = vmatprep.subr.bf16.mxu0 %v17986_v4  ;;  %8791 = vmatprep.subr.bf16.mxu1 %v17989_v44  ;;  %26731 = vst [vmem:[#allocation18_spill] sm:$0xff] %v21633_v42  ;;  %v21635_v4 = vpop.f32.mrf.mxu0  ;;  %v18022_v44 = vld [vmem:[%s26643_s0 + $0x2334] ss:$400 sps:$4 sm:$0xff]  }
 0x279   :  { %26732 = vst [vmem:[#allocation19_spill] sm:$0xff] %v21635_v4  ;;  %v18238_v42 = vld [vmem:[%s26643_s0 + $0x2364] ss:$400 sps:$4 sm:$0xff]  }
 0x27a   :  { %8671 = vmatmul.mubr.bf16.gmra.mxu0 %v21550_v19  ;;  %8724 = vmatmul.mubr.bf16.gmra.mxu1 %v21550_v19  ;;  %v18268_v4 = vld [vmem:[%s26643_s0 + $0x13d4] ss:$400 sps:$4 sm:$0xff]  }
 0x27b   :  { %8739 = vmatpush1.bf16.msra.mxu0 %v17984_v50  ;;  %8792 = vmatpush1.bf16.msra.mxu1 %v17987_v11  ;;  %v18025_v50 = vld [vmem:[%s26643_s0 + $0x233c] ss:$400 sps:$4 sm:$0xff]   ;;  %v18020_v11 = vld [vmem:[%s26643_s0 + $0x2330] ss:$400 sps:$4 sm:$0xff]  }
 0x27c   :  { %8740 = vmatprep.subr.bf16.mxu0 %v17992_v56  ;;  %8793 = vmatprep.subr.bf16.mxu1 %v17995_v57  ;;  %v18023_v56 = vld [vmem:[%s26643_s0 + $0x2338] ss:$400 sps:$4 sm:$0xff]   ;;  %v21649_v57 = vpop.f32.mrf.mxu1 }
 0x27d   :  { %16090 = vmatprep.mubr.msk.bf16.mxu1 %vm7349_vm0, %v21579_v36  ;;  %16088 = vmatprep.mubr.msk.bf16.mxu0 %vm7349_vm0, %v21579_v36  ;;  %26733 = vst [vmem:[#allocation20_spill] sm:$0xff] %v21649_v57  ;;  %v18244_v57 = vld [vmem:[%s26643_s0 + $0x2044] ss:$400 sps:$4 sm:$0xff]  }
 0x27f   :  { %8741 = vmatpush1.bf16.msra.mxu0 %v17990_v25  ;;  %8794 = vmatpush1.bf16.msra.mxu1 %v17993_v61  ;;  %v21651_v25 = vpop.f32.mrf.mxu0  ;;  %v18028_v61 = vld [vmem:[%s26643_s0 + $0x2014] ss:$400 sps:$4 sm:$0xff]  }
 0x280   :  { %8742 = vmatprep.subr.bf16.mxu0 %v17998_v6  ;;  %8795 = vmatprep.subr.bf16.mxu1 %v18001_v7  ;;  %26734 = vst [vmem:[#allocation21_spill] sm:$0xff] %v21651_v25  ;;  %v18031_v6 = vld [vmem:[%s26643_s0 + $0x201c] ss:$400 sps:$4 sm:$0xff]   ;;  %v21659_v7 = vpop.f32.mrf.mxu1  ;;  %v18242_v25 = vld [vmem:[%s26643_s0 + $0x2040] ss:$400 sps:$4 sm:$0xff]  }
 0x281   :  { %26735 = vst [vmem:[#allocation22_spill] sm:$0xff] %v21659_v7  ;;  %v18214_v7 = vld [vmem:[%s26643_s0 + $0xa64] ss:$400 sps:$4 sm:$0xff]  }
 0x283   :  { %8743 = vmatpush1.bf16.msra.mxu0 %v17996_v8  ;;  %8796 = vmatpush1.bf16.msra.mxu1 %v17999_v9  ;;  %v21661_v8 = vpop.f32.mrf.mxu0  ;;  %v18026_v9 = vld [vmem:[%s26643_s0 + $0x2010] ss:$400 sps:$4 sm:$0xff]  }
 0x284   :  { %8744 = vmatprep.subr.bf16.mxu0 %v18004_v41  ;;  %8797 = vmatprep.subr.bf16.mxu1 %v18007_v18  ;;  %26736 = vst [vmem:[#allocation23_spill] sm:$0xff] %v21661_v8  ;;  %v18029_v41 = vld [vmem:[%s26643_s0 + $0x2018] ss:$400 sps:$4 sm:$0xff]   ;;  %v21669_v18 = vpop.f32.mrf.mxu1  ;;  %v18262_v8 = vld [vmem:[%s26643_s0 + $0x16f4] ss:$400 sps:$4 sm:$0xff]  }
 0x285   :  { %26737 = vst [vmem:[#allocation24_spill] sm:$0xff] %v21669_v18  ;;  %v18230_v18 = vld [vmem:[%s26643_s0 + $0x100] ss:$400 sps:$4 sm:$0xff]  }
 0x287   :  { %8745 = vmatpush1.bf16.msra.mxu0 %v18002_v20  ;;  %8798 = vmatpush1.bf16.msra.mxu1 %v18005_v21  ;;  %v18034_v20 = vld [vmem:[%s26643_s0 + $0x1cf4] ss:$400 sps:$4 sm:$0xff]   ;;  %v18037_v21 = vld [vmem:[%s26643_s0 + $0x1cfc] ss:$400 sps:$4 sm:$0xff]  }
 0x288   :  { %8746 = vmatprep.subr.bf16.mxu0 %v18010_v26  ;;  %8799 = vmatprep.subr.bf16.mxu1 %v18013_v28  ;;  %v21677_v26 = vpop.f32.mrf.mxu0  ;;  %v18032_v28 = vld [vmem:[%s26643_s0 + $0x1cf0] ss:$400 sps:$4 sm:$0xff]  }
 0x289   :  { %26738 = vst [vmem:[#allocation25_spill] sm:$0xff] %v21677_v26  ;;  %v18236_v26 = vld [vmem:[%s26643_s0 + $0x2360] ss:$400 sps:$4 sm:$0xff]  }
 0x28b   :  { %8747 = vmatpush1.bf16.msra.mxu0 %v18008_v30  ;;  %8800 = vmatpush1.bf16.msra.mxu1 %v18011_v31  ;;  %v18035_v30 = vld [vmem:[%s26643_s0 + $0x1cf8] ss:$400 sps:$4 sm:$0xff]   ;;  %v21685_v31 = vpop.f32.mrf.mxu1 }
 0x28c   :  { %8748 = vmatprep.subr.bf16.mxu0 %v18016_v35  ;;  %8801 = vmatprep.subr.bf16.mxu1 %v18019_v58  ;;  %26739 = vst [vmem:[#allocation26_spill] sm:$0xff] %v21685_v31  ;;  %v18040_v35 = vld [vmem:[%s26643_s0 + $0x19d4] ss:$400 sps:$4 sm:$0xff]   ;;  %v18043_v58 = vld [vmem:[%s26643_s0 + $0x19dc] ss:$400 sps:$4 sm:$0xff]  }
 0x28f   :  { %8749 = vmatpush1.bf16.msra.mxu0 %v18014_v1  ;;  %8802 = vmatpush1.bf16.msra.mxu1 %v18017_v2  ;;  %v21693_v1 = vpop.f32.mrf.mxu0  ;;  %v18038_v2 = vld [vmem:[%s26643_s0 + $0x19d0] ss:$400 sps:$4 sm:$0xff]  }
 0x290   :  { %8758 = vmatprep.subr.bf16.mxu0 %v18022_v44  ;;  %8811 = vmatprep.subr.bf16.mxu1 %v18025_v50  ;;  %26740 = vst [vmem:[#allocation27_spill] sm:$0xff] %v21693_v1  ;;  %v18041_v44 = vld [vmem:[%s26643_s0 + $0x19d8] ss:$400 sps:$4 sm:$0xff]   ;;  %v21701_v50 = vpop.f32.mrf.mxu1  ;;  %v18256_v1 = vld [vmem:[%s26643_s0 + $0x1a04] ss:$400 sps:$4 sm:$0xff]  }
 0x291   :  { %26741 = vst [vmem:[#allocation28_spill] sm:$0xff] %v21701_v50  ;;  %v18226_v50 = vld [vmem:[%s26643_s0 + $0x424] ss:$400 sps:$4 sm:$0xff]  }
 0x293   :  { %8759 = vmatpush2.bf16.msra.mxu0 %v18020_v11  ;;  %8812 = vmatpush2.bf16.msra.mxu1 %v18023_v56  ;;  %v18046_v11 = vld [vmem:[%s26643_s0 + $0x16c4] ss:$400 sps:$4 sm:$0xff]   ;;  %v18049_v56 = vld [vmem:[%s26643_s0 + $0x16cc] ss:$400 sps:$4 sm:$0xff]  }
 0x294   :  { %8760 = vmatprep.subr.bf16.mxu0 %v18028_v61  ;;  %8813 = vmatprep.subr.bf16.mxu1 %v18031_v6  ;;  %v21709_v61 = vpop.f32.mrf.mxu0  ;;  %v18044_v6 = vld [vmem:[%s26643_s0 + $0x16c0] ss:$400 sps:$4 sm:$0xff]  }
 0x295   :  { %26742 = vst [vmem:[#allocation29_spill] sm:$0xff] %v21709_v61  ;;  %v18232_v61 = vld [vmem:[%s26643_s0 + $0x104] ss:$400 sps:$4 sm:$0xff]  }
 0x297   :  { %8761 = vmatpush2.bf16.msra.mxu0 %v18026_v9  ;;  %8814 = vmatpush2.bf16.msra.mxu1 %v18029_v41  ;;  %v18047_v9 = vld [vmem:[%s26643_s0 + $0x16c8] ss:$400 sps:$4 sm:$0xff]   ;;  %v21717_v41 = vpop.f32.mrf.mxu1 }
 0x298   :  { %8762 = vmatprep.subr.bf16.mxu0 %v18034_v20  ;;  %8815 = vmatprep.subr.bf16.mxu1 %v18037_v21  ;;  %26743 = vst [vmem:[#allocation30_spill] sm:$0xff] %v21717_v41  ;;  %v18052_v20 = vld [vmem:[%s26643_s0 + $0x13a4] ss:$400 sps:$4 sm:$0xff]   ;;  %v18055_v21 = vld [vmem:[%s26643_s0 + $0x13ac] ss:$400 sps:$4 sm:$0xff]  }
 0x299   :  { %v18182_v41 = vld [vmem:[%s26643_s0 + $0x19f0] ss:$400 sps:$4 sm:$0xff]  }
 0x29b   :  { %8763 = vmatpush2.bf16.msra.mxu0 %v18032_v28  ;;  %8816 = vmatpush2.bf16.msra.mxu1 %v18035_v30  ;;  %v21725_v28 = vpop.f32.mrf.mxu1  ;;  %v21727_v30 = vpop.f32.mrf.mxu0 }
 0x29c   :  { %8764 = vmatprep.subr.bf16.mxu0 %v18040_v35  ;;  %8817 = vmatprep.subr.bf16.mxu1 %v18043_v58  ;;  %26744 = vst [vmem:[#allocation31_spill] sm:$0xff] %v21725_v28  ;;  %26745 = vst [vmem:[#allocation32_spill] sm:$0xff] %v21727_v30  ;;  %v18050_v35 = vld [vmem:[%s26643_s0 + $0x13a0] ss:$400 sps:$4 sm:$0xff]   ;;  %v18053_v58 = vld [vmem:[%s26643_s0 + $0x13a8] ss:$400 sps:$4 sm:$0xff]  }
 0x29f   :  { %8765 = vmatpush2.bf16.msra.mxu0 %v18038_v2  ;;  %8818 = vmatpush2.bf16.msra.mxu1 %v18041_v44  ;;  %v18058_v2 = vld [vmem:[%s26643_s0 + $0x1084] ss:$400 sps:$4 sm:$0xff]   ;;  %v18061_v44 = vld [vmem:[%s26643_s0 + $0x108c] ss:$400 sps:$4 sm:$0xff]  }
 0x2a0   :  { %8840 = vmatprep.subr.bf16.mxu0 %v18046_v11  ;;  %8893 = vmatprep.subr.bf16.mxu1 %v18049_v56  ;;  %v21747_v11 = vpop.f32.mrf.mxu1  ;;  %v21749_v56 = vpop.f32.mrf.mxu0 }
 0x2a1   :  { %26746 = vst [vmem:[#allocation33_spill] sm:$0xff] %v21747_v11  ;;  %26747 = vst [vmem:[#allocation34_spill] sm:$0xff] %v21749_v56  ;;  %v18070_v11 = vld [vmem:[%s26643_s0 + $0xa44] ss:$400 sps:$4 sm:$0xff]  }
 0x2a2   :  { %8820 = vmatmul.mubr.bf16.vlgmr.msra.gmra.mxu1 %v21502_v62  ;;  %8767 = vmatmul.mubr.bf16.vlgmr.msra.gmra.mxu0 %v21502_v62 }
 0x2a3   :  { %8841 = vmatpush1.bf16.msra.mxu0 %v18044_v6  ;;  %8894 = vmatpush1.bf16.msra.mxu1 %v18047_v9  ;;  %v18056_v6 = vld [vmem:[%s26643_s0 + $0x1080] ss:$400 sps:$4 sm:$0xff]   ;;  %v18059_v9 = vld [vmem:[%s26643_s0 + $0x1088] ss:$400 sps:$4 sm:$0xff]  }
 0x2a4   :  { %8842 = vmatprep.subr.bf16.mxu0 %v18052_v20  ;;  %8895 = vmatprep.subr.bf16.mxu1 %v18055_v21  ;;  %v18064_v20 = vld [vmem:[%s26643_s0 + $0xd64] ss:$400 sps:$4 sm:$0xff]   ;;  %v18067_v21 = vld [vmem:[%s26643_s0 + $0xd6c] ss:$400 sps:$4 sm:$0xff]  }
 0x2a5   :  { %16091 = vmatprep.mubr.msk.bf16.mxu1 %vm7349_vm0, %v21523_v46  ;;  %16089 = vmatprep.mubr.msk.bf16.mxu0 %vm7349_vm0, %v21523_v46 }
 0x2a7   :  { %8843 = vmatpush1.bf16.msra.mxu0 %v18050_v35  ;;  %8896 = vmatpush1.bf16.msra.mxu1 %v18053_v58  ;;  %v21763_v35 = vpop.f32.mrf.mxu1  ;;  %v21765_v58 = vpop.f32.mrf.mxu0 }
 0x2a8   :  { %8844 = vmatprep.subr.bf16.mxu0 %v18058_v2  ;;  %8897 = vmatprep.subr.bf16.mxu1 %v18061_v44  ;;  %26748 = vst [vmem:[#allocation35_spill] sm:$0xff] %v21763_v35  ;;  %26749 = vst [vmem:[#allocation36_spill] sm:$0xff] %v21765_v58  ;;  %v18062_v2 = vld [vmem:[%s26643_s0 + $0xd60] ss:$400 sps:$4 sm:$0xff]   ;;  %v18065_v44 = vld [vmem:[%s26643_s0 + $0xd68] ss:$400 sps:$4 sm:$0xff]  }
 0x2a9   :  { %v18073_v35 = vld [vmem:[%s26643_s0 + $0xa4c] ss:$400 sps:$4 sm:$0xff]   ;;  %v18202_v58 = vld [vmem:[%s26643_s0 + $0x10a4] ss:$400 sps:$4 sm:$0xff]  }
 0x2aa   :  { %8830 = vmatmul.mubr.bf16.gmra.mxu1 %v21550_v19  ;;  %8777 = vmatmul.mubr.bf16.gmra.mxu0 %v21550_v19 }
 0x2ab   :  { %8845 = vmatpush1.bf16.msra.mxu0 %v18056_v6  ;;  %8898 = vmatpush1.bf16.msra.mxu1 %v18059_v9  ;;  %v21785_v6 = vpop.f32.mrf.mxu1  ;;  %v21787_v9 = vpop.f32.mrf.mxu0 }
 0x2ac   :  { %8846 = vmatprep.subr.bf16.mxu0 %v18064_v20  ;;  %8899 = vmatprep.subr.bf16.mxu1 %v18067_v21  ;;  %26750 = vst [vmem:[#allocation37_spill] sm:$0xff] %v21785_v6  ;;  %26751 = vst [vmem:[#allocation38_spill] sm:$0xff] %v21787_v9  ;;  %v18068_v20 = vld [vmem:[%s26643_s0 + $0xa40] ss:$400 sps:$4 sm:$0xff]   ;;  %v18071_v21 = vld [vmem:[%s26643_s0 + $0xa48] ss:$400 sps:$4 sm:$0xff]  }
 0x2ad   :  { %16094 = vmatprep.mubr.msk.bf16.mxu1 %vm7349_vm0, %v21579_v36  ;;  %16092 = vmatprep.mubr.msk.bf16.mxu0 %vm7349_vm0, %v21579_v36  ;;  %v21795_v28 = vpop.f32.mrf.mxu1  ;;  %v21797_v56 = vpop.f32.mrf.mxu0  ;;  %v18076_v6 = vld [vmem:[%s26643_s0 + $0x724] ss:$400 sps:$4 sm:$0xff]  }
 0x2ae   :  { %26752 = vst [vmem:[#allocation39_spill] sm:$0xff] %v21795_v28  ;;  %26753 = vst [vmem:[#allocation40_spill] sm:$0xff] %v21797_v56  ;;  %v18077_v28 = vld [vmem:[%s26643_s0 + $0x728] ss:$400 sps:$4 sm:$0xff]   ;;  %v18082_v9 = vld [vmem:[%s26643_s0 + $0x404] ss:$400 sps:$4 sm:$0xff]  }
 0x2af   :  { %8847 = vmatpush1.bf16.msra.mxu0 %v18062_v2  ;;  %8900 = vmatpush1.bf16.msra.mxu1 %v18065_v44  ;;  %v18079_v2 = vld [vmem:[%s26643_s0 + $0x72c] ss:$400 sps:$4 sm:$0xff]   ;;  %v18074_v44 = vld [vmem:[%s26643_s0 + $0x720] ss:$400 sps:$4 sm:$0xff]  }
 0x2b0   :  { %8848 = vmatprep.subr.bf16.mxu0 %v18070_v11  ;;  %8901 = vmatprep.subr.bf16.mxu1 %v18073_v35  ;;  %v21811_v11 = vpop.f32.mrf.mxu1  ;;  %v21813_v35 = vpop.f32.mrf.mxu0  ;;  %v18188_v56 = vld [vmem:[%s26643_s0 + $0x16e0] ss:$400 sps:$4 sm:$0xff]  }
 0x2b1   :  { %26754 = vst [vmem:[#allocation41_spill] sm:$0xff] %v21811_v11  ;;  %26755 = vst [vmem:[#allocation42_spill] sm:$0xff] %v21813_v35  ;;  %v18083_v11 = vld [vmem:[%s26643_s0 + $0x408] ss:$400 sps:$4 sm:$0xff]   ;;  %v18088_v35 = vld [vmem:[%s26643_s0 + $0xe4] ss:$400 sps:$4 sm:$0xff]  }
 0x2b3   :  { %8849 = vmatpush1.bf16.msra.mxu0 %v18068_v20  ;;  %8902 = vmatpush1.bf16.msra.mxu1 %v18071_v21  ;;  %v18085_v20 = vld [vmem:[%s26643_s0 + $0x40c] ss:$400 sps:$4 sm:$0xff]   ;;  %v18080_v21 = vld [vmem:[%s26643_s0 + $0x400] ss:$400 sps:$4 sm:$0xff]  }
 0x2b4   :  { %8850 = vmatprep.subr.bf16.mxu0 %v18076_v6  ;;  %8903 = vmatprep.subr.bf16.mxu1 %v18079_v2  ;;  %v21827_v6 = vpop.f32.mrf.mxu1  ;;  %v21829_v2 = vpop.f32.mrf.mxu0 }
 0x2b5   :  { %26756 = vst [vmem:[#allocation43_spill] sm:$0xff] %v21827_v6  ;;  %26757 = vst [vmem:[#allocation44_spill] sm:$0xff] %v21829_v2  ;;  %v18089_v6 = vld [vmem:[%s26643_s0 + $0xe8] ss:$400 sps:$4 sm:$0xff]   ;;  %v18094_v2 = vld [vmem:[%s26643_s0 + $0x2344] ss:$400 sps:$4 sm:$0xff]  }
 0x2b7   :  { %8851 = vmatpush1.bf16.msra.mxu0 %v18074_v44  ;;  %8904 = vmatpush1.bf16.msra.mxu1 %v18077_v28  ;;  %v18091_v28 = vld [vmem:[%s26643_s0 + $0xec] ss:$400 sps:$4 sm:$0xff]   ;;  %v18086_v44 = vld [vmem:[%s26643_s0 + $0xe0] ss:$400 sps:$4 sm:$0xff]  }
 0x2b8   :  { %8852 = vmatprep.subr.bf16.mxu0 %v18082_v9  ;;  %8905 = vmatprep.subr.bf16.mxu1 %v18085_v20  ;;  %v21843_v9 = vpop.f32.mrf.mxu1  ;;  %v21845_v20 = vpop.f32.mrf.mxu0 }
 0x2b9   :  { %26758 = vst [vmem:[#allocation45_spill] sm:$0xff] %v21843_v9  ;;  %26759 = vst [vmem:[#allocation46_spill] sm:$0xff] %v21845_v20  ;;  %v18092_v9 = vld [vmem:[%s26643_s0 + $0x2340] ss:$400 sps:$4 sm:$0xff]   ;;  %v18100_v20 = vld [vmem:[%s26643_s0 + $0x2024] ss:$400 sps:$4 sm:$0xff]  }
 0x2bb   :  { %8853 = vmatpush1.bf16.msra.mxu0 %v18080_v21  ;;  %8906 = vmatpush1.bf16.msra.mxu1 %v18083_v11  ;;  %v18097_v11 = vld [vmem:[%s26643_s0 + $0x234c] ss:$400 sps:$4 sm:$0xff]   ;;  %v21853_v21 = vpop.f32.mrf.mxu1 }
 0x2bc   :  { %8854 = vmatprep.subr.bf16.mxu0 %v18088_v35  ;;  %8907 = vmatprep.subr.bf16.mxu1 %v18091_v28  ;;  %26760 = vst [vmem:[#allocation47_spill] sm:$0xff] %v21853_v21  ;;  %v18095_v35 = vld [vmem:[%s26643_s0 + $0x2348] ss:$400 sps:$4 sm:$0xff]   ;;  %v21861_v28 = vpop.f32.mrf.mxu0  ;;  %v18098_v21 = vld [vmem:[%s26643_s0 + $0x2020] ss:$400 sps:$4 sm:$0xff]  }
 0x2bd   :  { %26761 = vst [vmem:[#allocation48_spill] sm:$0xff] %v21861_v28  ;;  %v18106_v28 = vld [vmem:[%s26643_s0 + $0x1d04] ss:$400 sps:$4 sm:$0xff]  }
 0x2bf   :  { %8855 = vmatpush1.bf16.msra.mxu0 %v18086_v44  ;;  %8908 = vmatpush1.bf16.msra.mxu1 %v18089_v6  ;;  %v18103_v6 = vld [vmem:[%s26643_s0 + $0x202c] ss:$400 sps:$4 sm:$0xff]   ;;  %v21869_v44 = vpop.f32.mrf.mxu1 }
 0x2c0   :  { %8864 = vmatprep.subr.bf16.mxu0 %v18094_v2  ;;  %8917 = vmatprep.subr.bf16.mxu1 %v18097_v11  ;;  %26762 = vst [vmem:[#allocation49_spill] sm:$0xff] %v21869_v44  ;;  %v18101_v2 = vld [vmem:[%s26643_s0 + $0x2028] ss:$400 sps:$4 sm:$0xff]   ;;  %v21877_v11 = vpop.f32.mrf.mxu0  ;;  %v18104_v44 = vld [vmem:[%s26643_s0 + $0x1d00] ss:$400 sps:$4 sm:$0xff]  }
 0x2c1   :  { %26763 = vst [vmem:[#allocation50_spill] sm:$0xff] %v21877_v11  ;;  %v18112_v11 = vld [vmem:[%s26643_s0 + $0x19e4] ss:$400 sps:$4 sm:$0xff]  }
 0x2c3   :  { %8865 = vmatpush2.bf16.msra.mxu0 %v18092_v9  ;;  %8918 = vmatpush2.bf16.msra.mxu1 %v18095_v35  ;;  %v18109_v9 = vld [vmem:[%s26643_s0 + $0x1d0c] ss:$400 sps:$4 sm:$0xff]   ;;  %v21885_v35 = vpop.f32.mrf.mxu1 }
 0x2c4   :  { %8866 = vmatprep.subr.bf16.mxu0 %v18100_v20  ;;  %8919 = vmatprep.subr.bf16.mxu1 %v18103_v6  ;;  %26764 = vst [vmem:[#allocation51_spill] sm:$0xff] %v21885_v35  ;;  %v18107_v20 = vld [vmem:[%s26643_s0 + $0x1d08] ss:$400 sps:$4 sm:$0xff]   ;;  %v21893_v6 = vpop.f32.mrf.mxu0  ;;  %v18110_v35 = vld [vmem:[%s26643_s0 + $0x19e0] ss:$400 sps:$4 sm:$0xff]  }
 0x2c5   :  { %26765 = vst [vmem:[#allocation52_spill] sm:$0xff] %v21893_v6 }
 0x2c7   :  { %8867 = vmatpush2.bf16.msra.mxu0 %v18098_v21  ;;  %8920 = vmatpush2.bf16.msra.mxu1 %v18101_v2  ;;  %v18115_v21 = vld [vmem:[%s26643_s0 + $0x19ec] ss:$400 sps:$4 sm:$0xff]   ;;  %v21901_v2 = vpop.f32.mrf.mxu1 }
 0x2c8   :  { %8868 = vmatprep.subr.bf16.mxu0 %v18106_v28  ;;  %8921 = vmatprep.subr.bf16.mxu1 %v18109_v9  ;;  %26766 = vst [vmem:[#allocation53_spill] sm:$0xff] %v21901_v2  ;;  %v18113_v28 = vld [vmem:[%s26643_s0 + $0x19e8] ss:$400 sps:$4 sm:$0xff]   ;;  %v21909_v9 = vpop.f32.mrf.mxu0  ;;  %v18118_v2 = vld [vmem:[%s26643_s0 + $0x16d4] ss:$400 sps:$4 sm:$0xff]  }
 0x2c9   :  { %26767 = vst [vmem:[#allocation54_spill] sm:$0xff] %v21909_v9  ;;  %v21911_v6 = vpop.f32.mrf.mxu1  ;;  %v18116_v9 = vld [vmem:[%s26643_s0 + $0x16d0] ss:$400 sps:$4 sm:$0xff]  }
 0x2ca   :  { %26768 = vst [vmem:[#allocation55_spill] sm:$0xff] %v21911_v6  ;;  %v18124_v6 = vld [vmem:[%s26643_s0 + $0x13b4] ss:$400 sps:$4 sm:$0xff]  }
 0x2cb   :  { %8869 = vmatpush2.bf16.msra.mxu0 %v18104_v44  ;;  %8922 = vmatpush2.bf16.msra.mxu1 %v18107_v20  ;;  %v18121_v44 = vld [vmem:[%s26643_s0 + $0x16dc] ss:$400 sps:$4 sm:$0xff]   ;;  %v21919_v20 = vpop.f32.mrf.mxu0 }
 0x2cc   :  { %8870 = vmatprep.subr.bf16.mxu0 %v18112_v11  ;;  %8923 = vmatprep.subr.bf16.mxu1 %v18115_v21  ;;  %26769 = vst [vmem:[#allocation56_spill] sm:$0xff] %v21919_v20  ;;  %v18119_v11 = vld [vmem:[%s26643_s0 + $0x16d8] ss:$400 sps:$4 sm:$0xff]   ;;  %v21927_v21 = vpop.f32.mrf.mxu1  ;;  %v18136_v20 = vld [vmem:[%s26643_s0 + $0xd74] ss:$400 sps:$4 sm:$0xff]  }
 0x2cd   :  { %26770 = vst [vmem:[#allocation57_spill] sm:$0xff] %v21927_v21 }
 0x2ce   :  { %v21945_v21 = vpop.f32.mrf.mxu1 }
 0x2cf   :  { %8871 = vmatpush2.bf16.msra.mxu0 %v18110_v35  ;;  %8924 = vmatpush2.bf16.msra.mxu1 %v18113_v28  ;;  %v18127_v35 = vld [vmem:[%s26643_s0 + $0x13bc] ss:$400 sps:$4 sm:$0xff]   ;;  %v21935_v28 = vpop.f32.mrf.mxu0  ;;  %26772 = vst [vmem:[#allocation59_spill] sm:$0xff] %v21945_v21 }
 0x2d0   :  { %8946 = vmatprep.subr.bf16.mxu0 %v18118_v2  ;;  %8999 = vmatprep.subr.bf16.mxu1 %v18121_v44  ;;  %26771 = vst [vmem:[#allocation58_spill] sm:$0xff] %v21935_v28  ;;  %v18122_v2 = vld [vmem:[%s26643_s0 + $0x13b0] ss:$400 sps:$4 sm:$0xff]   ;;  %v18125_v44 = vld [vmem:[%s26643_s0 + $0x13b8] ss:$400 sps:$4 sm:$0xff]   ;;  %v21965_v21 = vpop.f32.mrf.mxu1 }
 0x2d1   :  { %v18130_v28 = vld [vmem:[%s26643_s0 + $0x1094] ss:$400 sps:$4 sm:$0xff]   ;;  %26774 = vst [vmem:[#allocation61_spill] sm:$0xff] %v21965_v21  ;;  %v18145_v21 = vld [vmem:[%s26643_s0 + $0xa5c] ss:$400 sps:$4 sm:$0xff]  }
 0x2d2   :  { %8926 = vmatmul.mubr.bf16.vlgmr.msra.gmra.mxu1 %v21502_v62  ;;  %8873 = vmatmul.mubr.bf16.vlgmr.msra.gmra.mxu0 %v21502_v62 }
 0x2d3   :  { %8947 = vmatpush1.bf16.msra.mxu0 %v18116_v9  ;;  %9000 = vmatpush1.bf16.msra.mxu1 %v18119_v11  ;;  %v18133_v9 = vld [vmem:[%s26643_s0 + $0x109c] ss:$400 sps:$4 sm:$0xff]   ;;  %v21957_v11 = vpop.f32.mrf.mxu0 }
 0x2d4   :  { %8948 = vmatprep.subr.bf16.mxu0 %v18124_v6  ;;  %9001 = vmatprep.subr.bf16.mxu1 %v18127_v35  ;;  %26773 = vst [vmem:[#allocation60_spill] sm:$0xff] %v21957_v11  ;;  %v18128_v6 = vld [vmem:[%s26643_s0 + $0x1090] ss:$400 sps:$4 sm:$0xff]   ;;  %v18131_v35 = vld [vmem:[%s26643_s0 + $0x1098] ss:$400 sps:$4 sm:$0xff]   ;;  %v21975_v11 = vpop.f32.mrf.mxu1 }
 0x2d5   :  { %16095 = vmatprep.mubr.msk.bf16.mxu1 %vm7349_vm0, %v21523_v46  ;;  %16093 = vmatprep.mubr.msk.bf16.mxu0 %vm7349_vm0, %v21523_v46  ;;  %26776 = vst [vmem:[#allocation63_spill] sm:$0xff] %v21975_v11  ;;  %v18142_v11 = vld [vmem:[%s26643_s0 + $0xa54] ss:$400 sps:$4 sm:$0xff]  }
 0x2d7   :  { %8949 = vmatpush1.bf16.msra.mxu0 %v18122_v2  ;;  %9002 = vmatpush1.bf16.msra.mxu1 %v18125_v44  ;;  %v18139_v2 = vld [vmem:[%s26643_s0 + $0xd7c] ss:$400 sps:$4 sm:$0xff]   ;;  %v21973_v44 = vpop.f32.mrf.mxu0 }
 0x2d8   :  { %8950 = vmatprep.subr.bf16.mxu0 %v18130_v28  ;;  %9003 = vmatprep.subr.bf16.mxu1 %v18133_v9  ;;  %26775 = vst [vmem:[#allocation62_spill] sm:$0xff] %v21973_v44  ;;  %v18134_v28 = vld [vmem:[%s26643_s0 + $0xd70] ss:$400 sps:$4 sm:$0xff]   ;;  %v18137_v9 = vld [vmem:[%s26643_s0 + $0xd78] ss:$400 sps:$4 sm:$0xff]  }
 0x2d9   :  { %v18148_v44 = vld [vmem:[%s26643_s0 + $0x734] ss:$400 sps:$4 sm:$0xff]  }
 0x2da   :  { %8936 = vmatmul.mubr.bf16.gmra.mxu1 %v21550_v19  ;;  %8883 = vmatmul.mubr.bf16.gmra.mxu0 %v21550_v19 }
 0x2db   :  { %8951 = vmatpush1.bf16.msra.mxu0 %v18128_v6  ;;  %9004 = vmatpush1.bf16.msra.mxu1 %v18131_v35  ;;  %v21995_v6 = vpop.f32.mrf.mxu0  ;;  %v21997_v35 = vpop.f32.mrf.mxu1 }
 0x2dc   :  { %8952 = vmatprep.subr.bf16.mxu0 %v18136_v20  ;;  %9005 = vmatprep.subr.bf16.mxu1 %v18139_v2  ;;  %26777 = vst [vmem:[#allocation64_spill] sm:$0xff] %v21995_v6  ;;  %26778 = vst [vmem:[#allocation65_spill] sm:$0xff] %v21997_v35  ;;  %v18140_v20 = vld [vmem:[%s26643_s0 + $0xa50] ss:$400 sps:$4 sm:$0xff]   ;;  %v18143_v2 = vld [vmem:[%s26643_s0 + $0xa58] ss:$400 sps:$4 sm:$0xff]  }
 0x2dd   :  { %16098 = vmatprep.mubr.msk.bf16.mxu1 %vm7349_vm0, %v21579_v36  ;;  %16096 = vmatprep.mubr.msk.bf16.mxu0 %vm7349_vm0, %v21579_v36  ;;  %v18151_v35 = vld [vmem:[%s26643_s0 + $0x73c] ss:$400 sps:$4 sm:$0xff]   ;;  %v18146_v6 = vld [vmem:[%s26643_s0 + $0x730] ss:$400 sps:$4 sm:$0xff]  }
 0x2df   :  { %8953 = vmatpush1.bf16.msra.mxu0 %v18134_v28  ;;  %9006 = vmatpush1.bf16.msra.mxu1 %v18137_v9  ;;  %v22011_v28 = vpop.f32.mrf.mxu0  ;;  %v22013_v9 = vpop.f32.mrf.mxu1 }
 0x2e0   :  { %8954 = vmatprep.subr.bf16.mxu0 %v18142_v11  ;;  %9007 = vmatprep.subr.bf16.mxu1 %v18145_v21  ;;  %26779 = vst [vmem:[#allocation66_spill] sm:$0xff] %v22011_v28  ;;  %26780 = vst [vmem:[#allocation67_spill] sm:$0xff] %v22013_v9  ;;  %v18149_v21 = vld [vmem:[%s26643_s0 + $0x738] ss:$400 sps:$4 sm:$0xff]   ;;  %v18154_v11 = vld [vmem:[%s26643_s0 + $0x414] ss:$400 sps:$4 sm:$0xff]  }
 0x2e1   :  { %v18157_v9 = vld [vmem:[%s26643_s0 + $0x41c] ss:$400 sps:$4 sm:$0xff]   ;;  %v18152_v28 = vld [vmem:[%s26643_s0 + $0x410] ss:$400 sps:$4 sm:$0xff]  }
 0x2e3   :  { %8955 = vmatpush1.bf16.msra.mxu0 %v18140_v20  ;;  %9008 = vmatpush1.bf16.msra.mxu1 %v18143_v2  ;;  %v22027_v20 = vpop.f32.mrf.mxu0  ;;  %v22029_v2 = vpop.f32.mrf.mxu1 }
 0x2e4   :  { %8956 = vmatprep.subr.bf16.mxu0 %v18148_v44  ;;  %9009 = vmatprep.subr.bf16.mxu1 %v18151_v35  ;;  %26781 = vst [vmem:[#allocation68_spill] sm:$0xff] %v22027_v20  ;;  %26782 = vst [vmem:[#allocation69_spill] sm:$0xff] %v22029_v2  ;;  %v18155_v44 = vld [vmem:[%s26643_s0 + $0x418] ss:$400 sps:$4 sm:$0xff]   ;;  %v18160_v20 = vld [vmem:[%s26643_s0 + $0xf4] ss:$400 sps:$4 sm:$0xff]  }
 0x2e5   :  { %v22037_v35 = vpop.f32.mrf.mxu1  ;;  %v18158_v2 = vld [vmem:[%s26643_s0 + $0xf0] ss:$400 sps:$4 sm:$0xff]  }
 0x2e6   :  { %26783 = vst [vmem:[#allocation70_spill] sm:$0xff] %v22037_v35 }
 0x2e7   :  { %8957 = vmatpush1.bf16.msra.mxu0 %v18146_v6  ;;  %9010 = vmatpush1.bf16.msra.mxu1 %v18149_v21  ;;  %v18163_v6 = vld [vmem:[%s26643_s0 + $0xfc] ss:$400 sps:$4 sm:$0xff]   ;;  %v22045_v21 = vpop.f32.mrf.mxu0 }
 0x2e8   :  { %8958 = vmatprep.subr.bf16.mxu0 %v18154_v11  ;;  %9011 = vmatprep.subr.bf16.mxu1 %v18157_v9  ;;  %26784 = vst [vmem:[#allocation71_spill] sm:$0xff] %v22045_v21  ;;  %v18161_v9 = vld [vmem:[%s26643_s0 + $0xf8] ss:$400 sps:$4 sm:$0xff]   ;;  %v22053_v11 = vpop.f32.mrf.mxu1  ;;  %v18166_v21 = vld [vmem:[%s26643_s0 + $0x2354] ss:$400 sps:$4 sm:$0xff]  }
 0x2e9   :  { %26785 = vst [vmem:[#allocation72_spill] sm:$0xff] %v22053_v11  ;;  %v22055_v35 = vpop.f32.mrf.mxu0  ;;  %v18167_v11 = vld [vmem:[%s26643_s0 + $0x2358] ss:$400 sps:$4 sm:$0xff]  }
 0x2ea   :  { %26786 = vst [vmem:[#allocation73_spill] sm:$0xff] %v22055_v35  ;;  %v18172_v35 = vld [vmem:[%s26643_s0 + $0x2034] ss:$400 sps:$4 sm:$0xff]  }
 0x2eb   :  { %8959 = vmatpush1.bf16.msra.mxu0 %v18152_v28  ;;  %9012 = vmatpush1.bf16.msra.mxu1 %v18155_v44  ;;  %v18169_v28 = vld [vmem:[%s26643_s0 + $0x235c] ss:$400 sps:$4 sm:$0xff]   ;;  %v18164_v44 = vld [vmem:[%s26643_s0 + $0x2350] ss:$400 sps:$4 sm:$0xff]  }
 0x2ec   :  { %8960 = vmatprep.subr.bf16.mxu0 %v18160_v20  ;;  %9013 = vmatprep.subr.bf16.mxu1 %v18163_v6  ;;  %v22069_v20 = vpop.f32.mrf.mxu1  ;;  %v22071_v6 = vpop.f32.mrf.mxu0 }
 0x2ed   :  { %26787 = vst [vmem:[#allocation74_spill] sm:$0xff] %v22069_v20  ;;  %26788 = vst [vmem:[#allocation75_spill] sm:$0xff] %v22071_v6  ;;  %v18173_v20 = vld [vmem:[%s26643_s0 + $0x2038] ss:$400 sps:$4 sm:$0xff]   ;;  %v18178_v6 = vld [vmem:[%s26643_s0 + $0x1d14] ss:$400 sps:$4 sm:$0xff]  }
 0x2ef   :  { %8961 = vmatpush1.bf16.msra.mxu0 %v18158_v2  ;;  %9014 = vmatpush1.bf16.msra.mxu1 %v18161_v9  ;;  %v18175_v2 = vld [vmem:[%s26643_s0 + $0x203c] ss:$400 sps:$4 sm:$0xff]   ;;  %v18170_v9 = vld [vmem:[%s26643_s0 + $0x2030] ss:$400 sps:$4 sm:$0xff]  }
 0x2f0   :  { %8970 = vmatprep.subr.bf16.mxu0 %v18166_v21  ;;  %9023 = vmatprep.subr.bf16.mxu1 %v18169_v28  ;;  %v22085_v21 = vpop.f32.mrf.mxu1  ;;  %v22087_v28 = vpop.f32.mrf.mxu0 }
 0x2f1   :  { %26789 = vst [vmem:[#allocation76_spill] sm:$0xff] %v22085_v21  ;;  %26790 = vst [vmem:[#allocation77_spill] sm:$0xff] %v22087_v28  ;;  %v18176_v21 = vld [vmem:[%s26643_s0 + $0x1d10] ss:$400 sps:$4 sm:$0xff]   ;;  %v18184_v28 = vld [vmem:[%s26643_s0 + $0x19f4] ss:$400 sps:$4 sm:$0xff]  }
 0x2f3   :  { %8971 = vmatpush2.bf16.msra.mxu0 %v18164_v44  ;;  %9024 = vmatpush2.bf16.msra.mxu1 %v18167_v11  ;;  %v18181_v11 = vld [vmem:[%s26643_s0 + $0x1d1c] ss:$400 sps:$4 sm:$0xff]   ;;  %v22095_v44 = vpop.f32.mrf.mxu1 }
 0x2f4   :  { %8972 = vmatprep.subr.bf16.mxu0 %v18172_v35  ;;  %9025 = vmatprep.subr.bf16.mxu1 %v18175_v2  ;;  %v18179_v35 = vld [vmem:[%s26643_s0 + $0x1d18] ss:$400 sps:$4 sm:$0xff]   ;;  %v22103_v2 = vpop.f32.mrf.mxu0 }
 0x2f5   :  { %26791 = vst [vmem:[#allocation78_spill] sm:$0xff] %v22103_v2  ;;  %v18190_v2 = vld [vmem:[%s26643_s0 + $0x16e4] ss:$400 sps:$4 sm:$0xff]  }
 0x2f7   :  { %8973 = vmatpush2.bf16.msra.mxu0 %v18170_v9  ;;  %9026 = vmatpush2.bf16.msra.mxu1 %v18173_v20  ;;  %v18187_v20 = vld [vmem:[%s26643_s0 + $0x19fc] ss:$400 sps:$4 sm:$0xff]   ;;  %v22111_v9 = vpop.f32.mrf.mxu1 }
 0x2f8   :  { %8974 = vmatprep.subr.bf16.mxu0 %v18178_v6  ;;  %9027 = vmatprep.subr.bf16.mxu1 %v18181_v11  ;;  %v18185_v6 = vld [vmem:[%s26643_s0 + $0x19f8] ss:$400 sps:$4 sm:$0xff]   ;;  %v22119_v11 = vpop.f32.mrf.mxu0 }
 0x2f9   :  { %26792 = vst [vmem:[#allocation79_spill] sm:$0xff] %v22119_v11  ;;  %v18196_v11 = vld [vmem:[%s26643_s0 + $0x13c4] ss:$400 sps:$4 sm:$0xff]  }
 0x2fb   :  { %8975 = vmatpush2.bf16.msra.mxu0 %v18176_v21  ;;  %9028 = vmatpush2.bf16.msra.mxu1 %v18179_v35  ;;  %v18193_v21 = vld [vmem:[%s26643_s0 + $0x16ec] ss:$400 sps:$4 sm:$0xff]   ;;  %v22127_v35 = vpop.f32.mrf.mxu1 }
 0x2fc   :  { %8976 = vmatprep.subr.bf16.mxu0 %v18184_v28  ;;  %9029 = vmatprep.subr.bf16.mxu1 %v18187_v20  ;;  %v18191_v28 = vld [vmem:[%s26643_s0 + $0x16e8] ss:$400 sps:$4 sm:$0xff]   ;;  %v22135_v20 = vpop.f32.mrf.mxu0 }
 0x2fe   :  { %v22153_v31 = vpop.f32.mrf.mxu0 }
 0x2ff   :  { %8977 = vmatpush2.bf16.msra.mxu0 %v18182_v41  ;;  %9030 = vmatpush2.bf16.msra.mxu1 %v18185_v6  ;;  %v18199_v41 = vld [vmem:[%s26643_s0 + $0x13cc] ss:$400 sps:$4 sm:$0xff]   ;;  %v22143_v6 = vpop.f32.mrf.mxu1  ;;  %26793 = vst [vmem:[#allocation80_spill] sm:$0xff] %v22153_v31 }
 0x300   :  { %9052 = vmatprep.subr.bf16.mxu0 %v18190_v2  ;;  %9105 = vmatprep.subr.bf16.mxu1 %v18193_v21  ;;  %v18194_v2 = vld [vmem:[%s26643_s0 + $0x13c0] ss:$400 sps:$4 sm:$0xff]   ;;  %v18197_v21 = vld [vmem:[%s26643_s0 + $0x13c8] ss:$400 sps:$4 sm:$0xff]  }
 0x302   :  { %9032 = vmatmul.mubr.bf16.vlgmr.msra.gmra.mxu1 %v21502_v62  ;;  %8979 = vmatmul.mubr.bf16.vlgmr.msra.gmra.mxu0 %v21502_v62  ;;  %v18205_v62 = vld [vmem:[%s26643_s0 + $0x10ac] ss:$400 sps:$4 sm:$0xff]  }
 0x303   :  { %9053 = vmatpush1.bf16.msra.mxu0 %v18188_v56  ;;  %9106 = vmatpush1.bf16.msra.mxu1 %v18191_v28  ;;  %v22165_v56 = vpop.f32.mrf.mxu1  ;;  %v18203_v28 = vld [vmem:[%s26643_s0 + $0x10a8] ss:$400 sps:$4 sm:$0xff]  }
 0x304   :  { %9054 = vmatprep.subr.bf16.mxu0 %v18196_v11  ;;  %9107 = vmatprep.subr.bf16.mxu1 %v18199_v41  ;;  %v18200_v11 = vld [vmem:[%s26643_s0 + $0x10a0] ss:$400 sps:$4 sm:$0xff]   ;;  %v22173_v41 = vpop.f32.mrf.mxu0 }
 0x305   :  { %16099 = vmatprep.mubr.msk.bf16.mxu1 %vm7349_vm0, %v21523_v46  ;;  %16097 = vmatprep.mubr.msk.bf16.mxu0 %vm7349_vm0, %v21523_v46  ;;  %v18208_v46 = vld [vmem:[%s26643_s0 + $0xd84] ss:$400 sps:$4 sm:$0xff]  }
 0x306   :  { %v22191_v31 = vpop.f32.mrf.mxu0 }
 0x307   :  { %9055 = vmatpush1.bf16.msra.mxu0 %v18194_v2  ;;  %9108 = vmatpush1.bf16.msra.mxu1 %v18197_v21  ;;  %v18211_v2 = vld [vmem:[%s26643_s0 + $0xd8c] ss:$400 sps:$4 sm:$0xff]   ;;  %v22181_v21 = vpop.f32.mrf.mxu1  ;;  %26794 = vst [vmem:[#allocation81_spill] sm:$0xff] %v22191_v31  ;;  %v18218_v31 = vld [vmem:[%s26643_s0 + $0x740] ss:$400 sps:$4 sm:$0xff]  }
 0x308   :  { %9056 = vmatprep.subr.bf16.mxu0 %v18202_v58  ;;  %9109 = vmatprep.subr.bf16.mxu1 %v18205_v62  ;;  %v18206_v58 = vld [vmem:[%s26643_s0 + $0xd80] ss:$400 sps:$4 sm:$0xff]   ;;  %v18209_v62 = vld [vmem:[%s26643_s0 + $0xd88] ss:$400 sps:$4 sm:$0xff]  }
 0x30a   :  { %9042 = vmatmul.mubr.bf16.gmra.mxu1 %v21550_v19  ;;  %8989 = vmatmul.mubr.bf16.gmra.mxu0 %v21550_v19  ;;  %v18217_v19 = vld [vmem:[%s26643_s0 + $0xa6c] ss:$400 sps:$4 sm:$0xff]  }
 0x30b   :  { %9057 = vmatpush1.bf16.msra.mxu0 %v18200_v11  ;;  %9110 = vmatpush1.bf16.msra.mxu1 %v18203_v28  ;;  %v22203_v11 = vpop.f32.mrf.mxu1  ;;  %v18212_v28 = vld [vmem:[%s26643_s0 + $0xa60] ss:$400 sps:$4 sm:$0xff]  }
 0x30c   :  { %9058 = vmatprep.subr.bf16.mxu0 %v18208_v46  ;;  %9111 = vmatprep.subr.bf16.mxu1 %v18211_v2  ;;  %v18215_v46 = vld [vmem:[%s26643_s0 + $0xa68] ss:$400 sps:$4 sm:$0xff]   ;;  %v22211_v2 = vpop.f32.mrf.mxu0 }
 0x30d   :  { %16102 = vmatprep.mubr.msk.bf16.mxu1 %vm7349_vm0, %v21579_v36  ;;  %16100 = vmatprep.mubr.msk.bf16.mxu0 %vm7349_vm0, %v21579_v36  ;;  %v18220_v36 = vld [vmem:[%s26643_s0 + $0x744] ss:$400 sps:$4 sm:$0xff]  }
 0x30f   :  { %9059 = vmatpush1.bf16.msra.mxu0 %v18206_v58  ;;  %9112 = vmatpush1.bf16.msra.mxu1 %v18209_v62  ;;  %v18223_v58 = vld [vmem:[%s26643_s0 + $0x74c] ss:$400 sps:$4 sm:$0xff]   ;;  %v22219_v62 = vpop.f32.mrf.mxu1 }
 0x310   :  { %9060 = vmatprep.subr.bf16.mxu0 %v18214_v7  ;;  %9113 = vmatprep.subr.bf16.mxu1 %v18217_v19  ;;  %v18221_v7 = vld [vmem:[%s26643_s0 + $0x748] ss:$400 sps:$4 sm:$0xff]   ;;  %v22227_v19 = vpop.f32.mrf.mxu0 }
 0x311   :  { %26795 = vst [vmem:[#allocation82_spill] sm:$0xff] %v22227_v19  ;;  %v22229_v30 = vpop.f32.mrf.mxu1  ;;  %v18227_v19 = vld [vmem:[%s26643_s0 + $0x428] ss:$400 sps:$4 sm:$0xff]  }
 0x312   :  { %26796 = vst [vmem:[#allocation83_spill] sm:$0xff] %v22229_v30  ;;  %v11364_v30 = vld [vmem:[%s26646_s4 + $0x110] sm:$0xff] }
 0x313   :  { %9061 = vmatpush1.bf16.msra.mxu0 %v18212_v28  ;;  %9114 = vmatpush1.bf16.msra.mxu1 %v18215_v46  ;;  %v18229_v28 = vld [vmem:[%s26643_s0 + $0x42c] ss:$400 sps:$4 sm:$0xff]   ;;  %v18224_v46 = vld [vmem:[%s26643_s0 + $0x420] ss:$400 sps:$4 sm:$0xff]  }
 0x314   :  { %9062 = vmatprep.subr.bf16.mxu0 %v18220_v36  ;;  %9115 = vmatprep.subr.bf16.mxu1 %v18223_v58  ;;  %v22243_v36 = vpop.f32.mrf.mxu0  ;;  %v22245_v58 = vpop.f32.mrf.mxu1 }
 0x315   :  { %26797 = vst [vmem:[#allocation84_spill] sm:$0xff] %v22245_v58  ;;  %v23313_v58 = vld [vmem:[%s26644_s1 + $0x4] ss:$8 sps:$4 sm:$0xff]  }
 0x317   :  { %9063 = vmatpush1.bf16.msra.mxu0 %v18218_v31  ;;  %9116 = vmatpush1.bf16.msra.mxu1 %v18221_v7  ;;  %v18235_v31 = vld [vmem:[%s26643_s0 + $0x10c] ss:$400 sps:$4 sm:$0xff]   ;;  %v22253_v7 = vpop.f32.mrf.mxu0 }
 0x318   :  { %9064 = vmatprep.subr.bf16.mxu0 %v18226_v50  ;;  %9117 = vmatprep.subr.bf16.mxu1 %v18229_v28  ;;  %v18233_v50 = vld [vmem:[%s26643_s0 + $0x108] ss:$400 sps:$4 sm:$0xff]   ;;  %v22261_v28 = vpop.f32.mrf.mxu1 }
 0x319   :  { %26798 = vst [vmem:[#allocation85_spill] sm:$0xff] %v22261_v28 }
 0x31b   :  { %9065 = vmatpush1.bf16.msra.mxu0 %v18224_v46  ;;  %9118 = vmatpush1.bf16.msra.mxu1 %v18227_v19  ;;  %v18241_v19 = vld [vmem:[%s26643_s0 + $0x236c] ss:$400 sps:$4 sm:$0xff]   ;;  %v22269_v46 = vpop.f32.mrf.mxu0 }
 0x31c   :  { %9066 = vmatprep.subr.bf16.mxu0 %v18232_v61  ;;  %9119 = vmatprep.subr.bf16.mxu1 %v18235_v31  ;;  %v18239_v61 = vld [vmem:[%s26643_s0 + $0x2368] ss:$400 sps:$4 sm:$0xff]   ;;  %v22277_v31 = vpop.f32.mrf.mxu1 }
 0x31d   :  { %26799 = vst [vmem:[#allocation86_spill] sm:$0xff] %v22277_v31 }
 0x31f   :  { %9067 = vmatpush1.bf16.msra.mxu0 %v18230_v18  ;;  %9120 = vmatpush1.bf16.msra.mxu1 %v18233_v50  ;;  %v18247_v18 = vld [vmem:[%s26643_s0 + $0x204c] ss:$400 sps:$4 sm:$0xff]   ;;  %v22285_v50 = vpop.f32.mrf.mxu0 }
 0x320   :  { %9076 = vmatprep.subr.bf16.mxu0 %v18238_v42  ;;  %9129 = vmatprep.subr.bf16.mxu1 %v18241_v19  ;;  %v18245_v42 = vld [vmem:[%s26643_s0 + $0x2048] ss:$400 sps:$4 sm:$0xff]   ;;  %v22293_v19 = vpop.f32.mrf.mxu1 }
 0x321   :  { %26800 = vst [vmem:[#allocation87_spill] sm:$0xff] %v22293_v19 }
 0x323   :  { %9077 = vmatpush2.bf16.msra.mxu0 %v18236_v26  ;;  %9130 = vmatpush2.bf16.msra.mxu1 %v18239_v61  ;;  %v18253_v26 = vld [vmem:[%s26643_s0 + $0x1d2c] ss:$400 sps:$4 sm:$0xff]   ;;  %v22301_v61 = vpop.f32.mrf.mxu0 }
 0x324   :  { %9078 = vmatprep.subr.bf16.mxu0 %v18244_v57  ;;  %9131 = vmatprep.subr.bf16.mxu1 %v18247_v18  ;;  %v18251_v57 = vld [vmem:[%s26643_s0 + $0x1d28] ss:$400 sps:$4 sm:$0xff]   ;;  %v22309_v18 = vpop.f32.mrf.mxu1 }
 0x325   :  { %26801 = vst [vmem:[#allocation88_spill] sm:$0xff] %v22309_v18 }
 0x327   :  { %9079 = vmatpush2.bf16.msra.mxu0 %v18242_v25  ;;  %9132 = vmatpush2.bf16.msra.mxu1 %v18245_v42  ;;  %v18259_v25 = vld [vmem:[%s26643_s0 + $0x1a0c] ss:$400 sps:$4 sm:$0xff]   ;;  %v22317_v42 = vpop.f32.mrf.mxu0 }
 0x328   :  { %9080 = vmatprep.subr.bf16.mxu0 %v18250_v32  ;;  %9133 = vmatprep.subr.bf16.mxu1 %v18253_v26  ;;  %v18257_v32 = vld [vmem:[%s26643_s0 + $0x1a08] ss:$400 sps:$4 sm:$0xff]   ;;  %v22325_v26 = vpop.f32.mrf.mxu1 }
 0x329   :  { %26802 = vst [vmem:[#allocation89_spill] sm:$0xff] %v22325_v26  ;;  %v18280_v26 = vld [vmem:[%s26643_s0 + $0xd94] ss:$400 sps:$4 sm:$0xff]  }
 0x32b   :  { %9081 = vmatpush2.bf16.msra.mxu0 %v18248_v34  ;;  %9134 = vmatpush2.bf16.msra.mxu1 %v18251_v57  ;;  %v18265_v34 = vld [vmem:[%s26643_s0 + $0x16fc] ss:$400 sps:$4 sm:$0xff]   ;;  %v22333_v57 = vpop.f32.mrf.mxu0 }
 0x32c   :  { %9082 = vmatprep.subr.bf16.mxu0 %v18256_v1  ;;  %9135 = vmatprep.subr.bf16.mxu1 %v18259_v25  ;;  %v18263_v1 = vld [vmem:[%s26643_s0 + $0x16f8] ss:$400 sps:$4 sm:$0xff]   ;;  %v22341_v25 = vpop.f32.mrf.mxu1 }
 0x32d   :  { %26803 = vst [vmem:[#allocation90_spill] sm:$0xff] %v22341_v25  ;;  %v18275_v25 = vld [vmem:[%s26643_s0 + $0x10b8] ss:$400 sps:$4 sm:$0xff]  }
 0x32e   :  { %v22351_v49 = vpop.f32.mrf.mxu1 }
 0x32f   :  { %9083 = vmatpush2.bf16.msra.mxu0 %v18254_v22  ;;  %9136 = vmatpush2.bf16.msra.mxu1 %v18257_v32  ;;  %v18271_v22 = vld [vmem:[%s26643_s0 + $0x13dc] ss:$400 sps:$4 sm:$0xff]   ;;  %v22349_v32 = vpop.f32.mrf.mxu0  ;;  %26804 = vst [vmem:[#allocation91_spill] sm:$0xff] %v22351_v49  ;;  %v18274_v49 = vld [vmem:[%s26643_s0 + $0x10b4] ss:$400 sps:$4 sm:$0xff]  }
 0x330   :  { %9158 = vmatprep.subr.bf16.mxu0 %v18262_v8  ;;  %9211 = vmatprep.subr.bf16.mxu1 %v18265_v34  ;;  %v18266_v8 = vld [vmem:[%s26643_s0 + $0x13d0] ss:$400 sps:$4 sm:$0xff]   ;;  %v18269_v34 = vld [vmem:[%s26643_s0 + $0x13d8] ss:$400 sps:$4 sm:$0xff]  }
 0x332   :  { %9138 = vmatmul.mubr.bf16.vlgmr.msra.gmra.mxu1 %v22356_v24  ;;  %9085 = vmatmul.mubr.bf16.vlgmr.msra.gmra.mxu0 %v22356_v24 }
 0x333   :  { %9159 = vmatpush1.bf16.msra.mxu0 %v18260_v63  ;;  %9212 = vmatpush1.bf16.msra.mxu1 %v18263_v1  ;;  %v22375_v63 = vld [vmem:[%s26644_s1 + $0x14] ss:$8 sps:$4 sm:$0x7f]   ;;  %v22383_v1 = vpop.f32.mrf.mxu1 }
 0x334   :  { %9160 = vmatprep.subr.bf16.mxu0 %v18268_v4  ;;  %9213 = vmatprep.subr.bf16.mxu1 %v18271_v22  ;;  %v22381_v4 = vpop.f32.mrf.mxu0  ;;  %26805 = vst [vmem:[#allocation92_spill] sm:$0xff] %v22383_v1  ;;  %v18272_v22 = vld [vmem:[%s26643_s0 + $0x10b0] ss:$400 sps:$4 sm:$0xff]  }
 0x335   :  { %16103 = vmatprep.mubr.msk.bf16.mxu1 %vm7349_vm0, %v22375_v63  ;;  %16101 = vmatprep.mubr.msk.bf16.mxu0 %vm7349_vm0, %v22375_v63  ;;  %v22404_v1 = vld [vmem:[%s26644_s1 + $0x10] ss:$8 sps:$4 sm:$0x7f]  }
 0x336   :  { %v22391_v16 = vpop.f32.mrf.mxu0 }
 0x337   :  { %9161 = vmatpush1.bf16.msra.mxu0 %v18266_v8  ;;  %9214 = vmatpush1.bf16.msra.mxu1 %v18269_v34  ;;  %26806 = vst [vmem:[#allocation93_spill] sm:$0xff] %v22391_v16  ;;  %v18283_v8 = vld [vmem:[%s26643_s0 + $0xd9c] ss:$400 sps:$4 sm:$0xff]   ;;  %v22399_v34 = vpop.f32.mrf.mxu1 }
 0x338   :  { %9162 = vmatprep.subr.bf16.mxu0 %v18274_v49  ;;  %9215 = vmatprep.subr.bf16.mxu1 %v18277_v13  ;;  %26807 = vst [vmem:[#allocation94_spill] sm:$0xff] %v22399_v34  ;;  %v18278_v49 = vld [vmem:[%s26643_s0 + $0xd90] ss:$400 sps:$4 sm:$0xff]   ;;  %v18281_v13 = vld [vmem:[%s26643_s0 + $0xd98] ss:$400 sps:$4 sm:$0xff]   ;;  %v22414_v34 = vpop.f32.mrf.mxu0 }
 0x339   :  { %26808 = vst [vmem:[#allocation95_spill] sm:$0xff] %v22414_v34  ;;  %v18287_v34 = vld [vmem:[%s26643_s0 + $0xa78] ss:$400 sps:$4 sm:$0xff]  }
 0x33a   :  { %9148 = vmatmul.mubr.bf16.gmra.mxu1 %v22404_v1  ;;  %9095 = vmatmul.mubr.bf16.gmra.mxu0 %v22404_v1  ;;  %v22439_v16 = vpop.f32.mrf.mxu0 }
 0x33b   :  { %9163 = vmatpush1.bf16.msra.mxu0 %v18272_v22  ;;  %9216 = vmatpush1.bf16.msra.mxu1 %v18275_v25  ;;  %v18289_v25 = vld [vmem:[%s26643_s0 + $0xa7c] ss:$400 sps:$4 sm:$0xff]   ;;  %26810 = vst [vmem:[#allocation97_spill] sm:$0xff] %v22439_v16  ;;  %v18298_v16 = vld [vmem:[%s26643_s0 + $0x434] ss:$400 sps:$4 sm:$0xff]  }
 0x33c   :  { %9164 = vmatprep.subr.bf16.mxu0 %v18280_v26  ;;  %9217 = vmatprep.subr.bf16.mxu1 %v18283_v8  ;;  %v22425_v22 = vld [vmem:[%s26644_s1 + $0x4] ss:$8 sps:$4 sm:$0xff]   ;;  %v22431_v26 = vpop.f32.mrf.mxu1  ;;  %v18284_v8 = vld [vmem:[%s26643_s0 + $0xa70] ss:$400 sps:$4 sm:$0xff]  }
 0x33d   :  { %16106 = vmatprep.mubr.msk.bf16.mxu1 %vm7349_vm0, %v22425_v22  ;;  %16104 = vmatprep.mubr.msk.bf16.mxu0 %vm7349_vm0, %v22425_v22  ;;  %26809 = vst [vmem:[#allocation96_spill] sm:$0xff] %v22431_v26  ;;  %v18290_v26 = vld [vmem:[%s26643_s0 + $0x750] ss:$400 sps:$4 sm:$0xff]  }
 0x33f   :  { %9165 = vmatpush1.bf16.msra.mxu0 %v18278_v49  ;;  %9218 = vmatpush1.bf16.msra.mxu1 %v18281_v13  ;;  %v18295_v49 = vld [vmem:[%s26643_s0 + $0x75c] ss:$400 sps:$4 sm:$0xff]   ;;  %v22447_v13 = vpop.f32.mrf.mxu1 }
 0x340   :  { %9166 = vmatprep.subr.bf16.mxu0 %v18286_v51  ;;  %9219 = vmatprep.subr.bf16.mxu1 %v18289_v25  ;;  %26811 = vst [vmem:[#allocation98_spill] sm:$0xff] %v22447_v13  ;;  %v18293_v51 = vld [vmem:[%s26643_s0 + $0x758] ss:$400 sps:$4 sm:$0xff]   ;;  %v22455_v25 = vpop.f32.mrf.mxu0  ;;  %v18296_v13 = vld [vmem:[%s26643_s0 + $0x430] ss:$400 sps:$4 sm:$0xff]  }
 0x341   :  { %26812 = vst [vmem:[#allocation99_spill] sm:$0xff] %v22455_v25  ;;  %v18304_v25 = vld [vmem:[%s26643_s0 + $0x114] ss:$400 sps:$4 sm:$0xff]  }
 0x343   :  { %9167 = vmatpush1.bf16.msra.mxu0 %v18284_v8  ;;  %9220 = vmatpush1.bf16.msra.mxu1 %v18287_v34  ;;  %v18301_v34 = vld [vmem:[%s26643_s0 + $0x43c] ss:$400 sps:$4 sm:$0xff]   ;;  %v22463_v8 = vpop.f32.mrf.mxu1 }
 0x344   :  { %9168 = vmatprep.subr.bf16.mxu0 %v18292_v52  ;;  %9221 = vmatprep.subr.bf16.mxu1 %v18295_v49  ;;  %26813 = vst [vmem:[#allocation100_spill] sm:$0xff] %v22463_v8  ;;  %v18299_v52 = vld [vmem:[%s26643_s0 + $0x438] ss:$400 sps:$4 sm:$0xff]   ;;  %v22471_v49 = vpop.f32.mrf.mxu0  ;;  %v18302_v8 = vld [vmem:[%s26643_s0 + $0x110] ss:$400 sps:$4 sm:$0xff]  }
 0x345   :  { %26814 = vst [vmem:[#allocation101_spill] sm:$0xff] %v22471_v49  ;;  %v18310_v49 = vld [vmem:[%s26643_s0 + $0x2374] ss:$400 sps:$4 sm:$0xff]  }
 0x347   :  { %9169 = vmatpush1.bf16.msra.mxu0 %v18290_v26  ;;  %9222 = vmatpush1.bf16.msra.mxu1 %v18293_v51  ;;  %v18307_v26 = vld [vmem:[%s26643_s0 + $0x11c] ss:$400 sps:$4 sm:$0xff]   ;;  %v22479_v51 = vpop.f32.mrf.mxu1 }
 0x348   :  { %9170 = vmatprep.subr.bf16.mxu0 %v18298_v16  ;;  %9223 = vmatprep.subr.bf16.mxu1 %v18301_v34  ;;  %26815 = vst [vmem:[#allocation102_spill] sm:$0xff] %v22479_v51  ;;  %v18305_v16 = vld [vmem:[%s26643_s0 + $0x118] ss:$400 sps:$4 sm:$0xff]   ;;  %v22487_v34 = vpop.f32.mrf.mxu0  ;;  %v18308_v51 = vld [vmem:[%s26643_s0 + $0x2370] ss:$400 sps:$4 sm:$0xff]  }
 0x349   :  { %26816 = vst [vmem:[#allocation103_spill] sm:$0xff] %v22487_v34 }
 0x34b   :  { %9171 = vmatpush1.bf16.msra.mxu0 %v18296_v13  ;;  %9224 = vmatpush1.bf16.msra.mxu1 %v18299_v52  ;;  %v18313_v13 = vld [vmem:[%s26643_s0 + $0x237c] ss:$400 sps:$4 sm:$0xff]   ;;  %v22495_v52 = vpop.f32.mrf.mxu1 }
 0x34c   :  { %9172 = vmatprep.subr.bf16.mxu0 %v18304_v25  ;;  %9225 = vmatprep.subr.bf16.mxu1 %v18307_v26  ;;  %26817 = vst [vmem:[#allocation104_spill] sm:$0xff] %v22495_v52  ;;  %v18311_v25 = vld [vmem:[%s26643_s0 + $0x2378] ss:$400 sps:$4 sm:$0xff]   ;;  %v22503_v26 = vpop.f32.mrf.mxu0  ;;  %v18316_v52 = vld [vmem:[%s26643_s0 + $0x2054] ss:$400 sps:$4 sm:$0xff]  }
 0x34d   :  { %26818 = vst [vmem:[#allocation105_spill] sm:$0xff] %v22503_v26  ;;  %v22505_v34 = vpop.f32.mrf.mxu1  ;;  %v18322_v26 = vld [vmem:[%s26643_s0 + $0x1d34] ss:$400 sps:$4 sm:$0xff]  }
 0x34e   :  { %26819 = vst [vmem:[#allocation106_spill] sm:$0xff] %v22505_v34  ;;  %v18317_v34 = vld [vmem:[%s26643_s0 + $0x2058] ss:$400 sps:$4 sm:$0xff]  }
 0x34f   :  { %9173 = vmatpush1.bf16.msra.mxu0 %v18302_v8  ;;  %9226 = vmatpush1.bf16.msra.mxu1 %v18305_v16  ;;  %v18319_v8 = vld [vmem:[%s26643_s0 + $0x205c] ss:$400 sps:$4 sm:$0xff]   ;;  %v18314_v16 = vld [vmem:[%s26643_s0 + $0x2050] ss:$400 sps:$4 sm:$0xff]  }
 0x350   :  { %9182 = vmatprep.subr.bf16.mxu0 %v18310_v49  ;;  %9235 = vmatprep.subr.bf16.mxu1 %v18313_v13  ;;  %v22519_v49 = vpop.f32.mrf.mxu0  ;;  %v22521_v13 = vpop.f32.mrf.mxu1 }
 0x351   :  { %26820 = vst [vmem:[#allocation107_spill] sm:$0xff] %v22519_v49  ;;  %26821 = vst [vmem:[#allocation108_spill] sm:$0xff] %v22521_v13  ;;  %v18320_v49 = vld [vmem:[%s26643_s0 + $0x1d30] ss:$400 sps:$4 sm:$0xff]   ;;  %v18328_v13 = vld [vmem:[%s26643_s0 + $0x1a14] ss:$400 sps:$4 sm:$0xff]  }
 0x353   :  { %9183 = vmatpush2.bf16.msra.mxu0 %v18308_v51  ;;  %9236 = vmatpush2.bf16.msra.mxu1 %v18311_v25  ;;  %v18325_v51 = vld [vmem:[%s26643_s0 + $0x1d3c] ss:$400 sps:$4 sm:$0xff]   ;;  %v22529_v25 = vpop.f32.mrf.mxu0 }
 0x354   :  { %9184 = vmatprep.subr.bf16.mxu0 %v18316_v52  ;;  %9237 = vmatprep.subr.bf16.mxu1 %v18319_v8  ;;  %26822 = vst [vmem:[#allocation109_spill] sm:$0xff] %v22529_v25  ;;  %v18323_v52 = vld [vmem:[%s26643_s0 + $0x1d38] ss:$400 sps:$4 sm:$0xff]   ;;  %v22537_v8 = vpop.f32.mrf.mxu1  ;;  %v22550_v25 = vld [vmem:[%s26643_s0 + $0x1a10] ss:$400 sps:$4 sm:$0xff]  }
 0x355   :  { %26823 = vst [vmem:[#allocation110_spill] sm:$0xff] %v22537_v8  ;;  %v22562_v8 = vld [vmem:[%s26643_s0 + $0x1704] ss:$400 sps:$4 sm:$0xff]  }
 0x357   :  { %9185 = vmatpush2.bf16.msra.mxu0 %v18314_v16  ;;  %9238 = vmatpush2.bf16.msra.mxu1 %v18317_v34  ;;  %v18331_v34 = vld [vmem:[%s26643_s0 + $0x1a1c] ss:$400 sps:$4 sm:$0xff]   ;;  %v22545_v16 = vpop.f32.mrf.mxu0 }
 0x358   :  { %9186 = vmatprep.subr.bf16.mxu0 %v18322_v26  ;;  %9239 = vmatprep.subr.bf16.mxu1 %v18325_v51  ;;  %26824 = vst [vmem:[#allocation111_spill] sm:$0xff] %v22545_v16  ;;  %v22555_v26 = vld [vmem:[%s26643_s0 + $0x1a18] ss:$400 sps:$4 sm:$0xff]   ;;  %v22557_v51 = vpop.f32.mrf.mxu1 }
 0x359   :  { %26825 = vst [vmem:[#allocation112_spill] sm:$0xff] %v22557_v51  ;;  %v18332_v51 = vld [vmem:[%s26643_s0 + $0x1700] ss:$400 sps:$4 sm:$0xff]   ;;  %v18335_v16 = vld [vmem:[%s26643_s0 + $0x1708] ss:$400 sps:$4 sm:$0xff]  }
 0x35a   :  { %v22684_v18 = vpop.f32.mrf.mxu1 }
 0x35b   :  { %9187 = vmatpush2.bf16.msra.mxu0 %v18320_v49  ;;  %9240 = vmatpush2.bf16.msra.mxu1 %v18323_v52  ;;  %v22567_v49 = vld [vmem:[%s26643_s0 + $0x170c] ss:$400 sps:$4 sm:$0xff]   ;;  %v26687_v52 = vmov 0   ;;  %26827 = vst [vmem:[#allocation114_spill] sm:$0xff] %v22684_v18  ;;  %v10308_v18 = vld [vmem:[%s26645_s2 + $0x10] sm:$0xff] }
 0x35c   :  { %9188 = vmatprep.subr.bf16.mxu0 %v18328_v13  ;;  %9241 = vmatprep.subr.bf16.mxu1 %v18331_v34  ;;  %27 = vst [vmem:[#allocation2] sm:$0xf] %v26687_v52  ;;  %28 = vst [vmem:[#allocation2 + $0x4] sm:$0xf] %v26687_v52  ;;  %v10306_v13 = vld [vmem:[%s26645_s2] sm:$0xff]  ;;  %v22674_v34 = vpop.f32.mrf.mxu0 }
 0x35d   :  { %29 = vst [vmem:[#allocation2 + $0x8] sm:$0xf] %v26687_v52  ;;  %30 = vst [vmem:[#allocation2 + $0xc] sm:$0xf] %v26687_v52  ;;  %17029 = vset.pattern.permute.xlu1 %v26687_v52  ;;  %17028 = vset.pattern.permute.xlu0 %v26687_v52 }
 0x35e   :  { %31 = vst [vmem:[#allocation2 + $0x10] sm:$0xf] %v26687_v52  ;;  %32 = vst [vmem:[#allocation2 + $0x14] sm:$0xf] %v26687_v52  ;;  %10312 = vperm.xlu1 %17029, %v10306_v13   ;;  %v22694_v13 = vpop.f32.mrf.mxu0  ;;  %10322 = vperm.xlu0 %17028, %v10308_v18   ;;  %v18355_v18 = vld [vmem:[%s26643_s0 + $0xdac] ss:$400 sps:$4 sm:$0xff]  }
 0x35f   :  { %33 = vst [vmem:[#allocation2 + $0x18] sm:$0xf] %v26687_v52  ;;  %34 = vst [vmem:[#allocation2 + $0x1c] sm:$0xf] %v26687_v52  ;;  %9189 = vmatpush2.bf16.msra.mxu0 %v22550_v25  ;;  %9242 = vmatpush2.bf16.msra.mxu1 %v22555_v26  ;;  %v18340_v25 = vld [vmem:[%s26643_s0 + $0x13e4] ss:$400 sps:$4 sm:$0xff]  }
 0x360   :  { %35 = vst [vmem:[#allocation2 + $0x20] sm:$0xf] %v26687_v52  ;;  %36 = vst [vmem:[#allocation2 + $0x24] sm:$0xf] %v26687_v52  ;;  %9264 = vmatprep.subr.bf16.mxu0 %v22562_v8  ;;  %9317 = vmatprep.subr.bf16.mxu1 %v22567_v49  ;;  %v18343_v26 = vld [vmem:[%s26643_s0 + $0x13ec] ss:$400 sps:$4 sm:$0xff]  }
 0x361   :  { %37 = vst [vmem:[#allocation2 + $0x28] sm:$0xf] %v26687_v52  ;;  %38 = vst [vmem:[#allocation2 + $0x2c] sm:$0xf] %v26687_v52  ;;  %v18338_v8 = vld [vmem:[%s26643_s0 + $0x13e0] ss:$400 sps:$4 sm:$0xff]  }
 0x362   :  { %39 = vst [vmem:[#allocation2 + $0x30] sm:$0xf] %v26687_v52  ;;  %40 = vst [vmem:[#allocation2 + $0x34] sm:$0xf] %v26687_v52  ;;  %9244 = vmatmul.mubr.bf16.vlgmr.msra.gmra.mxu1 %v22356_v24  ;;  %9191 = vmatmul.mubr.bf16.vlgmr.msra.gmra.mxu0 %v22356_v24  ;;  %v18341_v49 = vld [vmem:[%s26643_s0 + $0x13e8] ss:$400 sps:$4 sm:$0xff]  }
 0x363   :  { %41 = vst [vmem:[#allocation2 + $0x38] sm:$0xf] %v26687_v52  ;;  %42 = vst [vmem:[#allocation2 + $0x3c] sm:$0xf] %v26687_v52  ;;  %9265 = vmatpush1.bf16.msra.mxu0 %v18332_v51  ;;  %9318 = vmatpush1.bf16.msra.mxu1 %v18335_v16  ;;  %v18346_v16 = vld [vmem:[%s26643_s0 + $0x10c4] ss:$400 sps:$4 sm:$0xff]  }
 0x364   :  { %43 = vst [vmem:[#allocation2 + $0x40] sm:$0xf] %v26687_v52  ;;  %44 = vst [vmem:[#allocation2 + $0x44] sm:$0xf] %v26687_v52  ;;  %9266 = vmatprep.subr.bf16.mxu0 %v18340_v25  ;;  %9319 = vmatprep.subr.bf16.mxu1 %v18343_v26  ;;  %v18349_v51 = vld [vmem:[%s26643_s0 + $0x10cc] ss:$400 sps:$4 sm:$0xff]  }
 0x365   :  { %45 = vst [vmem:[#allocation2 + $0x48] sm:$0xf] %v26687_v52  ;;  %46 = vst [vmem:[#allocation2 + $0x4c] sm:$0xf] %v26687_v52  ;;  %16107 = vmatprep.mubr.msk.bf16.mxu1 %vm7349_vm0, %v22375_v63  ;;  %16105 = vmatprep.mubr.msk.bf16.mxu0 %vm7349_vm0, %v22375_v63  ;;  %v18344_v25 = vld [vmem:[%s26643_s0 + $0x10c0] ss:$400 sps:$4 sm:$0xff]  }
 0x366   :  { %47 = vst [vmem:[#allocation2 + $0x50] sm:$0xf] %v26687_v52  ;;  %48 = vst [vmem:[#allocation2 + $0x54] sm:$0xf] %v26687_v52  ;;  %v18347_v26 = vld [vmem:[%s26643_s0 + $0x10c8] ss:$400 sps:$4 sm:$0xff]  }
 0x367   :  { %49 = vst [vmem:[#allocation2 + $0x58] sm:$0xf] %v26687_v52  ;;  %50 = vst [vmem:[#allocation2 + $0x5c] sm:$0xf] %v26687_v52  ;;  %9267 = vmatpush1.bf16.msra.mxu0 %v18338_v8  ;;  %9320 = vmatpush1.bf16.msra.mxu1 %v18341_v49  ;;  %v18350_v8 = vld [vmem:[%s26643_s0 + $0xda0] ss:$400 sps:$4 sm:$0xff]  }
 0x368   :  { %51 = vst [vmem:[#allocation2 + $0x60] sm:$0xf] %v26687_v52  ;;  %52 = vst [vmem:[#allocation2 + $0x64] sm:$0xf] %v26687_v52  ;;  %9268 = vmatprep.subr.bf16.mxu0 %v18346_v16  ;;  %9321 = vmatprep.subr.bf16.mxu1 %v18349_v51  ;;  %v18353_v49 = vld [vmem:[%s26643_s0 + $0xda8] ss:$400 sps:$4 sm:$0xff]  }
 0x369   :  { %53 = vst [vmem:[#allocation2 + $0x68] sm:$0xf] %v26687_v52  ;;  %54 = vst [vmem:[#allocation2 + $0x6c] sm:$0xf] %v26687_v52  ;;  %v10309_v16 = vld [vmem:[%s26645_s2 + $0x18] sm:$0x3f] }
 0x36a   :  { %55 = vst [vmem:[#allocation2 + $0x70] sm:$0xf] %v26687_v52  ;;  %56 = vst [vmem:[#allocation2 + $0x74] sm:$0xf] %v26687_v52  ;;  %9254 = vmatmul.mubr.bf16.gmra.mxu1 %v22404_v1  ;;  %9201 = vmatmul.mubr.bf16.gmra.mxu0 %v22404_v1 }
 0x36b   :  { %57 = vst [vmem:[#allocation2 + $0x78] sm:$0xf] %v26687_v52  ;;  %58 = vst [vmem:[#allocation2 + $0x7c] sm:$0xf] %v26687_v52  ;;  %9269 = vmatpush1.bf16.msra.mxu0 %v18344_v25  ;;  %9322 = vmatpush1.bf16.msra.mxu1 %v18347_v26  ;;  %v18358_v25 = vld [vmem:[%s26643_s0 + $0xa84] ss:$400 sps:$4 sm:$0xff]  }
 0x36c   :  { %59 = vst [vmem:[#allocation2 + $0x80] sm:$0xf] %v26687_v52  ;;  %60 = vst [vmem:[#allocation2 + $0x84] sm:$0xf] %v26687_v52  ;;  %9323 = vmatprep.subr.bf16.mxu1 %v18355_v18  ;;  %v18361_v26 = vld [vmem:[%s26643_s0 + $0xa8c] ss:$400 sps:$4 sm:$0xff]   ;;  %16110 = vmatprep.mubr.msk.bf16.mxu1 %vm7349_vm0, %v22425_v22 }
 0x36d   :  { %61 = vst [vmem:[#allocation2 + $0x88] sm:$0xf] %v26687_v52  ;;  %62 = vst [vmem:[#allocation2 + $0x8c] sm:$0xf] %v26687_v52  ;;  %16108 = vmatprep.mubr.msk.bf16.mxu0 %vm7349_vm0, %v22425_v22  ;;  %10327 = vperm.xlu0 %17028, %v10309_v16   ;;  %v18359_v18 = vld [vmem:[%s26643_s0 + $0xa88] ss:$400 sps:$4 sm:$0xff]  }
 0x36e   :  { %63 = vst [vmem:[#allocation2 + $0x90] sm:$0xf] %v26687_v52  ;;  %64 = vst [vmem:[#allocation2 + $0x94] sm:$0xf] %v26687_v52  ;;  %v18364_v16 = vld [vmem:[%s26643_s0 + $0x764] ss:$400 sps:$4 sm:$0xff]  }
 0x36f   :  { %65 = vst [vmem:[#allocation2 + $0x98] sm:$0xf] %v26687_v52  ;;  %66 = vst [vmem:[#allocation2 + $0x9c] sm:$0xf] %v26687_v52  ;;  %9324 = vmatpush1.bf16.msra.mxu1 %v18353_v49 }
 0x370   :  { %67 = vst [vmem:[#allocation2 + $0xa0] sm:$0xf] %v26687_v52  ;;  %68 = vst [vmem:[#allocation2 + $0xa4] sm:$0xf] %v26687_v52  ;;  %9325 = vmatprep.subr.bf16.mxu1 %v18361_v26  ;;  %v18365_v26 = vld [vmem:[%s26643_s0 + $0x768] ss:$400 sps:$4 sm:$0xff]  }
 0x371   :  { %69 = vst [vmem:[#allocation2 + $0xa8] sm:$0xf] %v26687_v52  ;;  %70 = vst [vmem:[#allocation2 + $0xac] sm:$0xf] %v26687_v52 }
 0x372   :  { %71 = vst [vmem:[#allocation2 + $0xb0] sm:$0xf] %v26687_v52  ;;  %72 = vst [vmem:[#allocation2 + $0xb4] sm:$0xf] %v26687_v52 }
 0x373   :  { %73 = vst [vmem:[#allocation2 + $0xb8] sm:$0xf] %v26687_v52  ;;  %74 = vst [vmem:[#allocation2 + $0xbc] sm:$0xf] %v26687_v52  ;;  %9326 = vmatpush1.bf16.msra.mxu1 %v18359_v18  ;;  %v11361_v18 = vld [vmem:[%s26646_s4 + $0xf8] sm:$0xff] }
 0x374   :  { %75 = vst [vmem:[#allocation2 + $0xc0] sm:$0xf] %v26687_v52  ;;  %76 = vst [vmem:[#allocation2 + $0xc4] sm:$0xf] %v26687_v52 }
 0x375   :  { %77 = vst [vmem:[#allocation2 + $0xc8] sm:$0xf] %v26687_v52  ;;  %78 = vst [vmem:[#allocation2 + $0xcc] sm:$0xf] %v26687_v52 }
 0x376   :  { %79 = vst [vmem:[#allocation2 + $0xd0] sm:$0xf] %v26687_v52  ;;  %80 = vst [vmem:[#allocation2 + $0xd4] sm:$0xf] %v26687_v52 }
 0x377   :  { %81 = vst [vmem:[#allocation2 + $0xd8] sm:$0xf] %v26687_v52  ;;  %82 = vst [vmem:[#allocation2 + $0xdc] sm:$0xf] %v26687_v52 }
 0x378   :  { %83 = vst [vmem:[#allocation2 + $0xe0] sm:$0xf] %v26687_v52  ;;  %84 = vst [vmem:[#allocation2 + $0xe4] sm:$0xf] %v26687_v52 }
 0x379   :  { %85 = vst [vmem:[#allocation2 + $0xe8] sm:$0xf] %v26687_v52  ;;  %86 = vst [vmem:[#allocation2 + $0xec] sm:$0xf] %v26687_v52 }
 0x37a   :  { %87 = vst [vmem:[#allocation2 + $0xf0] sm:$0xf] %v26687_v52  ;;  %88 = vst [vmem:[#allocation2 + $0xf4] sm:$0xf] %v26687_v52 }
 0x37b   :  { %89 = vst [vmem:[#allocation2 + $0xf8] sm:$0xf] %v26687_v52  ;;  %90 = vst [vmem:[#allocation2 + $0xfc] sm:$0xf] %v26687_v52 }
 0x37c   :  { %91 = vst [vmem:[#allocation2 + $0x100] sm:$0xf] %v26687_v52  ;;  %92 = vst [vmem:[#allocation2 + $0x104] sm:$0xf] %v26687_v52 }
 0x37d   :  { %93 = vst [vmem:[#allocation2 + $0x108] sm:$0xf] %v26687_v52  ;;  %94 = vst [vmem:[#allocation2 + $0x10c] sm:$0xf] %v26687_v52 }
 0x37e   :  { %95 = vst [vmem:[#allocation2 + $0x110] sm:$0xf] %v26687_v52  ;;  %96 = vst [vmem:[#allocation2 + $0x114] sm:$0xf] %v26687_v52 }
 0x37f   :  { %97 = vst [vmem:[#allocation2 + $0x118] sm:$0xf] %v26687_v52  ;;  %98 = vst [vmem:[#allocation2 + $0x11c] sm:$0xf] %v26687_v52 }
 0x380   :  { %99 = vst [vmem:[#allocation2 + $0x120] sm:$0xf] %v26687_v52  ;;  %100 = vst [vmem:[#allocation2 + $0x124] sm:$0xf] %v26687_v52 }
 0x381   :  { %101 = vst [vmem:[#allocation2 + $0x128] sm:$0xf] %v26687_v52  ;;  %102 = vst [vmem:[#allocation2 + $0x12c] sm:$0xf] %v26687_v52 }
 0x382   :  { %103 = vst [vmem:[#allocation2 + $0x130] sm:$0xf] %v26687_v52  ;;  %104 = vst [vmem:[#allocation2 + $0x134] sm:$0xf] %v26687_v52 }
 0x383   :  { %105 = vst [vmem:[#allocation2 + $0x138] sm:$0xf] %v26687_v52  ;;  %106 = vst [vmem:[#allocation2 + $0x13c] sm:$0xf] %v26687_v52 }
 0x384   :  { %107 = vst [vmem:[#allocation2 + $0x140] sm:$0xf] %v26687_v52  ;;  %108 = vst [vmem:[#allocation2 + $0x144] sm:$0xf] %v26687_v52 }
 0x385   :  { %109 = vst [vmem:[#allocation2 + $0x148] sm:$0xf] %v26687_v52  ;;  %110 = vst [vmem:[#allocation2 + $0x14c] sm:$0xf] %v26687_v52 }
 0x386   :  { %111 = vst [vmem:[#allocation2 + $0x150] sm:$0xf] %v26687_v52  ;;  %112 = vst [vmem:[#allocation2 + $0x154] sm:$0xf] %v26687_v52 }
 0x387   :  { %113 = vst [vmem:[#allocation2 + $0x158] sm:$0xf] %v26687_v52  ;;  %114 = vst [vmem:[#allocation2 + $0x15c] sm:$0xf] %v26687_v52 }
 0x388   :  { %115 = vst [vmem:[#allocation2 + $0x160] sm:$0xf] %v26687_v52  ;;  %116 = vst [vmem:[#allocation2 + $0x164] sm:$0xf] %v26687_v52 }
 0x389   :  { %117 = vst [vmem:[#allocation2 + $0x168] sm:$0xf] %v26687_v52  ;;  %118 = vst [vmem:[#allocation2 + $0x16c] sm:$0xf] %v26687_v52 }
 0x38a   :  { %119 = vst [vmem:[#allocation2 + $0x170] sm:$0xf] %v26687_v52  ;;  %120 = vst [vmem:[#allocation2 + $0x174] sm:$0xf] %v26687_v52 }
 0x38b   :  { %121 = vst [vmem:[#allocation2 + $0x178] sm:$0xf] %v26687_v52  ;;  %122 = vst [vmem:[#allocation2 + $0x17c] sm:$0xf] %v26687_v52 }
 0x38c   :  { %123 = vst [vmem:[#allocation2 + $0x180] sm:$0xf] %v26687_v52  ;;  %124 = vst [vmem:[#allocation2 + $0x184] sm:$0xf] %v26687_v52 }
 0x38d   :  { %125 = vst [vmem:[#allocation2 + $0x188] sm:$0xf] %v26687_v52  ;;  %126 = vst [vmem:[#allocation2 + $0x18c] sm:$0xf] %v26687_v52  ;;  %v10307_v52 = vld [vmem:[%s26645_s2 + $0x8] sm:$0xff] }
 0x38e   :  { %26826 = vst [vmem:[#allocation113_spill] sm:$0xff] %v22674_v34  ;;  %26828 = vst [vmem:[#allocation115_spill] sm:$0xff] %v22694_v13  ;;  %v22710_v13 = vpop.f32.mrf.mxu1  ;;  %v22722_v34 = vpop.f32.mrf.mxu0  ;;  %10317 = vperm.xlu1 %17029, %v10307_v52  }
 0x38f   :  { %26829 = vst [vmem:[#allocation116_spill] sm:$0xff] %v22710_v13  ;;  %26830 = vst [vmem:[#allocation117_spill] sm:$0xff] %v22722_v34  ;;  %v18352_v34 = vld [vmem:[%s26643_s0 + $0xda4] ss:$400 sps:$4 sm:$0xff]  }
 0x390   :  { %v22730_v13 = vpop.f32.mrf.mxu1  ;;  %v22738_v52 = vpop.f32.mrf.mxu0  ;;  %9270 = vmatprep.subr.bf16.mxu0 %v18352_v34  ;;  %v18356_v34 = vld [vmem:[%s26643_s0 + $0xa80] ss:$400 sps:$4 sm:$0xff]  }
 0x391   :  { %26831 = vst [vmem:[#allocation118_spill] sm:$0xff] %v22730_v13  ;;  %26832 = vst [vmem:[#allocation119_spill] sm:$0xff] %v22738_v52  ;;  %9271 = vmatpush1.bf16.msra.mxu0 %v18350_v8  ;;  %v18367_v8 = vld [vmem:[%s26643_s0 + $0x76c] ss:$400 sps:$4 sm:$0xff]  }
 0x392   :  { %v22751_v51 = vpop.f32.mrf.mxu1  ;;  %v22763_v13 = vpop.f32.mrf.mxu0  ;;  %9272 = vmatprep.subr.bf16.mxu0 %v18358_v25  ;;  %v18362_v25 = vld [vmem:[%s26643_s0 + $0x760] ss:$400 sps:$4 sm:$0xff]   ;;  %9327 = vmatprep.subr.bf16.mxu1 %v18367_v8  ;;  %v18371_v8 = vld [vmem:[%s26643_s0 + $0x448] ss:$400 sps:$4 sm:$0xff]  }
 0x393   :  { %26833 = vst [vmem:[#allocation120_spill] sm:$0xff] %v22751_v51  ;;  %26834 = vst [vmem:[#allocation121_spill] sm:$0xff] %v22763_v13  ;;  %v11360_v51 = vld [vmem:[%s26646_s4 + $0xf0] sm:$0xff]  ;;  %11537 = vperm.xlu1 %17029, %v11361_v18   ;;  %9328 = vmatpush1.bf16.msra.mxu1 %v18365_v26  ;;  %v11345_v26 = vld [vmem:[%s26646_s4 + $0x78] sm:$0xff] }
 0x394   :  { %v22765_v52 = vpop.f32.mrf.mxu1  ;;  %v22782_v49 = vpop.f32.mrf.mxu0  ;;  %11532 = vperm.xlu0 %17028, %v11360_v51   ;;  %v11344_v13 = vld [vmem:[%s26646_s4 + $0x70] sm:$0xff] }
 0x395   :  { %26835 = vst [vmem:[#allocation122_spill] sm:$0xff] %v22765_v52  ;;  %26836 = vst [vmem:[#allocation123_spill] sm:$0xff] %v22782_v49  ;;  %9273 = vmatpush1.bf16.msra.mxu0 %v18356_v34  ;;  %v18370_v51 = vld [vmem:[%s26643_s0 + $0x444] ss:$400 sps:$4 sm:$0xff]   ;;  %v18373_v34 = vld [vmem:[%s26643_s0 + $0x44c] ss:$400 sps:$4 sm:$0xff]  }
 0x396   :  { %v22784_v52 = vpop.f32.mrf.mxu1  ;;  %v22795_v55 = vpop.f32.mrf.mxu0  ;;  %9274 = vmatprep.subr.bf16.mxu0 %v18364_v16  ;;  %v18368_v16 = vld [vmem:[%s26643_s0 + $0x440] ss:$400 sps:$4 sm:$0xff]   ;;  %9329 = vmatprep.subr.bf16.mxu1 %v18373_v34  ;;  %v18377_v34 = vld [vmem:[%s26643_s0 + $0x128] ss:$400 sps:$4 sm:$0xff]  }
 0x397   :  { %26837 = vst [vmem:[#allocation124_spill] sm:$0xff] %v22784_v52  ;;  %26838 = vst [vmem:[#allocation125_spill] sm:$0xff] %v22795_v55  ;;  %v11376_v55 = vld [vmem:[%s26646_s4 + $0x170] sm:$0xff]  ;;  %11457 = vperm.xlu1 %17029, %v11345_v26   ;;  %9330 = vmatpush1.bf16.msra.mxu1 %v18371_v8  ;;  %v11377_v26 = vld [vmem:[%s26646_s4 + $0x178] sm:$0xff] }
 0x398   :  { %v22806_v52 = vpop.f32.mrf.mxu1  ;;  %11452 = vperm.xlu0 %17028, %v11344_v13   ;;  %v22817_v49 = vpop.f32.mrf.mxu0  ;;  %v18376_v13 = vld [vmem:[%s26643_s0 + $0x124] ss:$400 sps:$4 sm:$0xff]  }
 0x399   :  { %26839 = vst [vmem:[#allocation126_spill] sm:$0xff] %v22806_v52  ;;  %9275 = vmatpush1.bf16.msra.mxu0 %v18362_v25  ;;  %26840 = vst [vmem:[#allocation127_spill] sm:$0xff] %v22817_v49  ;;  %v18379_v25 = vld [vmem:[%s26643_s0 + $0x12c] ss:$400 sps:$4 sm:$0xff]   ;;  %v11358_v52 = vld [vmem:[%s26646_s4 + $0xe0] sm:$0xff] }
 0x39a   :  { %9276 = vmatprep.subr.bf16.mxu0 %v18370_v51  ;;  %v22828_v18 = vpop.f32.mrf.mxu1  ;;  %v18374_v51 = vld [vmem:[%s26643_s0 + $0x120] ss:$400 sps:$4 sm:$0xff]   ;;  %9331 = vmatprep.subr.bf16.mxu1 %v18379_v25 }
 0x39b   :  { %26841 = vst [vmem:[#allocation128_spill] sm:$0xff] %v22828_v18  ;;  %v22842_v18 = vpop.f32.mrf.mxu0  ;;  %11617 = vperm.xlu1 %17029, %v11377_v26   ;;  %v18380_v49 = vld [vmem:[%s26643_s0 + $0x2380] ss:$400 sps:$4 sm:$0xff]   ;;  %9332 = vmatpush1.bf16.msra.mxu1 %v18377_v34  ;;  %v11359_v26 = vld [vmem:[%s26646_s4 + $0xe8] sm:$0xff] }
 0x39c   :  { %11612 = vperm.xlu0 %17028, %v11376_v55   ;;  %26842 = vst [vmem:[#allocation129_spill] sm:$0xff] %v22842_v18  ;;  %v18382_v55 = vld [vmem:[%s26643_s0 + $0x2384] ss:$400 sps:$4 sm:$0xff]   ;;  %v22850_v8 = vpop.f32.mrf.mxu1  ;;  %v18386_v18 = vld [vmem:[%s26643_s0 + $0x2060] ss:$400 sps:$4 sm:$0xff]  }
 0x39d   :  { %9277 = vmatpush1.bf16.msra.mxu0 %v18368_v16  ;;  %v18385_v16 = vld [vmem:[%s26643_s0 + $0x238c] ss:$400 sps:$4 sm:$0xff]   ;;  %26843 = vst [vmem:[#allocation130_spill] sm:$0xff] %v22850_v8  ;;  %v11342_v25 = vld [vmem:[%s26646_s4 + $0x60] sm:$0xff]  ;;  %v22864_v8 = vpop.f32.mrf.mxu0 }
 0x39e   :  { %9278 = vmatprep.subr.bf16.mxu0 %v18376_v13  ;;  %v18383_v13 = vld [vmem:[%s26643_s0 + $0x2388] ss:$400 sps:$4 sm:$0xff]   ;;  %26844 = vst [vmem:[#allocation131_spill] sm:$0xff] %v22864_v8  ;;  %9341 = vmatprep.subr.bf16.mxu1 %v18385_v16  ;;  %v22872_v34 = vpop.f32.mrf.mxu1  ;;  %v11374_v16 = vld [vmem:[%s26646_s4 + $0x160] sm:$0xff] }
 0x39f   :  { %11527 = vperm.xlu1 %17029, %v11359_v26   ;;  %26845 = vst [vmem:[#allocation132_spill] sm:$0xff] %v22872_v34  ;;  %9342 = vmatpush2.bf16.msra.mxu1 %v18383_v13  ;;  %v11343_v26 = vld [vmem:[%s26646_s4 + $0x68] sm:$0xff]  ;;  %v22886_v34 = vpop.f32.mrf.mxu0  ;;  %v18392_v8 = vld [vmem:[%s26643_s0 + $0x1d40] ss:$400 sps:$4 sm:$0xff]  }
 0x3a0   :  { %11522 = vperm.xlu0 %17028, %v11358_v52   ;;  %v18388_v52 = vld [vmem:[%s26643_s0 + $0x2064] ss:$400 sps:$4 sm:$0xff]   ;;  %26846 = vst [vmem:[#allocation133_spill] sm:$0xff] %v22886_v34  ;;  %v18397_v13 = vld [vmem:[%s26643_s0 + $0x1d4c] ss:$400 sps:$4 sm:$0xff]  }
 0x3a1   :  { %9279 = vmatpush1.bf16.msra.mxu0 %v18374_v51  ;;  %v18391_v51 = vld [vmem:[%s26643_s0 + $0x206c] ss:$400 sps:$4 sm:$0xff]   ;;  %v18398_v34 = vld [vmem:[%s26643_s0 + $0x1a20] ss:$400 sps:$4 sm:$0xff]  }
 0x3a2   :  { %9288 = vmatprep.subr.bf16.mxu0 %v18382_v55  ;;  %v18389_v55 = vld [vmem:[%s26643_s0 + $0x2068] ss:$400 sps:$4 sm:$0xff]   ;;  %9343 = vmatprep.subr.bf16.mxu1 %v18391_v51  ;;  %v11356_v51 = vld [vmem:[%s26646_s4 + $0xd0] sm:$0xff] }
 0x3a3   :  { %11447 = vperm.xlu1 %17029, %v11343_v26   ;;  %9344 = vmatpush2.bf16.msra.mxu1 %v18389_v55  ;;  %v11375_v26 = vld [vmem:[%s26646_s4 + $0x168] sm:$0xff] }
 0x3a4   :  { %11442 = vperm.xlu0 %17028, %v11342_v25   ;;  %v22894_v25 = vpop.f32.mrf.mxu1  ;;  %9345 = vmatprep.subr.bf16.mxu1 %v18397_v13  ;;  %v18403_v55 = vld [vmem:[%s26643_s0 + $0x1a2c] ss:$400 sps:$4 sm:$0xff]   ;;  %v11340_v13 = vld [vmem:[%s26646_s4 + $0x50] sm:$0xff] }
 0x3a5   :  { %9289 = vmatpush2.bf16.msra.mxu0 %v18380_v49  ;;  %v18394_v49 = vld [vmem:[%s26643_s0 + $0x1d44] ss:$400 sps:$4 sm:$0xff]   ;;  %26847 = vst [vmem:[#allocation134_spill] sm:$0xff] %v22894_v25  ;;  %v22908_v25 = vpop.f32.mrf.mxu0 }
 0x3a6   :  { %9290 = vmatprep.subr.bf16.mxu0 %v18388_v52  ;;  %v18395_v52 = vld [vmem:[%s26643_s0 + $0x1d48] ss:$400 sps:$4 sm:$0xff]   ;;  %26848 = vst [vmem:[#allocation135_spill] sm:$0xff] %v22908_v25 }
 0x3a7   :  { %11607 = vperm.xlu1 %17029, %v11375_v26   ;;  %9346 = vmatpush2.bf16.msra.mxu1 %v18395_v52  ;;  %v11357_v26 = vld [vmem:[%s26646_s4 + $0xd8] sm:$0xff] }
 0x3a8   :  { %11602 = vperm.xlu0 %17028, %v11374_v16   ;;  %v22916_v16 = vpop.f32.mrf.mxu1  ;;  %9347 = vmatprep.subr.bf16.mxu1 %v18403_v55  ;;  %v18409_v52 = vld [vmem:[%s26643_s0 + $0x171c] ss:$400 sps:$4 sm:$0xff]  }
 0x3a9   :  { %9291 = vmatpush2.bf16.msra.mxu0 %v18386_v18  ;;  %v18400_v18 = vld [vmem:[%s26643_s0 + $0x1a24] ss:$400 sps:$4 sm:$0xff]   ;;  %26849 = vst [vmem:[#allocation136_spill] sm:$0xff] %v22916_v16  ;;  %v22930_v16 = vpop.f32.mrf.mxu0  ;;  %v11341_v55 = vld [vmem:[%s26646_s4 + $0x58] sm:$0xff] }
 0x3aa   :  { %9292 = vmatprep.subr.bf16.mxu0 %v18394_v49  ;;  %v18401_v49 = vld [vmem:[%s26643_s0 + $0x1a28] ss:$400 sps:$4 sm:$0xff]   ;;  %26850 = vst [vmem:[#allocation137_spill] sm:$0xff] %v22930_v16  ;;  %v22932_v25 = vpop.f32.mrf.mxu1 }
 0x3ab   :  { %26851 = vst [vmem:[#allocation138_spill] sm:$0xff] %v22932_v25  ;;  %11517 = vperm.xlu1 %17029, %v11357_v26   ;;  %9348 = vmatpush2.bf16.msra.mxu1 %v18401_v49  ;;  %v22949_v25 = vpop.f32.mrf.mxu0  ;;  %v18415_v49 = vld [vmem:[%s26643_s0 + $0x13fc] ss:$400 sps:$4 sm:$0xff]   ;;  %v18410_v26 = vld [vmem:[%s26643_s0 + $0x13f0] ss:$400 sps:$4 sm:$0xff]  }
 0x3ac   :  { %11512 = vperm.xlu0 %17028, %v11356_v51   ;;  %v18404_v51 = vld [vmem:[%s26643_s0 + $0x1710] ss:$400 sps:$4 sm:$0xff]   ;;  %26852 = vst [vmem:[#allocation139_spill] sm:$0xff] %v22949_v25  ;;  %v22951_v16 = vpop.f32.mrf.mxu1  ;;  %9423 = vmatprep.subr.bf16.mxu1 %v18409_v52 }
 0x3ad   :  { %9293 = vmatpush2.bf16.msra.mxu0 %v18392_v8  ;;  %v18406_v8 = vld [vmem:[%s26643_s0 + $0x1714] ss:$400 sps:$4 sm:$0xff]   ;;  %26853 = vst [vmem:[#allocation140_spill] sm:$0xff] %v22951_v16 }
 0x3ae   :  { %9294 = vmatprep.subr.bf16.mxu0 %v18400_v18  ;;  %v18407_v18 = vld [vmem:[%s26643_s0 + $0x1718] ss:$400 sps:$4 sm:$0xff]   ;;  %9350 = vmatmul.mubr.bf16.vlgmr.msra.gmra.mxu1 %v22356_v24  ;;  %v11372_v52 = vld [vmem:[%s26646_s4 + $0x150] sm:$0xff]  ;;  %v22975_v16 = vpop.f32.mrf.mxu1 }
 0x3af   :  { %11437 = vperm.xlu1 %17029, %v11341_v55   ;;  %9424 = vmatpush1.bf16.msra.mxu1 %v18407_v18  ;;  %v11373_v55 = vld [vmem:[%s26646_s4 + $0x158] sm:$0xff]  ;;  %26855 = vst [vmem:[#allocation142_spill] sm:$0xff] %v22975_v16 }
 0x3b0   :  { %11432 = vperm.xlu0 %17028, %v11340_v13   ;;  %v22959_v13 = vpop.f32.mrf.mxu0  ;;  %9425 = vmatprep.subr.bf16.mxu1 %v18415_v49  ;;  %v18419_v49 = vld [vmem:[%s26643_s0 + $0x10d8] ss:$400 sps:$4 sm:$0xff]   ;;  %v22995_v16 = vpop.f32.mrf.mxu1 }
 0x3b1   :  { %9295 = vmatpush2.bf16.msra.mxu0 %v18398_v34  ;;  %v18412_v34 = vld [vmem:[%s26643_s0 + $0x13f4] ss:$400 sps:$4 sm:$0xff]   ;;  %26854 = vst [vmem:[#allocation141_spill] sm:$0xff] %v22959_v13  ;;  %16111 = vmatprep.mubr.msk.bf16.mxu1 %vm7349_vm0, %v22375_v63  ;;  %26857 = vst [vmem:[#allocation144_spill] sm:$0xff] %v22995_v16 }
 0x3b2   :  { %9370 = vmatprep.subr.bf16.mxu0 %v18406_v8  ;;  %v18413_v8 = vld [vmem:[%s26643_s0 + $0x13f8] ss:$400 sps:$4 sm:$0xff]   ;;  %v22987_v18 = vpop.f32.mrf.mxu0  ;;  %v23019_v16 = vpop.f32.mrf.mxu1 }
 0x3b3   :  { %26856 = vst [vmem:[#allocation143_spill] sm:$0xff] %v22987_v18  ;;  %11597 = vperm.xlu1 %17029, %v11373_v55   ;;  %9426 = vmatpush1.bf16.msra.mxu1 %v18413_v8  ;;  %v18425_v55 = vld [vmem:[%s26643_s0 + $0xdb8] ss:$400 sps:$4 sm:$0xff]   ;;  %26859 = vst [vmem:[#allocation146_spill] sm:$0xff] %v23019_v16  ;;  %v11338_v16 = vld [vmem:[%s26646_s4 + $0x40] sm:$0xff] }
 0x3b4   :  { %9297 = vmatmul.mubr.bf16.vlgmr.msra.gmra.mxu0 %v22356_v24  ;;  %v18418_v24 = vld [vmem:[%s26643_s0 + $0x10d4] ss:$400 sps:$4 sm:$0xff]   ;;  %11592 = vperm.xlu0 %17028, %v11372_v52   ;;  %v23003_v8 = vpop.f32.mrf.mxu0  ;;  %v18422_v52 = vld [vmem:[%s26643_s0 + $0xdb0] ss:$400 sps:$4 sm:$0xff]  }
 0x3b5   :  { %9371 = vmatpush1.bf16.msra.mxu0 %v18404_v51  ;;  %v18421_v51 = vld [vmem:[%s26643_s0 + $0x10dc] ss:$400 sps:$4 sm:$0xff]   ;;  %16109 = vmatprep.mubr.msk.bf16.mxu0 %vm7349_vm0, %v22375_v63  ;;  %v18424_v63 = vld [vmem:[%s26643_s0 + $0xdb4] ss:$400 sps:$4 sm:$0xff]   ;;  %26858 = vst [vmem:[#allocation145_spill] sm:$0xff] %v23003_v8 }
 0x3b6   :  { %9372 = vmatprep.subr.bf16.mxu0 %v18412_v34  ;;  %v18416_v34 = vld [vmem:[%s26643_s0 + $0x10d0] ss:$400 sps:$4 sm:$0xff]   ;;  %9427 = vmatprep.subr.bf16.mxu1 %v18421_v51  ;;  %v11355_v51 = vld [vmem:[%s26646_s4 + $0xc8] sm:$0xff] }
 0x3b7   :  { %9360 = vmatmul.mubr.bf16.gmra.mxu1 %v22404_v1  ;;  %11507 = vperm.xlu1 %17029, %v11355_v51   ;;  %v18434_v51 = vld [vmem:[%s26643_s0 + $0x770] ss:$400 sps:$4 sm:$0xff]  }
 0x3b8   :  { %9428 = vmatpush1.bf16.msra.mxu1 %v18419_v49  ;;  %16114 = vmatprep.mubr.msk.bf16.mxu1 %vm7349_vm0, %v22425_v22  ;;  %v23031_v49 = vpop.f32.mrf.mxu0  ;;  %v18446_v8 = vld [vmem:[%s26643_s0 + $0x130] ss:$400 sps:$4 sm:$0xff]  }
 0x3b9   :  { %9373 = vmatpush1.bf16.msra.mxu0 %v18410_v26  ;;  %v18427_v26 = vld [vmem:[%s26643_s0 + $0xdbc] ss:$400 sps:$4 sm:$0xff]   ;;  %26860 = vst [vmem:[#allocation147_spill] sm:$0xff] %v23031_v49  ;;  %v23045_v49 = vpop.f32.mrf.mxu1 }
 0x3ba   :  { %9374 = vmatprep.subr.bf16.mxu0 %v18418_v24  ;;  %v11354_v24 = vld [vmem:[%s26646_s4 + $0xc0] sm:$0xff]  ;;  %9429 = vmatprep.subr.bf16.mxu1 %v18427_v26  ;;  %v18431_v26 = vld [vmem:[%s26643_s0 + $0xa98] ss:$400 sps:$4 sm:$0xff]   ;;  %26861 = vst [vmem:[#allocation148_spill] sm:$0xff] %v23045_v49 }
 0x3bb   :  { %11502 = vperm.xlu0 %17028, %v11354_v24   ;;  %v23053_v24 = vpop.f32.mrf.mxu0  ;;  %v11371_v49 = vld [vmem:[%s26646_s4 + $0x148] sm:$0xff] }
 0x3bc   :  { %9307 = vmatmul.mubr.bf16.gmra.mxu0 %v22404_v1  ;;  %v18430_v1 = vld [vmem:[%s26643_s0 + $0xa94] ss:$400 sps:$4 sm:$0xff]   ;;  %9430 = vmatpush1.bf16.msra.mxu1 %v18425_v55  ;;  %v18439_v55 = vld [vmem:[%s26643_s0 + $0x77c] ss:$400 sps:$4 sm:$0xff]   ;;  %26862 = vst [vmem:[#allocation149_spill] sm:$0xff] %v23053_v24  ;;  %v23067_v24 = vpop.f32.mrf.mxu1 }
 0x3bd   :  { %9375 = vmatpush1.bf16.msra.mxu0 %v18416_v34  ;;  %v18433_v34 = vld [vmem:[%s26643_s0 + $0xa9c] ss:$400 sps:$4 sm:$0xff]   ;;  %16112 = vmatprep.mubr.msk.bf16.mxu0 %vm7349_vm0, %v22425_v22  ;;  %26863 = vst [vmem:[#allocation150_spill] sm:$0xff] %v23067_v24 }
 0x3be   :  { %9376 = vmatprep.subr.bf16.mxu0 %v18424_v63  ;;  %v18428_v63 = vld [vmem:[%s26643_s0 + $0xa90] ss:$400 sps:$4 sm:$0xff]   ;;  %v11339_v22 = vld [vmem:[%s26646_s4 + $0x48] sm:$0xff]  ;;  %9431 = vmatprep.subr.bf16.mxu1 %v18433_v34  ;;  %v11353_v24 = vld [vmem:[%s26646_s4 + $0xb8] sm:$0xff] }
 0x3bf   :  { %11422 = vperm.xlu0 %17028, %v11338_v16   ;;  %11427 = vperm.xlu1 %17029, %v11339_v22   ;;  %v11370_v34 = vld [vmem:[%s26646_s4 + $0x140] sm:$0xff] }
 0x3c0   :  { %9432 = vmatpush1.bf16.msra.mxu1 %v18431_v26  ;;  %v18442_v16 = vld [vmem:[%s26643_s0 + $0x454] ss:$400 sps:$4 sm:$0xff]   ;;  %v23075_v26 = vpop.f32.mrf.mxu0  ;;  %v18440_v22 = vld [vmem:[%s26643_s0 + $0x450] ss:$400 sps:$4 sm:$0xff]  }
 0x3c1   :  { %9377 = vmatpush1.bf16.msra.mxu0 %v18422_v52  ;;  %v18436_v52 = vld [vmem:[%s26643_s0 + $0x774] ss:$400 sps:$4 sm:$0xff]   ;;  %9433 = vmatprep.subr.bf16.mxu1 %v18439_v55  ;;  %26864 = vst [vmem:[#allocation151_spill] sm:$0xff] %v23075_v26  ;;  %v23089_v26 = vpop.f32.mrf.mxu1 }
 0x3c2   :  { %9378 = vmatprep.subr.bf16.mxu0 %v18430_v1  ;;  %v18437_v1 = vld [vmem:[%s26643_s0 + $0x778] ss:$400 sps:$4 sm:$0xff]   ;;  %v11352_v55 = vld [vmem:[%s26646_s4 + $0xb0] sm:$0xff]  ;;  %26865 = vst [vmem:[#allocation152_spill] sm:$0xff] %v23089_v26 }
 0x3c3   :  { %11582 = vperm.xlu0 %17028, %v11370_v34   ;;  %11587 = vperm.xlu1 %17029, %v11371_v49   ;;  %v18448_v49 = vld [vmem:[%s26643_s0 + $0x134] ss:$400 sps:$4 sm:$0xff]   ;;  %v23099_v34 = vpop.f32.mrf.mxu1  ;;  %v11337_v26 = vld [vmem:[%s26646_s4 + $0x38] sm:$0xff] }
 0x3c4   :  { %9434 = vmatpush1.bf16.msra.mxu1 %v18437_v1  ;;  %v23097_v1 = vpop.f32.mrf.mxu0 }
 0x3c5   :  { %9379 = vmatpush1.bf16.msra.mxu0 %v18428_v63  ;;  %v18445_v63 = vld [vmem:[%s26643_s0 + $0x45c] ss:$400 sps:$4 sm:$0xff]   ;;  %26866 = vst [vmem:[#allocation153_spill] sm:$0xff] %v23097_v1  ;;  %v18452_v1 = vld [vmem:[%s26643_s0 + $0x2390] ss:$400 sps:$4 sm:$0xff]  }
 0x3c6   :  { %9380 = vmatprep.subr.bf16.mxu0 %v18436_v52  ;;  %v18443_v52 = vld [vmem:[%s26643_s0 + $0x458] ss:$400 sps:$4 sm:$0xff]   ;;  %9435 = vmatprep.subr.bf16.mxu1 %v18445_v63  ;;  %v11336_v63 = vld [vmem:[%s26646_s4 + $0x30] sm:$0xff] }
 0x3c7   :  { %11492 = vperm.xlu0 %17028, %v11352_v55   ;;  %11497 = vperm.xlu1 %17029, %v11353_v24   ;;  %v18454_v24 = vld [vmem:[%s26643_s0 + $0x2394] ss:$400 sps:$4 sm:$0xff]   ;;  %v23121_v55 = vpop.f32.mrf.mxu1 }
 0x3c8   :  { %9436 = vmatpush1.bf16.msra.mxu1 %v18443_v52  ;;  %v23119_v52 = vpop.f32.mrf.mxu0 }
 0x3c9   :  { %9381 = vmatpush1.bf16.msra.mxu0 %v18434_v51  ;;  %v18451_v51 = vld [vmem:[%s26643_s0 + $0x13c] ss:$400 sps:$4 sm:$0xff]   ;;  %26867 = vst [vmem:[#allocation154_spill] sm:$0xff] %v23119_v52 }
 0x3ca   :  { %9382 = vmatprep.subr.bf16.mxu0 %v18442_v16  ;;  %v18449_v16 = vld [vmem:[%s26643_s0 + $0x138] ss:$400 sps:$4 sm:$0xff]   ;;  %9437 = vmatprep.subr.bf16.mxu1 %v18451_v51  ;;  %v11368_v51 = vld [vmem:[%s26646_s4 + $0x130] sm:$0xff]  ;;  %v23135_v18 = vpop.f32.mrf.mxu0 }
 0x3cb   :  { %11412 = vperm.xlu0 %17028, %v11336_v63   ;;  %11417 = vperm.xlu1 %17029, %v11337_v26   ;;  %v11369_v52 = vld [vmem:[%s26646_s4 + $0x138] sm:$0xff]  ;;  %26868 = vst [vmem:[#allocation155_spill] sm:$0xff] %v23135_v18  ;;  %v18458_v63 = vld [vmem:[%s26643_s0 + $0x2070] ss:$400 sps:$4 sm:$0xff]   ;;  %v11351_v18 = vld [vmem:[%s26646_s4 + $0xa8] sm:$0xff] }
 0x3cc   :  { %9438 = vmatpush1.bf16.msra.mxu1 %v18449_v16  ;;  %v18463_v26 = vld [vmem:[%s26643_s0 + $0x207c] ss:$400 sps:$4 sm:$0xff]   ;;  %v23143_v16 = vpop.f32.mrf.mxu1  ;;  %v23157_v13 = vpop.f32.mrf.mxu0 }
 0x3cd   :  { %9383 = vmatpush1.bf16.msra.mxu0 %v18440_v22  ;;  %v18457_v22 = vld [vmem:[%s26643_s0 + $0x239c] ss:$400 sps:$4 sm:$0xff]   ;;  %26869 = vst [vmem:[#allocation156_spill] sm:$0xff] %v23157_v13 }
 0x3ce   :  { %9384 = vmatprep.subr.bf16.mxu0 %v18448_v49  ;;  %v18455_v49 = vld [vmem:[%s26643_s0 + $0x2398] ss:$400 sps:$4 sm:$0xff]   ;;  %9447 = vmatprep.subr.bf16.mxu1 %v18457_v22  ;;  %v11350_v22 = vld [vmem:[%s26646_s4 + $0xa0] sm:$0xff]  ;;  %v23179_v25 = vpop.f32.mrf.mxu0 }
 0x3cf   :  { %11572 = vperm.xlu0 %17028, %v11368_v51   ;;  %11577 = vperm.xlu1 %17029, %v11369_v52   ;;  %v18469_v52 = vld [vmem:[%s26643_s0 + $0x1d5c] ss:$400 sps:$4 sm:$0xff]   ;;  %v18464_v51 = vld [vmem:[%s26643_s0 + $0x1d50] ss:$400 sps:$4 sm:$0xff]   ;;  %26871 = vst [vmem:[#allocation158_spill] sm:$0xff] %v23179_v25 }
 0x3d0   :  { %9448 = vmatpush2.bf16.msra.mxu1 %v18455_v49  ;;  %v23165_v49 = vpop.f32.mrf.mxu1  ;;  %v11335_v13 = vld [vmem:[%s26646_s4 + $0x28] sm:$0xff]  ;;  %v23201_v25 = vpop.f32.mrf.mxu0 }
 0x3d1   :  { %9385 = vmatpush1.bf16.msra.mxu0 %v18446_v8  ;;  %v18460_v8 = vld [vmem:[%s26643_s0 + $0x2074] ss:$400 sps:$4 sm:$0xff]   ;;  %9449 = vmatprep.subr.bf16.mxu1 %v18463_v26  ;;  %26870 = vst [vmem:[#allocation157_spill] sm:$0xff] %v23165_v49  ;;  %26872 = vst [vmem:[#allocation159_spill] sm:$0xff] %v23201_v25 }
 0x3d2   :  { %9394 = vmatprep.subr.bf16.mxu0 %v18454_v24  ;;  %v18461_v24 = vld [vmem:[%s26643_s0 + $0x2078] ss:$400 sps:$4 sm:$0xff]   ;;  %v11334_v26 = vld [vmem:[%s26646_s4 + $0x20] sm:$0xff]  ;;  %v23181_v19 = vpop.f32.mrf.mxu1 }
 0x3d3   :  { %11482 = vperm.xlu0 %17028, %v11350_v22   ;;  %11487 = vperm.xlu1 %17029, %v11351_v18   ;;  %v18472_v18 = vld [vmem:[%s26643_s0 + $0x1a34] ss:$400 sps:$4 sm:$0xff]   ;;  %v18473_v22 = vld [vmem:[%s26643_s0 + $0x1a38] ss:$400 sps:$4 sm:$0xff]  }
 0x3d4   :  { %9450 = vmatpush2.bf16.msra.mxu1 %v18461_v24  ;;  %v18470_v24 = vld [vmem:[%s26643_s0 + $0x1a30] ss:$400 sps:$4 sm:$0xff]   ;;  %v23203_v38 = vpop.f32.mrf.mxu1 }
 0x3d5   :  { %9395 = vmatpush2.bf16.msra.mxu0 %v18452_v1  ;;  %v18466_v1 = vld [vmem:[%s26643_s0 + $0x1d54] ss:$400 sps:$4 sm:$0xff]   ;;  %9451 = vmatprep.subr.bf16.mxu1 %v18469_v52  ;;  %v11367_v52 = vld [vmem:[%s26646_s4 + $0x128] sm:$0xff]  ;;  %26873 = vst [vmem:[#allocation160_spill] sm:$0xff] %v23203_v38  ;;  %v18506_v38 = vld [vmem:[%s26643_s0 + $0x780] ss:$400 sps:$4 sm:$0xff]  }
 0x3d6   :  { %9396 = vmatprep.subr.bf16.mxu0 %v18460_v8  ;;  %v18467_v8 = vld [vmem:[%s26643_s0 + $0x1d58] ss:$400 sps:$4 sm:$0xff]  }
 0x3d7   :  { %11402 = vperm.xlu0 %17028, %v11334_v26   ;;  %11407 = vperm.xlu1 %17029, %v11335_v13   ;;  %v18478_v13 = vld [vmem:[%s26643_s0 + $0x1724] ss:$400 sps:$4 sm:$0xff]   ;;  %v18479_v26 = vld [vmem:[%s26643_s0 + $0x1728] ss:$400 sps:$4 sm:$0xff]  }
 0x3d8   :  { %9452 = vmatpush2.bf16.msra.mxu1 %v18467_v8  ;;  %v18476_v8 = vld [vmem:[%s26643_s0 + $0x1720] ss:$400 sps:$4 sm:$0xff]  }
 0x3d9   :  { %9397 = vmatpush2.bf16.msra.mxu0 %v18458_v63  ;;  %v18475_v63 = vld [vmem:[%s26643_s0 + $0x1a3c] ss:$400 sps:$4 sm:$0xff]  }
 0x3da   :  { %9398 = vmatprep.subr.bf16.mxu0 %v18466_v1  ;;  %v11366_v1 = vld [vmem:[%s26646_s4 + $0x120] sm:$0xff]  ;;  %9453 = vmatprep.subr.bf16.mxu1 %v18475_v63  ;;  %v23219_v63 = vpop.f32.mrf.mxu1 }
 0x3db   :  { %11562 = vperm.xlu0 %17028, %v11366_v1   ;;  %11567 = vperm.xlu1 %17029, %v11367_v52   ;;  %v18484_v1 = vld [vmem:[%s26643_s0 + $0x1404] ss:$400 sps:$4 sm:$0xff]   ;;  %v18482_v52 = vld [vmem:[%s26643_s0 + $0x1400] ss:$400 sps:$4 sm:$0xff]  }
 0x3dc   :  { %9454 = vmatpush2.bf16.msra.mxu1 %v18473_v22  ;;  %v23230_v22 = vld [vmem:[%s26644_s1] ss:$8 sps:$4 sm:$0xff]   ;;  %v23248_v31 = vpop.f32.mrf.mxu1 }
 0x3dd   :  { %9399 = vmatpush2.bf16.msra.mxu0 %v18464_v51  ;;  %v18481_v51 = vld [vmem:[%s26643_s0 + $0x172c] ss:$400 sps:$4 sm:$0xff]   ;;  %26876 = vst [vmem:[#allocation163_spill] sm:$0xff] %v23248_v31 }
 0x3de   :  { %9400 = vmatprep.subr.bf16.mxu0 %v18472_v18  ;;  %v23217_v18 = vpop.f32.mrf.mxu0  ;;  %9529 = vmatprep.subr.bf16.mxu1 %v18481_v51  ;;  %v11348_v51 = vld [vmem:[%s26646_s4 + $0x90] sm:$0xff]  ;;  %v11365_v31 = vld [vmem:[%s26646_s4 + $0x118] sm:$0xff] }
 0x3df   :  { %26874 = vst [vmem:[#allocation161_spill] sm:$0xff] %v23217_v18  ;;  %9456 = vmatmul.mubr.bf16.vlgmr.msra.gmra.mxu1 %v23230_v22  ;;  %v11349_v18 = vld [vmem:[%s26646_s4 + $0x98] sm:$0xff]  ;;  %11472 = vperm.xlu0 %17028, %v11348_v51   ;;  %v18494_v51 = vld [vmem:[%s26643_s0 + $0xdc0] ss:$400 sps:$4 sm:$0xff]  }
 0x3e0   :  { %9530 = vmatpush1.bf16.msra.mxu1 %v18479_v26  ;;  %v23246_v25 = vpop.f32.mrf.mxu0  ;;  %v18493_v26 = vld [vmem:[%s26643_s0 + $0x10ec] ss:$400 sps:$4 sm:$0xff]   ;;  %16115 = vmatprep.mubr.msk.bf16.mxu1 %vm7349_vm0, %v23259_v40 }
 0x3e1   :  { %9401 = vmatpush2.bf16.msra.mxu0 %v18470_v24  ;;  %v18487_v24 = vld [vmem:[%s26643_s0 + $0x140c] ss:$400 sps:$4 sm:$0xff]   ;;  %26875 = vst [vmem:[#allocation162_spill] sm:$0xff] %v23246_v25  ;;  %11477 = vperm.xlu1 %17029, %v11349_v18   ;;  %v18491_v25 = vld [vmem:[%s26643_s0 + $0x10e8] ss:$400 sps:$4 sm:$0xff]  }
 0x3e2   :  { %9476 = vmatprep.subr.bf16.mxu0 %v18478_v13  ;;  %v18485_v13 = vld [vmem:[%s26643_s0 + $0x1408] ss:$400 sps:$4 sm:$0xff]   ;;  %9531 = vmatprep.subr.bf16.mxu1 %v18487_v24  ;;  %v18488_v24 = vld [vmem:[%s26643_s0 + $0x10e0] ss:$400 sps:$4 sm:$0xff]   ;;  %v23273_v28 = vpop.f32.mrf.mxu0  ;;  %v18499_v18 = vld [vmem:[%s26643_s0 + $0xdcc] ss:$400 sps:$4 sm:$0xff]  }
 0x3e3   :  { %26877 = vst [vmem:[#allocation164_spill] sm:$0xff] %v23273_v28  ;;  %v11333_v28 = vld [vmem:[%s26646_s4 + $0x18] sm:$0xff] }
 0x3e4   :  { %9403 = vmatmul.mubr.bf16.vlgmr.msra.gmra.mxu0 %v23230_v22  ;;  %9532 = vmatpush1.bf16.msra.mxu1 %v18485_v13  ;;  %v23286_v13 = vld [vmem:[%s26644_s1 + $0x10] ss:$8 sps:$4 sm:$0x7f]  }
 0x3e5   :  { %9477 = vmatpush1.bf16.msra.mxu0 %v18476_v8  ;;  %v18490_v8 = vld [vmem:[%s26643_s0 + $0x10e4] ss:$400 sps:$4 sm:$0xff]   ;;  %16113 = vmatprep.mubr.msk.bf16.mxu0 %vm7349_vm0, %v23259_v40 }
 0x3e6   :  { %9478 = vmatprep.subr.bf16.mxu0 %v18484_v1  ;;  %v23265_v1 = vpop.f32.mrf.mxu1  ;;  %9533 = vmatprep.subr.bf16.mxu1 %v18493_v26  ;;  %v11332_v26 = vld [vmem:[%s26646_s4 + $0x10] sm:$0xff] }
 0x3e7   :  { %9466 = vmatmul.mubr.bf16.gmra.mxu1 %v23286_v13  ;;  %11392 = vperm.xlu0 %17028, %v11332_v26  }
 0x3e8   :  { %9534 = vmatpush1.bf16.msra.mxu1 %v18491_v25  ;;  %v18502_v25 = vld [vmem:[%s26643_s0 + $0xaa4] ss:$400 sps:$4 sm:$0xff]   ;;  %16118 = vmatprep.mubr.msk.bf16.mxu1 %vm7349_vm0, %v23313_v58 }
 0x3e9   :  { %9479 = vmatpush1.bf16.msra.mxu0 %v18482_v52  ;;  %v23281_v52 = vpop.f32.mrf.mxu1  ;;  %9535 = vmatprep.subr.bf16.mxu1 %v18499_v18 }
 0x3ea   :  { %9480 = vmatprep.subr.bf16.mxu0 %v18490_v8  ;;  %26878 = vst [vmem:[#allocation165_spill] sm:$0xff] %v23281_v52  ;;  %v18497_v8 = vld [vmem:[%s26643_s0 + $0xdc8] ss:$400 sps:$4 sm:$0xff]   ;;  %v23302_v52 = vpop.f32.mrf.mxu0  ;;  %11397 = vperm.xlu1 %17029, %v11333_v28   ;;  %v18508_v28 = vld [vmem:[%s26643_s0 + $0x784] ss:$400 sps:$4 sm:$0xff]  }
 0x3eb   :  { %26879 = vst [vmem:[#allocation166_spill] sm:$0xff] %v23302_v52  ;;  %v23321_v18 = vpop.f32.mrf.mxu1  ;;  %v18500_v52 = vld [vmem:[%s26643_s0 + $0xaa0] ss:$400 sps:$4 sm:$0xff]   ;;  %11552 = vperm.xlu0 %17028, %v11364_v30   ;;  %v18517_v30 = vld [vmem:[%s26643_s0 + $0x46c] ss:$400 sps:$4 sm:$0xff]  }
 0x3ec   :  { %9413 = vmatmul.mubr.bf16.gmra.mxu0 %v23286_v13  ;;  %26880 = vst [vmem:[#allocation167_spill] sm:$0xff] %v23321_v18  ;;  %9536 = vmatpush1.bf16.msra.mxu1 %v18497_v8 }
 0x3ed   :  { %9481 = vmatpush1.bf16.msra.mxu0 %v18488_v24  ;;  %v18505_v24 = vld [vmem:[%s26643_s0 + $0xaac] ss:$400 sps:$4 sm:$0xff]   ;;  %16116 = vmatprep.mubr.msk.bf16.mxu0 %vm7349_vm0, %v23313_v58  ;;  %v23343_v26 = vpop.f32.mrf.mxu1 }
 0x3ee   :  { %9482 = vmatprep.subr.bf16.mxu0 %v18496_v53  ;;  %v23319_v53 = vpop.f32.mrf.mxu0  ;;  %9537 = vmatprep.subr.bf16.mxu1 %v18505_v24  ;;  %26881 = vst [vmem:[#allocation168_spill] sm:$0xff] %v23343_v26  ;;  %v11346_v24 = vld [vmem:[%s26646_s4 + $0x80] sm:$0xff]  ;;  %v11347_v26 = vld [vmem:[%s26646_s4 + $0x88] sm:$0xff] }
 0x3ef   :  { %11557 = vperm.xlu1 %17029, %v11365_v31   ;;  %v23357_v18 = vpop.f32.mrf.mxu1  ;;  %11462 = vperm.xlu0 %17028, %v11346_v24   ;;  %v18518_v24 = vld [vmem:[%s26643_s0 + $0x140] ss:$400 sps:$4 sm:$0xff]  }
 0x3f0   :  { %v23341_v8 = vpop.f32.mrf.mxu0  ;;  %9538 = vmatpush1.bf16.msra.mxu1 %v18503_v27  ;;  %26882 = vst [vmem:[#allocation169_spill] sm:$0xff] %v23357_v18  ;;  %v18514_v27 = vld [vmem:[%s26643_s0 + $0x464] ss:$400 sps:$4 sm:$0xff]   ;;  %v11331_v18 = vld [vmem:[%s26646_s4 + $0x8] sm:$0xff] }
 0x3f1   :  { %9483 = vmatpush1.bf16.msra.mxu0 %v18494_v51  ;;  %v18511_v51 = vld [vmem:[%s26643_s0 + $0x78c] ss:$400 sps:$4 sm:$0xff]  }
 0x3f2   :  { %9484 = vmatprep.subr.bf16.mxu0 %v18502_v25  ;;  %v18509_v25 = vld [vmem:[%s26643_s0 + $0x788] ss:$400 sps:$4 sm:$0xff]   ;;  %9539 = vmatprep.subr.bf16.mxu1 %v18511_v51  ;;  %v23365_v31 = vpop.f32.mrf.mxu0  ;;  %v11330_v51 = vld [vmem:[%s26646_s4] sm:$0xff] }
 0x3f3   :  { %26883 = vst [vmem:[#allocation170_spill] sm:$0xff] %v23365_v31  ;;  %11467 = vperm.xlu1 %17029, %v11347_v26   ;;  %v23379_v31 = vpop.f32.mrf.mxu1  ;;  %v18523_v26 = vld [vmem:[%s26643_s0 + $0x14c] ss:$400 sps:$4 sm:$0xff]   ;;  %11382 = vperm.xlu0 %17028, %v11330_v51   ;;  %v18527_v51 = vld [vmem:[%s26643_s0 + $0x23a8] ss:$400 sps:$4 sm:$0xff]  }
 0x3f4   :  { %9540 = vmatpush1.bf16.msra.mxu1 %v18509_v25  ;;  %26884 = vst [vmem:[#allocation171_spill] sm:$0xff] %v23379_v31  ;;  %v23387_v25 = vpop.f32.mrf.mxu0  ;;  %v11363_v31 = vld [vmem:[%s26646_s4 + $0x108] sm:$0xff] }
 0x3f5   :  { %9485 = vmatpush1.bf16.msra.mxu0 %v18500_v52  ;;  %v18512_v52 = vld [vmem:[%s26643_s0 + $0x460] ss:$400 sps:$4 sm:$0xff]   ;;  %9541 = vmatprep.subr.bf16.mxu1 %v18517_v30  ;;  %26885 = vst [vmem:[#allocation172_spill] sm:$0xff] %v23387_v25  ;;  %v23401_v25 = vpop.f32.mrf.mxu1 }
 0x3f6   :  { %9486 = vmatprep.subr.bf16.mxu0 %v18508_v28  ;;  %v18515_v28 = vld [vmem:[%s26643_s0 + $0x468] ss:$400 sps:$4 sm:$0xff]   ;;  %v11362_v30 = vld [vmem:[%s26646_s4 + $0x100] sm:$0xff]  ;;  %26886 = vst [vmem:[#allocation173_spill] sm:$0xff] %v23401_v25  ;;  %v23403_v49 = vpop.f32.mrf.mxu0 }
 0x3f7   :  { %11387 = vperm.xlu1 %17029, %v11331_v18   ;;  %26887 = vst [vmem:[#allocation174_spill] sm:$0xff] %v23403_v49  ;;  %v18526_v18 = vld [vmem:[%s26643_s0 + $0x23a4] ss:$400 sps:$4 sm:$0xff]   ;;  %11542 = vperm.xlu0 %17028, %v11362_v30   ;;  %v23423_v25 = vpop.f32.mrf.mxu1  ;;  %v18530_v30 = vld [vmem:[%s26643_s0 + $0x2080] ss:$400 sps:$4 sm:$0xff]  }
 0x3f8   :  { %9542 = vmatpush1.bf16.msra.mxu1 %v18515_v28  ;;  %v18524_v28 = vld [vmem:[%s26643_s0 + $0x23a0] ss:$400 sps:$4 sm:$0xff]   ;;  %26888 = vst [vmem:[#allocation175_spill] sm:$0xff] %v23423_v25  ;;  %v23425_v49 = vpop.f32.mrf.mxu0 }
 0x3f9   :  { %9487 = vmatpush1.bf16.msra.mxu0 %v18506_v38  ;;  %v18520_v38 = vld [vmem:[%s26643_s0 + $0x144] ss:$400 sps:$4 sm:$0xff]   ;;  %9543 = vmatprep.subr.bf16.mxu1 %v18523_v26  ;;  %v11379_v26 = vld [vmem:[%s26646_s4 + $0x188] sm:$0xff]  ;;  %26889 = vst [vmem:[#allocation176_spill] sm:$0xff] %v23425_v49 }
 0x3fa   :  { %9488 = vmatprep.subr.bf16.mxu0 %v18514_v27  ;;  %v18521_v27 = vld [vmem:[%s26643_s0 + $0x148] ss:$400 sps:$4 sm:$0xff]   ;;  %v13942_v25 = vld [vmem:[%s26647_s6 + $0x20] sm:$0xff] }
 0x3fb   :  { %11547 = vperm.xlu1 %17029, %v11363_v31   ;;  %v18532_v31 = vld [vmem:[%s26643_s0 + $0x2084] ss:$400 sps:$4 sm:$0xff]  }
 0x3fc   :  { %9544 = vmatpush1.bf16.msra.mxu1 %v18521_v27  ;;  %v23433_v27 = vpop.f32.mrf.mxu1 }
 0x3fd   :  { %9489 = vmatpush1.bf16.msra.mxu0 %v18512_v52  ;;  %v18529_v52 = vld [vmem:[%s26643_s0 + $0x23ac] ss:$400 sps:$4 sm:$0xff]   ;;  %26890 = vst [vmem:[#allocation177_spill] sm:$0xff] %v23433_v27  ;;  %v23447_v27 = vpop.f32.mrf.mxu0 }
 0x3fe   :  { %9490 = vmatprep.subr.bf16.mxu0 %v18520_v38  ;;  %v11378_v38 = vld [vmem:[%s26646_s4 + $0x180] sm:$0xff]  ;;  %9553 = vmatprep.subr.bf16.mxu1 %v18529_v52  ;;  %26891 = vst [vmem:[#allocation178_spill] sm:$0xff] %v23447_v27 }
 0x3ff   :  { %11622 = vperm.xlu0 %17028, %v11378_v38   ;;  %11627 = vperm.xlu1 %17029, %v11379_v26   ;;  %v13938_v52 = vld [vmem:[%s26647_s6] sm:$0xff]  ;;  %v23455_v38 = vpop.f32.mrf.mxu1  ;;  %v23469_v27 = vpop.f32.mrf.mxu0 }
 0x400   :  { %9554 = vmatpush2.bf16.msra.mxu1 %v18527_v51  ;;  %v18541_v51 = vld [vmem:[%s26643_s0 + $0x1d6c] ss:$400 sps:$4 sm:$0xff]   ;;  %26892 = vst [vmem:[#allocation179_spill] sm:$0xff] %v23455_v38  ;;  %v18536_v26 = vld [vmem:[%s26643_s0 + $0x1d60] ss:$400 sps:$4 sm:$0xff]   ;;  %26893 = vst [vmem:[#allocation180_spill] sm:$0xff] %v23469_v27 }
 0x401   :  { %9491 = vmatpush1.bf16.msra.mxu0 %v18518_v24  ;;  %v18535_v24 = vld [vmem:[%s26643_s0 + $0x208c] ss:$400 sps:$4 sm:$0xff]   ;;  %v13940_v38 = vld [vmem:[%s26647_s6 + $0x10] sm:$0xff]  ;;  %v23491_v27 = vpop.f32.mrf.mxu0 }
 0x402   :  { %9500 = vmatprep.subr.bf16.mxu0 %v18526_v18  ;;  %v18533_v18 = vld [vmem:[%s26643_s0 + $0x2088] ss:$400 sps:$4 sm:$0xff]   ;;  %9555 = vmatprep.subr.bf16.mxu1 %v18535_v24  ;;  %26895 = vst [vmem:[#allocation182_spill] sm:$0xff] %v23491_v27 }
 0x403   :  { %13965 = vperm.xlu0 %17028, %v13938_v52   ;;  %13985 = vperm.xlu1 %17029, %v13942_v25   ;;  %v13939_v24 = vld [vmem:[%s26647_s6 + $0x8] sm:$0xff]  ;;  %v18544_v25 = vld [vmem:[%s26643_s0 + $0x1a44] ss:$400 sps:$4 sm:$0xff]   ;;  %v18542_v52 = vld [vmem:[%s26643_s0 + $0x1a40] ss:$400 sps:$4 sm:$0xff]  }
 0x404   :  { %9556 = vmatpush2.bf16.msra.mxu1 %v18533_v18  ;;  %v23477_v18 = vpop.f32.mrf.mxu1 }
 0x405   :  { %9501 = vmatpush2.bf16.msra.mxu0 %v18524_v28  ;;  %v18538_v28 = vld [vmem:[%s26643_s0 + $0x1d64] ss:$400 sps:$4 sm:$0xff]   ;;  %9557 = vmatprep.subr.bf16.mxu1 %v18541_v51  ;;  %26894 = vst [vmem:[#allocation181_spill] sm:$0xff] %v23477_v18  ;;  %v13941_v51 = vld [vmem:[%s26647_s6 + $0x18] sm:$0xff]  ;;  %v13943_v18 = vld [vmem:[%s26647_s6 + $0x28] sm:$0xff] }
 0x406   :  { %9502 = vmatprep.subr.bf16.mxu0 %v18532_v31  ;;  %v18539_v31 = vld [vmem:[%s26643_s0 + $0x1d68] ss:$400 sps:$4 sm:$0xff]  }
 0x407   :  { %13970 = vperm.xlu0 %17028, %v13939_v24   ;;  %13975 = vperm.xlu1 %17029, %v13940_v38   ;;  %v18550_v38 = vld [vmem:[%s26643_s0 + $0x1734] ss:$400 sps:$4 sm:$0xff]   ;;  %v18548_v24 = vld [vmem:[%s26643_s0 + $0x1730] ss:$400 sps:$4 sm:$0xff]  }
 0x408   :  { %9558 = vmatpush2.bf16.msra.mxu1 %v18539_v31  ;;  %v23499_v31 = vpop.f32.mrf.mxu1 }
 0x409   :  { %9503 = vmatpush2.bf16.msra.mxu0 %v18530_v30  ;;  %v18547_v30 = vld [vmem:[%s26643_s0 + $0x1a4c] ss:$400 sps:$4 sm:$0xff]   ;;  %26896 = vst [vmem:[#allocation183_spill] sm:$0xff] %v23499_v31 }
 0x40a   :  { %9504 = vmatprep.subr.bf16.mxu0 %v18538_v28  ;;  %v18545_v28 = vld [vmem:[%s26643_s0 + $0x1a48] ss:$400 sps:$4 sm:$0xff]   ;;  %9559 = vmatprep.subr.bf16.mxu1 %v18547_v30  ;;  %v23507_v30 = vpop.f32.mrf.mxu0  ;;  %v23509_v27 = vpop.f32.mrf.mxu1 }
 0x40b   :  { %13980 = vperm.xlu0 %17028, %v13941_v51   ;;  %13990 = vperm.xlu1 %17029, %v13943_v18   ;;  %26897 = vst [vmem:[#allocation184_spill] sm:$0xff] %v23507_v30  ;;  %26898 = vst [vmem:[#allocation185_spill] sm:$0xff] %v23509_v27  ;;  %v18556_v18 = vld [vmem:[%s26643_s0 + $0x1414] ss:$400 sps:$4 sm:$0xff]   ;;  %v18557_v51 = vld [vmem:[%s26643_s0 + $0x1418] ss:$400 sps:$4 sm:$0xff]  }
 0x40c   :  { %9560 = vmatpush2.bf16.msra.mxu1 %v18545_v28  ;;  %v18554_v28 = vld [vmem:[%s26643_s0 + $0x1410] ss:$400 sps:$4 sm:$0xff]   ;;  %v23531_v31 = vpop.f32.mrf.mxu0  ;;  %v23533_v27 = vpop.f32.mrf.mxu1 }
 0x40d   :  { %9505 = vmatpush2.bf16.msra.mxu0 %v18536_v26  ;;  %v18553_v26 = vld [vmem:[%s26643_s0 + $0x173c] ss:$400 sps:$4 sm:$0xff]   ;;  %26899 = vst [vmem:[#allocation186_spill] sm:$0xff] %v23531_v31  ;;  %26900 = vst [vmem:[#allocation187_spill] sm:$0xff] %v23533_v27 }
 0x40e   :  { %9506 = vmatprep.subr.bf16.mxu0 %v18544_v25  ;;  %v18551_v25 = vld [vmem:[%s26643_s0 + $0x1738] ss:$400 sps:$4 sm:$0xff]   ;;  %9635 = vmatprep.subr.bf16.mxu1 %v18553_v26  ;;  %v23551_v27 = vpop.f32.mrf.mxu0  ;;  %v23553_v31 = vpop.f32.mrf.mxu1 }
 0x40f   :  { %9562 = vmatmul.mubr.bf16.vlgmr.msra.gmra.mxu1 %v23230_v22  ;;  %v13945_v26 = vld [vmem:[%s26647_s6 + $0x38] sm:$0xff]  ;;  %26901 = vst [vmem:[#allocation188_spill] sm:$0xff] %v23551_v27  ;;  %26902 = vst [vmem:[#allocation189_spill] sm:$0xff] %v23553_v31  ;;  %v13947_v31 = vld [vmem:[%s26647_s6 + $0x48] sm:$0xff] }
 0x410   :  { %9636 = vmatpush1.bf16.msra.mxu1 %v18551_v25  ;;  %v18565_v25 = vld [vmem:[%s26643_s0 + $0x10fc] ss:$400 sps:$4 sm:$0xff]   ;;  %16119 = vmatprep.mubr.msk.bf16.mxu1 %vm7349_vm0, %v23259_v40 }
 0x411   :  { %9507 = vmatpush2.bf16.msra.mxu0 %v18542_v52  ;;  %v18559_v52 = vld [vmem:[%s26643_s0 + $0x141c] ss:$400 sps:$4 sm:$0xff]   ;;  %14000 = vperm.xlu1 %17029, %v13945_v26   ;;  %v18566_v26 = vld [vmem:[%s26643_s0 + $0xdd0] ss:$400 sps:$4 sm:$0xff]  }
 0x412   :  { %9582 = vmatprep.subr.bf16.mxu0 %v18550_v38  ;;  %v13944_v38 = vld [vmem:[%s26647_s6 + $0x30] sm:$0xff]  ;;  %9637 = vmatprep.subr.bf16.mxu1 %v18559_v52  ;;  %v18563_v52 = vld [vmem:[%s26643_s0 + $0x10f8] ss:$400 sps:$4 sm:$0xff]  }
 0x413   :  { %13995 = vperm.xlu0 %17028, %v13944_v38   ;;  %v18568_v38 = vld [vmem:[%s26643_s0 + $0xdd4] ss:$400 sps:$4 sm:$0xff]  }
 0x414   :  { %9509 = vmatmul.mubr.bf16.vlgmr.msra.gmra.mxu0 %v23230_v22  ;;  %9638 = vmatpush1.bf16.msra.mxu1 %v18557_v51  ;;  %v23561_v51 = vpop.f32.mrf.mxu0 }
 0x415   :  { %9583 = vmatpush1.bf16.msra.mxu0 %v18548_v24  ;;  %v18562_v24 = vld [vmem:[%s26643_s0 + $0x10f4] ss:$400 sps:$4 sm:$0xff]   ;;  %16117 = vmatprep.mubr.msk.bf16.mxu0 %vm7349_vm0, %v23259_v40  ;;  %26903 = vst [vmem:[#allocation190_spill] sm:$0xff] %v23561_v51  ;;  %v23577_v51 = vpop.f32.mrf.mxu1 }
 0x416   :  { %9584 = vmatprep.subr.bf16.mxu0 %v18556_v18  ;;  %v18560_v18 = vld [vmem:[%s26643_s0 + $0x10f0] ss:$400 sps:$4 sm:$0xff]   ;;  %9639 = vmatprep.subr.bf16.mxu1 %v18565_v25  ;;  %26904 = vst [vmem:[#allocation191_spill] sm:$0xff] %v23577_v51  ;;  %v23589_v27 = vpop.f32.mrf.mxu0 }
 0x417   :  { %9572 = vmatmul.mubr.bf16.gmra.mxu1 %v23286_v13  ;;  %v13946_v25 = vld [vmem:[%s26647_s6 + $0x40] sm:$0xff]  ;;  %26905 = vst [vmem:[#allocation192_spill] sm:$0xff] %v23589_v27  ;;  %v23591_v30 = vpop.f32.mrf.mxu1  ;;  %14010 = vperm.xlu1 %17029, %v13947_v31   ;;  %v13948_v51 = vld [vmem:[%s26647_s6 + $0x50] sm:$0xff] }
 0x418   :  { %9640 = vmatpush1.bf16.msra.mxu1 %v18563_v52  ;;  %v18577_v52 = vld [vmem:[%s26643_s0 + $0xabc] ss:$400 sps:$4 sm:$0xff]   ;;  %16122 = vmatprep.mubr.msk.bf16.mxu1 %vm7349_vm0, %v23313_v58  ;;  %26906 = vst [vmem:[#allocation193_spill] sm:$0xff] %v23591_v30  ;;  %v18580_v31 = vld [vmem:[%s26643_s0 + $0x794] ss:$400 sps:$4 sm:$0xff]  }
 0x419   :  { %9585 = vmatpush1.bf16.msra.mxu0 %v18554_v28  ;;  %v18571_v28 = vld [vmem:[%s26643_s0 + $0xddc] ss:$400 sps:$4 sm:$0xff]   ;;  %14005 = vperm.xlu0 %17028, %v13946_v25   ;;  %v23613_v25 = vpop.f32.mrf.mxu1  ;;  %v18578_v27 = vld [vmem:[%s26643_s0 + $0x790] ss:$400 sps:$4 sm:$0xff]  }
 0x41a   :  { %9586 = vmatprep.subr.bf16.mxu0 %v18562_v24  ;;  %v18569_v24 = vld [vmem:[%s26643_s0 + $0xdd8] ss:$400 sps:$4 sm:$0xff]   ;;  %9641 = vmatprep.subr.bf16.mxu1 %v18571_v28  ;;  %26908 = vst [vmem:[#allocation195_spill] sm:$0xff] %v23613_v25 }
 0x41b   :  { %v18575_v28 = vld [vmem:[%s26643_s0 + $0xab8] ss:$400 sps:$4 sm:$0xff]  }
 0x41c   :  { %9519 = vmatmul.mubr.bf16.gmra.mxu0 %v23286_v13  ;;  %9642 = vmatpush1.bf16.msra.mxu1 %v18569_v24  ;;  %v13949_v30 = vld [vmem:[%s26647_s6 + $0x58] sm:$0xff]  ;;  %v23611_v24 = vpop.f32.mrf.mxu0  ;;  %v13951_v25 = vld [vmem:[%s26647_s6 + $0x68] sm:$0xff] }
 0x41d   :  { %9587 = vmatpush1.bf16.msra.mxu0 %v18560_v18  ;;  %v18574_v18 = vld [vmem:[%s26643_s0 + $0xab4] ss:$400 sps:$4 sm:$0xff]   ;;  %16120 = vmatprep.mubr.msk.bf16.mxu0 %vm7349_vm0, %v23313_v58  ;;  %26907 = vst [vmem:[#allocation194_spill] sm:$0xff] %v23611_v24  ;;  %v18584_v24 = vld [vmem:[%s26643_s0 + $0x470] ss:$400 sps:$4 sm:$0xff]  }
 0x41e   :  { %9588 = vmatprep.subr.bf16.mxu0 %v18568_v38  ;;  %v18572_v38 = vld [vmem:[%s26643_s0 + $0xab0] ss:$400 sps:$4 sm:$0xff]   ;;  %9643 = vmatprep.subr.bf16.mxu1 %v18577_v52 }
 0x41f   :  { %14015 = vperm.xlu0 %17028, %v13948_v51   ;;  %14020 = vperm.xlu1 %17029, %v13949_v30   ;;  %v13950_v52 = vld [vmem:[%s26647_s6 + $0x60] sm:$0xff]  ;;  %v18589_v51 = vld [vmem:[%s26643_s0 + $0x47c] ss:$400 sps:$4 sm:$0xff]  }
 0x420   :  { %9644 = vmatpush1.bf16.msra.mxu1 %v18575_v28  ;;  %v18586_v30 = vld [vmem:[%s26643_s0 + $0x474] ss:$400 sps:$4 sm:$0xff]   ;;  %v23635_v28 = vpop.f32.mrf.mxu1 }
 0x421   :  { %9589 = vmatpush1.bf16.msra.mxu0 %v18566_v26  ;;  %v18583_v26 = vld [vmem:[%s26643_s0 + $0x79c] ss:$400 sps:$4 sm:$0xff]   ;;  %26910 = vst [vmem:[#allocation197_spill] sm:$0xff] %v23635_v28 }
 0x422   :  { %9590 = vmatprep.subr.bf16.mxu0 %v18574_v18  ;;  %v18581_v18 = vld [vmem:[%s26643_s0 + $0x798] ss:$400 sps:$4 sm:$0xff]   ;;  %9645 = vmatprep.subr.bf16.mxu1 %v18583_v26  ;;  %v13952_v26 = vld [vmem:[%s26647_s6 + $0x70] sm:$0xff] }
 0x423   :  { %14025 = vperm.xlu0 %17028, %v13950_v52   ;;  %14030 = vperm.xlu1 %17029, %v13951_v25   ;;  %v13953_v28 = vld [vmem:[%s26647_s6 + $0x78] sm:$0xff]  ;;  %v18592_v25 = vld [vmem:[%s26643_s0 + $0x154] ss:$400 sps:$4 sm:$0xff]   ;;  %v23657_v52 = vpop.f32.mrf.mxu1 }
 0x424   :  { %9646 = vmatpush1.bf16.msra.mxu1 %v18581_v18  ;;  %26912 = vst [vmem:[#allocation199_spill] sm:$0xff] %v23657_v52  ;;  %v13955_v52 = vld [vmem:[%s26647_s6 + $0x88] sm:$0xff] }
 0x425   :  { %9591 = vmatpush1.bf16.msra.mxu0 %v18572_v38  ;;  %v23633_v38 = vpop.f32.mrf.mxu0  ;;  %9647 = vmatprep.subr.bf16.mxu1 %v18589_v51  ;;  %v13954_v51 = vld [vmem:[%s26647_s6 + $0x80] sm:$0xff] }
 0x426   :  { %9592 = vmatprep.subr.bf16.mxu0 %v18580_v31  ;;  %26909 = vst [vmem:[#allocation196_spill] sm:$0xff] %v23633_v38  ;;  %v18587_v31 = vld [vmem:[%s26643_s0 + $0x478] ss:$400 sps:$4 sm:$0xff]   ;;  %v18590_v38 = vld [vmem:[%s26643_s0 + $0x150] ss:$400 sps:$4 sm:$0xff]  }
 0x427   :  { %v23655_v18 = vpop.f32.mrf.mxu0  ;;  %14035 = vperm.xlu0 %17028, %v13952_v26   ;;  %14040 = vperm.xlu1 %17029, %v13953_v28   ;;  %v18601_v28 = vld [vmem:[%s26643_s0 + $0x23bc] ss:$400 sps:$4 sm:$0xff]   ;;  %v18596_v26 = vld [vmem:[%s26643_s0 + $0x23b0] ss:$400 sps:$4 sm:$0xff]  }
 0x428   :  { %26911 = vst [vmem:[#allocation198_spill] sm:$0xff] %v23655_v18  ;;  %9648 = vmatpush1.bf16.msra.mxu1 %v18587_v31  ;;  %v23671_v18 = vpop.f32.mrf.mxu1 }
 0x429   :  { %9593 = vmatpush1.bf16.msra.mxu0 %v18578_v27  ;;  %v18595_v27 = vld [vmem:[%s26643_s0 + $0x15c] ss:$400 sps:$4 sm:$0xff]   ;;  %26913 = vst [vmem:[#allocation200_spill] sm:$0xff] %v23671_v18  ;;  %v23679_v31 = vpop.f32.mrf.mxu0 }
 0x42a   :  { %9594 = vmatprep.subr.bf16.mxu0 %v18586_v30  ;;  %v18593_v30 = vld [vmem:[%s26643_s0 + $0x158] ss:$400 sps:$4 sm:$0xff]   ;;  %9649 = vmatprep.subr.bf16.mxu1 %v18595_v27  ;;  %26914 = vst [vmem:[#allocation201_spill] sm:$0xff] %v23679_v31  ;;  %v13956_v27 = vld [vmem:[%s26647_s6 + $0x90] sm:$0xff]  ;;  %v23693_v31 = vpop.f32.mrf.mxu1 }
 0x42b   :  { %14045 = vperm.xlu0 %17028, %v13954_v51   ;;  %14050 = vperm.xlu1 %17029, %v13955_v52   ;;  %v13957_v18 = vld [vmem:[%s26647_s6 + $0x98] sm:$0xff]  ;;  %26915 = vst [vmem:[#allocation202_spill] sm:$0xff] %v23693_v31  ;;  %v18602_v51 = vld [vmem:[%s26643_s0 + $0x2090] ss:$400 sps:$4 sm:$0xff]   ;;  %v13959_v31 = vld [vmem:[%s26647_s6 + $0xa8] sm:$0xff] }
 0x42c   :  { %9650 = vmatpush1.bf16.msra.mxu1 %v18593_v30  ;;  %v18607_v52 = vld [vmem:[%s26643_s0 + $0x209c] ss:$400 sps:$4 sm:$0xff]   ;;  %v23701_v30 = vpop.f32.mrf.mxu0 }
 0x42d   :  { %9595 = vmatpush1.bf16.msra.mxu0 %v18584_v24  ;;  %v18598_v24 = vld [vmem:[%s26643_s0 + $0x23b4] ss:$400 sps:$4 sm:$0xff]   ;;  %9659 = vmatprep.subr.bf16.mxu1 %v18601_v28  ;;  %26916 = vst [vmem:[#allocation203_spill] sm:$0xff] %v23701_v30  ;;  %v23715_v30 = vpop.f32.mrf.mxu1 }
 0x42e   :  { %9596 = vmatprep.subr.bf16.mxu0 %v18592_v25  ;;  %v18599_v25 = vld [vmem:[%s26643_s0 + $0x23b8] ss:$400 sps:$4 sm:$0xff]   ;;  %v13958_v28 = vld [vmem:[%s26647_s6 + $0xa0] sm:$0xff]  ;;  %26917 = vst [vmem:[#allocation204_spill] sm:$0xff] %v23715_v30 }
 0x42f   :  { %14055 = vperm.xlu0 %17028, %v13956_v27   ;;  %14060 = vperm.xlu1 %17029, %v13957_v18   ;;  %v18610_v18 = vld [vmem:[%s26643_s0 + $0x1d74] ss:$400 sps:$4 sm:$0xff]   ;;  %v18608_v27 = vld [vmem:[%s26643_s0 + $0x1d70] ss:$400 sps:$4 sm:$0xff]   ;;  %v13961_v30 = vld [vmem:[%s26647_s6 + $0xb8] sm:$0xff]  ;;  %v23739_v49 = vpop.f32.mrf.mxu1 }
 0x430   :  { %9660 = vmatpush2.bf16.msra.mxu1 %v18599_v25  ;;  %v23723_v25 = vpop.f32.mrf.mxu0  ;;  %26919 = vst [vmem:[#allocation206_spill] sm:$0xff] %v23739_v49 }
 0x431   :  { %9597 = vmatpush1.bf16.msra.mxu0 %v18590_v38  ;;  %v18604_v38 = vld [vmem:[%s26643_s0 + $0x2094] ss:$400 sps:$4 sm:$0xff]   ;;  %9661 = vmatprep.subr.bf16.mxu1 %v18607_v52  ;;  %26918 = vst [vmem:[#allocation205_spill] sm:$0xff] %v23723_v25 }
 0x432   :  { %9606 = vmatprep.subr.bf16.mxu0 %v18598_v24  ;;  %v18605_v24 = vld [vmem:[%s26643_s0 + $0x2098] ss:$400 sps:$4 sm:$0xff]   ;;  %v13960_v52 = vld [vmem:[%s26647_s6 + $0xb0] sm:$0xff]  ;;  %v23737_v25 = vpop.f32.mrf.mxu0 }
 0x433   :  { %14065 = vperm.xlu0 %17028, %v13958_v28   ;;  %14070 = vperm.xlu1 %17029, %v13959_v31   ;;  %v18616_v31 = vld [vmem:[%s26643_s0 + $0x1a54] ss:$400 sps:$4 sm:$0xff]   ;;  %v18614_v28 = vld [vmem:[%s26643_s0 + $0x1a50] ss:$400 sps:$4 sm:$0xff]  }
 0x434   :  { %9662 = vmatpush2.bf16.msra.mxu1 %v18605_v24  ;;  %v23747_v24 = vpop.f32.mrf.mxu1  ;;  %v23758_v49 = vpop.f32.mrf.mxu0 }
 0x435   :  { %9607 = vmatpush2.bf16.msra.mxu0 %v18596_v26  ;;  %v18613_v26 = vld [vmem:[%s26643_s0 + $0x1d7c] ss:$400 sps:$4 sm:$0xff]   ;;  %26920 = vst [vmem:[#allocation207_spill] sm:$0xff] %v23747_v24  ;;  %v18628_v24 = vld [vmem:[%s26643_s0 + $0x1424] ss:$400 sps:$4 sm:$0xff]  }
 0x436   :  { %9608 = vmatprep.subr.bf16.mxu0 %v18604_v38  ;;  %v18611_v38 = vld [vmem:[%s26643_s0 + $0x1d78] ss:$400 sps:$4 sm:$0xff]   ;;  %9663 = vmatprep.subr.bf16.mxu1 %v18613_v26  ;;  %v13962_v26 = vld [vmem:[%s26647_s6 + $0xc0] sm:$0xff] }
 0x437   :  { %14075 = vperm.xlu0 %17028, %v13960_v52   ;;  %14080 = vperm.xlu1 %17029, %v13961_v30   ;;  %v18622_v30 = vld [vmem:[%s26643_s0 + $0x1744] ss:$400 sps:$4 sm:$0xff]   ;;  %v18620_v52 = vld [vmem:[%s26643_s0 + $0x1740] ss:$400 sps:$4 sm:$0xff]  }
 0x438   :  { %9664 = vmatpush2.bf16.msra.mxu1 %v18611_v38  ;;  %v23766_v38 = vpop.f32.mrf.mxu1 }
 0x439   :  { %9609 = vmatpush2.bf16.msra.mxu0 %v18602_v51  ;;  %v18619_v51 = vld [vmem:[%s26643_s0 + $0x1a5c] ss:$400 sps:$4 sm:$0xff]   ;;  %26921 = vst [vmem:[#allocation208_spill] sm:$0xff] %v23766_v38  ;;  %v18634_v38 = vld [vmem:[%s26643_s0 + $0x1104] ss:$400 sps:$4 sm:$0xff]  }
 0x43a   :  { %9610 = vmatprep.subr.bf16.mxu0 %v18610_v18  ;;  %v18617_v18 = vld [vmem:[%s26643_s0 + $0x1a58] ss:$400 sps:$4 sm:$0xff]   ;;  %9665 = vmatprep.subr.bf16.mxu1 %v18619_v51  ;;  %v23774_v51 = vpop.f32.mrf.mxu0 }
 0x43b   :  { %14085 = vperm.xlu0 %17028, %v13962_v26   ;;  %26922 = vst [vmem:[#allocation209_spill] sm:$0xff] %v23774_v51  ;;  %v18626_v26 = vld [vmem:[%s26643_s0 + $0x1420] ss:$400 sps:$4 sm:$0xff]  }
 0x43c   :  { %9666 = vmatpush2.bf16.msra.mxu1 %v18617_v18  ;;  %v23782_v18 = vpop.f32.mrf.mxu1 }
 0x43d   :  { %9611 = vmatpush2.bf16.msra.mxu0 %v18608_v27  ;;  %v18625_v27 = vld [vmem:[%s26643_s0 + $0x174c] ss:$400 sps:$4 sm:$0xff]   ;;  %26923 = vst [vmem:[#allocation210_spill] sm:$0xff] %v23782_v18 }
 0x43e   :  { %9612 = vmatprep.subr.bf16.mxu0 %v18616_v31  ;;  %v18623_v31 = vld [vmem:[%s26643_s0 + $0x1748] ss:$400 sps:$4 sm:$0xff]   ;;  %9741 = vmatprep.subr.bf16.mxu1 %v18625_v27  ;;  %v23792_v27 = vpop.f32.mrf.mxu0 }
 0x43f   :  { %9668 = vmatmul.mubr.bf16.vlgmr.msra.gmra.mxu1 %v23230_v22  ;;  %26924 = vst [vmem:[#allocation211_spill] sm:$0xff] %v23792_v27 }
 0x440   :  { %9742 = vmatpush1.bf16.msra.mxu1 %v18623_v31  ;;  %16123 = vmatprep.mubr.msk.bf16.mxu1 %vm7349_vm0, %v23259_v40  ;;  %v23804_v31 = vpop.f32.mrf.mxu1  ;;  %v23812_v18 = vpop.f32.mrf.mxu0 }
 0x441   :  { %9613 = vmatpush2.bf16.msra.mxu0 %v18614_v28  ;;  %v18631_v28 = vld [vmem:[%s26643_s0 + $0x142c] ss:$400 sps:$4 sm:$0xff]   ;;  %26925 = vst [vmem:[#allocation212_spill] sm:$0xff] %v23804_v31  ;;  %26926 = vst [vmem:[#allocation213_spill] sm:$0xff] %v23812_v18  ;;  %v18640_v31 = vld [vmem:[%s26643_s0 + $0xde4] ss:$400 sps:$4 sm:$0xff]  }
 0x442   :  { %9688 = vmatprep.subr.bf16.mxu0 %v18622_v30  ;;  %v18629_v30 = vld [vmem:[%s26643_s0 + $0x1428] ss:$400 sps:$4 sm:$0xff]   ;;  %9743 = vmatprep.subr.bf16.mxu1 %v18631_v28  ;;  %v23814_v51 = vpop.f32.mrf.mxu1  ;;  %v18646_v18 = vld [vmem:[%s26643_s0 + $0xac4] ss:$400 sps:$4 sm:$0xff]  }
 0x443   :  { %v18635_v28 = vld [vmem:[%s26643_s0 + $0x1108] ss:$400 sps:$4 sm:$0xff]   ;;  %26927 = vst [vmem:[#allocation214_spill] sm:$0xff] %v23814_v51 }
 0x444   :  { %9615 = vmatmul.mubr.bf16.vlgmr.msra.gmra.mxu0 %v23230_v22  ;;  %9744 = vmatpush1.bf16.msra.mxu1 %v18629_v30  ;;  %v18638_v30 = vld [vmem:[%s26643_s0 + $0xde0] ss:$400 sps:$4 sm:$0xff]   ;;  %v23832_v51 = vpop.f32.mrf.mxu1 }
 0x445   :  { %9689 = vmatpush1.bf16.msra.mxu0 %v18620_v52  ;;  %v18637_v52 = vld [vmem:[%s26643_s0 + $0x110c] ss:$400 sps:$4 sm:$0xff]   ;;  %16121 = vmatprep.mubr.msk.bf16.mxu0 %vm7349_vm0, %v23259_v40  ;;  %26929 = vst [vmem:[#allocation216_spill] sm:$0xff] %v23832_v51 }
 0x446   :  { %9690 = vmatprep.subr.bf16.mxu0 %v18628_v24  ;;  %v18632_v24 = vld [vmem:[%s26643_s0 + $0x1100] ss:$400 sps:$4 sm:$0xff]   ;;  %9745 = vmatprep.subr.bf16.mxu1 %v18637_v52  ;;  %v23830_v52 = vpop.f32.mrf.mxu0  ;;  %v23852_v51 = vpop.f32.mrf.mxu1 }
 0x447   :  { %9678 = vmatmul.mubr.bf16.gmra.mxu1 %v23286_v13  ;;  %26928 = vst [vmem:[#allocation215_spill] sm:$0xff] %v23830_v52  ;;  %26931 = vst [vmem:[#allocation218_spill] sm:$0xff] %v23852_v51  ;;  %v18652_v52 = vld [vmem:[%s26643_s0 + $0x7a4] ss:$400 sps:$4 sm:$0xff]   ;;  %v18653_v51 = vld [vmem:[%s26643_s0 + $0x7a8] ss:$400 sps:$4 sm:$0xff]  }
 0x448   :  { %9746 = vmatpush1.bf16.msra.mxu1 %v18635_v28  ;;  %16126 = vmatprep.mubr.msk.bf16.mxu1 %vm7349_vm0, %v23313_v58  ;;  %v18647_v28 = vld [vmem:[%s26643_s0 + $0xac8] ss:$400 sps:$4 sm:$0xff]  }
 0x449   :  { %9691 = vmatpush1.bf16.msra.mxu0 %v18626_v26  ;;  %v18643_v26 = vld [vmem:[%s26643_s0 + $0xdec] ss:$400 sps:$4 sm:$0xff]  }
 0x44a   :  { %9692 = vmatprep.subr.bf16.mxu0 %v18634_v38  ;;  %v18641_v38 = vld [vmem:[%s26643_s0 + $0xde8] ss:$400 sps:$4 sm:$0xff]   ;;  %9747 = vmatprep.subr.bf16.mxu1 %v18643_v26  ;;  %v23850_v26 = vpop.f32.mrf.mxu0 }
 0x44b   :  { %26930 = vst [vmem:[#allocation217_spill] sm:$0xff] %v23850_v26  ;;  %v18658_v26 = vld [vmem:[%s26643_s0 + $0x484] ss:$400 sps:$4 sm:$0xff]  }
 0x44c   :  { %9625 = vmatmul.mubr.bf16.gmra.mxu0 %v23286_v13  ;;  %9748 = vmatpush1.bf16.msra.mxu1 %v18641_v38  ;;  %v18650_v38 = vld [vmem:[%s26643_s0 + $0x7a0] ss:$400 sps:$4 sm:$0xff]  }
 0x44d   :  { %9693 = vmatpush1.bf16.msra.mxu0 %v18632_v24  ;;  %v18649_v24 = vld [vmem:[%s26643_s0 + $0xacc] ss:$400 sps:$4 sm:$0xff]   ;;  %16124 = vmatprep.mubr.msk.bf16.mxu0 %vm7349_vm0, %v23313_v58 }
 0x44e   :  { %9694 = vmatprep.subr.bf16.mxu0 %v18640_v31  ;;  %v18644_v31 = vld [vmem:[%s26643_s0 + $0xac0] ss:$400 sps:$4 sm:$0xff]   ;;  %9749 = vmatprep.subr.bf16.mxu1 %v18649_v24  ;;  %v23868_v24 = vpop.f32.mrf.mxu1 }
 0x44f   :  { %26933 = vst [vmem:[#allocation220_spill] sm:$0xff] %v23868_v24  ;;  %v18656_v24 = vld [vmem:[%s26643_s0 + $0x480] ss:$400 sps:$4 sm:$0xff]  }
 0x450   :  { %9750 = vmatpush1.bf16.msra.mxu1 %v18647_v28  ;;  %v23878_v27 = vpop.f32.mrf.mxu1 }
 0x451   :  { %9695 = vmatpush1.bf16.msra.mxu0 %v18638_v30  ;;  %v18655_v30 = vld [vmem:[%s26643_s0 + $0x7ac] ss:$400 sps:$4 sm:$0xff]   ;;  %26935 = vst [vmem:[#allocation222_spill] sm:$0xff] %v23878_v27 }
 0x452   :  { %9696 = vmatprep.subr.bf16.mxu0 %v18646_v18  ;;  %v23866_v18 = vpop.f32.mrf.mxu0  ;;  %9751 = vmatprep.subr.bf16.mxu1 %v18655_v30  ;;  %v18664_v30 = vld [vmem:[%s26643_s0 + $0x164] ss:$400 sps:$4 sm:$0xff]   ;;  %v18667_v27 = vld [vmem:[%s26643_s0 + $0x16c] ss:$400 sps:$4 sm:$0xff]  }
 0x453   :  { %26932 = vst [vmem:[#allocation219_spill] sm:$0xff] %v23866_v18 }
 0x454   :  { %v23876_v28 = vpop.f32.mrf.mxu0  ;;  %9752 = vmatpush1.bf16.msra.mxu1 %v18653_v51  ;;  %v23894_v51 = vpop.f32.mrf.mxu1 }
 0x455   :  { %9697 = vmatpush1.bf16.msra.mxu0 %v18644_v31  ;;  %v18661_v31 = vld [vmem:[%s26643_s0 + $0x48c] ss:$400 sps:$4 sm:$0xff]   ;;  %26934 = vst [vmem:[#allocation221_spill] sm:$0xff] %v23876_v28  ;;  %26937 = vst [vmem:[#allocation224_spill] sm:$0xff] %v23894_v51  ;;  %v18662_v28 = vld [vmem:[%s26643_s0 + $0x160] ss:$400 sps:$4 sm:$0xff]  }
 0x456   :  { %9698 = vmatprep.subr.bf16.mxu0 %v18652_v52  ;;  %v18659_v52 = vld [vmem:[%s26643_s0 + $0x488] ss:$400 sps:$4 sm:$0xff]   ;;  %9753 = vmatprep.subr.bf16.mxu1 %v18661_v31  ;;  %v18670_v31 = vld [vmem:[%s26643_s0 + $0x23c4] ss:$400 sps:$4 sm:$0xff]   ;;  %v18673_v51 = vld [vmem:[%s26643_s0 + $0x23cc] ss:$400 sps:$4 sm:$0xff]  }
 0x458   :  { %9754 = vmatpush1.bf16.msra.mxu1 %v18659_v52  ;;  %v23910_v52 = vpop.f32.mrf.mxu1 }
 0x459   :  { %9699 = vmatpush1.bf16.msra.mxu0 %v18650_v38  ;;  %v23892_v38 = vpop.f32.mrf.mxu0  ;;  %9755 = vmatprep.subr.bf16.mxu1 %v18667_v27  ;;  %26939 = vst [vmem:[#allocation226_spill] sm:$0xff] %v23910_v52  ;;  %v18671_v27 = vld [vmem:[%s26643_s0 + $0x23c8] ss:$400 sps:$4 sm:$0xff]   ;;  %v18679_v52 = vld [vmem:[%s26643_s0 + $0x20ac] ss:$400 sps:$4 sm:$0xff]  }
 0x45a   :  { %9700 = vmatprep.subr.bf16.mxu0 %v18658_v26  ;;  %26936 = vst [vmem:[#allocation223_spill] sm:$0xff] %v23892_v38  ;;  %v18665_v26 = vld [vmem:[%s26643_s0 + $0x168] ss:$400 sps:$4 sm:$0xff]   ;;  %v18668_v38 = vld [vmem:[%s26643_s0 + $0x23c0] ss:$400 sps:$4 sm:$0xff]  }
 0x45c   :  { %9756 = vmatpush1.bf16.msra.mxu1 %v18665_v26  ;;  %v23926_v26 = vpop.f32.mrf.mxu1 }
 0x45d   :  { %9701 = vmatpush1.bf16.msra.mxu0 %v18656_v24  ;;  %v23908_v24 = vpop.f32.mrf.mxu0  ;;  %9765 = vmatprep.subr.bf16.mxu1 %v18673_v51  ;;  %26941 = vst [vmem:[#allocation228_spill] sm:$0xff] %v23926_v26  ;;  %v18677_v51 = vld [vmem:[%s26643_s0 + $0x20a8] ss:$400 sps:$4 sm:$0xff]   ;;  %v18680_v26 = vld [vmem:[%s26643_s0 + $0x1d80] ss:$400 sps:$4 sm:$0xff]  }
 0x45e   :  { %9702 = vmatprep.subr.bf16.mxu0 %v18664_v30  ;;  %26938 = vst [vmem:[#allocation225_spill] sm:$0xff] %v23908_v24  ;;  %v18676_v30 = vld [vmem:[%s26643_s0 + $0x20a4] ss:$400 sps:$4 sm:$0xff]   ;;  %v18674_v24 = vld [vmem:[%s26643_s0 + $0x20a0] ss:$400 sps:$4 sm:$0xff]  }
 0x460   :  { %9766 = vmatpush2.bf16.msra.mxu1 %v18671_v27 }
 0x461   :  { %9703 = vmatpush1.bf16.msra.mxu0 %v18662_v28  ;;  %v23924_v28 = vpop.f32.mrf.mxu0  ;;  %9767 = vmatprep.subr.bf16.mxu1 %v18679_v52  ;;  %v18683_v52 = vld [vmem:[%s26643_s0 + $0x1d88] ss:$400 sps:$4 sm:$0xff]  }
 0x462   :  { %9712 = vmatprep.subr.bf16.mxu0 %v18670_v31  ;;  %26940 = vst [vmem:[#allocation227_spill] sm:$0xff] %v23924_v28  ;;  %v23934_v31 = vpop.f32.mrf.mxu1  ;;  %v18682_v28 = vld [vmem:[%s26643_s0 + $0x1d84] ss:$400 sps:$4 sm:$0xff]  }
 0x463   :  { %26942 = vst [vmem:[#allocation229_spill] sm:$0xff] %v23934_v31  ;;  %v23942_v27 = vpop.f32.mrf.mxu0  ;;  %v18688_v31 = vld [vmem:[%s26643_s0 + $0x1a64] ss:$400 sps:$4 sm:$0xff]  }
 0x464   :  { %26943 = vst [vmem:[#allocation230_spill] sm:$0xff] %v23942_v27  ;;  %9768 = vmatpush2.bf16.msra.mxu1 %v18677_v51  ;;  %v18686_v27 = vld [vmem:[%s26643_s0 + $0x1a60] ss:$400 sps:$4 sm:$0xff]  }
 0x465   :  { %9713 = vmatpush2.bf16.msra.mxu0 %v18668_v38  ;;  %v18685_v38 = vld [vmem:[%s26643_s0 + $0x1d8c] ss:$400 sps:$4 sm:$0xff]   ;;  %v23958_v51 = vpop.f32.mrf.mxu0 }
 0x466   :  { %9714 = vmatprep.subr.bf16.mxu0 %v18676_v30  ;;  %v23950_v30 = vpop.f32.mrf.mxu1  ;;  %9769 = vmatprep.subr.bf16.mxu1 %v18685_v38  ;;  %26945 = vst [vmem:[#allocation232_spill] sm:$0xff] %v23958_v51  ;;  %v18692_v51 = vld [vmem:[%s26643_s0 + $0x1750] ss:$400 sps:$4 sm:$0xff]  }
 0x467   :  { %26944 = vst [vmem:[#allocation231_spill] sm:$0xff] %v23950_v30  ;;  %v18694_v30 = vld [vmem:[%s26643_s0 + $0x1754] ss:$400 sps:$4 sm:$0xff]  }
 0x468   :  { %9770 = vmatpush2.bf16.msra.mxu1 %v18683_v52  ;;  %v23966_v38 = vpop.f32.mrf.mxu1  ;;  %v23974_v52 = vpop.f32.mrf.mxu0 }
 0x469   :  { %9715 = vmatpush2.bf16.msra.mxu0 %v18674_v24  ;;  %v18691_v24 = vld [vmem:[%s26643_s0 + $0x1a6c] ss:$400 sps:$4 sm:$0xff]   ;;  %26946 = vst [vmem:[#allocation233_spill] sm:$0xff] %v23966_v38  ;;  %26947 = vst [vmem:[#allocation234_spill] sm:$0xff] %v23974_v52  ;;  %v18700_v38 = vld [vmem:[%s26643_s0 + $0x1434] ss:$400 sps:$4 sm:$0xff]  }
 0x46a   :  { %9716 = vmatprep.subr.bf16.mxu0 %v18682_v28  ;;  %v18689_v28 = vld [vmem:[%s26643_s0 + $0x1a68] ss:$400 sps:$4 sm:$0xff]   ;;  %9771 = vmatprep.subr.bf16.mxu1 %v18691_v24  ;;  %v23982_v24 = vpop.f32.mrf.mxu1 }
 0x46b   :  { %26948 = vst [vmem:[#allocation235_spill] sm:$0xff] %v23982_v24  ;;  %v24002_v24 = vpop.permute.xlu1 %10312 }
 0x46c   :  { %9772 = vmatpush2.bf16.msra.mxu1 %v18689_v28  ;;  %v23990_v28 = vpop.f32.mrf.mxu0 }
 0x46d   :  { %9717 = vmatpush2.bf16.msra.mxu0 %v18680_v26  ;;  %v18697_v26 = vld [vmem:[%s26643_s0 + $0x175c] ss:$400 sps:$4 sm:$0xff]   ;;  %26949 = vst [vmem:[#allocation236_spill] sm:$0xff] %v23990_v28 }
 0x46e   :  { %9718 = vmatprep.subr.bf16.mxu0 %v18688_v31  ;;  %v18695_v31 = vld [vmem:[%s26643_s0 + $0x1758] ss:$400 sps:$4 sm:$0xff]   ;;  %9847 = vmatprep.subr.bf16.mxu1 %v18697_v26  ;;  %v23992_v52 = vpop.f32.mrf.mxu1  ;;  %v24004_v18 = vpop.f32.mrf.mxu0 }
 0x46f   :  { %26950 = vst [vmem:[#allocation237_spill] sm:$0xff] %v23992_v52  ;;  %9774 = vmatmul.mubr.bf16.vlgmr.msra.gmra.mxu1 %v23230_v22  ;;  %v18701_v26 = vld [vmem:[%s26643_s0 + $0x1438] ss:$400 sps:$4 sm:$0xff]   ;;  %26951 = vst [vmem:[#allocation238_spill] sm:$0xff] %v24004_v18  ;;  %v18704_v18 = vld [vmem:[%s26643_s0 + $0x1110] ss:$400 sps:$4 sm:$0xff]  }
 0x470   :  { %9848 = vmatpush1.bf16.msra.mxu1 %v18695_v31  ;;  %v9353_v28 = vpop.f32.mrf.mxu1  ;;  %v10006_v31 = vmax.f32 %v21321_v39, %v22135_v20  ;;  %16127 = vmatprep.mubr.msk.bf16.mxu1 %vm7349_vm0, %v23259_v40  ;;  %v18707_v39 = vld [vmem:[%s26643_s0 + $0x1118] ss:$400 sps:$4 sm:$0xff]   ;;  %v24027_v20 = vpop.f32.mrf.mxu0 }
 0x471   :  { %9719 = vmatpush2.bf16.msra.mxu0 %v18686_v27  ;;  %v18703_v27 = vld [vmem:[%s26643_s0 + $0x143c] ss:$400 sps:$4 sm:$0xff]   ;;  %v10106_v52 = vmax.f32 %v23099_v34, %v9353_v28  ;;  %v10031_v28 = vmax.f32 %v21357_v48, %v22173_v41  ;;  %v18713_v48 = vld [vmem:[%s26643_s0 + $0xdf8] ss:$400 sps:$4 sm:$0xff]   ;;  %v24050_v41 = vpop.permute.xlu0 %10322 }
 0x472   :  { %9794 = vmatprep.subr.bf16.mxu0 %v18694_v30  ;;  %v18698_v30 = vld [vmem:[%s26643_s0 + $0x1430] ss:$400 sps:$4 sm:$0xff]   ;;  %9849 = vmatprep.subr.bf16.mxu1 %v18703_v27 }
 0x473   :  { %v10206_v27 = vmax.f32 %v10006_v31, %v10106_v52  ;;  %v18715_v52 = vld [vmem:[%s26643_s0 + $0xdfc] ss:$400 sps:$4 sm:$0xff]   ;;  %v18710_v31 = vld [vmem:[%s26643_s0 + $0xdf0] ss:$400 sps:$4 sm:$0xff]  }
 0x474   :  { %9721 = vmatmul.mubr.bf16.vlgmr.msra.gmra.mxu0 %v23230_v22  ;;  %v18706_v22 = vld [vmem:[%s26643_s0 + $0x1114] ss:$400 sps:$4 sm:$0xff]   ;;  %9850 = vmatpush1.bf16.msra.mxu1 %v18701_v26 }
 0x475   :  { %9795 = vmatpush1.bf16.msra.mxu0 %v18692_v51  ;;  %v18709_v51 = vld [vmem:[%s26643_s0 + $0x111c] ss:$400 sps:$4 sm:$0xff]   ;;  %16125 = vmatprep.mubr.msk.bf16.mxu0 %vm7349_vm0, %v23259_v40  ;;  %v18712_v40 = vld [vmem:[%s26643_s0 + $0xdf4] ss:$400 sps:$4 sm:$0xff]  }
 0x476   :  { %9796 = vmatprep.subr.bf16.mxu0 %v18700_v38  ;;  %v24019_v38 = vpop.f32.mrf.mxu1  ;;  %9851 = vmatprep.subr.bf16.mxu1 %v18709_v51 }
 0x477   :  { %26952 = vst [vmem:[#allocation239_spill] sm:$0xff] %v24019_v38  ;;  %9784 = vmatmul.mubr.bf16.gmra.mxu1 %v23286_v13 }
 0x478   :  { %v9357_v34 = vpop.f32.mrf.mxu1  ;;  %9852 = vmatpush1.bf16.msra.mxu1 %v18707_v39  ;;  %v18721_v39 = vld [vmem:[%s26643_s0 + $0xadc] ss:$400 sps:$4 sm:$0xff]   ;;  %16130 = vmatprep.mubr.msk.bf16.mxu1 %vm7349_vm0, %v23313_v58 }
 0x479   :  { %9797 = vmatpush1.bf16.msra.mxu0 %v18698_v30  ;;  %v10131_v30 = vmax.f32 %v23143_v16, %v9357_v34  ;;  %v10330_v16 = vadd.f32 %v24002_v24, %v10206_v27  ;;  %v24053_v34 = vpop.f32.mrf.mxu0  ;;  %9853 = vmatprep.subr.bf16.mxu1 %v18715_v52 }
 0x47a   :  { %9798 = vmatprep.subr.bf16.mxu0 %v18706_v22  ;;  %v24038_v26 = vpop.f32.mrf.mxu1  ;;  %v24042_v22 = vpop.permute.xlu1 %10317 }
 0x47b   :  { %26953 = vst [vmem:[#allocation240_spill] sm:$0xff] %v24038_v26  ;;  %v10231_v51 = vmax.f32 %v10031_v28, %v10131_v30  ;;  %v10056_v28 = vmax.f32 %v21389_v60, %v22211_v2  ;;  %v18716_v26 = vld [vmem:[%s26643_s0 + $0xad0] ss:$400 sps:$4 sm:$0xff]   ;;  %v18719_v60 = vld [vmem:[%s26643_s0 + $0xad8] ss:$400 sps:$4 sm:$0xff]   ;;  %v10430_v2 = vmax.f32 %v10330_v16, 0.0 }
 0x47c   :  { %9731 = vmatmul.mubr.bf16.gmra.mxu0 %v23286_v13  ;;  %v9363_v13 = vpop.f32.mrf.mxu1  ;;  %9854 = vmatpush1.bf16.msra.mxu1 %v18713_v48  ;;  %v10081_v48 = vmax.f32 %v21421_v10, %v22243_v36  ;;  %v18730_v36 = vld [vmem:[%s26643_s0 + $0x494] ss:$400 sps:$4 sm:$0xff]  }
 0x47d   :  { %9799 = vmatpush1.bf16.msra.mxu0 %v18704_v18  ;;  %v18718_v18 = vld [vmem:[%s26643_s0 + $0xad4] ss:$400 sps:$4 sm:$0xff]   ;;  %v10156_v30 = vmax.f32 %v23181_v19, %v9363_v13  ;;  %16128 = vmatprep.mubr.msk.bf16.mxu0 %vm7349_vm0, %v23313_v58  ;;  %v10355_v27 = vadd.f32 %v24042_v22, %v10231_v51  ;;  %v24077_v13 = vpop.f32.mrf.mxu0 }
 0x47e   :  { %9800 = vmatprep.subr.bf16.mxu0 %v18712_v40  ;;  %v24069_v40 = vpop.f32.mrf.mxu1  ;;  %9855 = vmatprep.subr.bf16.mxu1 %v18721_v39  ;;  %v18724_v51 = vld [vmem:[%s26643_s0 + $0x7b4] ss:$400 sps:$4 sm:$0xff]   ;;  %v18722_v39 = vld [vmem:[%s26643_s0 + $0x7b0] ss:$400 sps:$4 sm:$0xff]  }
 0x47f   :  { %26954 = vst [vmem:[#allocation241_spill] sm:$0xff] %v24069_v40  ;;  %v10256_v52 = vmax.f32 %v10056_v28, %v10156_v30  ;;  %v10455_v19 = vmax.f32 %v10355_v27, 0.0  ;;  %v24089_v27 = vpop.permute.xlu0 %10327  ;;  %v18725_v40 = vld [vmem:[%s26643_s0 + $0x7b8] ss:$400 sps:$4 sm:$0xff]   ;;  %v24097_v10 = vpop.f32.mrf.mxu0 }
 0x480   :  { %v9367_v58 = vpop.f32.mrf.mxu1  ;;  %9856 = vmatpush1.bf16.msra.mxu1 %v18719_v60  ;;  %v18728_v60 = vld [vmem:[%s26643_s0 + $0x490] ss:$400 sps:$4 sm:$0xff]  }
 0x481   :  { %9801 = vmatpush1.bf16.msra.mxu0 %v18710_v31  ;;  %v18727_v31 = vld [vmem:[%s26643_s0 + $0x7bc] ss:$400 sps:$4 sm:$0xff]   ;;  %v10181_v28 = vmax.f32 %v23219_v63, %v9367_v58  ;;  %v10380_v16 = vadd.f32 %v24050_v41, %v10256_v52  ;;  %v16654_v30 = vpack.c.bf16 %v10455_v19, %v10430_v2  ;;  %v18731_v2 = vld [vmem:[%s26643_s0 + $0x498] ss:$400 sps:$4 sm:$0xff]   ;;  %v24112_v58 = vpop.f32.mrf.mxu0 }
 0x482   :  { %9802 = vmatprep.subr.bf16.mxu0 %v18718_v18  ;;  %9857 = vmatprep.subr.bf16.mxu1 %v18727_v31  ;;  %v18733_v63 = vld [vmem:[%s26643_s0 + $0x49c] ss:$400 sps:$4 sm:$0xff]   ;;  %v18734_v31 = vld [vmem:[%s26643_s0 + $0x170] ss:$400 sps:$4 sm:$0xff]  }
 0x483   :  { %v10281_v18 = vmax.f32 %v10081_v48, %v10181_v28  ;;  %v10480_v38 = vmax.f32 %v10380_v16, 0.0  ;;  %16655 = vst [vmem:[#allocation2] sm:$0xff] %v16654_v30   ;;  %v18737_v48 = vld [vmem:[%s26643_s0 + $0x178] ss:$400 sps:$4 sm:$0xff]   ;;  %v24126_v28 = vpop.f32.mrf.mxu0  ;;  %v18742_v16 = vld [vmem:[%s26643_s0 + $0x23d4] ss:$400 sps:$4 sm:$0xff]  }
 0x484   :  { %9858 = vmatpush1.bf16.msra.mxu1 %v18725_v40  ;;  %v18739_v40 = vld [vmem:[%s26643_s0 + $0x17c] ss:$400 sps:$4 sm:$0xff]   ;;  %26955 = vst [vmem:[#allocation242_spill] sm:$0xff] %v24126_v28 }
 0x485   :  { %9803 = vmatpush1.bf16.msra.mxu0 %v18716_v26  ;;  %v10405_v26 = vadd.f32 %v24089_v27, %v10281_v18  ;;  %v16553_v52 = vpack.c.bf16 %v10480_v38, %v10480_v38  ;;  %9859 = vmatprep.subr.bf16.mxu1 %v18733_v63  ;;  %v18736_v38 = vld [vmem:[%s26643_s0 + $0x174] ss:$400 sps:$4 sm:$0xff]   ;;  %v18745_v30 = vld [vmem:[%s26643_s0 + $0x23dc] ss:$400 sps:$4 sm:$0xff]   ;;  %v18740_v18 = vld [vmem:[%s26643_s0 + $0x23d0] ss:$400 sps:$4 sm:$0xff]  }
 0x486   :  { %9804 = vmatprep.subr.bf16.mxu0 %v18724_v51  ;;  %v18748_v63 = vld [vmem:[%s26643_s0 + $0x20b4] ss:$400 sps:$4 sm:$0xff]  }
 0x487   :  { %v10505_v19 = vmax.f32 %v10405_v26, 0.0  ;;  %10596 = vst [vmem:[#allocation2 + $0x8] sm:$0xf] %v16553_v52  ;;  %v18751_v26 = vld [vmem:[%s26643_s0 + $0x20bc] ss:$400 sps:$4 sm:$0xff]  }
 0x488   :  { %9860 = vmatpush1.bf16.msra.mxu1 %v18731_v2  ;;  %v18746_v52 = vld [vmem:[%s26643_s0 + $0x20b0] ss:$400 sps:$4 sm:$0xff]  }
 0x489   :  { %9805 = vmatpush1.bf16.msra.mxu0 %v18722_v39  ;;  %v16554_v51 = vpack.c.bf16 %v10505_v19, %v10505_v19  ;;  %9861 = vmatprep.subr.bf16.mxu1 %v18739_v40  ;;  %v18743_v39 = vld [vmem:[%s26643_s0 + $0x23d8] ss:$400 sps:$4 sm:$0xff]   ;;  %v18754_v19 = vld [vmem:[%s26643_s0 + $0x1d94] ss:$400 sps:$4 sm:$0xff]   ;;  %v18752_v40 = vld [vmem:[%s26643_s0 + $0x1d90] ss:$400 sps:$4 sm:$0xff]  }
 0x48a   :  { %9806 = vmatprep.subr.bf16.mxu0 %v18730_v36  ;;  %v24140_v36 = vpop.f32.mrf.mxu0 }
 0x48b   :  { %10597 = vst [vmem:[#allocation2 + $0xc] sm:$0x7] %v16554_v51  ;;  %v18755_v51 = vld [vmem:[%s26643_s0 + $0x1d98] ss:$400 sps:$4 sm:$0xff]  }
 0x48c   :  { %9862 = vmatpush1.bf16.msra.mxu1 %v18737_v48  ;;  %v24154_v2 = vpop.f32.mrf.mxu0  ;;  %v18760_v48 = vld [vmem:[%s26643_s0 + $0x1a74] ss:$400 sps:$4 sm:$0xff]  }
 0x48d   :  { %9807 = vmatpush1.bf16.msra.mxu0 %v18728_v60  ;;  %9871 = vmatprep.subr.bf16.mxu1 %v18745_v30  ;;  %v18749_v60 = vld [vmem:[%s26643_s0 + $0x20b8] ss:$400 sps:$4 sm:$0xff]   ;;  %26956 = vst [vmem:[#allocation243_spill] sm:$0xff] %v24154_v2  ;;  %v18758_v30 = vld [vmem:[%s26643_s0 + $0x1a70] ss:$400 sps:$4 sm:$0xff]   ;;  %v10034_v2 = vmax.f32 %v21403_v3, %v22285_v50 }
 0x48e   :  { %9808 = vmatprep.subr.bf16.mxu0 %v18736_v38  ;;  %v18757_v38 = vld [vmem:[%s26643_s0 + $0x1d9c] ss:$400 sps:$4 sm:$0xff]   ;;  %v18776_v3 = vld [vmem:[%s26643_s0 + $0x1120] ss:$400 sps:$4 sm:$0xff]  }
 0x490   :  { %9872 = vmatpush2.bf16.msra.mxu1 %v18743_v39 }
 0x491   :  { %9809 = vmatpush1.bf16.msra.mxu0 %v18734_v31  ;;  %9873 = vmatprep.subr.bf16.mxu1 %v18751_v26  ;;  %v24168_v31 = vpop.f32.mrf.mxu0  ;;  %v18769_v26 = vld [vmem:[%s26643_s0 + $0x176c] ss:$400 sps:$4 sm:$0xff]  }
 0x492   :  { %9818 = vmatprep.subr.bf16.mxu0 %v18742_v16  ;;  %26957 = vst [vmem:[#allocation244_spill] sm:$0xff] %v24168_v31  ;;  %v18763_v16 = vld [vmem:[%s26643_s0 + $0x1a7c] ss:$400 sps:$4 sm:$0xff]   ;;  %v26969_v31 = vld [vmem:[#allocation169_spill] sm:$0xff] }
 0x493   :  { %v24182_v39 = vpop.f32.mrf.mxu0 }
 0x494   :  { %9874 = vmatpush2.bf16.msra.mxu1 %v18749_v60  ;;  %26958 = vst [vmem:[#allocation245_spill] sm:$0xff] %v24182_v39  ;;  %v18767_v60 = vld [vmem:[%s26643_s0 + $0x1768] ss:$400 sps:$4 sm:$0xff]   ;;  %v10010_v39 = vmax.f32 %v21447_v45, %v22269_v46  ;;  %v10035_v45 = vmax.f32 %v21481_v33, %v22301_v61  ;;  %v10059_v46 = vmax.f32 %v21423_v12, %v22317_v42 }
 0x495   :  { %9819 = vmatpush2.bf16.msra.mxu0 %v18740_v18  ;;  %9875 = vmatprep.subr.bf16.mxu1 %v18757_v38  ;;  %v18761_v18 = vld [vmem:[%s26643_s0 + $0x1a78] ss:$400 sps:$4 sm:$0xff]   ;;  %v18772_v38 = vld [vmem:[%s26643_s0 + $0x1444] ss:$400 sps:$4 sm:$0xff]  }
 0x496   :  { %9820 = vmatprep.subr.bf16.mxu0 %v18748_v63  ;;  %v18766_v63 = vld [vmem:[%s26643_s0 + $0x1764] ss:$400 sps:$4 sm:$0xff]  }
 0x498   :  { %9876 = vmatpush2.bf16.msra.mxu1 %v18755_v51  ;;  %v10007_v51 = vmax.f32 %v21337_v37, %v22095_v44 }
 0x499   :  { %9821 = vmatpush2.bf16.msra.mxu0 %v18746_v52  ;;  %9877 = vmatprep.subr.bf16.mxu1 %v18763_v16  ;;  %v18764_v52 = vld [vmem:[%s26643_s0 + $0x1760] ss:$400 sps:$4 sm:$0xff]   ;;  %v10032_v16 = vmax.f32 %v21373_v14, %v22127_v35  ;;  %v18778_v35 = vld [vmem:[%s26643_s0 + $0x1124] ss:$400 sps:$4 sm:$0xff]  }
 0x49a   :  { %9822 = vmatprep.subr.bf16.mxu0 %v18754_v19  ;;  %v24196_v19 = vpop.f32.mrf.mxu0  ;;  %v24224_v14 = vld [vmem:[%s26644_s1] ss:$8 sps:$4 sm:$0xff]  }
 0x49b   :  { %26959 = vst [vmem:[#allocation246_spill] sm:$0xff] %v24196_v19  ;;  %v18770_v19 = vld [vmem:[%s26643_s0 + $0x1440] ss:$400 sps:$4 sm:$0xff]  }
 0x49c   :  { %9878 = vmatpush2.bf16.msra.mxu1 %v18761_v18  ;;  %v18781_v18 = vld [vmem:[%s26643_s0 + $0x112c] ss:$400 sps:$4 sm:$0xff]  }
 0x49d   :  { %9823 = vmatpush2.bf16.msra.mxu0 %v18752_v40  ;;  %v18775_v40 = vld [vmem:[%s26643_s0 + $0x144c] ss:$400 sps:$4 sm:$0xff]   ;;  %9953 = vmatprep.subr.bf16.mxu1 %v18769_v26 }
 0x49e   :  { %9824 = vmatprep.subr.bf16.mxu0 %v18760_v48  ;;  %v10008_v48 = vmax.f32 %v21355_v47, %v22111_v9  ;;  %v18773_v9 = vld [vmem:[%s26643_s0 + $0x1448] ss:$400 sps:$4 sm:$0xff]  }
 0x49f   :  { %v9457_v44 = vpop.f32.mrf.mxu1  ;;  %9880 = vmatmul.mubr.bf16.vlgmr.msra.gmra.mxu1 %v24224_v14 }
 0x4a0   :  { %v10109_v37 = vmax.f32 %v23341_v8, %v9457_v44  ;;  %9954 = vmatpush1.bf16.msra.mxu1 %v18767_v60  ;;  %v26960_v44 = vld [vmem:[#allocation157_spill] sm:$0xff] }
 0x4a1   :  { %9825 = vmatpush2.bf16.msra.mxu0 %v18758_v30  ;;  %9955 = vmatprep.subr.bf16.mxu1 %v18775_v40  ;;  %v18779_v40 = vld [vmem:[%s26643_s0 + $0x1128] ss:$400 sps:$4 sm:$0xff]  }
 0x4a2   :  { %9900 = vmatprep.subr.bf16.mxu0 %v18766_v63  ;;  %v10009_v63 = vmax.f32 %v21371_v54, %v22253_v7  ;;  %v9459_v7 = vpop.f32.mrf.mxu1 }
 0x4a3   :  { %v10110_v60 = vmax.f32 %v23265_v1, %v9459_v7  ;;  %v26968_v1 = vld [vmem:[#allocation174_spill] sm:$0xff] }
 0x4a4   :  { %v9404_v47 = vpop.f32.mrf.mxu0  ;;  %9827 = vmatmul.mubr.bf16.vlgmr.msra.gmra.mxu0 %v24224_v14  ;;  %v10209_v8 = vmax.f32 %v10009_v63, %v10109_v37  ;;  %9956 = vmatpush1.bf16.msra.mxu1 %v18773_v9  ;;  %v18787_v9 = vld [vmem:[%s26643_s0 + $0xe0c] ss:$400 sps:$4 sm:$0xff]  }
 0x4a5   :  { %v10107_v26 = vmax.f32 %v23121_v55, %v9404_v47  ;;  %9901 = vmatpush1.bf16.msra.mxu0 %v18764_v52  ;;  %v24252_v47 = vld [vmem:[%s26644_s1 + $0x14] ss:$8 sps:$4 sm:$0x7f]   ;;  %v10210_v42 = vmax.f32 %v10010_v39, %v10110_v60  ;;  %9957 = vmatprep.subr.bf16.mxu1 %v18781_v18  ;;  %v24304_v18 = vld [vmem:[%s26644_s1 + $0x10] ss:$8 sps:$4 sm:$0x7f]  }
 0x4a6   :  { %v9406_v54 = vpop.f32.mrf.mxu0  ;;  %9902 = vmatprep.subr.bf16.mxu0 %v18772_v38  ;;  %16129 = vmatprep.mubr.msk.bf16.mxu0 %vm7349_vm0, %v24252_v47  ;;  %v9461_v38 = vpop.f32.mrf.mxu1  ;;  %v24276_v12 = vadd.f32 %v24002_v24, %v10209_v8 }
 0x4a7   :  { %v10207_v55 = vmax.f32 %v10007_v51, %v10107_v26  ;;  %v10108_v52 = vmax.f32 %v23319_v53, %v9406_v54  ;;  %16131 = vmatprep.mubr.msk.bf16.mxu1 %vm7349_vm0, %v24252_v47  ;;  %v18784_v51 = vld [vmem:[%s26643_s0 + $0xe04] ss:$400 sps:$4 sm:$0xff]   ;;  %v26961_v26 = vld [vmem:[#allocation172_spill] sm:$0xff] }
 0x4a8   :  { %v9408_v53 = vpop.f32.mrf.mxu0  ;;  %v10134_v54 = vmax.f32 %v26961_v26, %v9461_v38  ;;  %v10433_v39 = vmax.f32 %v24276_v12, 0.0  ;;  %v26964_v26 = vld [vmem:[#allocation160_spill] sm:$0xff]  ;;  %9890 = vmatmul.mubr.bf16.gmra.mxu1 %v24304_v18 }
 0x4a9   :  { %v24273_v33 = vadd.f32 %v24002_v24, %v10207_v55  ;;  %v10208_v61 = vmax.f32 %v10008_v48, %v10108_v52  ;;  %9903 = vmatpush1.bf16.msra.mxu0 %v18770_v19  ;;  %v10132_v63 = vmax.f32 %v26960_v44, %v9408_v53  ;;  %v9463_v55 = vpop.f32.mrf.mxu1  ;;  %v24291_v48 = vadd.f32 %v24002_v24, %v10210_v42  ;;  %v18782_v52 = vld [vmem:[%s26643_s0 + $0xe00] ss:$400 sps:$4 sm:$0xff]   ;;  %v26962_v53 = vld [vmem:[#allocation170_spill] sm:$0xff] }
 0x4aa   :  { %v9410_v7 = vpop.f32.mrf.mxu0  ;;  %9904 = vmatprep.subr.bf16.mxu0 %v18778_v35  ;;  %v10234_v60 = vmax.f32 %v10034_v2, %v10134_v54  ;;  %v18785_v42 = vld [vmem:[%s26643_s0 + $0xe08] ss:$400 sps:$4 sm:$0xff]   ;;  %v18790_v2 = vld [vmem:[%s26643_s0 + $0xae4] ss:$400 sps:$4 sm:$0xff]   ;;  %9958 = vmatpush1.bf16.msra.mxu1 %v18779_v40 }
 0x4ab   :  { %v10431_v8 = vmax.f32 %v24273_v33, 0.0  ;;  %v24288_v19 = vadd.f32 %v24002_v24, %v10208_v61  ;;  %v10232_v35 = vmax.f32 %v10032_v16, %v10132_v63  ;;  %v10133_v38 = vmax.f32 %v26962_v53, %v9410_v7  ;;  %v26963_v33 = vld [vmem:[#allocation167_spill] sm:$0xff]  ;;  %v9467_v44 = vpop.f32.mrf.mxu1  ;;  %v26965_v7 = vld [vmem:[#allocation176_spill] sm:$0xff]  ;;  %9959 = vmatprep.subr.bf16.mxu1 %v18787_v9 }
 0x4ac   :  { %v10135_v12 = vmax.f32 %v26963_v33, %v9463_v55  ;;  %v9414_v61 = vpop.f32.mrf.mxu0  ;;  %9837 = vmatmul.mubr.bf16.gmra.mxu0 %v24304_v18  ;;  %v10434_v63 = vmax.f32 %v24291_v48, 0.0  ;;  %v10159_v55 = vmax.f32 %v26965_v7, %v9467_v44  ;;  %v18793_v53 = vld [vmem:[%s26643_s0 + $0xaec] ss:$400 sps:$4 sm:$0xff]   ;;  %v10358_v37 = vadd.f32 %v24042_v22, %v10234_v60  ;;  %v18796_v9 = vld [vmem:[%s26643_s0 + $0x7c4] ss:$400 sps:$4 sm:$0xff]  }
 0x4ad   :  { %v10432_v16 = vmax.f32 %v24288_v19, 0.0  ;;  %v10157_v54 = vmax.f32 %v26964_v26, %v9414_v61  ;;  %9905 = vmatpush1.bf16.msra.mxu0 %v18776_v3  ;;  %v10356_v33 = vadd.f32 %v24042_v22, %v10232_v35  ;;  %v26966_v19 = vmax.f32 %v21387_v59, %v22143_v6  ;;  %v9469_v26 = vpop.f32.mrf.mxu1  ;;  %v18788_v35 = vld [vmem:[%s26643_s0 + $0xae0] ss:$400 sps:$4 sm:$0xff]  }
 0x4ae   :  { %v10235_v48 = vmax.f32 %v10035_v45, %v10135_v12  ;;  %v9416_v61 = vpop.f32.mrf.mxu0  ;;  %v26967_v44 = vmax.f32 %v21405_v29, %v22165_v56  ;;  %v10259_v7 = vmax.f32 %v10059_v46, %v10159_v55  ;;  %v10160_v28 = vmax.f32 %v26969_v31, %v9469_v26  ;;  %9906 = vmatprep.subr.bf16.mxu0 %v18784_v51  ;;  %v18791_v29 = vld [vmem:[%s26643_s0 + $0xae8] ss:$400 sps:$4 sm:$0xff]   ;;  %v19291_v56 = vld [vmem:[%s26644_s1 + $0x4] ss:$8 sps:$4 sm:$0xff]  }
 0x4af   :  { %v10233_v30 = vmax.f32 %v26966_v19, %v10133_v38  ;;  %v10158_v50 = vmax.f32 %v26968_v1, %v9416_v61  ;;  %v10456_v59 = vmax.f32 %v10356_v33, 0.0  ;;  %v10458_v6 = vmax.f32 %v10358_v37, 0.0  ;;  %v9471_v38 = vpop.f32.mrf.mxu1  ;;  %16132 = vmatprep.mubr.msk.bf16.mxu0 %vm7349_vm0, %v19291_v56  ;;  %9960 = vmatpush1.bf16.msra.mxu1 %v18785_v42  ;;  %v18802_v26 = vld [vmem:[%s26643_s0 + $0x4a4] ss:$400 sps:$4 sm:$0xff]  }
 0x4b0   :  { %v10257_v3 = vmax.f32 %v26967_v44, %v10157_v54  ;;  %v10359_v40 = vadd.f32 %v24042_v22, %v10235_v48  ;;  %v9418_v60 = vpop.f32.mrf.mxu0  ;;  %v10383_v46 = vadd.f32 %v24050_v41, %v10259_v7  ;;  %v26971_v51 = vmax.f32 %v21512_v43, %v22333_v57  ;;  %9961 = vmatprep.subr.bf16.mxu1 %v18793_v53  ;;  %v18794_v57 = vld [vmem:[%s26643_s0 + $0x7c0] ss:$400 sps:$4 sm:$0xff]   ;;  %v18797_v53 = vld [vmem:[%s26643_s0 + $0x7c8] ss:$400 sps:$4 sm:$0xff]  }
 0x4b1   :  { %v10357_v45 = vadd.f32 %v24042_v22, %v10233_v30  ;;  %v26970_v30 = vmax.f32 %v21407_v5, %v22181_v21  ;;  %9907 = vmatpush1.bf16.msra.mxu0 %v18782_v52  ;;  %v16659_v12 = vpack.c.bf16 %v10456_v59, %v10431_v8  ;;  %v16669_v54 = vpack.c.bf16 %v10458_v6, %v10433_v39  ;;  %v9473_v43 = vpop.f32.mrf.mxu1  ;;  %v26972_v52 = vld [vmem:[#allocation163_spill] sm:$0xff] }
 0x4b2   :  { %v10381_v31 = vadd.f32 %v24050_v41, %v10257_v3  ;;  %v10260_v37 = vmax.f32 %v26971_v51, %v10160_v28  ;;  %v10459_v33 = vmax.f32 %v10359_v40, 0.0  ;;  %9908 = vmatprep.subr.bf16.mxu0 %v18790_v2  ;;  %v10483_v48 = vmax.f32 %v10383_v46, 0.0  ;;  %v18799_v28 = vld [vmem:[%s26643_s0 + $0x7cc] ss:$400 sps:$4 sm:$0xff]   ;;  %16134 = vmatprep.mubr.msk.bf16.mxu1 %vm7349_vm0, %v19291_v56  ;;  %v26977_v56 = vld [vmem:[#allocation173_spill] sm:$0xff] }
 0x4b3   :  { %v10258_v1 = vmax.f32 %v26970_v30, %v10158_v50  ;;  %v10457_v55 = vmax.f32 %v10357_v45, 0.0  ;;  %v9420_v50 = vpop.f32.mrf.mxu0  ;;  %16776 = vst [vmem:[#allocation2 + $0x10] sm:$0xff] %v16659_v12   ;;  %16778 = vst [vmem:[#allocation2 + $0x30] sm:$0xff] %v16669_v54   ;;  %v10182_v42 = vmax.f32 %v26972_v52, %v9418_v60  ;;  %v26973_v2 = vld [vmem:[#allocation180_spill] sm:$0xff]  ;;  %v26975_v45 = vmax.f32 %v21455_v23, %v22349_v32  ;;  %v26976_v60 = vld [vmem:[#allocation178_spill] sm:$0xff] }
 0x4b4   :  { %v10481_v19 = vmax.f32 %v10381_v31, 0.0  ;;  %v10384_v21 = vadd.f32 %v24050_v41, %v10260_v37  ;;  %v16674_v39 = vpack.c.bf16 %v10459_v33, %v10434_v63  ;;  %v10184_v61 = vmax.f32 %v26973_v2, %v9471_v38  ;;  %9962 = vmatpush1.bf16.msra.mxu1 %v18791_v29  ;;  %v18803_v51 = vld [vmem:[%s26643_s0 + $0x4a8] ss:$400 sps:$4 sm:$0xff]   ;;  %v18808_v37 = vld [vmem:[%s26643_s0 + $0x184] ss:$400 sps:$4 sm:$0xff]  }
 0x4b5   :  { %v10382_v5 = vadd.f32 %v24050_v41, %v10258_v1  ;;  %v16664_v8 = vpack.c.bf16 %v10457_v55, %v10432_v16  ;;  %v16565_v3 = vpack.c.bf16 %v10483_v48, %v10483_v48  ;;  %9909 = vmatpush1.bf16.msra.mxu0 %v18788_v35  ;;  %v18805_v16 = vld [vmem:[%s26643_s0 + $0x4ac] ss:$400 sps:$4 sm:$0xff]   ;;  %v26974_v63 = vmax.f32 %v21431_v15, %v22203_v11  ;;  %v18800_v15 = vld [vmem:[%s26643_s0 + $0x4a0] ss:$400 sps:$4 sm:$0xff]   ;;  %v18809_v48 = vld [vmem:[%s26643_s0 + $0x188] ss:$400 sps:$4 sm:$0xff]  }
 0x4b6   :  { %v16557_v44 = vpack.c.bf16 %v10481_v19, %v10481_v19  ;;  %v10484_v59 = vmax.f32 %v10384_v21, 0.0  ;;  %16779 = vst [vmem:[#allocation2 + $0x40] sm:$0xff] %v16674_v39   ;;  %v10284_v40 = vmax.f32 %v26975_v45, %v10184_v61  ;;  %v10183_v38 = vmax.f32 %v26976_v60, %v9420_v50  ;;  %9910 = vmatprep.subr.bf16.mxu0 %v18796_v9  ;;  %v18814_v50 = vld [vmem:[%s26643_s0 + $0x23e4] ss:$400 sps:$4 sm:$0xff]   ;;  %v18823_v39 = vld [vmem:[%s26643_s0 + $0x20cc] ss:$400 sps:$4 sm:$0xff]  }
 0x4b7   :  { %v10482_v7 = vmax.f32 %v10382_v5, 0.0  ;;  %16777 = vst [vmem:[#allocation2 + $0x20] sm:$0xff] %v16664_v8   ;;  %v10282_v6 = vmax.f32 %v26974_v63, %v10182_v42  ;;  %v10185_v31 = vmax.f32 %v26977_v56, %v9473_v43  ;;  %10650 = vst [vmem:[#allocation2 + $0x38] sm:$0xf] %v16565_v3  ;;  %9963 = vmatprep.subr.bf16.mxu1 %v18799_v28  ;;  %v18812_v43 = vld [vmem:[%s26643_s0 + $0x23e0] ss:$400 sps:$4 sm:$0xff]  }
 0x4b8   :  { %10614 = vst [vmem:[#allocation2 + $0x18] sm:$0xf] %v16557_v44  ;;  %v16569_v46 = vpack.c.bf16 %v10484_v59, %v10484_v59  ;;  %v10408_v23 = vadd.f32 %v24089_v27, %v10284_v40  ;;  %v26978_v32 = vmax.f32 %v21439_v17, %v22219_v62  ;;  %v26979_v29 = vmax.f32 %v21562_v0, %v22381_v4  ;;  %v18806_v0 = vld [vmem:[%s26643_s0 + $0x180] ss:$400 sps:$4 sm:$0xff]   ;;  %v18811_v4 = vld [vmem:[%s26643_s0 + $0x18c] ss:$400 sps:$4 sm:$0xff]  }
 0x4b9   :  { %v16561_v35 = vpack.c.bf16 %v10482_v7, %v10482_v7  ;;  %v10406_v11 = vadd.f32 %v24089_v27, %v10282_v6  ;;  %9911 = vmatpush1.bf16.msra.mxu0 %v18794_v57  ;;  %9964 = vmatpush1.bf16.msra.mxu1 %v18797_v53  ;;  %v18817_v57 = vld [vmem:[%s26643_s0 + $0x23ec] ss:$400 sps:$4 sm:$0xff]   ;;  %v18815_v28 = vld [vmem:[%s26643_s0 + $0x23e8] ss:$400 sps:$4 sm:$0xff]   ;;  %v18820_v8 = vld [vmem:[%s26643_s0 + $0x20c4] ss:$400 sps:$4 sm:$0xff]  }
 0x4ba   :  { %v10283_v30 = vmax.f32 %v26978_v32, %v10183_v38  ;;  %v10285_v1 = vmax.f32 %v26979_v29, %v10185_v31  ;;  %10668 = vst [vmem:[#allocation2 + $0x48] sm:$0xf] %v16569_v46  ;;  %v10508_v12 = vmax.f32 %v10408_v23, 0.0  ;;  %9912 = vmatprep.subr.bf16.mxu0 %v18802_v26  ;;  %9965 = vmatprep.subr.bf16.mxu1 %v18805_v16  ;;  %v18818_v52 = vld [vmem:[%s26643_s0 + $0x20c0] ss:$400 sps:$4 sm:$0xff]   ;;  %v26980_v63 = vmov 0  }
 0x4bb   :  { %10632 = vst [vmem:[#allocation2 + $0x28] sm:$0xf] %v16561_v35  ;;  %v10506_v9 = vmax.f32 %v10406_v11, 0.0  ;;  %v18821_v42 = vld [vmem:[%s26643_s0 + $0x20c8] ss:$400 sps:$4 sm:$0xff]   ;;  %v26981_v6 = vld [vmem:[#allocation83_spill] sm:$0xff] }
 0x4bc   :  { %v10407_v17 = vadd.f32 %v24089_v27, %v10283_v30  ;;  %v10409_v62 = vadd.f32 %v24089_v27, %v10285_v1  ;;  %v16566_v55 = vpack.c.bf16 %v10508_v12, %v10508_v12  ;;  %v18826_v2 = vld [vmem:[%s26643_s0 + $0x1da4] ss:$400 sps:$4 sm:$0xff]   ;;  %v18824_v61 = vld [vmem:[%s26643_s0 + $0x1da0] ss:$400 sps:$4 sm:$0xff]   ;;  %v18829_v53 = vld [vmem:[%s26643_s0 + $0x1dac] ss:$400 sps:$4 sm:$0xff]  }
 0x4bd   :  { %v16558_v54 = vpack.c.bf16 %v10506_v9, %v10506_v9  ;;  %9913 = vmatpush1.bf16.msra.mxu0 %v18800_v15  ;;  %9966 = vmatpush1.bf16.msra.mxu1 %v18803_v51  ;;  %v18827_v26 = vld [vmem:[%s26643_s0 + $0x1da8] ss:$400 sps:$4 sm:$0xff]   ;;  %v18832_v44 = vld [vmem:[%s26643_s0 + $0x1a84] ss:$400 sps:$4 sm:$0xff]   ;;  %v18835_v3 = vld [vmem:[%s26643_s0 + $0x1a8c] ss:$400 sps:$4 sm:$0xff]  }
 0x4be   :  { %v10507_v33 = vmax.f32 %v10407_v17, 0.0  ;;  %v10509_v19 = vmax.f32 %v10409_v62, 0.0  ;;  %10651 = vst [vmem:[#allocation2 + $0x3c] sm:$0x7] %v16566_v55  ;;  %9914 = vmatprep.subr.bf16.mxu0 %v18808_v37  ;;  %9967 = vmatprep.subr.bf16.mxu1 %v18811_v4  ;;  %v18830_v7 = vld [vmem:[%s26643_s0 + $0x1a80] ss:$400 sps:$4 sm:$0xff]  }
 0x4bf   :  { %10615 = vst [vmem:[#allocation2 + $0x1c] sm:$0x7] %v16558_v54  ;;  %v18833_v59 = vld [vmem:[%s26643_s0 + $0x1a88] ss:$400 sps:$4 sm:$0xff]   ;;  %v26984_v38 = vld [vmem:[#allocation3_spill] sm:$0xff]  ;;  %v26985_v31 = vld [vmem:[#allocation85_spill] sm:$0xff] }
 0x4c0   :  { %v16562_v5 = vpack.c.bf16 %v10507_v33, %v10507_v33  ;;  %v16570_v21 = vpack.c.bf16 %v10509_v19, %v10509_v19  ;;  %v26982_v45 = vld [vmem:[#allocation4_spill] sm:$0xff]  ;;  %v26986_v35 = vld [vmem:[#allocation7_spill] sm:$0xff]  ;;  %v26987_v15 = vld [vmem:[#allocation86_spill] sm:$0xff] }
 0x4c1   :  { %9915 = vmatpush1.bf16.msra.mxu0 %v18806_v0  ;;  %9968 = vmatpush1.bf16.msra.mxu1 %v18809_v48  ;;  %v10011_v40 = vmax.f32 %v26982_v45, %v26981_v6  ;;  %v26983_v60 = vld [vmem:[#allocation84_spill] sm:$0xff]  ;;  %v10036_v46 = vmax.f32 %v26986_v35, %v26985_v31  ;;  %v26988_v11 = vld [vmem:[#allocation6_spill] sm:$0xff]  ;;  %v26989_v32 = vld [vmem:[#allocation87_spill] sm:$0xff] }
 0x4c2   :  { %10633 = vst [vmem:[#allocation2 + $0x2c] sm:$0x7] %v16562_v5  ;;  %10669 = vst [vmem:[#allocation2 + $0x4c] sm:$0x7] %v16570_v21  ;;  %9924 = vmatprep.subr.bf16.mxu0 %v18814_v50  ;;  %9977 = vmatprep.subr.bf16.mxu1 %v18817_v57  ;;  %v10012_v56 = vmax.f32 %v26984_v38, %v26983_v60  ;;  %v10037_v23 = vmax.f32 %v26988_v11, %v26987_v15  ;;  %v26990_v30 = vld [vmem:[#allocation10_spill] sm:$0xff]  ;;  %v26991_v1 = vld [vmem:[#allocation88_spill] sm:$0xff] }
 0x4c3   :  { %v10061_v29 = vmax.f32 %v26990_v30, %v26989_v32  ;;  %v26992_v51 = vld [vmem:[#allocation9_spill] sm:$0xff]  ;;  %v26996_v55 = vld [vmem:[#allocation184_spill] sm:$0xff]  ;;  %v18837_v19 = vld [vmem:[#allocation2 + $0x30] sm:$0xff]  }
 0x4c4   :  { %v10062_v37 = vmax.f32 %v26992_v51, %v26991_v1  ;;  %v26993_v17 = vld [vmem:[#allocation93_spill] sm:$0xff]  ;;  %v26999_v50 = vld [vmem:[#allocation90_spill] sm:$0xff]  ;;  %v27008_v6 = vld [vmem:[#allocation19_spill] sm:$0xff] }
 0x4c5   :  { %9925 = vmatpush2.bf16.msra.mxu0 %v18812_v43  ;;  %9978 = vmatpush2.bf16.msra.mxu1 %v18815_v28  ;;  %v18836_v16 = vld [vmem:[#allocation2 + $0x38] sm:$0xff]   ;;  %v26994_v62 = vld [vmem:[#allocation5_spill] sm:$0xff]  ;;  %v27001_v28 = vld [vmem:[#allocation95_spill] sm:$0xff] }
 0x4c6   :  { %9926 = vmatprep.subr.bf16.mxu0 %v18820_v8  ;;  %9979 = vmatprep.subr.bf16.mxu1 %v18823_v39  ;;  %v10013_v0 = vmax.f32 %v26994_v62, %v26993_v17  ;;  %v26995_v4 = vld [vmem:[#allocation165_spill] sm:$0xff]  ;;  %v27000_v43 = vld [vmem:[#allocation12_spill] sm:$0xff]  ;;  %v27002_v8 = vld [vmem:[#allocation15_spill] sm:$0xff] }
 0x4c7   :  { %v26997_v48 = vld [vmem:[#allocation89_spill] sm:$0xff]  ;;  %v10087_v57 = vmax.f32 %v27000_v43, %v26999_v50  ;;  %v10014_v39 = vmax.f32 %v27002_v8, %v27001_v28  ;;  %v27010_v38 = vld [vmem:[#allocation11_spill] sm:$0xff] }
 0x4c8   :  { %v26998_v5 = vld [vmem:[#allocation13_spill] sm:$0xff]  ;;  %v27011_v35 = vld [vmem:[#allocation103_spill] sm:$0xff] }
 0x4c9   :  { %9927 = vmatpush2.bf16.msra.mxu0 %v18818_v52  ;;  %9980 = vmatpush2.bf16.msra.mxu1 %v18821_v42  ;;  %v10086_v21 = vmax.f32 %v26998_v5, %v26997_v48  ;;  %v27009_v60 = vld [vmem:[#allocation101_spill] sm:$0xff]  ;;  %v27015_v28 = vld [vmem:[#allocation107_spill] sm:$0xff] }
 0x4ca   :  { %9928 = vmatprep.subr.bf16.mxu0 %v18826_v2  ;;  %9981 = vmatprep.subr.bf16.mxu1 %v18829_v53  ;;  %v10063_v31 = vmax.f32 %v27010_v38, %v27009_v60  ;;  %v27016_v8 = vld [vmem:[#allocation27_spill] sm:$0xff]  ;;  %v27019_v60 = vld [vmem:[#allocation186_spill] sm:$0xff] }
 0x4cb   :  { %v27029_v5 = vmax.f32 %v27016_v8, %v27015_v28  ;;  %v18843_v8 = vld [vmem:[#allocation2] sm:$0xff]  }
 0x4cd   :  { %9929 = vmatpush2.bf16.msra.mxu0 %v18824_v61  ;;  %9982 = vmatpush2.bf16.msra.mxu1 %v18827_v26  ;;  %v27003_v61 = vld [vmem:[#allocation182_spill] sm:$0xff]  ;;  %v27004_v26 = vld [vmem:[#allocation177_spill] sm:$0xff] }
 0x4ce   :  { %9930 = vmatprep.subr.bf16.mxu0 %v18832_v44  ;;  %9983 = vmatprep.subr.bf16.mxu1 %v18835_v3  ;;  %v27005_v3 = vld [vmem:[#allocation97_spill] sm:$0xff] }
 0x4cf   :  { %v9563_v12 = vpop.f32.mrf.mxu1 }
 0x4d0   :  { %v10113_v33 = vmax.f32 %v26996_v55, %v9563_v12  ;;  %v27014_v55 = vld [vmem:[#allocation14_spill] sm:$0xff] }
 0x4d1   :  { %9931 = vmatpush2.bf16.msra.mxu0 %v18830_v7  ;;  %9984 = vmatpush2.bf16.msra.mxu1 %v18833_v59  ;;  %v9565_v42 = vpop.f32.mrf.mxu1  ;;  %v27006_v7 = vld [vmem:[#allocation8_spill] sm:$0xff] }
 0x4d2   :  { %12881 = vmatprep.subr.bf16.mxu0 %v26980_v63  ;;  %13114 = vmatprep.subr.bf16.mxu1 %v26980_v63  ;;  %v10114_v44 = vmax.f32 %v27004_v26, %v9565_v42  ;;  %v10038_v59 = vmax.f32 %v27006_v7, %v27005_v3  ;;  %v27017_v42 = vld [vmem:[#allocation168_spill] sm:$0xff] }
 0x4d3   :  { %v9567_v17 = vpop.f32.mrf.mxu1  ;;  %v27018_v26 = vld [vmem:[#allocation188_spill] sm:$0xff] }
 0x4d4   :  { %v9510_v9 = vpop.f32.mrf.mxu0  ;;  %9933 = vmatmul.mubr.bf16.vlgmr.msra.gmra.mxu0 %v24224_v14  ;;  %9986 = vmatmul.mubr.bf16.vlgmr.msra.gmra.mxu1 %v24224_v14  ;;  %v10213_v14 = vmax.f32 %v10013_v0, %v10113_v33  ;;  %v10138_v3 = vmax.f32 %v27018_v26, %v9567_v17 }
 0x4d5   :  { %v10111_v54 = vmax.f32 %v26995_v4, %v9510_v9  ;;  %12882 = vmatpush1.bf16.msra.mxu0 %v18836_v16  ;;  %16133 = vmatprep.mubr.msk.bf16.mxu0 %vm7349_vm0, %v24252_v47  ;;  %v27007_v16 = vld [vmem:[#allocation99_spill] sm:$0xff] }
 0x4d6   :  { %v9512_v52 = vpop.f32.mrf.mxu0  ;;  %12883 = vmatprep.subr.bf16.mxu0 %v26980_v63  ;;  %16135 = vmatprep.mubr.msk.bf16.mxu1 %vm7349_vm0, %v24252_v47  ;;  %v10039_v45 = vmax.f32 %v27008_v6, %v27007_v16  ;;  %v27012_v9 = vld [vmem:[#allocation23_spill] sm:$0xff]  ;;  %v10337_v0 = vadd.f32 %v24002_v24, %v10213_v14  ;;  %v10214_v47 = vmax.f32 %v10014_v39, %v10114_v44  ;;  %v9569_v16 = vpop.f32.mrf.mxu1  ;;  %v18838_v39 = vld [vmem:[#allocation2 + $0x28] sm:$0xff]   ;;  %v18854_v14 = vld [vmem:[%s26648_s3 + $0x4] ss:$28 sps:$4 sm:$0xff]  }
 0x4d7   :  { %v10211_v2 = vmax.f32 %v10011_v40, %v10111_v54  ;;  %v10112_v53 = vmax.f32 %v27003_v61, %v9512_v52  ;;  %v10064_v40 = vmax.f32 %v27012_v9, %v27011_v35  ;;  %v27013_v54 = vld [vmem:[#allocation105_spill] sm:$0xff]  ;;  %v10238_v44 = vmax.f32 %v10038_v59, %v10138_v3 }
 0x4d8   :  { %v9514_v12 = vpop.f32.mrf.mxu0  ;;  %v10088_v33 = vmax.f32 %v27014_v55, %v27013_v54  ;;  %v10437_v6 = vmax.f32 %v10337_v0, 0.0  ;;  %v27020_v35 = vld [vmem:[#allocation181_spill] sm:$0xff]  ;;  %v9573_v17 = vpop.f32.mrf.mxu1 }
 0x4d9   :  { %v10335_v62 = vadd.f32 %v24002_v24, %v10211_v2  ;;  %v10212_v4 = vmax.f32 %v10012_v56, %v10112_v53  ;;  %12884 = vmatpush1.bf16.msra.mxu0 %v18837_v19  ;;  %v10136_v61 = vmax.f32 %v27017_v42, %v9514_v12  ;;  %v10338_v19 = vadd.f32 %v24002_v24, %v10214_v47  ;;  %v27022_v47 = vld [vmem:[#allocation192_spill] sm:$0xff]  ;;  %v18839_v52 = vld [vmem:[#allocation2 + $0x20] sm:$0xff]  }
 0x4da   :  { %v9516_v7 = vpop.f32.mrf.mxu0  ;;  %12885 = vmatprep.subr.bf16.mxu0 %v26980_v63  ;;  %v10139_v9 = vmax.f32 %v27020_v35, %v9569_v16  ;;  %v10163_v26 = vmax.f32 %v27022_v47, %v9573_v17  ;;  %v10362_v59 = vadd.f32 %v24042_v22, %v10238_v44  ;;  %v9575_v16 = vpop.f32.mrf.mxu1 }
 0x4db   :  { %v10435_v2 = vmax.f32 %v10335_v62, 0.0  ;;  %v10336_v56 = vadd.f32 %v24002_v24, %v10212_v4  ;;  %v10236_v53 = vmax.f32 %v10036_v46, %v10136_v61  ;;  %v10137_v38 = vmax.f32 %v27019_v60, %v9516_v7  ;;  %v27021_v4 = vld [vmem:[#allocation171_spill] sm:$0xff]  ;;  %v27024_v60 = vld [vmem:[#allocation185_spill] sm:$0xff] }
 0x4dc   :  { %v9520_v12 = vpop.f32.mrf.mxu0  ;;  %9943 = vmatmul.mubr.bf16.gmra.mxu0 %v24304_v18  ;;  %v10438_v0 = vmax.f32 %v10338_v19, 0.0  ;;  %9996 = vmatmul.mubr.bf16.gmra.mxu1 %v24304_v18  ;;  %v10239_v3 = vmax.f32 %v10039_v45, %v10139_v9  ;;  %v10263_v18 = vmax.f32 %v10063_v31, %v10163_v26  ;;  %v27023_v19 = vld [vmem:[#allocation190_spill] sm:$0xff]  ;;  %v10462_v35 = vmax.f32 %v10362_v59, 0.0  ;;  %v9577_v45 = vpop.f32.mrf.mxu1  ;;  %v18840_v59 = vld [vmem:[#allocation2 + $0x18] sm:$0xff]  }
 0x4dd   :  { %v10436_v62 = vmax.f32 %v10336_v56, 0.0  ;;  %v10161_v42 = vmax.f32 %v27021_v4, %v9520_v12  ;;  %12886 = vmatpush1.bf16.msra.mxu0 %v18838_v39  ;;  %v10360_v46 = vadd.f32 %v24042_v22, %v10236_v53  ;;  %v10237_v61 = vmax.f32 %v10037_v23, %v10137_v38  ;;  %12913 = vmatprep.mubr.bf16.mxu0 %v18854_v14 }
 0x4de   :  { %v9522_v7 = vpop.f32.mrf.mxu0  ;;  %12887 = vmatprep.subr.bf16.mxu0 %v26980_v63  ;;  %v10164_v53 = vmax.f32 %v27024_v60, %v9575_v16  ;;  %v10363_v11 = vadd.f32 %v24042_v22, %v10239_v3  ;;  %v10387_v9 = vadd.f32 %v24050_v41, %v10263_v18  ;;  %v16689_v31 = vpack.c.bf16 %v10462_v35, %v10437_v6  ;;  %v18841_v16 = vld [vmem:[#allocation2 + $0x10] sm:$0xff]  }
 0x4df   :  { %v10261_v56 = vmax.f32 %v10061_v29, %v10161_v42  ;;  %v10162_v39 = vmax.f32 %v27023_v19, %v9522_v7  ;;  %v10460_v44 = vmax.f32 %v10360_v46, 0.0  ;;  %v10361_v15 = vadd.f32 %v24042_v22, %v10237_v61  ;;  %v9579_v46 = vpop.f32.mrf.mxu1  ;;  %v27028_v19 = vld [vmem:[#allocation189_spill] sm:$0xff] }
 0x4e0   :  { %v9524_v23 = vpop.f32.mrf.mxu0  ;;  %v10264_v30 = vmax.f32 %v10064_v40, %v10164_v53  ;;  %v10463_v12 = vmax.f32 %v10363_v11, 0.0  ;;  %v10487_v4 = vmax.f32 %v10387_v9, 0.0  ;;  %16782 = vst [vmem:[#allocation2 + $0x70] sm:$0xff] %v16689_v31   ;;  %v18842_v11 = vld [vmem:[#allocation2 + $0x8] sm:$0xff]   ;;  %v27030_v31 = vld [vmem:[#allocation91_spill] sm:$0xff] }
 0x4e1   :  { %v10385_v38 = vadd.f32 %v24050_v41, %v10261_v56  ;;  %v10262_v32 = vmax.f32 %v10062_v37, %v10162_v39  ;;  %12888 = vmatpush1.bf16.msra.mxu0 %v18839_v52  ;;  %v16679_v29 = vpack.c.bf16 %v10460_v44, %v10435_v2  ;;  %v10461_v14 = vmax.f32 %v10361_v15, 0.0  ;;  %v27025_v37 = vld [vmem:[#allocation175_spill] sm:$0xff]  ;;  %v27026_v52 = vld [vmem:[#allocation196_spill] sm:$0xff] }
 0x4e2   :  { %12889 = vmatprep.subr.bf16.mxu0 %v26980_v63  ;;  %v10388_v47 = vadd.f32 %v24050_v41, %v10264_v30  ;;  %v9526_v26 = vpop.f32.mrf.mxu0  ;;  %v16694_v51 = vpack.c.bf16 %v10463_v12, %v10438_v0  ;;  %v10186_v40 = vmax.f32 %v27025_v37, %v9524_v23  ;;  %v10188_v2 = vmax.f32 %v27026_v52, %v9577_v45  ;;  %v27027_v0 = vld [vmem:[#allocation194_spill] sm:$0xff] }
 0x4e3   :  { %v10485_v17 = vmax.f32 %v10385_v38, 0.0  ;;  %v10386_v42 = vadd.f32 %v24050_v41, %v10262_v32  ;;  %16780 = vst [vmem:[#allocation2 + $0x50] sm:$0xff] %v16679_v29   ;;  %v16684_v1 = vpack.c.bf16 %v10461_v14, %v10436_v62  ;;  %v16581_v61 = vpack.c.bf16 %v10487_v4, %v10487_v4  ;;  %v18909_v38 = vld [vmem:[%s26648_s3 + $0xc] ss:$28 sps:$4 sm:$0xff]   ;;  %v27031_v14 = vld [vmem:[#allocation17_spill] sm:$0xff]  ;;  %v27033_v4 = vld [vmem:[#allocation16_spill] sm:$0xff] }
 0x4e4   :  { %v10488_v7 = vmax.f32 %v10388_v47, 0.0  ;;  %16783 = vst [vmem:[#allocation2 + $0x80] sm:$0xff] %v16694_v51   ;;  %v10286_v56 = vmax.f32 %v10086_v21, %v10186_v40  ;;  %v10288_v62 = vmax.f32 %v10088_v33, %v10188_v2  ;;  %v10187_v18 = vmax.f32 %v27027_v0, %v9526_v26  ;;  %13146 = vmatprep.mubr.bf16.mxu1 %v18909_v38  ;;  %v27034_v47 = vld [vmem:[#allocation94_spill] sm:$0xff]  ;;  %v27035_v26 = vld [vmem:[#allocation21_spill] sm:$0xff] }
 0x4e5   :  { %v16573_v6 = vpack.c.bf16 %v10485_v17, %v10485_v17  ;;  %v10486_v3 = vmax.f32 %v10386_v42, 0.0  ;;  %12890 = vmatpush1.bf16.msra.mxu0 %v18840_v59  ;;  %16781 = vst [vmem:[#allocation2 + $0x60] sm:$0xff] %v16684_v1   ;;  %v10189_v39 = vmax.f32 %v27028_v19, %v9579_v46  ;;  %10722 = vst [vmem:[#allocation2 + $0x78] sm:$0xf] %v16581_v61  ;;  %v27032_v17 = vld [vmem:[#allocation92_spill] sm:$0xff]  ;;  %v27038_v52 = vld [vmem:[#allocation98_spill] sm:$0xff] }
 0x4e6   :  { %12891 = vmatprep.subr.bf16.mxu0 %v26980_v63  ;;  %v16585_v53 = vpack.c.bf16 %v10488_v7, %v10488_v7  ;;  %v10410_v44 = vadd.f32 %v24089_v27, %v10286_v56  ;;  %v10412_v35 = vadd.f32 %v24089_v27, %v10288_v62  ;;  %v10287_v48 = vmax.f32 %v10087_v57, %v10187_v18  ;;  %v27036_v59 = vld [vmem:[#allocation96_spill] sm:$0xff]  ;;  %v27039_v2 = vld [vmem:[#allocation25_spill] sm:$0xff]  ;;  %v27055_v38 = vld [vmem:[#allocation22_spill] sm:$0xff] }
 0x4e7   :  { %10686 = vst [vmem:[#allocation2 + $0x58] sm:$0xf] %v16573_v6  ;;  %v16577_v60 = vpack.c.bf16 %v10486_v3, %v10486_v3  ;;  %v10289_v21 = vmax.f32 %v27029_v5, %v10189_v39  ;;  %v18845_v32 = vld [vmem:[#allocation2 + $0x70] sm:$0xff]   ;;  %v10015_v12 = vmax.f32 %v27031_v14, %v27030_v31  ;;  %v10016_v42 = vmax.f32 %v27033_v4, %v27032_v17  ;;  %v27037_v1 = vld [vmem:[#allocation20_spill] sm:$0xff]  ;;  %v27040_v61 = vld [vmem:[#allocation109_spill] sm:$0xff] }
 0x4e8   :  { %10740 = vst [vmem:[#allocation2 + $0x88] sm:$0xf] %v16585_v53  ;;  %v10510_v54 = vmax.f32 %v10410_v44, 0.0  ;;  %v10512_v55 = vmax.f32 %v10412_v35, 0.0  ;;  %v10411_v33 = vadd.f32 %v24089_v27, %v10287_v48  ;;  %v10040_v46 = vmax.f32 %v27035_v26, %v27034_v47  ;;  %v27041_v3 = vld [vmem:[#allocation18_spill] sm:$0xff]  ;;  %v27043_v62 = vld [vmem:[#allocation201_spill] sm:$0xff] }
 0x4e9   :  { %10704 = vst [vmem:[#allocation2 + $0x68] sm:$0xf] %v16577_v60  ;;  %12892 = vmatpush1.bf16.msra.mxu0 %v18841_v16  ;;  %v10413_v15 = vadd.f32 %v24089_v27, %v10289_v21  ;;  %v10041_v51 = vmax.f32 %v27037_v1, %v27036_v59  ;;  %v10065_v6 = vmax.f32 %v27039_v2, %v27038_v52  ;;  %v27042_v16 = vld [vmem:[#allocation179_spill] sm:$0xff]  ;;  %v27044_v19 = vld [vmem:[#allocation100_spill] sm:$0xff]  ;;  %v27046_v53 = vld [vmem:[#allocation102_spill] sm:$0xff] }
 0x4ea   :  { %12893 = vmatprep.subr.bf16.mxu0 %v26980_v63  ;;  %v16574_v23 = vpack.c.bf16 %v10510_v54, %v10510_v54  ;;  %v16582_v45 = vpack.c.bf16 %v10512_v55, %v10512_v55  ;;  %v10511_v50 = vmax.f32 %v10411_v33, 0.0  ;;  %v10017_v7 = vmax.f32 %v27041_v3, %v27040_v61  ;;  %v27045_v39 = vld [vmem:[#allocation24_spill] sm:$0xff]  ;;  %v27047_v44 = vld [vmem:[#allocation29_spill] sm:$0xff]  ;;  %v27050_v54 = vld [vmem:[#allocation111_spill] sm:$0xff] }
 0x4eb   :  { %v10513_v43 = vmax.f32 %v10413_v15, 0.0  ;;  %v10066_v60 = vmax.f32 %v27045_v39, %v27044_v19  ;;  %v10090_v35 = vmax.f32 %v27047_v44, %v27046_v53  ;;  %v27048_v48 = vld [vmem:[#allocation104_spill] sm:$0xff]  ;;  %v27058_v31 = vld [vmem:[#allocation117_spill] sm:$0xff]  ;;  %v27059_v14 = vld [vmem:[#allocation26_spill] sm:$0xff] }
 0x4ec   :  { %10687 = vst [vmem:[#allocation2 + $0x5c] sm:$0x7] %v16574_v23  ;;  %10723 = vst [vmem:[#allocation2 + $0x7c] sm:$0x7] %v16582_v45  ;;  %v16578_v57 = vpack.c.bf16 %v10511_v50, %v10511_v50  ;;  %v18847_v29 = vld [vmem:[#allocation2 + $0x60] sm:$0xff]   ;;  %v27049_v5 = vld [vmem:[#allocation28_spill] sm:$0xff]  ;;  %v10067_v17 = vmax.f32 %v27059_v14, %v27058_v31 }
 0x4ed   :  { %12894 = vmatpush1.bf16.msra.mxu0 %v18842_v11  ;;  %v16586_v28 = vpack.c.bf16 %v10513_v43, %v10513_v43  ;;  %v10091_v21 = vmax.f32 %v27049_v5, %v27048_v48  ;;  %v27051_v55 = vld [vmem:[#allocation32_spill] sm:$0xff]  ;;  %v27052_v50 = vld [vmem:[#allocation198_spill] sm:$0xff]  ;;  %v27060_v4 = vld [vmem:[#allocation119_spill] sm:$0xff] }
 0x4ee   :  { %12895 = vmatprep.subr.bf16.mxu0 %v26980_v63  ;;  %10705 = vst [vmem:[#allocation2 + $0x6c] sm:$0x7] %v16578_v57  ;;  %v10018_v33 = vmax.f32 %v27051_v55, %v27050_v54  ;;  %v27053_v57 = vld [vmem:[#allocation193_spill] sm:$0xff]  ;;  %v27061_v47 = vld [vmem:[#allocation40_spill] sm:$0xff]  ;;  %v18849_v2 = vld [vmem:[#allocation2 + $0x50] sm:$0xff]  }
 0x4ef   :  { %10741 = vst [vmem:[#allocation2 + $0x8c] sm:$0x7] %v16586_v28  ;;  %v10068_v26 = vmax.f32 %v27061_v47, %v27060_v4  ;;  %v27062_v61 = vld [vmem:[#allocation121_spill] sm:$0xff]  ;;  %v27063_v3 = vld [vmem:[#allocation30_spill] sm:$0xff]  ;;  %v27070_v4 = vld [vmem:[#allocation187_spill] sm:$0xff] }
 0x4f0   :  { %v27067_v54 = vld [vmem:[#allocation205_spill] sm:$0xff]  ;;  %v18857_v39 = vld [vmem:[%s26648_s3 + $0x3c] ss:$28 sps:$4 sm:$0xff]   ;;  %v18860_v48 = vld [vmem:[%s26648_s3 + $0x74] ss:$28 sps:$4 sm:$0xff]  }
 0x4f1   :  { %12896 = vmatpush1.bf16.msra.mxu0 %v18843_v8  ;;  %v27054_v8 = vld [vmem:[#allocation113_spill] sm:$0xff] }
 0x4f2   :  { %12897 = vmatprep.subr.bf16.mxu0 %v26980_v63 }
 0x4f3   :  { %v18844_v9 = vld [vmem:[#allocation2 + $0x78] sm:$0xff]  }
 0x4f4   :  { %v18848_v18 = vld [vmem:[#allocation2 + $0x58] sm:$0xff]  }
 0x4f5   :  { %12898 = vmatpush2.bf16.msra.mxu0 %v18844_v9  ;;  %v18846_v30 = vld [vmem:[#allocation2 + $0x68] sm:$0xff]   ;;  %v10042_v9 = vmax.f32 %v27055_v38, %v27054_v8  ;;  %v27069_v8 = vld [vmem:[#allocation197_spill] sm:$0xff] }
 0x4f6   :  { %12899 = vmatprep.subr.bf16.mxu0 %v26980_v63 }
 0x4f9   :  { %12900 = vmatpush2.bf16.msra.mxu0 %v18845_v32  ;;  %v27056_v32 = vld [vmem:[#allocation115_spill] sm:$0xff] }
 0x4fa   :  { %12901 = vmatprep.subr.bf16.mxu0 %v26980_v63 }
 0x4fd   :  { %12902 = vmatpush2.bf16.msra.mxu0 %v18846_v30  ;;  %v27057_v30 = vld [vmem:[#allocation36_spill] sm:$0xff] }
 0x4fe   :  { %12903 = vmatprep.subr.bf16.mxu0 %v26980_v63 }
 0x4ff   :  { %v9669_v40 = vpop.f32.mrf.mxu1 }
 0x500   :  { %v10117_v0 = vmax.f32 %v27043_v62, %v9669_v40 }
 0x501   :  { %12904 = vmatpush2.bf16.msra.mxu0 %v18847_v29  ;;  %v9671_v11 = vpop.f32.mrf.mxu1  ;;  %v10043_v29 = vmax.f32 %v27057_v30, %v27056_v32 }
 0x502   :  { %12905 = vmatprep.subr.bf16.mxu0 %v26980_v63  ;;  %v10217_v45 = vmax.f32 %v10017_v7, %v10117_v0  ;;  %v10118_v28 = vmax.f32 %v27053_v57, %v9671_v11  ;;  %v10092_v7 = vmax.f32 %v27063_v3, %v27062_v61  ;;  %v27066_v0 = vld [vmem:[#allocation183_spill] sm:$0xff] }
 0x504   :  { %v9616_v37 = vpop.f32.mrf.mxu0  ;;  %v10218_v52 = vmax.f32 %v10018_v33, %v10118_v28 }
 0x505   :  { %v10115_v56 = vmax.f32 %v27042_v16, %v9616_v37  ;;  %12906 = vmatpush2.bf16.msra.mxu0 %v18848_v18  ;;  %v10341_v37 = vadd.f32 %v24002_v24, %v10217_v45  ;;  %v27064_v16 = vld [vmem:[#allocation123_spill] sm:$0xff] }
 0x506   :  { %v9618_v15 = vpop.f32.mrf.mxu0  ;;  %12907 = vmatprep.subr.bf16.mxu0 %v26980_v63 }
 0x507   :  { %v10215_v23 = vmax.f32 %v10015_v12, %v10115_v56  ;;  %v10116_v43 = vmax.f32 %v27052_v50, %v9618_v15  ;;  %v9673_v12 = vpop.f32.mrf.mxu1  ;;  %v27065_v56 = vld [vmem:[#allocation44_spill] sm:$0xff]  ;;  %v10441_v57 = vmax.f32 %v10341_v37, 0.0 }
 0x508   :  { %v9620_v59 = vpop.f32.mrf.mxu0  ;;  %v10093_v62 = vmax.f32 %v27065_v56, %v27064_v16  ;;  %v10142_v55 = vmax.f32 %v27067_v54, %v9673_v12  ;;  %v18850_v12 = vld [vmem:[#allocation2 + $0x48] sm:$0xff]   ;;  %v27071_v54 = vld [vmem:[#allocation200_spill] sm:$0xff] }
 0x509   :  { %v10339_v1 = vadd.f32 %v24002_v24, %v10215_v23  ;;  %v10216_v40 = vmax.f32 %v10016_v42, %v10116_v43  ;;  %v10140_v18 = vmax.f32 %v27066_v0, %v9620_v59  ;;  %v9675_v11 = vpop.f32.mrf.mxu1  ;;  %v10342_v42 = vadd.f32 %v24002_v24, %v10218_v52  ;;  %12908 = vmatpush2.bf16.msra.mxu0 %v18849_v2  ;;  %v27068_v43 = vld [vmem:[#allocation203_spill] sm:$0xff] }
 0x50a   :  { %v9622_v15 = vpop.f32.mrf.mxu0  ;;  %v10242_v45 = vmax.f32 %v10042_v9, %v10142_v55  ;;  %v10143_v38 = vmax.f32 %v27069_v8, %v9675_v11  ;;  %12909 = vmatprep.subr.bf16.mxu0 %v26980_v63 }
 0x50b   :  { %v10439_v50 = vmax.f32 %v10339_v1, 0.0  ;;  %v10340_v23 = vadd.f32 %v24002_v24, %v10216_v40  ;;  %v10240_v33 = vmax.f32 %v10040_v46, %v10140_v18  ;;  %v10141_v28 = vmax.f32 %v27068_v43, %v9622_v15  ;;  %v9679_v30 = vpop.f32.mrf.mxu1 }
 0x50c   :  { %v9626_v32 = vpop.f32.mrf.mxu0  ;;  %v10442_v14 = vmax.f32 %v10342_v42, 0.0  ;;  %v10167_v59 = vmax.f32 %v23758_v49, %v9679_v30  ;;  %v10366_v46 = vadd.f32 %v24042_v22, %v10242_v45  ;;  %v10243_v37 = vmax.f32 %v10043_v29, %v10143_v38  ;;  %v18852_v38 = vld [vmem:[%s26648_s3] ss:$28 sps:$4 sm:$0xff]  }
 0x50d   :  { %v10440_v31 = vmax.f32 %v10340_v23, 0.0  ;;  %v10165_v47 = vmax.f32 %v27070_v4, %v9626_v32  ;;  %v10364_v1 = vadd.f32 %v24042_v22, %v10240_v33  ;;  %v10241_v9 = vmax.f32 %v10041_v51, %v10141_v28  ;;  %v9681_v52 = vpop.f32.mrf.mxu1  ;;  %12910 = vmatpush2.bf16.msra.mxu0 %v18850_v12  ;;  %v27073_v12 = vld [vmem:[#allocation211_spill] sm:$0xff] }
 0x50e   :  { %v9628_v40 = vpop.f32.mrf.mxu0  ;;  %v10267_v0 = vmax.f32 %v10067_v17, %v10167_v59  ;;  %v10168_v55 = vmax.f32 %v27071_v54, %v9681_v52  ;;  %v10466_v11 = vmax.f32 %v10366_v46, 0.0  ;;  %v10367_v23 = vadd.f32 %v24042_v22, %v10243_v37  ;;  %12911 = vmatprep.subr.bf16.mxu0 %v26980_v63  ;;  %v18851_v17 = vld [vmem:[#allocation2 + $0x40] sm:$0xff]  }
 0x50f   :  { %v10265_v2 = vmax.f32 %v10065_v6, %v10165_v47  ;;  %v10166_v18 = vmax.f32 %v23737_v25, %v9628_v40  ;;  %v10464_v15 = vmax.f32 %v10364_v1, 0.0  ;;  %v10365_v49 = vadd.f32 %v24042_v22, %v10241_v9  ;;  %v9683_v33 = vpop.f32.mrf.mxu1 }
 0x510   :  { %v9630_v42 = vpop.f32.mrf.mxu0  ;;  %v10391_v6 = vadd.f32 %v24050_v41, %v10267_v0  ;;  %v10268_v29 = vmax.f32 %v10068_v26, %v10168_v55  ;;  %v16709_v43 = vpack.c.bf16 %v10466_v11, %v10441_v57  ;;  %v10467_v8 = vmax.f32 %v10367_v23, 0.0  ;;  %v27075_v0 = vld [vmem:[#allocation204_spill] sm:$0xff] }
 0x511   :  { %v10389_v51 = vadd.f32 %v24050_v41, %v10265_v2  ;;  %v10266_v25 = vmax.f32 %v10066_v60, %v10166_v18  ;;  %v16699_v45 = vpack.c.bf16 %v10464_v15, %v10439_v50  ;;  %v10465_v28 = vmax.f32 %v10365_v49, 0.0  ;;  %12912 = vmatpush2.bf16.msra.mxu0 %v18851_v17  ;;  %v9685_v19 = vpop.f32.mrf.mxu1  ;;  %v27072_v50 = vld [vmem:[#allocation191_spill] sm:$0xff] }
 0x512   :  { %v10491_v30 = vmax.f32 %v10391_v6, 0.0  ;;  %v10392_v47 = vadd.f32 %v24050_v41, %v10268_v29  ;;  %v9632_v59 = vpop.f32.mrf.mxu0  ;;  %16786 = vst [vmem:[#allocation2 + $0xb0] sm:$0xff] %v16709_v43   ;;  %v16714_v26 = vpack.c.bf16 %v10467_v8, %v10442_v14  ;;  %v10190_v57 = vmax.f32 %v27072_v50, %v9630_v42  ;;  %13347 = vmatprep.subr.bf16.mxu0 %v26980_v63  ;;  %v27074_v14 = vld [vmem:[#allocation209_spill] sm:$0xff]  ;;  %v18855_v49 = vld [vmem:[%s26648_s3 + $0x38] ss:$28 sps:$4 sm:$0xff]   ;;  %v27077_v8 = vld [vmem:[#allocation34_spill] sm:$0xff] }
 0x513   :  { %v10489_v32 = vmax.f32 %v10389_v51, 0.0  ;;  %v10390_v4 = vadd.f32 %v24050_v41, %v10266_v25  ;;  %16784 = vst [vmem:[#allocation2 + $0x90] sm:$0xff] %v16699_v45   ;;  %v16704_v60 = vpack.c.bf16 %v10465_v28, %v10440_v31  ;;  %v10192_v1 = vmax.f32 %v27073_v12, %v9683_v33  ;;  %v18858_v42 = vld [vmem:[%s26648_s3 + $0x70] ss:$28 sps:$4 sm:$0xff]   ;;  %v18863_v25 = vld [vmem:[%s26648_s3 + $0xa8] ss:$28 sps:$4 sm:$0xff]  }
 0x514   :  { %v16597_v9 = vpack.c.bf16 %v10491_v30, %v10491_v30  ;;  %v10492_v40 = vmax.f32 %v10392_v47, 0.0  ;;  %16787 = vst [vmem:[#allocation2 + $0xc0] sm:$0xff] %v16714_v26   ;;  %v10290_v52 = vmax.f32 %v10090_v35, %v10190_v57  ;;  %v10191_v2 = vmax.f32 %v27074_v14, %v9632_v59  ;;  %12914 = vmatmul.mubr.bf16.vlgmr.msra.gmra.mxu0 %v18852_v38  ;;  %v18865_v33 = vld [vmem:[%s26648_s3 + $0xac] ss:$28 sps:$4 sm:$0xff]   ;;  %v18870_v29 = vld [vmem:[%s26648_s3 + $0xe4] ss:$28 sps:$4 sm:$0xff]  }
 0x515   :  { %v16589_v46 = vpack.c.bf16 %v10489_v32, %v10489_v32  ;;  %v10490_v37 = vmax.f32 %v10390_v4, 0.0  ;;  %16785 = vst [vmem:[#allocation2 + $0xa0] sm:$0xff] %v16704_v60   ;;  %v10292_v31 = vmax.f32 %v10092_v7, %v10192_v1  ;;  %v10193_v18 = vmax.f32 %v27075_v0, %v9685_v19  ;;  %12921 = vmatprep.mubr.bf16.mxu0 %v18857_v39  ;;  %v18868_v43 = vld [vmem:[%s26648_s3 + $0xe0] ss:$28 sps:$4 sm:$0xff]   ;;  %v27076_v28 = vld [vmem:[#allocation106_spill] sm:$0xff]  ;;  %v27079_v30 = vld [vmem:[#allocation31_spill] sm:$0xff] }
 0x516   :  { %10794 = vst [vmem:[#allocation2 + $0xb8] sm:$0xf] %v16597_v9  ;;  %v16601_v55 = vpack.c.bf16 %v10492_v40, %v10492_v40  ;;  %v10414_v15 = vadd.f32 %v24089_v27, %v10290_v52  ;;  %v10291_v53 = vmax.f32 %v10091_v21, %v10191_v2  ;;  %v10019_v38 = vmax.f32 %v27077_v8, %v27076_v28  ;;  %v27078_v32 = vld [vmem:[#allocation108_spill] sm:$0xff]  ;;  %v27080_v47 = vld [vmem:[#allocation110_spill] sm:$0xff]  ;;  %v27083_v60 = vld [vmem:[#allocation35_spill] sm:$0xff] }
 0x517   :  { %10758 = vst [vmem:[#allocation2 + $0x98] sm:$0xf] %v16589_v46  ;;  %v16593_v54 = vpack.c.bf16 %v10490_v37, %v10490_v37  ;;  %v10416_v11 = vadd.f32 %v24089_v27, %v10292_v31  ;;  %v10293_v44 = vmax.f32 %v10093_v62, %v10193_v18  ;;  %v10020_v4 = vmax.f32 %v27079_v30, %v27078_v32  ;;  %v27081_v59 = vld [vmem:[#allocation38_spill] sm:$0xff]  ;;  %v27082_v39 = vld [vmem:[#allocation112_spill] sm:$0xff]  ;;  %v27087_v40 = vld [vmem:[#allocation39_spill] sm:$0xff] }
 0x518   :  { %10812 = vst [vmem:[#allocation2 + $0xc8] sm:$0xf] %v16601_v55  ;;  %v10514_v35 = vmax.f32 %v10414_v15, 0.0  ;;  %v10415_v3 = vadd.f32 %v24089_v27, %v10291_v53  ;;  %v10044_v19 = vmax.f32 %v27081_v59, %v27080_v47  ;;  %v10045_v26 = vmax.f32 %v27083_v60, %v27082_v39  ;;  %v27084_v50 = vld [vmem:[#allocation114_spill] sm:$0xff]  ;;  %v18875_v9 = vld [vmem:[%s26648_s3 + $0x11c] ss:$28 sps:$4 sm:$0xff]  }
 0x519   :  { %10776 = vst [vmem:[#allocation2 + $0xa8] sm:$0xf] %v16593_v54  ;;  %v10516_v61 = vmax.f32 %v10416_v11, 0.0  ;;  %v10417_v7 = vadd.f32 %v24089_v27, %v10293_v44  ;;  %v18862_v6 = vld [vmem:[#allocation2 + $0xb0] sm:$0xff]   ;;  %v27085_v57 = vld [vmem:[#allocation42_spill] sm:$0xff]  ;;  %v27086_v37 = vld [vmem:[#allocation116_spill] sm:$0xff] }
 0x51a   :  { %v16590_v5 = vpack.c.bf16 %v10514_v35, %v10514_v35  ;;  %v10515_v16 = vmax.f32 %v10415_v3, 0.0  ;;  %v10069_v12 = vmax.f32 %v27085_v57, %v27084_v50  ;;  %v10070_v52 = vmax.f32 %v27087_v40, %v27086_v37  ;;  %v27088_v31 = vld [vmem:[#allocation125_spill] sm:$0xff]  ;;  %v27090_v0 = vld [vmem:[#allocation195_spill] sm:$0xff]  ;;  %v27092_v11 = vld [vmem:[#allocation118_spill] sm:$0xff] }
 0x51b   :  { %v16598_v21 = vpack.c.bf16 %v10516_v61, %v10516_v61  ;;  %v10517_v56 = vmax.f32 %v10417_v7, 0.0  ;;  %v27089_v14 = vld [vmem:[#allocation33_spill] sm:$0xff]  ;;  %v27091_v54 = vld [vmem:[#allocation215_spill] sm:$0xff]  ;;  %v27093_v53 = vld [vmem:[#allocation46_spill] sm:$0xff] }
 0x51c   :  { %10759 = vst [vmem:[#allocation2 + $0x9c] sm:$0x7] %v16590_v5  ;;  %v16594_v62 = vpack.c.bf16 %v10515_v16, %v10515_v16  ;;  %12922 = vmatmul.mubr.bf16.gmra.mxu0 %v18855_v49  ;;  %v18867_v45 = vld [vmem:[#allocation2 + $0xa0] sm:$0xff]   ;;  %v10021_v2 = vmax.f32 %v27089_v14, %v27088_v31  ;;  %v10094_v44 = vmax.f32 %v27093_v53, %v27092_v11  ;;  %v27094_v35 = vld [vmem:[#allocation120_spill] sm:$0xff]  ;;  %v27095_v61 = vld [vmem:[#allocation43_spill] sm:$0xff] }
 0x51d   :  { %10795 = vst [vmem:[#allocation2 + $0xbc] sm:$0x7] %v16598_v21  ;;  %v16602_v23 = vpack.c.bf16 %v10517_v56, %v10517_v56  ;;  %12929 = vmatprep.mubr.bf16.mxu0 %v18860_v48  ;;  %v10095_v3 = vmax.f32 %v27095_v61, %v27094_v35  ;;  %v27096_v7 = vld [vmem:[#allocation127_spill] sm:$0xff]  ;;  %v27097_v49 = vld [vmem:[#allocation48_spill] sm:$0xff]  ;;  %v27098_v5 = vld [vmem:[#allocation129_spill] sm:$0xff] }
 0x51e   :  { %10777 = vst [vmem:[#allocation2 + $0xac] sm:$0x7] %v16594_v62  ;;  %v10022_v48 = vmax.f32 %v27097_v49, %v27096_v7  ;;  %v27099_v21 = vld [vmem:[#allocation37_spill] sm:$0xff]  ;;  %v27106_v30 = vld [vmem:[#allocation135_spill] sm:$0xff]  ;;  %v27107_v47 = vld [vmem:[#allocation56_spill] sm:$0xff] }
 0x51f   :  { %10813 = vst [vmem:[#allocation2 + $0xcc] sm:$0x7] %v16602_v23  ;;  %v10046_v16 = vmax.f32 %v27099_v21, %v27098_v5  ;;  %v27104_v28 = vld [vmem:[#allocation133_spill] sm:$0xff]  ;;  %v10072_v59 = vmax.f32 %v27107_v47, %v27106_v30  ;;  %v18872_v31 = vld [vmem:[#allocation2 + $0x90] sm:$0xff]   ;;  %v18883_v40 = vld [vmem:[%s26648_s3 + $0x18c] ss:$28 sps:$4 sm:$0xff]  }
 0x520   :  { %v27105_v8 = vld [vmem:[#allocation41_spill] sm:$0xff]  ;;  %v27113_v49 = vld [vmem:[#allocation219_spill] sm:$0xff] }
 0x521   :  { %v10071_v32 = vmax.f32 %v27105_v8, %v27104_v28  ;;  %v27108_v14 = vld [vmem:[#allocation137_spill] sm:$0xff]  ;;  %v18880_v8 = vld [vmem:[%s26648_s3 + $0x154] ss:$28 sps:$4 sm:$0xff]  }
 0x522   :  { %v18886_v35 = vld [vmem:[%s26648_s3 + $0x1c4] ss:$28 sps:$4 sm:$0xff]  }
 0x523   :  { %v18871_v15 = vld [vmem:[#allocation2 + $0x98] sm:$0xff]  }
 0x524   :  { %v18861_v51 = vld [vmem:[#allocation2 + $0xb8] sm:$0xff]   ;;  %12930 = vmatmul.mubr.bf16.gmra.mxu0 %v18858_v42 }
 0x525   :  { %13115 = vmatpush1.bf16.msra.mxu1 %v18861_v51  ;;  %12937 = vmatprep.mubr.bf16.mxu0 %v18865_v33  ;;  %v18866_v17 = vld [vmem:[#allocation2 + $0xa8] sm:$0xff]   ;;  %v27100_v33 = vld [vmem:[#allocation213_spill] sm:$0xff] }
 0x526   :  { %13116 = vmatprep.subr.bf16.mxu1 %v26980_v63 }
 0x529   :  { %13117 = vmatpush1.bf16.msra.mxu1 %v18862_v6  ;;  %v27101_v6 = vld [vmem:[#allocation207_spill] sm:$0xff] }
 0x52a   :  { %13118 = vmatprep.subr.bf16.mxu1 %v26980_v63 }
 0x52c   :  { %12938 = vmatmul.mubr.bf16.gmra.mxu0 %v18863_v25 }
 0x52d   :  { %13119 = vmatpush1.bf16.msra.mxu1 %v18866_v17  ;;  %12945 = vmatprep.mubr.bf16.mxu0 %v18870_v29  ;;  %v27102_v29 = vld [vmem:[#allocation131_spill] sm:$0xff]  ;;  %v27103_v17 = vld [vmem:[#allocation52_spill] sm:$0xff] }
 0x52e   :  { %13120 = vmatprep.subr.bf16.mxu1 %v26980_v63 }
 0x52f   :  { %v9775_v46 = vpop.f32.mrf.mxu1 }
 0x530   :  { %v10121_v55 = vmax.f32 %v27091_v54, %v9775_v46  ;;  %v27111_v54 = vld [vmem:[#allocation60_spill] sm:$0xff] }
 0x531   :  { %13121 = vmatpush1.bf16.msra.mxu1 %v18867_v45  ;;  %v9777_v62 = vpop.f32.mrf.mxu1  ;;  %v10047_v45 = vmax.f32 %v27103_v17, %v27102_v29 }
 0x532   :  { %13122 = vmatprep.subr.bf16.mxu1 %v26980_v63  ;;  %v10221_v42 = vmax.f32 %v10021_v2, %v10121_v55  ;;  %v10122_v25 = vmax.f32 %v27101_v6, %v9777_v62  ;;  %v27109_v2 = vld [vmem:[#allocation45_spill] sm:$0xff] }
 0x534   :  { %v9722_v1 = vpop.f32.mrf.mxu0  ;;  %12946 = vmatmul.mubr.bf16.gmra.mxu0 %v18868_v43  ;;  %v9779_v43 = vpop.f32.mrf.mxu1  ;;  %v10345_v60 = vadd.f32 %v24002_v24, %v10221_v42  ;;  %v10222_v46 = vmax.f32 %v10022_v48, %v10122_v25  ;;  %v27115_v25 = vld [vmem:[#allocation210_spill] sm:$0xff] }
 0x535   :  { %v10119_v18 = vmax.f32 %v27090_v0, %v9722_v1  ;;  %13123 = vmatpush1.bf16.msra.mxu1 %v18871_v15  ;;  %12953 = vmatprep.mubr.bf16.mxu0 %v18875_v9  ;;  %v10096_v0 = vmax.f32 %v27109_v2, %v27108_v14  ;;  %v27112_v15 = vld [vmem:[#allocation199_spill] sm:$0xff]  ;;  %v10146_v5 = vmax.f32 %v27113_v49, %v9779_v43 }
 0x536   :  { %v9724_v56 = vpop.f32.mrf.mxu0  ;;  %13124 = vmatprep.subr.bf16.mxu1 %v26980_v63  ;;  %v18873_v9 = vld [vmem:[%s26648_s3 + $0x118] ss:$28 sps:$4 sm:$0xff]  }
 0x537   :  { %v10219_v23 = vmax.f32 %v10019_v38, %v10119_v18  ;;  %v10120_v51 = vmax.f32 %v27100_v33, %v9724_v56  ;;  %v27110_v18 = vld [vmem:[#allocation139_spill] sm:$0xff]  ;;  %v9781_v56 = vpop.f32.mrf.mxu1  ;;  %v10246_v33 = vmax.f32 %v10046_v16, %v10146_v5 }
 0x538   :  { %v9726_v39 = vpop.f32.mrf.mxu0  ;;  %v10097_v55 = vmax.f32 %v27111_v54, %v27110_v18  ;;  %v10147_v29 = vmax.f32 %v27115_v25, %v9781_v56 }
 0x539   :  { %v10343_v38 = vadd.f32 %v24002_v24, %v10219_v23  ;;  %v10220_v1 = vmax.f32 %v10020_v4, %v10120_v51  ;;  %v10144_v7 = vmax.f32 %v27112_v15, %v9726_v39  ;;  %v10445_v4 = vmax.f32 %v10345_v60, 0.0  ;;  %13125 = vmatpush1.bf16.msra.mxu1 %v18872_v31  ;;  %v27114_v51 = vld [vmem:[#allocation217_spill] sm:$0xff]  ;;  %v9785_v28 = vpop.f32.mrf.mxu1  ;;  %v27116_v39 = vld [vmem:[#allocation202_spill] sm:$0xff] }
 0x53a   :  { %v9728_v21 = vpop.f32.mrf.mxu0  ;;  %v10346_v23 = vadd.f32 %v24002_v24, %v10222_v46  ;;  %13126 = vmatprep.subr.bf16.mxu1 %v26980_v63  ;;  %v10247_v31 = vmax.f32 %v10047_v45, %v10147_v29 }
 0x53b   :  { %v10443_v62 = vmax.f32 %v10343_v38, 0.0  ;;  %v10344_v48 = vadd.f32 %v24002_v24, %v10220_v1  ;;  %v10244_v42 = vmax.f32 %v10044_v19, %v10144_v7  ;;  %v10145_v6 = vmax.f32 %v27114_v51, %v9728_v21  ;;  %v27117_v38 = vld [vmem:[#allocation223_spill] sm:$0xff]  ;;  %v18876_v19 = vld [vmem:[#allocation2 + $0x88] sm:$0xff]   ;;  %v9787_v7 = vpop.f32.mrf.mxu1  ;;  %v27118_v21 = vld [vmem:[#allocation221_spill] sm:$0xff] }
 0x53c   :  { %v9732_v17 = vpop.f32.mrf.mxu0  ;;  %v10446_v47 = vmax.f32 %v10346_v23, 0.0  ;;  %v10171_v60 = vmax.f32 %v27117_v38, %v9785_v28  ;;  %v10370_v1 = vadd.f32 %v24042_v22, %v10246_v33  ;;  %12954 = vmatmul.mubr.bf16.gmra.mxu0 %v18873_v9  ;;  %v18877_v33 = vld [vmem:[#allocation2 + $0x80] sm:$0xff]  }
 0x53d   :  { %v10444_v30 = vmax.f32 %v10344_v48, 0.0  ;;  %v10169_v43 = vmax.f32 %v27116_v39, %v9732_v17  ;;  %v10368_v16 = vadd.f32 %v24042_v22, %v10244_v42  ;;  %v10245_v46 = vmax.f32 %v10045_v26, %v10145_v6  ;;  %13127 = vmatpush1.bf16.msra.mxu1 %v18876_v19  ;;  %v27119_v48 = vld [vmem:[#allocation214_spill] sm:$0xff]  ;;  %v9789_v9 = vpop.f32.mrf.mxu1  ;;  %12961 = vmatprep.mubr.bf16.mxu0 %v18880_v8 }
 0x53e   :  { %v9734_v15 = vpop.f32.mrf.mxu0  ;;  %v10271_v5 = vmax.f32 %v10071_v32, %v10171_v60  ;;  %v10172_v23 = vmax.f32 %v27119_v48, %v9787_v7  ;;  %v10470_v25 = vmax.f32 %v10370_v1, 0.0  ;;  %v10371_v26 = vadd.f32 %v24042_v22, %v10247_v31  ;;  %13128 = vmatprep.subr.bf16.mxu1 %v26980_v63  ;;  %v18878_v39 = vld [vmem:[%s26648_s3 + $0x150] ss:$28 sps:$4 sm:$0xff]  }
 0x53f   :  { %v10269_v49 = vmax.f32 %v10069_v12, %v10169_v43  ;;  %v10170_v56 = vmax.f32 %v27118_v21, %v9734_v15  ;;  %v10468_v51 = vmax.f32 %v10368_v16, 0.0  ;;  %v10369_v42 = vadd.f32 %v24042_v22, %v10245_v46  ;;  %v9791_v37 = vpop.f32.mrf.mxu1  ;;  %v27121_v16 = vld [vmem:[#allocation227_spill] sm:$0xff]  ;;  %v27123_v21 = vld [vmem:[#allocation218_spill] sm:$0xff] }
 0x540   :  { %v9736_v45 = vpop.f32.mrf.mxu0  ;;  %v10395_v57 = vadd.f32 %v24050_v41, %v10271_v5  ;;  %v10272_v32 = vmax.f32 %v10072_v59, %v10172_v23  ;;  %v16729_v29 = vpack.c.bf16 %v10470_v25, %v10445_v4  ;;  %v10471_v28 = vmax.f32 %v10371_v26, 0.0 }
 0x541   :  { %v10393_v50 = vadd.f32 %v24050_v41, %v10269_v49  ;;  %v10270_v12 = vmax.f32 %v10070_v52, %v10170_v56  ;;  %v16719_v6 = vpack.c.bf16 %v10468_v51, %v10443_v62  ;;  %v10469_v17 = vmax.f32 %v10369_v42, 0.0  ;;  %13129 = vmatpush1.bf16.msra.mxu1 %v18877_v33  ;;  %v27120_v62 = vld [vmem:[#allocation206_spill] sm:$0xff] }
 0x542   :  { %v10495_v8 = vmax.f32 %v10395_v57, 0.0  ;;  %v10396_v60 = vadd.f32 %v24050_v41, %v10272_v32  ;;  %v9738_v19 = vpop.f32.mrf.mxu0  ;;  %16790 = vst [vmem:[#allocation2 + $0xf0] sm:$0xff] %v16729_v29   ;;  %v16734_v59 = vpack.c.bf16 %v10471_v28, %v10446_v47  ;;  %v10194_v4 = vmax.f32 %v27120_v62, %v9736_v45  ;;  %13130 = vmatprep.subr.bf16.mxu1 %v26980_v63  ;;  %v27122_v47 = vld [vmem:[#allocation225_spill] sm:$0xff]  ;;  %v18896_v32 = vld [vmem:[%s26648_s3 + $0x234] ss:$28 sps:$4 sm:$0xff]   ;;  %v27125_v28 = vld [vmem:[#allocation50_spill] sm:$0xff] }
 0x543   :  { %v10493_v43 = vmax.f32 %v10393_v50, 0.0  ;;  %v10394_v38 = vadd.f32 %v24050_v41, %v10270_v12  ;;  %16788 = vst [vmem:[#allocation2 + $0xd0] sm:$0xff] %v16719_v6   ;;  %v16724_v52 = vpack.c.bf16 %v10469_v17, %v10444_v30  ;;  %v10196_v1 = vmax.f32 %v27121_v16, %v9789_v9  ;;  %v18881_v42 = vld [vmem:[%s26648_s3 + $0x188] ss:$28 sps:$4 sm:$0xff]   ;;  %v18884_v45 = vld [vmem:[%s26648_s3 + $0x1c0] ss:$28 sps:$4 sm:$0xff]  }
 0x544   :  { %v16613_v31 = vpack.c.bf16 %v10495_v8, %v10495_v8  ;;  %v10496_v7 = vmax.f32 %v10396_v60, 0.0  ;;  %16791 = vst [vmem:[#allocation2 + $0x100] sm:$0xff] %v16734_v59   ;;  %v10294_v49 = vmax.f32 %v10094_v44, %v10194_v4  ;;  %v10195_v5 = vmax.f32 %v27122_v47, %v9738_v19  ;;  %12962 = vmatmul.mubr.bf16.gmra.mxu0 %v18878_v39  ;;  %v18891_v9 = vld [vmem:[%s26648_s3 + $0x1fc] ss:$28 sps:$4 sm:$0xff]   ;;  %v18894_v29 = vld [vmem:[%s26648_s3 + $0x230] ss:$28 sps:$4 sm:$0xff]  }
 0x545   :  { %v16605_v46 = vpack.c.bf16 %v10493_v43, %v10493_v43  ;;  %v10494_v15 = vmax.f32 %v10394_v38, 0.0  ;;  %16789 = vst [vmem:[#allocation2 + $0xe0] sm:$0xff] %v16724_v52   ;;  %v10296_v30 = vmax.f32 %v10096_v0, %v10196_v1  ;;  %v10197_v56 = vmax.f32 %v27123_v21, %v9791_v37  ;;  %12969 = vmatprep.mubr.bf16.mxu0 %v18883_v40  ;;  %v18889_v12 = vld [vmem:[%s26648_s3 + $0x1f8] ss:$28 sps:$4 sm:$0xff]   ;;  %v27124_v17 = vld [vmem:[#allocation122_spill] sm:$0xff] }
 0x546   :  { %10866 = vst [vmem:[#allocation2 + $0xf8] sm:$0xf] %v16613_v31  ;;  %v16617_v23 = vpack.c.bf16 %v10496_v7, %v10496_v7  ;;  %v10418_v51 = vadd.f32 %v24089_v27, %v10294_v49  ;;  %v10295_v11 = vmax.f32 %v10095_v3, %v10195_v5  ;;  %v10023_v39 = vmax.f32 %v27125_v28, %v27124_v17  ;;  %v27126_v43 = vld [vmem:[#allocation124_spill] sm:$0xff]  ;;  %v27127_v8 = vld [vmem:[#allocation47_spill] sm:$0xff]  ;;  %v27128_v60 = vld [vmem:[#allocation126_spill] sm:$0xff] }
 0x547   :  { %10830 = vst [vmem:[#allocation2 + $0xd8] sm:$0xf] %v16605_v46  ;;  %v16609_v48 = vpack.c.bf16 %v10494_v15, %v10494_v15  ;;  %v10420_v25 = vadd.f32 %v24089_v27, %v10296_v30  ;;  %v10297_v53 = vmax.f32 %v10097_v55, %v10197_v56  ;;  %v10024_v38 = vmax.f32 %v27127_v8, %v27126_v43  ;;  %v27129_v19 = vld [vmem:[#allocation54_spill] sm:$0xff]  ;;  %v27130_v40 = vld [vmem:[#allocation128_spill] sm:$0xff]  ;;  %v27131_v52 = vld [vmem:[#allocation51_spill] sm:$0xff] }
 0x548   :  { %10884 = vst [vmem:[#allocation2 + $0x108] sm:$0xf] %v16617_v23  ;;  %v10518_v44 = vmax.f32 %v10418_v51, 0.0  ;;  %v10419_v2 = vadd.f32 %v24089_v27, %v10295_v11  ;;  %v10048_v37 = vmax.f32 %v27129_v19, %v27128_v60  ;;  %v10049_v59 = vmax.f32 %v27131_v52, %v27130_v40  ;;  %v18901_v16 = vld [vmem:[%s26648_s3 + $0x26c] ss:$28 sps:$4 sm:$0xff]   ;;  %v27134_v15 = vld [vmem:[#allocation141_spill] sm:$0xff] }
 0x549   :  { %10848 = vst [vmem:[#allocation2 + $0xe8] sm:$0xf] %v16609_v48  ;;  %v10520_v14 = vmax.f32 %v10420_v25, 0.0  ;;  %v10421_v0 = vadd.f32 %v24089_v27, %v10297_v53  ;;  %v18888_v57 = vld [vmem:[#allocation2 + $0xf0] sm:$0xff]   ;;  %v27132_v1 = vld [vmem:[#allocation130_spill] sm:$0xff]  ;;  %v27135_v7 = vld [vmem:[#allocation49_spill] sm:$0xff] }
 0x54a   :  { %v16606_v61 = vpack.c.bf16 %v10518_v44, %v10518_v44  ;;  %v10519_v18 = vmax.f32 %v10419_v2, 0.0  ;;  %v27133_v46 = vld [vmem:[#allocation58_spill] sm:$0xff]  ;;  %v10025_v49 = vmax.f32 %v27135_v7, %v27134_v15  ;;  %v27136_v30 = vld [vmem:[#allocation208_spill] sm:$0xff]  ;;  %v27139_v23 = vld [vmem:[#allocation55_spill] sm:$0xff] }
 0x54b   :  { %v16614_v3 = vpack.c.bf16 %v10520_v14, %v10520_v14  ;;  %v10521_v54 = vmax.f32 %v10421_v0, 0.0  ;;  %v10073_v31 = vmax.f32 %v27133_v46, %v27132_v1  ;;  %v27137_v5 = vld [vmem:[#allocation232_spill] sm:$0xff]  ;;  %v27140_v25 = vld [vmem:[#allocation134_spill] sm:$0xff]  ;;  %v27143_v14 = vld [vmem:[#allocation59_spill] sm:$0xff] }
 0x54c   :  { %10831 = vst [vmem:[#allocation2 + $0xdc] sm:$0x7] %v16606_v61  ;;  %v16610_v55 = vpack.c.bf16 %v10519_v18, %v10519_v18  ;;  %12970 = vmatmul.mubr.bf16.gmra.mxu0 %v18881_v42  ;;  %v18893_v6 = vld [vmem:[#allocation2 + $0xe0] sm:$0xff]   ;;  %v27138_v48 = vld [vmem:[#allocation132_spill] sm:$0xff]  ;;  %v27141_v11 = vld [vmem:[#allocation62_spill] sm:$0xff] }
 0x54d   :  { %10867 = vst [vmem:[#allocation2 + $0xfc] sm:$0x7] %v16614_v3  ;;  %v16618_v26 = vpack.c.bf16 %v10521_v54, %v10521_v54  ;;  %12977 = vmatprep.mubr.bf16.mxu0 %v18886_v35  ;;  %v10074_v51 = vmax.f32 %v27139_v23, %v27138_v48  ;;  %v10098_v53 = vmax.f32 %v27141_v11, %v27140_v25  ;;  %v27142_v44 = vld [vmem:[#allocation136_spill] sm:$0xff]  ;;  %v27144_v0 = vld [vmem:[#allocation143_spill] sm:$0xff]  ;;  %v27152_v17 = vld [vmem:[#allocation149_spill] sm:$0xff] }
 0x54e   :  { %10849 = vst [vmem:[#allocation2 + $0xec] sm:$0x7] %v16610_v55  ;;  %v10099_v2 = vmax.f32 %v27143_v14, %v27142_v44  ;;  %v27145_v42 = vld [vmem:[#allocation64_spill] sm:$0xff]  ;;  %v27146_v55 = vld [vmem:[#allocation230_spill] sm:$0xff]  ;;  %v27153_v28 = vld [vmem:[#allocation57_spill] sm:$0xff] }
 0x54f   :  { %10885 = vst [vmem:[#allocation2 + $0x10c] sm:$0x7] %v16618_v26  ;;  %v10026_v35 = vmax.f32 %v27145_v42, %v27144_v0  ;;  %v10075_v43 = vmax.f32 %v27153_v28, %v27152_v17  ;;  %v18898_v52 = vld [vmem:[#allocation2 + $0xd0] sm:$0xff]   ;;  %v27156_v46 = vld [vmem:[#allocation153_spill] sm:$0xff]  ;;  %v27160_v0 = vld [vmem:[#allocation154_spill] sm:$0xff] }
 0x550   :  { %v27157_v15 = vld [vmem:[#allocation61_spill] sm:$0xff]  ;;  %v27164_v17 = vld [vmem:[#allocation216_spill] sm:$0xff]  ;;  %v18918_v14 = vld [vmem:[%s26648_s3 + $0x314] ss:$28 sps:$4 sm:$0xff]  }
 0x551   :  { %v10100_v7 = vmax.f32 %v27157_v15, %v27156_v46  ;;  %v18913_v46 = vld [vmem:[%s26648_s3 + $0x40] ss:$28 sps:$4 sm:$0xff]   ;;  %v18910_v44 = vld [vmem:[%s26648_s3 + $0x2d8] ss:$28 sps:$4 sm:$0xff]  }
 0x553   :  { %v18897_v56 = vld [vmem:[#allocation2 + $0xd8] sm:$0xff]  }
 0x554   :  { %v18887_v50 = vld [vmem:[#allocation2 + $0xf8] sm:$0xff]   ;;  %12978 = vmatmul.mubr.bf16.gmra.mxu0 %v18884_v45  ;;  %v27147_v45 = vld [vmem:[#allocation222_spill] sm:$0xff] }
 0x555   :  { %13131 = vmatpush2.bf16.msra.mxu1 %v18887_v50  ;;  %12985 = vmatprep.mubr.bf16.mxu0 %v18891_v9  ;;  %v18892_v33 = vld [vmem:[#allocation2 + $0xe8] sm:$0xff]   ;;  %v27148_v50 = vld [vmem:[#allocation145_spill] sm:$0xff] }
 0x556   :  { %13132 = vmatprep.subr.bf16.mxu1 %v26980_v63 }
 0x559   :  { %13133 = vmatpush2.bf16.msra.mxu1 %v18888_v57  ;;  %v27149_v57 = vld [vmem:[#allocation53_spill] sm:$0xff] }
 0x55a   :  { %13134 = vmatprep.subr.bf16.mxu1 %v26980_v63 }
 0x55c   :  { %12986 = vmatmul.mubr.bf16.gmra.mxu0 %v18889_v12  ;;  %v10050_v12 = vmax.f32 %v27149_v57, %v27148_v50 }
 0x55d   :  { %13135 = vmatpush2.bf16.msra.mxu1 %v18892_v33  ;;  %12993 = vmatprep.mubr.bf16.mxu0 %v18896_v32  ;;  %v27150_v32 = vld [vmem:[#allocation147_spill] sm:$0xff]  ;;  %v27151_v33 = vld [vmem:[#allocation68_spill] sm:$0xff] }
 0x55e   :  { %13136 = vmatprep.subr.bf16.mxu1 %v26980_v63 }
 0x55f   :  { %v9881_v4 = vpop.f32.mrf.mxu1 }
 0x560   :  { %v10125_v21 = vmax.f32 %v27137_v5, %v9881_v4  ;;  %v27155_v4 = vld [vmem:[#allocation73_spill] sm:$0xff] }
 0x561   :  { %13137 = vmatpush2.bf16.msra.mxu1 %v18893_v6  ;;  %v9883_v3 = vpop.f32.mrf.mxu1  ;;  %v10051_v6 = vmax.f32 %v27151_v33, %v27150_v32 }
 0x562   :  { %13138 = vmatprep.subr.bf16.mxu1 %v26980_v63  ;;  %v10225_v54 = vmax.f32 %v10025_v49, %v10125_v21  ;;  %v10126_v9 = vmax.f32 %v27147_v45, %v9883_v3  ;;  %v27158_v49 = vld [vmem:[#allocation212_spill] sm:$0xff]  ;;  %v18906_v3 = vld [vmem:[%s26648_s3 + $0x2a4] ss:$28 sps:$4 sm:$0xff]   ;;  %v27163_v45 = vld [vmem:[#allocation226_spill] sm:$0xff] }
 0x564   :  { %v9828_v62 = vpop.f32.mrf.mxu0  ;;  %12994 = vmatmul.mubr.bf16.gmra.mxu0 %v18894_v29  ;;  %v9885_v29 = vpop.f32.mrf.mxu1  ;;  %v10349_v60 = vadd.f32 %v24002_v24, %v10225_v54  ;;  %v10226_v40 = vmax.f32 %v10026_v35, %v10126_v9 }
 0x565   :  { %v10123_v47 = vmax.f32 %v27136_v30, %v9828_v62  ;;  %13139 = vmatpush2.bf16.msra.mxu1 %v18897_v56  ;;  %13001 = vmatprep.mubr.bf16.mxu0 %v18901_v16  ;;  %v27154_v62 = vld [vmem:[#allocation151_spill] sm:$0xff]  ;;  %v18899_v16 = vld [vmem:[%s26648_s3 + $0x268] ss:$28 sps:$4 sm:$0xff]  }
 0x566   :  { %v9830_v61 = vpop.f32.mrf.mxu0  ;;  %13140 = vmatprep.subr.bf16.mxu1 %v26980_v63  ;;  %v10076_v1 = vmax.f32 %v27155_v4, %v27154_v62  ;;  %v9887_v56 = vpop.f32.mrf.mxu1  ;;  %v10449_v32 = vmax.f32 %v10349_v60, 0.0 }
 0x567   :  { %v10223_v18 = vmax.f32 %v10023_v39, %v10123_v47  ;;  %v10124_v26 = vmax.f32 %v27146_v55, %v9830_v61  ;;  %v27159_v47 = vld [vmem:[#allocation236_spill] sm:$0xff]  ;;  %v10350_v61 = vadd.f32 %v24002_v24, %v10226_v40  ;;  %v27162_v55 = vld [vmem:[#allocation234_spill] sm:$0xff]  ;;  %v10151_v9 = vmax.f32 %v27163_v45, %v9887_v56 }
 0x568   :  { %v9832_v8 = vpop.f32.mrf.mxu0  ;;  %v10150_v5 = vmax.f32 %v27159_v47, %v9885_v29  ;;  %v18902_v29 = vld [vmem:[#allocation2 + $0xc8] sm:$0xff]   ;;  %v18904_v45 = vld [vmem:[%s26648_s3 + $0x2a0] ss:$28 sps:$4 sm:$0xff]  }
 0x569   :  { %v10347_v39 = vadd.f32 %v24002_v24, %v10223_v18  ;;  %v10224_v19 = vmax.f32 %v10024_v38, %v10124_v26  ;;  %v10148_v30 = vmax.f32 %v27158_v49, %v9832_v8  ;;  %v27161_v38 = vld [vmem:[#allocation77_spill] sm:$0xff]  ;;  %13141 = vmatpush2.bf16.msra.mxu1 %v18898_v52  ;;  %v9891_v8 = vpop.f32.mrf.mxu1  ;;  %v10450_v62 = vmax.f32 %v10350_v61, 0.0 }
 0x56a   :  { %v9834_v21 = vpop.f32.mrf.mxu0  ;;  %v10101_v42 = vmax.f32 %v27161_v38, %v27160_v0  ;;  %v10250_v54 = vmax.f32 %v10050_v12, %v10150_v5  ;;  %13142 = vmatprep.subr.bf16.mxu1 %v26980_v63  ;;  %v10251_v12 = vmax.f32 %v10051_v6, %v10151_v9  ;;  %v10175_v49 = vmax.f32 %v24027_v20, %v9891_v8  ;;  %v27167_v8 = vld [vmem:[#allocation220_spill] sm:$0xff] }
 0x56b   :  { %v10348_v35 = vadd.f32 %v24002_v24, %v10224_v19  ;;  %v10248_v18 = vmax.f32 %v10048_v37, %v10148_v30  ;;  %v10149_v26 = vmax.f32 %v27162_v55, %v9834_v21  ;;  %v10447_v57 = vmax.f32 %v10347_v39, 0.0  ;;  %v27165_v39 = vld [vmem:[#allocation238_spill] sm:$0xff]  ;;  %v9893_v30 = vpop.f32.mrf.mxu1 }
 0x56c   :  { %v9838_v50 = vpop.f32.mrf.mxu0  ;;  %v10374_v40 = vadd.f32 %v24042_v22, %v10250_v54  ;;  %13002 = vmatmul.mubr.bf16.gmra.mxu0 %v18899_v16  ;;  %v10375_v56 = vadd.f32 %v24042_v22, %v10251_v12  ;;  %v10275_v6 = vmax.f32 %v10075_v43, %v10175_v49  ;;  %v27168_v49 = vld [vmem:[#allocation233_spill] sm:$0xff] }
 0x56d   :  { %v10448_v33 = vmax.f32 %v10348_v35, 0.0  ;;  %v10173_v28 = vmax.f32 %v27164_v17, %v9838_v50  ;;  %v10372_v19 = vadd.f32 %v24042_v22, %v10248_v18  ;;  %v10249_v37 = vmax.f32 %v10049_v59, %v10149_v26  ;;  %13143 = vmatpush2.bf16.msra.mxu1 %v18902_v29  ;;  %13009 = vmatprep.mubr.bf16.mxu0 %v18906_v3  ;;  %v9895_v61 = vpop.f32.mrf.mxu1  ;;  %v18903_v3 = vld [vmem:[#allocation2 + $0xc0] sm:$0xff]  }
 0x56e   :  { %v9840_v52 = vpop.f32.mrf.mxu0  ;;  %v10474_v5 = vmax.f32 %v10374_v40, 0.0  ;;  %13144 = vmatprep.subr.bf16.mxu1 %v26980_v63  ;;  %v10475_v26 = vmax.f32 %v10375_v56, 0.0  ;;  %v10399_v50 = vadd.f32 %v24050_v41, %v10275_v6  ;;  %v26713_v40 = vmov 0.0  }
 0x56f   :  { %v10273_v4 = vmax.f32 %v10073_v31, %v10173_v28  ;;  %v10174_v60 = vmax.f32 %v27165_v39, %v9840_v52  ;;  %v10472_v47 = vmax.f32 %v10372_v19, 0.0  ;;  %v10373_v21 = vadd.f32 %v24042_v22, %v10249_v37  ;;  %v27166_v31 = vld [vmem:[#allocation229_spill] sm:$0xff]  ;;  %v9897_v23 = vpop.f32.mrf.mxu1 }
 0x570   :  { %v9842_v35 = vpop.f32.mrf.mxu0  ;;  %v10176_v16 = vmax.f32 %v27166_v31, %v9893_v30  ;;  %v16749_v54 = vpack.c.bf16 %v10474_v5, %v10449_v32  ;;  %v16754_v28 = vpack.c.bf16 %v10475_v26, %v10450_v62  ;;  %v10200_v19 = vmax.f32 %v24077_v13, %v9895_v61  ;;  %v18919_v31 = vld [vmem:[%s26648_s3 + $0x78] ss:$28 sps:$4 sm:$0xff]   ;;  %v18934_v26 = vld [vmem:[%s26648_s3 + $0x384] ss:$28 sps:$4 sm:$0xff]  }
 0x571   :  { %v10397_v59 = vadd.f32 %v24050_v41, %v10273_v4  ;;  %v10274_v20 = vmax.f32 %v10074_v51, %v10174_v60  ;;  %v16739_v18 = vpack.c.bf16 %v10472_v47, %v10447_v57  ;;  %v10473_v55 = vmax.f32 %v10373_v21, 0.0  ;;  %13145 = vmatpush2.bf16.msra.mxu1 %v18903_v3  ;;  %v18907_v51 = vld [vmem:[%s26648_s3 + $0x8] ss:$28 sps:$4 sm:$0xff]   ;;  %v18912_v57 = vld [vmem:[%s26648_s3 + $0x2dc] ss:$28 sps:$4 sm:$0xff]  }
 0x572   :  { %v10276_v17 = vmax.f32 %v10076_v1, %v10176_v16  ;;  %v9844_v48 = vpop.f32.mrf.mxu0  ;;  %16794 = vst [vmem:[#allocation2 + $0x130] sm:$0xff] %v16749_v54   ;;  %v10198_v29 = vmax.f32 %v27167_v8, %v9842_v35  ;;  %v18915_v1 = vld [vmem:[%s26648_s3 + $0x44] ss:$28 sps:$4 sm:$0xff]   ;;  %16921 = vmatprep.subr.bf16.mxu1 %v26713_v40  ;;  %v10499_v12 = vmax.f32 %v10399_v50, 0.0  ;;  %16795 = vst [vmem:[#allocation2 + $0x140] sm:$0xff] %v16754_v28   ;;  %v27173_v8 = vld [vmem:[#allocation142_spill] sm:$0xff] }
 0x573   :  { %v10497_v9 = vmax.f32 %v10397_v59, 0.0  ;;  %v10398_v43 = vadd.f32 %v24050_v41, %v10274_v20  ;;  %16792 = vst [vmem:[#allocation2 + $0x110] sm:$0xff] %v16739_v18   ;;  %v16744_v32 = vpack.c.bf16 %v10473_v55, %v10448_v33  ;;  %v10300_v13 = vmax.f32 %v10100_v7, %v10200_v19  ;;  %v18916_v20 = vld [vmem:[%s26648_s3 + $0x310] ss:$28 sps:$4 sm:$0xff]   ;;  %v18924_v54 = vld [vmem:[%s26648_s3 + $0x348] ss:$28 sps:$4 sm:$0xff]  }
 0x574   :  { %v10400_v4 = vadd.f32 %v24050_v41, %v10276_v17  ;;  %v10298_v33 = vmax.f32 %v10098_v53, %v10198_v29  ;;  %v10199_v62 = vmax.f32 %v24053_v34, %v9844_v48  ;;  %v10201_v39 = vmax.f32 %v27168_v49, %v9897_v23  ;;  %13010 = vmatmul.mubr.bf16.gmra.mxu0 %v18904_v45  ;;  %v18926_v16 = vld [vmem:[%s26648_s3 + $0x34c] ss:$28 sps:$4 sm:$0xff]   ;;  %v18929_v61 = vld [vmem:[%s26648_s3 + $0xb4] ss:$28 sps:$4 sm:$0xff]  }
 0x575   :  { %v16621_v37 = vpack.c.bf16 %v10497_v9, %v10497_v9  ;;  %v10498_v52 = vmax.f32 %v10398_v43, 0.0  ;;  %16793 = vst [vmem:[#allocation2 + $0x120] sm:$0xff] %v16744_v32   ;;  %v16629_v60 = vpack.c.bf16 %v10499_v12, %v10499_v12  ;;  %13147 = vmatmul.mubr.bf16.vlgmr.msra.gmra.mxu1 %v18907_v51  ;;  %13017 = vmatprep.mubr.bf16.mxu0 %v18912_v57  ;;  %v18927_v55 = vld [vmem:[%s26648_s3 + $0xb0] ss:$28 sps:$4 sm:$0xff]   ;;  %v18932_v43 = vld [vmem:[%s26648_s3 + $0x380] ss:$28 sps:$4 sm:$0xff]  }
 0x576   :  { %v10500_v47 = vmax.f32 %v10400_v4, 0.0  ;;  %v10422_v5 = vadd.f32 %v24089_v27, %v10298_v33  ;;  %v10424_v25 = vadd.f32 %v24089_v27, %v10300_v13  ;;  %v10299_v11 = vmax.f32 %v10099_v2, %v10199_v62  ;;  %13154 = vmatprep.mubr.bf16.mxu1 %v18915_v1  ;;  %v18921_v2 = vld [vmem:[%s26648_s3 + $0x7c] ss:$28 sps:$4 sm:$0xff]   ;;  %v18937_v9 = vld [vmem:[%s26648_s3 + $0xec] ss:$28 sps:$4 sm:$0xff]   ;;  %v27172_v57 = vld [vmem:[#allocation63_spill] sm:$0xff] }
 0x577   :  { %10902 = vst [vmem:[#allocation2 + $0x118] sm:$0xf] %v16621_v37  ;;  %v16625_v30 = vpack.c.bf16 %v10498_v52, %v10498_v52  ;;  %v10301_v34 = vmax.f32 %v10101_v42, %v10201_v39  ;;  %10938 = vst [vmem:[#allocation2 + $0x138] sm:$0xf] %v16629_v60  ;;  %v27169_v17 = vld [vmem:[#allocation138_spill] sm:$0xff]  ;;  %v27171_v51 = vld [vmem:[#allocation140_spill] sm:$0xff] }
 0x578   :  { %v16633_v53 = vpack.c.bf16 %v10500_v47, %v10500_v47  ;;  %v10522_v15 = vmax.f32 %v10422_v5, 0.0  ;;  %v10524_v7 = vmax.f32 %v10424_v25, 0.0  ;;  %v10423_v21 = vadd.f32 %v24089_v27, %v10299_v11  ;;  %v27170_v48 = vld [vmem:[#allocation66_spill] sm:$0xff]  ;;  %v27174_v29 = vld [vmem:[#allocation71_spill] sm:$0xff]  ;;  %v27175_v1 = vld [vmem:[#allocation144_spill] sm:$0xff] }
 0x579   :  { %10920 = vst [vmem:[#allocation2 + $0x128] sm:$0xf] %v16625_v30  ;;  %v10425_v56 = vadd.f32 %v24089_v27, %v10301_v34  ;;  %v18923_v18 = vld [vmem:[#allocation2 + $0x130] sm:$0xff]   ;;  %v10027_v23 = vmax.f32 %v27170_v48, %v27169_v17  ;;  %v10028_v32 = vmax.f32 %v27172_v57, %v27171_v51  ;;  %v18935_v28 = vld [vmem:[%s26648_s3 + $0xe8] ss:$28 sps:$4 sm:$0xff]   ;;  %v10052_v19 = vmax.f32 %v27174_v29, %v27173_v8  ;;  %v27179_v13 = vld [vmem:[#allocation148_spill] sm:$0xff] }
 0x57a   :  { %10956 = vst [vmem:[#allocation2 + $0x148] sm:$0xf] %v16633_v53  ;;  %v16622_v0 = vpack.c.bf16 %v10522_v15, %v10522_v15  ;;  %v16630_v38 = vpack.c.bf16 %v10524_v7, %v10524_v7  ;;  %v10523_v42 = vmax.f32 %v10423_v21, 0.0  ;;  %v27176_v37 = vld [vmem:[#allocation67_spill] sm:$0xff]  ;;  %v27177_v52 = vld [vmem:[#allocation146_spill] sm:$0xff]  ;;  %v27183_v25 = vld [vmem:[#allocation152_spill] sm:$0xff] }
 0x57b   :  { %v10525_v35 = vmax.f32 %v10425_v56, 0.0  ;;  %v10053_v12 = vmax.f32 %v27176_v37, %v27175_v1  ;;  %v27178_v4 = vld [vmem:[#allocation75_spill] sm:$0xff]  ;;  %v27180_v62 = vld [vmem:[#allocation70_spill] sm:$0xff]  ;;  %v18942_v60 = vld [vmem:[%s26648_s3 + $0x3bc] ss:$28 sps:$4 sm:$0xff]  }
 0x57c   :  { %10903 = vst [vmem:[#allocation2 + $0x11c] sm:$0x7] %v16622_v0  ;;  %10939 = vst [vmem:[#allocation2 + $0x13c] sm:$0x7] %v16630_v38  ;;  %v16626_v59 = vpack.c.bf16 %v10523_v42, %v10523_v42  ;;  %13018 = vmatmul.mubr.bf16.gmra.mxu0 %v18910_v44  ;;  %v18931_v50 = vld [vmem:[#allocation2 + $0x120] sm:$0xff]   ;;  %v10077_v33 = vmax.f32 %v27178_v4, %v27177_v52  ;;  %v10078_v49 = vmax.f32 %v27180_v62, %v27179_v13  ;;  %v27181_v30 = vld [vmem:[#allocation150_spill] sm:$0xff] }
 0x57d   :  { %v16634_v6 = vpack.c.bf16 %v10525_v35, %v10525_v35  ;;  %13155 = vmatmul.mubr.bf16.gmra.mxu1 %v18913_v46  ;;  %13025 = vmatprep.mubr.bf16.mxu0 %v18918_v14  ;;  %v27182_v47 = vld [vmem:[#allocation78_spill] sm:$0xff]  ;;  %v27185_v53 = vld [vmem:[#allocation155_spill] sm:$0xff]  ;;  %v27186_v46 = vld [vmem:[#allocation65_spill] sm:$0xff] }
 0x57e   :  { %10921 = vst [vmem:[#allocation2 + $0x12c] sm:$0x7] %v16626_v59  ;;  %13162 = vmatprep.mubr.bf16.mxu1 %v18921_v2  ;;  %v10102_v5 = vmax.f32 %v27182_v47, %v27181_v30  ;;  %v27184_v11 = vld [vmem:[#allocation74_spill] sm:$0xff]  ;;  %v10029_v15 = vmax.f32 %v27186_v46, %v27185_v53  ;;  %v27187_v7 = vld [vmem:[#allocation224_spill] sm:$0xff]  ;;  %v18945_v14 = vld [vmem:[%s26648_s3 + $0x124] ss:$28 sps:$4 sm:$0xff]  }
 0x57f   :  { %10957 = vst [vmem:[#allocation2 + $0x14c] sm:$0x7] %v16634_v6  ;;  %v10103_v34 = vmax.f32 %v27184_v11, %v27183_v25  ;;  %v27188_v2 = vld [vmem:[#allocation156_spill] sm:$0xff]  ;;  %v27189_v0 = vld [vmem:[#allocation79_spill] sm:$0xff]  ;;  %v27190_v42 = vld [vmem:[#allocation158_spill] sm:$0xff] }
 0x580   :  { %v10030_v38 = vmax.f32 %v27189_v0, %v27188_v2  ;;  %v27191_v35 = vld [vmem:[#allocation69_spill] sm:$0xff]  ;;  %v27192_v6 = vld [vmem:[#allocation159_spill] sm:$0xff]  ;;  %v27201_v1 = vld [vmem:[#allocation228_spill] sm:$0xff] }
 0x581   :  { %v10054_v59 = vmax.f32 %v27191_v35, %v27190_v42  ;;  %v27198_v51 = vld [vmem:[#allocation237_spill] sm:$0xff]  ;;  %v27202_v53 = vld [vmem:[#allocation166_spill] sm:$0xff] }
 0x582   :  { %v27203_v46 = vld [vmem:[#allocation82_spill] sm:$0xff] }
 0x583   :  { %v18922_v3 = vld [vmem:[#allocation2 + $0x138] sm:$0xff]   ;;  %v27204_v42 = vld [vmem:[#allocation242_spill] sm:$0xff] }
 0x584   :  { %13026 = vmatmul.mubr.bf16.gmra.mxu0 %v18916_v20  ;;  %v18938_v44 = vld [vmem:[#allocation2 + $0x118] sm:$0xff]   ;;  %v18954_v25 = vld [vmem:[%s26648_s3 + $0x428] ss:$28 sps:$4 sm:$0xff]   ;;  %v18957_v11 = vld [vmem:[%s26648_s3 + $0x190] ss:$28 sps:$4 sm:$0xff]  }
 0x585   :  { %13163 = vmatmul.mubr.bf16.gmra.mxu1 %v18919_v31  ;;  %13348 = vmatpush1.bf16.msra.mxu0 %v18922_v3  ;;  %v18930_v45 = vld [vmem:[#allocation2 + $0x128] sm:$0xff]   ;;  %v27193_v20 = vld [vmem:[#allocation80_spill] sm:$0xff]  ;;  %v27194_v3 = vld [vmem:[#allocation161_spill] sm:$0xff] }
 0x586   :  { %13349 = vmatprep.subr.bf16.mxu0 %v26980_v63  ;;  %13033 = vmatprep.mubr.bf16.mxu0 %v18926_v16  ;;  %v10055_v31 = vmax.f32 %v27193_v20, %v27192_v6  ;;  %v18943_v6 = vld [vmem:[%s26648_s3 + $0x120] ss:$28 sps:$4 sm:$0xff]  }
 0x587   :  { %13170 = vmatprep.mubr.bf16.mxu1 %v18929_v61 }
 0x589   :  { %13350 = vmatpush1.bf16.msra.mxu0 %v18923_v18  ;;  %v27195_v18 = vld [vmem:[#allocation72_spill] sm:$0xff] }
 0x58a   :  { %13351 = vmatprep.subr.bf16.mxu0 %v26980_v63 }
 0x58c   :  { %13034 = vmatmul.mubr.bf16.gmra.mxu0 %v18924_v54  ;;  %v10079_v54 = vmax.f32 %v27195_v18, %v27194_v3 }
 0x58d   :  { %13171 = vmatmul.mubr.bf16.gmra.mxu1 %v18927_v55  ;;  %13352 = vmatpush1.bf16.msra.mxu0 %v18930_v45 }
 0x58e   :  { %13353 = vmatprep.subr.bf16.mxu0 %v26980_v63  ;;  %13041 = vmatprep.mubr.bf16.mxu0 %v18934_v26 }
 0x58f   :  { %13178 = vmatprep.mubr.bf16.mxu1 %v18937_v9  ;;  %v27196_v9 = vld [vmem:[#allocation162_spill] sm:$0xff] }
 0x591   :  { %13354 = vmatpush1.bf16.msra.mxu0 %v18931_v50  ;;  %v27197_v50 = vld [vmem:[#allocation81_spill] sm:$0xff] }
 0x592   :  { %13355 = vmatprep.subr.bf16.mxu0 %v26980_v63  ;;  %v10080_v17 = vmax.f32 %v27197_v50, %v27196_v9  ;;  %v18956_v9 = vld [vmem:[%s26648_s3 + $0x42c] ss:$28 sps:$4 sm:$0xff]  }
 0x594   :  { %v9934_v39 = vpop.f32.mrf.mxu0  ;;  %v9987_v56 = vpop.f32.mrf.mxu1  ;;  %13042 = vmatmul.mubr.bf16.gmra.mxu0 %v18932_v43  ;;  %v27200_v43 = vld [vmem:[#allocation76_spill] sm:$0xff] }
 0x595   :  { %v10127_v21 = vmax.f32 %v27187_v7, %v9934_v39  ;;  %v10129_v16 = vmax.f32 %v24112_v58, %v9987_v56  ;;  %13179 = vmatmul.mubr.bf16.gmra.mxu1 %v18935_v28  ;;  %13356 = vmatpush1.bf16.msra.mxu0 %v18938_v44  ;;  %v27199_v58 = vld [vmem:[#allocation164_spill] sm:$0xff]  ;;  %v18939_v39 = vld [vmem:[#allocation2 + $0x110] sm:$0xff]  }
 0x596   :  { %v9936_v61 = vpop.f32.mrf.mxu0  ;;  %v9989_v45 = vpop.f32.mrf.mxu1  ;;  %13357 = vmatprep.subr.bf16.mxu0 %v26980_v63  ;;  %13049 = vmatprep.mubr.bf16.mxu0 %v18942_v60  ;;  %v10104_v29 = vmax.f32 %v27200_v43, %v27199_v58  ;;  %v18940_v44 = vld [vmem:[%s26648_s3 + $0x3b8] ss:$28 sps:$4 sm:$0xff]  }
 0x597   :  { %v10227_v55 = vmax.f32 %v10027_v23, %v10127_v21  ;;  %v10128_v26 = vmax.f32 %v24097_v10, %v9936_v61  ;;  %v10229_v48 = vmax.f32 %v10029_v15, %v10129_v16  ;;  %v10130_v57 = vmax.f32 %v27198_v51, %v9989_v45  ;;  %13186 = vmatprep.mubr.bf16.mxu1 %v18945_v14  ;;  %v27205_v16 = vld [vmem:[#allocation239_spill] sm:$0xff] }
 0x598   :  { %v9938_v8 = vpop.f32.mrf.mxu0  ;;  %v9991_v10 = vpop.f32.mrf.mxu1  ;;  %v10105_v15 = vmax.f32 %v27203_v46, %v27202_v53  ;;  %v27206_v45 = vld [vmem:[#allocation231_spill] sm:$0xff] }
 0x599   :  { %v10351_v23 = vadd.f32 %v24002_v24, %v10227_v55  ;;  %v10228_v28 = vmax.f32 %v10028_v32, %v10128_v26  ;;  %v10152_v37 = vmax.f32 %v27201_v1, %v9938_v8  ;;  %v10353_v7 = vadd.f32 %v24002_v24, %v10229_v48  ;;  %13358 = vmatpush1.bf16.msra.mxu0 %v18939_v39 }
 0x59a   :  { %v10230_v21 = vmax.f32 %v10030_v38, %v10130_v57  ;;  %v10154_v56 = vmax.f32 %v24140_v36, %v9991_v10  ;;  %v9940_v60 = vpop.f32.mrf.mxu0  ;;  %v9993_v35 = vpop.f32.mrf.mxu1  ;;  %13359 = vmatprep.subr.bf16.mxu0 %v26980_v63  ;;  %v18946_v57 = vld [vmem:[#allocation2 + $0x108] sm:$0xff]  }
 0x59b   :  { %v10451_v2 = vmax.f32 %v10351_v23, 0.0  ;;  %v10352_v32 = vadd.f32 %v24002_v24, %v10228_v28  ;;  %v10252_v0 = vmax.f32 %v10052_v19, %v10152_v37  ;;  %v10153_v14 = vmax.f32 %v27204_v42, %v9940_v60  ;;  %v18950_v19 = vld [vmem:[%s26648_s3 + $0x3f4] ss:$28 sps:$4 sm:$0xff]   ;;  %v27207_v28 = vld [vmem:[#allocation244_spill] sm:$0xff] }
 0x59c   :  { %v10453_v38 = vmax.f32 %v10353_v7, 0.0  ;;  %v10354_v36 = vadd.f32 %v24002_v24, %v10230_v21  ;;  %v10254_v20 = vmax.f32 %v10054_v59, %v10154_v56  ;;  %v10155_v61 = vmax.f32 %v27205_v16, %v9993_v35  ;;  %v9944_v3 = vpop.f32.mrf.mxu0  ;;  %v9997_v51 = vpop.f32.mrf.mxu1  ;;  %v18953_v24 = vld [vmem:[%s26648_s3 + $0x15c] ss:$28 sps:$4 sm:$0xff]   ;;  %13050 = vmatmul.mubr.bf16.gmra.mxu0 %v18940_v44  ;;  %v27208_v7 = vld [vmem:[#allocation243_spill] sm:$0xff] }
 0x59d   :  { %v10452_v18 = vmax.f32 %v10352_v32, 0.0  ;;  %v10376_v55 = vadd.f32 %v24042_v22, %v10252_v0  ;;  %v10253_v26 = vmax.f32 %v10053_v12, %v10153_v14  ;;  %v10177_v48 = vmax.f32 %v27206_v45, %v9944_v3  ;;  %13187 = vmatmul.mubr.bf16.gmra.mxu1 %v18943_v6  ;;  %13360 = vmatpush1.bf16.msra.mxu0 %v18946_v57  ;;  %v27209_v0 = vld [vmem:[#allocation240_spill] sm:$0xff]  ;;  %v18947_v6 = vld [vmem:[#allocation2 + $0x100] sm:$0xff]   ;;  %v18959_v45 = vld [vmem:[%s26648_s3 + $0x194] ss:$28 sps:$4 sm:$0xff]  }
 0x59e   :  { %v10454_v59 = vmax.f32 %v10354_v36, 0.0  ;;  %v10378_v8 = vadd.f32 %v24042_v22, %v10254_v20  ;;  %v10255_v23 = vmax.f32 %v10055_v31, %v10155_v61  ;;  %v10179_v1 = vmax.f32 %v27207_v28, %v9997_v51  ;;  %v9946_v37 = vpop.f32.mrf.mxu0  ;;  %v9999_v56 = vpop.f32.mrf.mxu1  ;;  %13361 = vmatprep.subr.bf16.mxu0 %v26980_v63  ;;  %13057 = vmatprep.mubr.bf16.mxu0 %v18950_v19  ;;  %v18951_v19 = vld [vmem:[%s26648_s3 + $0x158] ss:$28 sps:$4 sm:$0xff]   ;;  %v27213_v28 = vld [vmem:[#allocation241_spill] sm:$0xff] }
 0x59f   :  { %v10476_v10 = vmax.f32 %v10376_v55, 0.0  ;;  %v10377_v39 = vadd.f32 %v24042_v22, %v10253_v26  ;;  %v10277_v12 = vmax.f32 %v10077_v33, %v10177_v48  ;;  %v10178_v21 = vmax.f32 %v27208_v7, %v9946_v37  ;;  %13194 = vmatprep.mubr.bf16.mxu1 %v18953_v24  ;;  %v27211_v55 = vld [vmem:[#allocation246_spill] sm:$0xff]  ;;  %v27212_v24 = vld [vmem:[#allocation245_spill] sm:$0xff] }
 0x5a0   :  { %v10478_v60 = vmax.f32 %v10378_v8, 0.0  ;;  %v10379_v32 = vadd.f32 %v24042_v22, %v10255_v23  ;;  %v10279_v31 = vmax.f32 %v10079_v54, %v10179_v1  ;;  %v10180_v42 = vmax.f32 %v27209_v0, %v9999_v56  ;;  %v9948_v44 = vpop.f32.mrf.mxu0  ;;  %v10001_v33 = vpop.f32.mrf.mxu1  ;;  %v18971_v0 = vld [vmem:[%s26648_s3 + $0x49c] ss:$28 sps:$4 sm:$0xff]  }
 0x5a1   :  { %v16759_v14 = vpack.c.bf16 %v10476_v10, %v10451_v2  ;;  %v10477_v35 = vmax.f32 %v10377_v39, 0.0  ;;  %v10401_v52 = vadd.f32 %v24050_v41, %v10277_v12  ;;  %v10278_v4 = vmax.f32 %v10078_v49, %v10178_v21  ;;  %v18948_v2 = vld [vmem:[%s26648_s3 + $0x3f0] ss:$28 sps:$4 sm:$0xff]   ;;  %13362 = vmatpush1.bf16.msra.mxu0 %v18947_v6 }
 0x5a2   :  { %v16769_v36 = vpack.c.bf16 %v10478_v60, %v10453_v38  ;;  %v10479_v22 = vmax.f32 %v10379_v32, 0.0  ;;  %v10403_v54 = vadd.f32 %v24050_v41, %v10279_v31  ;;  %v10280_v20 = vmax.f32 %v10080_v17, %v10180_v42  ;;  %v9950_v16 = vpop.f32.mrf.mxu0  ;;  %v27210_v49 = vld [vmem:[#allocation235_spill] sm:$0xff]  ;;  %v10003_v38 = vpop.f32.mrf.mxu1  ;;  %13363 = vmatprep.subr.bf16.mxu0 %v26980_v63  ;;  %v18963_v31 = vld [vmem:[%s26648_s3 + $0x1c8] ss:$28 sps:$4 sm:$0xff]  }
 0x5a3   :  { %16796 = vst [vmem:[#allocation2 + $0x150] sm:$0xff] %v16759_v14   ;;  %v16764_v61 = vpack.c.bf16 %v10477_v35, %v10452_v18  ;;  %v10501_v13 = vmax.f32 %v10401_v52, 0.0  ;;  %v10402_v62 = vadd.f32 %v24050_v41, %v10278_v4  ;;  %v10202_v3 = vmax.f32 %v27210_v49, %v9948_v44  ;;  %v25092_v32 = vpop.permute.xlu0 %11532  ;;  %v25103_v42 = vpop.permute.xlu1 %11537  ;;  %v18974_v14 = vld [vmem:[%s26648_s3 + $0x204] ss:$28 sps:$4 sm:$0xff]  }
 0x5a4   :  { %16798 = vst [vmem:[#allocation2 + $0x170] sm:$0xff] %v16769_v36   ;;  %v16774_v50 = vpack.c.bf16 %v10479_v22, %v10454_v59  ;;  %v10503_v17 = vmax.f32 %v10403_v54, 0.0  ;;  %v10404_v18 = vadd.f32 %v24050_v41, %v10280_v20  ;;  %v10204_v26 = vmax.f32 %v27211_v55, %v10001_v33  ;;  %13058 = vmatmul.mubr.bf16.gmra.mxu0 %v18948_v2  ;;  %v18969_v33 = vld [vmem:[%s26648_s3 + $0x498] ss:$28 sps:$4 sm:$0xff]   ;;  %v18972_v36 = vld [vmem:[%s26648_s3 + $0x200] ss:$28 sps:$4 sm:$0xff]  }
 0x5a5   :  { %16797 = vst [vmem:[#allocation2 + $0x160] sm:$0xff] %v16764_v61   ;;  %v16637_v48 = vpack.c.bf16 %v10501_v13, %v10501_v13  ;;  %v10502_v51 = vmax.f32 %v10402_v62, 0.0  ;;  %v10302_v57 = vmax.f32 %v10102_v5, %v10202_v3  ;;  %v10203_v59 = vmax.f32 %v27212_v24, %v9950_v16  ;;  %13195 = vmatmul.mubr.bf16.gmra.mxu1 %v18951_v19  ;;  %v18980_v54 = vld [vmem:[%s26648_s3 + $0x4d4] ss:$28 sps:$4 sm:$0xff]   ;;  %v18983_v2 = vld [vmem:[%s26648_s3 + $0x23c] ss:$28 sps:$4 sm:$0xff]  }
 0x5a6   :  { %16799 = vst [vmem:[#allocation2 + $0x180] sm:$0xff] %v16774_v50   ;;  %v16645_v8 = vpack.c.bf16 %v10503_v17, %v10503_v17  ;;  %v10504_v41 = vmax.f32 %v10404_v18, 0.0  ;;  %v10304_v23 = vmax.f32 %v10104_v29, %v10204_v26  ;;  %v10205_v1 = vmax.f32 %v27213_v28, %v10003_v38  ;;  %13065 = vmatprep.mubr.bf16.mxu0 %v18956_v9  ;;  %v18978_v62 = vld [vmem:[%s26648_s3 + $0x4d0] ss:$28 sps:$4 sm:$0xff]   ;;  %v18981_v3 = vld [vmem:[%s26648_s3 + $0x238] ss:$28 sps:$4 sm:$0xff]  }
 0x5a7   :  { %10974 = vst [vmem:[#allocation2 + $0x158] sm:$0xf] %v16637_v48  ;;  %v16641_v37 = vpack.c.bf16 %v10502_v51, %v10502_v51  ;;  %v10426_v10 = vadd.f32 %v24089_v27, %v10302_v57  ;;  %v10303_v30 = vmax.f32 %v10103_v34, %v10203_v59  ;;  %13202 = vmatprep.mubr.bf16.mxu1 %v18959_v45  ;;  %v18962_v34 = vld [vmem:[%s26648_s3 + $0x464] ss:$28 sps:$4 sm:$0xff]   ;;  %27214 = vst [vmem:[#allocation157_spill] sm:$0xff] %v25092_v32  ;;  %v25108_v35 = vpop.permute.xlu0 %11452  ;;  %v25115_v6 = vpop.permute.xlu1 %11457  ;;  %v18992_v51 = vld [vmem:[#allocation2 + $0x148] sm:$0xff]  }
 0x5a8   :  { %11010 = vst [vmem:[#allocation2 + $0x178] sm:$0xf] %v16645_v8  ;;  %v16649_v47 = vpack.c.bf16 %v10504_v41, %v10504_v41  ;;  %v10428_v5 = vadd.f32 %v24089_v27, %v10304_v23  ;;  %v10305_v58 = vmax.f32 %v10105_v15, %v10205_v1  ;;  %v18965_v15 = vld [vmem:[%s26648_s3 + $0x1cc] ss:$28 sps:$4 sm:$0xff]   ;;  %27215 = vst [vmem:[#allocation172_spill] sm:$0xff] %v25103_v42  ;;  %v18993_v59 = vld [vmem:[#allocation2 + $0x140] sm:$0xff]  }
 0x5a9   :  { %10992 = vst [vmem:[#allocation2 + $0x168] sm:$0xf] %v16641_v37  ;;  %v10526_v43 = vmax.f32 %v10426_v10, 0.0  ;;  %v10427_v29 = vadd.f32 %v24089_v27, %v10303_v30  ;;  %v18988_v38 = vld [vmem:[%s26648_s3 + $0x50c] ss:$28 sps:$4 sm:$0xff]  }
 0x5aa   :  { %11028 = vst [vmem:[#allocation2 + $0x188] sm:$0xf] %v16649_v47  ;;  %v10528_v53 = vmax.f32 %v10428_v5, 0.0  ;;  %v10429_v46 = vadd.f32 %v24089_v27, %v10305_v58  ;;  %v18960_v27 = vld [vmem:[%s26648_s3 + $0x460] ss:$28 sps:$4 sm:$0xff]   ;;  %v18985_v18 = vld [vmem:[#allocation2 + $0x150] sm:$0xff]  }
 0x5ab   :  { %v16638_v39 = vpack.c.bf16 %v10526_v43, %v10526_v43  ;;  %v10527_v12 = vmax.f32 %v10427_v29, 0.0  ;;  %v18968_v4 = vld [vmem:[#allocation2 + $0x170] sm:$0xff]   ;;  %v25124_v20 = vpop.permute.xlu0 %11612  ;;  %v25131_v61 = vpop.permute.xlu1 %11617  ;;  %v18986_v55 = vld [vmem:[%s26648_s3 + $0x508] ss:$28 sps:$4 sm:$0xff]   ;;  %v18994_v8 = vld [vmem:[%s26648_s3 + $0x540] ss:$28 sps:$4 sm:$0xff]  }
 0x5ac   :  { %v16646_v7 = vpack.c.bf16 %v10528_v53, %v10528_v53  ;;  %v10529_v21 = vmax.f32 %v10429_v46, 0.0  ;;  %13066 = vmatmul.mubr.bf16.gmra.mxu0 %v18954_v25  ;;  %27216 = vst [vmem:[#allocation170_spill] sm:$0xff] %v25124_v20  ;;  %27217 = vst [vmem:[#allocation167_spill] sm:$0xff] %v25131_v61  ;;  %v18977_v13 = vld [vmem:[#allocation2 + $0x160] sm:$0xff]   ;;  %v18991_v9 = vld [vmem:[%s26648_s3 + $0x274] ss:$28 sps:$4 sm:$0xff]  }
 0x5ad   :  { %10975 = vst [vmem:[#allocation2 + $0x15c] sm:$0x7] %v16638_v39  ;;  %v16642_v56 = vpack.c.bf16 %v10527_v12, %v10527_v12  ;;  %13203 = vmatmul.mubr.bf16.gmra.mxu1 %v18957_v11  ;;  %13073 = vmatprep.mubr.bf16.mxu0 %v18962_v34  ;;  %v18975_v22 = vld [vmem:[#allocation2 + $0x180] sm:$0xff]   ;;  %v18989_v26 = vld [vmem:[%s26648_s3 + $0x270] ss:$28 sps:$4 sm:$0xff]  }
 0x5ae   :  { %11011 = vst [vmem:[#allocation2 + $0x17c] sm:$0x7] %v16646_v7  ;;  %v16650_v60 = vpack.c.bf16 %v10529_v21, %v10529_v21  ;;  %13210 = vmatprep.mubr.bf16.mxu1 %v18965_v15  ;;  %v18996_v45 = vld [vmem:[%s26648_s3 + $0x544] ss:$28 sps:$4 sm:$0xff]   ;;  %v18999_v57 = vld [vmem:[%s26648_s3 + $0x2ac] ss:$28 sps:$4 sm:$0xff]  }
 0x5af   :  { %10993 = vst [vmem:[#allocation2 + $0x16c] sm:$0x7] %v16642_v56  ;;  %v25136_v49 = vpop.permute.xlu0 %11522  ;;  %v25148_v50 = vpop.permute.xlu1 %11527  ;;  %v18997_v23 = vld [vmem:[%s26648_s3 + $0x2a8] ss:$28 sps:$4 sm:$0xff]   ;;  %v19005_v28 = vld [vmem:[%s26648_s3 + $0x14] ss:$28 sps:$4 sm:$0xff]  }
 0x5b0   :  { %11029 = vst [vmem:[#allocation2 + $0x18c] sm:$0x7] %v16650_v60  ;;  %27218 = vst [vmem:[#allocation160_spill] sm:$0xff] %v25136_v49  ;;  %v19002_v1 = vld [vmem:[%s26648_s3 + $0x2e4] ss:$28 sps:$4 sm:$0xff]  }
 0x5b1   :  { %27219 = vst [vmem:[#allocation176_spill] sm:$0xff] %v25148_v50  ;;  %v19003_v58 = vld [vmem:[%s26648_s3 + $0x10] ss:$28 sps:$4 sm:$0xff]   ;;  %v19000_v29 = vld [vmem:[%s26648_s3 + $0x2e0] ss:$28 sps:$4 sm:$0xff]   ;;  %v27233_v50 = vmov 0.0  }
 0x5b2   :  { %v19011_v25 = vld [vmem:[%s26648_s3 + $0x4c] ss:$28 sps:$4 sm:$0xff]   ;;  %v19008_v34 = vld [vmem:[%s26648_s3 + $0x31c] ss:$28 sps:$4 sm:$0xff]   ;;  %v19017_v56 = vld [vmem:[%s26648_s3 + $0x84] ss:$28 sps:$4 sm:$0xff]  }
 0x5b3   :  { %v25151_v17 = vpop.permute.xlu0 %11442  ;;  %v25163_v48 = vpop.permute.xlu1 %11447  ;;  %v19009_v7 = vld [vmem:[%s26648_s3 + $0x48] ss:$28 sps:$4 sm:$0xff]   ;;  %v19006_v21 = vld [vmem:[%s26648_s3 + $0x318] ss:$28 sps:$4 sm:$0xff]  }
 0x5b4   :  { %13074 = vmatmul.mubr.bf16.gmra.mxu0 %v18960_v27  ;;  %v18984_v19 = vld [vmem:[#allocation2 + $0x158] sm:$0xff]   ;;  %v19014_v27 = vld [vmem:[%s26648_s3 + $0x354] ss:$28 sps:$4 sm:$0xff]  }
 0x5b5   :  { %v18966_v44 = vld [vmem:[#allocation2 + $0x178] sm:$0xff]   ;;  %13211 = vmatmul.mubr.bf16.gmra.mxu1 %v18963_v31  ;;  %13081 = vmatprep.mubr.bf16.mxu0 %v18971_v0 }
 0x5b6   :  { %13364 = vmatpush2.bf16.msra.mxu0 %v18966_v44  ;;  %13218 = vmatprep.mubr.bf16.mxu1 %v18974_v14  ;;  %v18976_v16 = vld [vmem:[#allocation2 + $0x168] sm:$0xff]   ;;  %v19054_v20 = vld [vmem:[%s26648_s3 + $0x4d8] ss:$28 sps:$4 sm:$0xff]  }
 0x5b7   :  { %v18967_v52 = vld [vmem:[#allocation2 + $0x188] sm:$0xff]   ;;  %13365 = vmatprep.subr.bf16.mxu0 %v26980_v63  ;;  %v25168_v24 = vpop.permute.xlu0 %11602  ;;  %v25174_v41 = vpop.permute.xlu1 %11607 }
 0x5b8   :  { %16922 = vmatpush3.bf16.msra.mxu1 %v18967_v52  ;;  %27220 = vst [vmem:[#allocation174_spill] sm:$0xff] %v25168_v24  ;;  %27221 = vst [vmem:[#allocation169_spill] sm:$0xff] %v25174_v41 }
 0x5b9   :  { %16923 = vmatprep.subr.bf16.mxu1 %v26713_v40 }
 0x5ba   :  { %13366 = vmatpush2.bf16.msra.mxu0 %v18968_v4  ;;  %v19015_v4 = vld [vmem:[%s26648_s3 + $0x80] ss:$28 sps:$4 sm:$0xff]  }
 0x5bb   :  { %13367 = vmatprep.subr.bf16.mxu0 %v26980_v63  ;;  %v25185_v37 = vpop.permute.xlu0 %11512  ;;  %v25189_v47 = vpop.permute.xlu1 %11517 }
 0x5bc   :  { %16924 = vmatpush3.bf16.msra.mxu1 %v18975_v22  ;;  %13082 = vmatmul.mubr.bf16.gmra.mxu0 %v18969_v33  ;;  %27222 = vst [vmem:[#allocation163_spill] sm:$0xff] %v25185_v37  ;;  %27223 = vst [vmem:[#allocation180_spill] sm:$0xff] %v25189_v47  ;;  %v19023_v22 = vld [vmem:[%s26648_s3 + $0xbc] ss:$28 sps:$4 sm:$0xff]  }
 0x5bd   :  { %14505 = vmatprep.subr.bf16.mxu1 %v26980_v63  ;;  %13219 = vmatmul.mubr.bf16.gmra.mxu1 %v18972_v36  ;;  %v19012_v36 = vld [vmem:[%s26648_s3 + $0x350] ss:$28 sps:$4 sm:$0xff]  }
 0x5be   :  { %13368 = vmatpush2.bf16.msra.mxu0 %v18976_v16  ;;  %13089 = vmatprep.mubr.bf16.mxu0 %v18980_v54  ;;  %v19020_v16 = vld [vmem:[%s26648_s3 + $0x38c] ss:$28 sps:$4 sm:$0xff]  }
 0x5bf   :  { %13369 = vmatprep.subr.bf16.mxu0 %v26980_v63  ;;  %13226 = vmatprep.mubr.bf16.mxu1 %v18983_v2  ;;  %v25196_v43 = vpop.permute.xlu0 %11432  ;;  %v25209_v46 = vpop.permute.xlu1 %11437 }
 0x5c2   :  { %13370 = vmatpush2.bf16.msra.mxu0 %v18977_v13 }
 0x5c3   :  { %13371 = vmatprep.subr.bf16.mxu0 %v26980_v63  ;;  %v25211_v39 = vpop.permute.xlu0 %11592  ;;  %v25227_v31 = vpop.permute.xlu1 %11597 }
 0x5c4   :  { %13090 = vmatmul.mubr.bf16.gmra.mxu0 %v18978_v62  ;;  %27224 = vst [vmem:[#allocation178_spill] sm:$0xff] %v25211_v39  ;;  %27225 = vst [vmem:[#allocation173_spill] sm:$0xff] %v25227_v31  ;;  %v19060_v39 = vld [vmem:[%s26648_s3 + $0x510] ss:$28 sps:$4 sm:$0xff]  }
 0x5c5   :  { %13227 = vmatmul.mubr.bf16.gmra.mxu1 %v18981_v3  ;;  %13097 = vmatprep.mubr.bf16.mxu0 %v18988_v38 }
 0x5c6   :  { %13372 = vmatpush2.bf16.msra.mxu0 %v18984_v19  ;;  %13234 = vmatprep.mubr.bf16.mxu1 %v18991_v9  ;;  %v19021_v19 = vld [vmem:[%s26648_s3 + $0xb8] ss:$28 sps:$4 sm:$0xff]  }
 0x5c7   :  { %13373 = vmatprep.subr.bf16.mxu0 %v26980_v63  ;;  %v25231_v44 = vpop.permute.xlu0 %11502  ;;  %v25238_v33 = vpop.permute.xlu1 %11507 }
 0x5ca   :  { %13374 = vmatpush2.bf16.msra.mxu0 %v18985_v18  ;;  %v19018_v18 = vld [vmem:[%s26648_s3 + $0x388] ss:$28 sps:$4 sm:$0xff]  }
 0x5cb   :  { %13375 = vmatprep.subr.bf16.mxu0 %v26980_v63  ;;  %v25249_v2 = vpop.permute.xlu0 %11422  ;;  %v25253_v3 = vpop.permute.xlu1 %11427 }
 0x5cc   :  { %13098 = vmatmul.mubr.bf16.gmra.mxu0 %v18986_v55  ;;  %v19029_v55 = vld [vmem:[%s26648_s3 + $0xf4] ss:$28 sps:$4 sm:$0xff]  }
 0x5cd   :  { %13235 = vmatmul.mubr.bf16.gmra.mxu1 %v18989_v26  ;;  %13105 = vmatprep.mubr.bf16.mxu0 %v18996_v45  ;;  %v19026_v45 = vld [vmem:[%s26648_s3 + $0x3c4] ss:$28 sps:$4 sm:$0xff]  }
 0x5ce   :  { %13376 = vmatpush2.bf16.msra.mxu0 %v18992_v51  ;;  %13242 = vmatprep.mubr.bf16.mxu1 %v18999_v57 }
 0x5cf   :  { %13377 = vmatprep.subr.bf16.mxu0 %v26980_v63  ;;  %v25260_v9 = vpop.permute.xlu0 %11582  ;;  %v25273_v57 = vpop.permute.xlu1 %11587 }
 0x5d0   :  { %27226 = vst [vmem:[#allocation83_spill] sm:$0xff] %v25260_v9  ;;  %27227 = vst [vmem:[#allocation4_spill] sm:$0xff] %v25273_v57 }
 0x5d2   :  { %13378 = vmatpush2.bf16.msra.mxu0 %v18993_v59 }
 0x5d4   :  { %v25187_v10 = vpop.f32.mrf.mxu0  ;;  %13106 = vmatmul.mubr.bf16.gmra.mxu0 %v18994_v8  ;;  %v25275_v8 = vpop.permute.xlu0 %11492 }
 0x5d5   :  { %13243 = vmatmul.mubr.bf16.gmra.mxu1 %v18997_v23  ;;  %13379 = vmatprep.mubr.bf16.mxu0 %v19005_v28  ;;  %v19027_v28 = vld [vmem:[%s26648_s3 + $0xf0] ss:$28 sps:$4 sm:$0xff]  }
 0x5d6   :  { %v12917_v30 = vpop.f32.mrf.mxu0  ;;  %13250 = vmatprep.mubr.bf16.mxu1 %v19002_v1  ;;  %v19024_v1 = vld [vmem:[%s26648_s3 + $0x3c0] ss:$28 sps:$4 sm:$0xff]  }
 0x5d7   :  { %v19035_v30 = vld [vmem:[%s26648_s3 + $0x12c] ss:$28 sps:$4 sm:$0xff]  }
 0x5d8   :  { %v25191_v5 = vpop.f32.mrf.mxu0 }
 0x5da   :  { %v12920_v11 = vpop.f32.mrf.mxu0 }
 0x5dc   :  { %v25207_v53 = vpop.f32.mrf.mxu0  ;;  %13380 = vmatmul.mubr.bf16.vlgmr.msra.gmra.mxu0 %v19003_v58 }
 0x5dd   :  { %13251 = vmatmul.mubr.bf16.gmra.mxu1 %v19000_v29  ;;  %13387 = vmatprep.mubr.bf16.mxu0 %v19011_v25  ;;  %v19032_v29 = vld [vmem:[%s26648_s3 + $0x3fc] ss:$28 sps:$4 sm:$0xff]   ;;  %v25291_v25 = vpop.permute.xlu1 %11497 }
 0x5de   :  { %v12925_v15 = vpop.f32.mrf.mxu0  ;;  %13258 = vmatprep.mubr.bf16.mxu1 %v19008_v34  ;;  %v25295_v34 = vpop.permute.xlu0 %11412 }
 0x5e0   :  { %v25213_v12 = vpop.f32.mrf.mxu0 }
 0x5e2   :  { %v12928_v60 = vpop.f32.mrf.mxu0 }
 0x5e3   :  { %v19030_v60 = vld [vmem:[%s26648_s3 + $0x3f8] ss:$28 sps:$4 sm:$0xff]  }
 0x5e4   :  { %v25229_v0 = vpop.f32.mrf.mxu0  ;;  %13388 = vmatmul.mubr.bf16.gmra.mxu0 %v19009_v7 }
 0x5e5   :  { %13259 = vmatmul.mubr.bf16.gmra.mxu1 %v19006_v21  ;;  %13395 = vmatprep.mubr.bf16.mxu0 %v19017_v56  ;;  %v19033_v21 = vld [vmem:[%s26648_s3 + $0x128] ss:$28 sps:$4 sm:$0xff]   ;;  %v25302_v56 = vpop.permute.xlu1 %11417 }
 0x5e6   :  { %v12933_v14 = vpop.f32.mrf.mxu0  ;;  %13266 = vmatprep.mubr.bf16.mxu1 %v19014_v27  ;;  %v19041_v27 = vld [vmem:[%s26648_s3 + $0x164] ss:$28 sps:$4 sm:$0xff]  }
 0x5e8   :  { %v25233_v52 = vpop.f32.mrf.mxu0 }
 0x5ea   :  { %v12936_v54 = vpop.f32.mrf.mxu0 }
 0x5ec   :  { %v25251_v13 = vpop.f32.mrf.mxu0  ;;  %13396 = vmatmul.mubr.bf16.gmra.mxu0 %v19015_v4  ;;  %v19038_v4 = vld [vmem:[%s26648_s3 + $0x434] ss:$28 sps:$4 sm:$0xff]  }
 0x5ed   :  { %13267 = vmatmul.mubr.bf16.gmra.mxu1 %v19012_v36  ;;  %13403 = vmatprep.mubr.bf16.mxu0 %v19023_v22  ;;  %v25313_v36 = vpop.permute.xlu0 %11572 }
 0x5ee   :  { %v12941_v62 = vpop.f32.mrf.mxu0  ;;  %13274 = vmatprep.mubr.bf16.mxu1 %v19020_v16  ;;  %27228 = vst [vmem:[#allocation84_spill] sm:$0xff] %v25313_v36  ;;  %v25317_v16 = vpop.permute.xlu1 %11577 }
 0x5ef   :  { %27229 = vst [vmem:[#allocation3_spill] sm:$0xff] %v25317_v16 }
 0x5f0   :  { %v25255_v38 = vpop.f32.mrf.mxu0 }
 0x5f2   :  { %v12944_v26 = vpop.f32.mrf.mxu0 }
 0x5f3   :  { %v19047_v26 = vld [vmem:[%s26648_s3 + $0x19c] ss:$28 sps:$4 sm:$0xff]  }
 0x5f4   :  { %v25271_v51 = vpop.f32.mrf.mxu0  ;;  %13404 = vmatmul.mubr.bf16.gmra.mxu0 %v19021_v19  ;;  %v19039_v19 = vld [vmem:[%s26648_s3 + $0x160] ss:$28 sps:$4 sm:$0xff]  }
 0x5f5   :  { %13275 = vmatmul.mubr.bf16.gmra.mxu1 %v19018_v18  ;;  %13411 = vmatprep.mubr.bf16.mxu0 %v19029_v55  ;;  %v25324_v18 = vpop.permute.xlu0 %11482  ;;  %v19036_v55 = vld [vmem:[%s26648_s3 + $0x430] ss:$28 sps:$4 sm:$0xff]  }
 0x5f6   :  { %v12949_v59 = vpop.f32.mrf.mxu0  ;;  %13282 = vmatprep.mubr.bf16.mxu1 %v19026_v45 }
 0x5f7   :  { %v19044_v59 = vld [vmem:[%s26648_s3 + $0x46c] ss:$28 sps:$4 sm:$0xff]  }
 0x5f8   :  { %v25277_v23 = vpop.f32.mrf.mxu0 }
 0x5fa   :  { %v12952_v58 = vpop.f32.mrf.mxu0 }
 0x5fb   :  { %v25339_v58 = vpop.permute.xlu0 %11402 }
 0x5fc   :  { %v25293_v11 = vpop.f32.mrf.mxu0  ;;  %13412 = vmatmul.mubr.bf16.gmra.mxu0 %v19027_v28 }
 0x5fd   :  { %13283 = vmatmul.mubr.bf16.gmra.mxu1 %v19024_v1  ;;  %13419 = vmatprep.mubr.bf16.mxu0 %v19035_v30  ;;  %v25337_v1 = vpop.permute.xlu1 %11487 }
 0x5fe   :  { %v12957_v15 = vpop.f32.mrf.mxu0  ;;  %13290 = vmatprep.mubr.bf16.mxu1 %v19032_v29 }
 0x5ff   :  { %v19045_v15 = vld [vmem:[%s26648_s3 + $0x198] ss:$28 sps:$4 sm:$0xff]  }
 0x600   :  { %v25297_v7 = vpop.f32.mrf.mxu0 }
 0x602   :  { %v12960_v14 = vpop.f32.mrf.mxu0 }
 0x603   :  { %v19050_v14 = vld [vmem:[%s26648_s3 + $0x4a4] ss:$28 sps:$4 sm:$0xff]  }
 0x604   :  { %v25315_v22 = vpop.f32.mrf.mxu0  ;;  %13420 = vmatmul.mubr.bf16.gmra.mxu0 %v19033_v21  ;;  %v19042_v21 = vld [vmem:[%s26648_s3 + $0x468] ss:$28 sps:$4 sm:$0xff]  }
 0x605   :  { %13291 = vmatmul.mubr.bf16.gmra.mxu1 %v19030_v60  ;;  %13427 = vmatprep.mubr.bf16.mxu0 %v19041_v27  ;;  %v19053_v60 = vld [vmem:[%s26648_s3 + $0x1d4] ss:$28 sps:$4 sm:$0xff]  }
 0x606   :  { %v12965_v54 = vpop.f32.mrf.mxu0  ;;  %13298 = vmatprep.mubr.bf16.mxu1 %v19038_v4  ;;  %v25355_v4 = vpop.permute.xlu1 %11407 }
 0x608   :  { %v25319_v62 = vpop.f32.mrf.mxu0 }
 0x60a   :  { %v12968_v45 = vpop.f32.mrf.mxu0 }
 0x60b   :  { %v19051_v45 = vld [vmem:[%s26648_s3 + $0x1d0] ss:$28 sps:$4 sm:$0xff]  }
 0x60c   :  { %v25335_v28 = vpop.f32.mrf.mxu0  ;;  %13428 = vmatmul.mubr.bf16.gmra.mxu0 %v19039_v19  ;;  %v25359_v19 = vpop.permute.xlu0 %11562 }
 0x60d   :  { %13299 = vmatmul.mubr.bf16.gmra.mxu1 %v19036_v55  ;;  %13435 = vmatprep.mubr.bf16.mxu0 %v19047_v26  ;;  %27230 = vst [vmem:[#allocation85_spill] sm:$0xff] %v25359_v19 }
 0x60e   :  { %v12973_v30 = vpop.f32.mrf.mxu0  ;;  %13306 = vmatprep.mubr.bf16.mxu1 %v19044_v59  ;;  %v25366_v59 = vpop.permute.xlu1 %11567 }
 0x60f   :  { %27231 = vst [vmem:[#allocation7_spill] sm:$0xff] %v25366_v59  ;;  %v19048_v30 = vld [vmem:[%s26648_s3 + $0x4a0] ss:$28 sps:$4 sm:$0xff]   ;;  %v19066_v59 = vld [vmem:[%s26648_s3 + $0x548] ss:$28 sps:$4 sm:$0xff]  }
 0x610   :  { %v25341_v29 = vpop.f32.mrf.mxu0 }
 0x612   :  { %v12976_v27 = vpop.f32.mrf.mxu0  ;;  %v25381_v40 = vpop.permute.xlu1 %11477 }
 0x613   :  { %v25377_v27 = vpop.permute.xlu0 %11472 }
 0x614   :  { %v25357_v54 = vpop.f32.mrf.mxu0  ;;  %13436 = vmatmul.mubr.bf16.gmra.mxu0 %v19045_v15  ;;  %v19059_v15 = vld [vmem:[%s26648_s3 + $0x20c] ss:$28 sps:$4 sm:$0xff]  }
 0x615   :  { %13307 = vmatmul.mubr.bf16.gmra.mxu1 %v19042_v21  ;;  %13443 = vmatprep.mubr.bf16.mxu0 %v19053_v60  ;;  %v19056_v60 = vld [vmem:[%s26648_s3 + $0x4dc] ss:$28 sps:$4 sm:$0xff]  }
 0x616   :  { %v12981_v55 = vpop.f32.mrf.mxu0  ;;  %13314 = vmatprep.mubr.bf16.mxu1 %v19050_v14 }
 0x617   :  { %v11393_v61 = vpop.permute.xlu0 %11392 }
 0x618   :  { %v25361_v26 = vpop.f32.mrf.mxu0 }
 0x61a   :  { %v12984_v21 = vpop.f32.mrf.mxu0 }
 0x61b   :  { %v19057_v21 = vld [vmem:[%s26648_s3 + $0x208] ss:$28 sps:$4 sm:$0xff]   ;;  %v25399_v24 = vpop.permute.xlu0 %11552 }
 0x61c   :  { %v25379_v14 = vpop.f32.mrf.mxu0  ;;  %13444 = vmatmul.mubr.bf16.gmra.mxu0 %v19051_v45  ;;  %v19065_v45 = vld [vmem:[%s26648_s3 + $0x244] ss:$28 sps:$4 sm:$0xff]  }
 0x61d   :  { %13315 = vmatmul.mubr.bf16.gmra.mxu1 %v19048_v30  ;;  %13451 = vmatprep.mubr.bf16.mxu0 %v19059_v15  ;;  %v19062_v15 = vld [vmem:[%s26648_s3 + $0x514] ss:$28 sps:$4 sm:$0xff]  }
 0x61e   :  { %v12989_v55 = vpop.f32.mrf.mxu0  ;;  %13322 = vmatprep.mubr.bf16.mxu1 %v19056_v60 }
 0x61f   :  { %v11398_v55 = vpop.permute.xlu1 %11397  ;;  %v25419_v57 = vpop.permute.xlu0 %11462 }
 0x620   :  { %v25383_v63 = vpop.f32.mrf.mxu0 }
 0x622   :  { %v12992_v30 = vpop.f32.mrf.mxu0 }
 0x623   :  { %v19063_v30 = vld [vmem:[%s26648_s3 + $0x240] ss:$28 sps:$4 sm:$0xff]  }
 0x624   :  { %v25397_v60 = vpop.f32.mrf.mxu0  ;;  %13452 = vmatmul.mubr.bf16.gmra.mxu0 %v19057_v21  ;;  %v19071_v21 = vld [vmem:[%s26648_s3 + $0x27c] ss:$28 sps:$4 sm:$0xff]  }
 0x625   :  { %13323 = vmatmul.mubr.bf16.gmra.mxu1 %v19054_v20  ;;  %13459 = vmatprep.mubr.bf16.mxu0 %v19065_v45  ;;  %v25415_v45 = vpop.permute.xlu1 %11557 }
 0x626   :  { %v12997_v41 = vpop.f32.mrf.mxu0  ;;  %13330 = vmatprep.mubr.bf16.mxu1 %v19062_v15 }
 0x627   :  { %v19068_v41 = vld [vmem:[%s26648_s3 + $0x54c] ss:$28 sps:$4 sm:$0xff]  }
 0x628   :  { %v25401_v31 = vpop.f32.mrf.mxu0 }
 0x629   :  { %v25426_v36 = vpop.permute.xlu1 %11467 }
 0x62a   :  { %v13000_v20 = vpop.f32.mrf.mxu0 }
 0x62b   :  { %v19069_v20 = vld [vmem:[%s26648_s3 + $0x278] ss:$28 sps:$4 sm:$0xff]  }
 0x62c   :  { %v25417_v15 = vpop.f32.mrf.mxu0  ;;  %13460 = vmatmul.mubr.bf16.gmra.mxu0 %v19063_v30  ;;  %v19074_v30 = vld [vmem:[%s26648_s3 + $0x2b4] ss:$28 sps:$4 sm:$0xff]  }
 0x62d   :  { %13331 = vmatmul.mubr.bf16.gmra.mxu1 %v19060_v39  ;;  %13467 = vmatprep.mubr.bf16.mxu0 %v19071_v21  ;;  %v11383_v21 = vpop.permute.xlu0 %11382  ;;  %v11388_v49 = vpop.permute.xlu1 %11387 }
 0x62e   :  { %v13005_v9 = vpop.f32.mrf.mxu0  ;;  %13338 = vmatprep.mubr.bf16.mxu1 %v19068_v41 }
 0x62f   :  { %v12916_v9 = vadd.f32 %v25187_v10, %v11383_v21  ;;  %v19072_v10 = vld [vmem:[%s26648_s3 + $0x2b0] ss:$28 sps:$4 sm:$0xff]  }
 0x630   :  { %v25421_v16 = vpop.f32.mrf.mxu0 }
 0x632   :  { %v13008_v39 = vpop.f32.mrf.mxu0 }
 0x633   :  { %v12919_v39 = vadd.f32 %v25191_v5, %v11388_v49  ;;  %v12924_v5 = vadd.f32 %v25207_v53, %v11393_v61  ;;  %v19076_v61 = vld [vmem:[%s26648_s3 + $0x2e8] ss:$28 sps:$4 sm:$0xff]  }
 0x634   :  { %v25435_v41 = vpop.f32.mrf.mxu0  ;;  %13468 = vmatmul.mubr.bf16.gmra.mxu0 %v19069_v20 }
 0x635   :  { %v13148_v19 = vpop.f32.mrf.mxu1  ;;  %13339 = vmatmul.mubr.bf16.gmra.mxu1 %v19066_v59  ;;  %13475 = vmatprep.mubr.bf16.mxu0 %v19074_v30 }
 0x636   :  { %v25437_v42 = vadd.f32 %v13148_v19, %v12916_v9  ;;  %v13013_v32 = vpop.f32.mrf.mxu0  ;;  %16925 = vmatprep.mubr.msk.bf16.mxu1 %vm19294_vm1, %v27233_v50  ;;  %v19075_v19 = vld [vmem:[%s26648_s3 + $0x18] ss:$28 sps:$4 sm:$0xff]  }
 0x637   :  { %v13150_v47 = vpop.f32.mrf.mxu1  ;;  %v19078_v32 = vld [vmem:[%s26648_s3 + $0x2ec] ss:$28 sps:$4 sm:$0xff]  }
 0x638   :  { %27232 = vst [vmem:[#allocation86_spill] sm:$0xff] %v25437_v42  ;;  %v25442_v37 = vpop.f32.mrf.mxu0 }
 0x639   :  { %v13151_v20 = vpop.f32.mrf.mxu1 }
 0x63a   :  { %v25453_v59 = vadd.f32 %v13151_v20, %v12919_v39  ;;  %v13016_v47 = vpop.f32.mrf.mxu0  ;;  %v12927_v20 = vadd.f32 %v25213_v12, %v11398_v55  ;;  %v12932_v12 = vadd.f32 %v25229_v0, %v25339_v58  ;;  %v19080_v0 = vld [vmem:[%s26648_s3 + $0x320] ss:$28 sps:$4 sm:$0xff]  }
 0x63b   :  { %v13153_v49 = vpop.f32.mrf.mxu1 }
 0x63c   :  { %v25456_v30 = vpop.f32.mrf.mxu0  ;;  %13476 = vmatmul.mubr.bf16.gmra.mxu0 %v19072_v10  ;;  %v19079_v10 = vld [vmem:[%s26648_s3 + $0x50] ss:$28 sps:$4 sm:$0xff]  }
 0x63d   :  { %v13156_v21 = vpop.f32.mrf.mxu1  ;;  %16926 = vmatmul.mubr.msk.bf16.vlgmr.msra.gmra.mxu1 %vm12805_vm2, %v19075_v19  ;;  %13483 = vmatprep.mubr.bf16.mxu0 %v19078_v32 }
 0x63e   :  { %v25459_v9 = vadd.f32 %v13156_v21, %v12924_v5  ;;  %v13021_v42 = vpop.f32.mrf.mxu0  ;;  %16929 = vmatprep.mubr.msk.bf16.mxu1 %vm19294_vm1, %v27233_v50 }
 0x63f   :  { %v13158_v39 = vpop.f32.mrf.mxu1  ;;  %v19082_v42 = vld [vmem:[%s26648_s3 + $0x324] ss:$28 sps:$4 sm:$0xff]  }
 0x640   :  { %v25464_v47 = vpop.f32.mrf.mxu0 }
 0x641   :  { %v13159_v53 = vpop.f32.mrf.mxu1 }
 0x642   :  { %v25475_v19 = vadd.f32 %v13159_v53, %v12927_v20  ;;  %v13024_v32 = vpop.f32.mrf.mxu0  ;;  %v12935_v53 = vadd.f32 %v25233_v52, %v25355_v4  ;;  %v12940_v52 = vadd.f32 %v25251_v13, %v25295_v34  ;;  %v19084_v13 = vld [vmem:[%s26648_s3 + $0x358] ss:$28 sps:$4 sm:$0xff]  }
 0x643   :  { %v13161_v49 = vpop.f32.mrf.mxu1 }
 0x644   :  { %v25479_v55 = vpop.f32.mrf.mxu0  ;;  %13484 = vmatmul.mubr.bf16.gmra.mxu0 %v19076_v61  ;;  %v19083_v61 = vld [vmem:[%s26648_s3 + $0x88] ss:$28 sps:$4 sm:$0xff]  }
 0x645   :  { %v13164_v5 = vpop.f32.mrf.mxu1  ;;  %16930 = vmatmul.mubr.msk.bf16.gmra.mxu1 %vm12805_vm2, %v19079_v10  ;;  %13491 = vmatprep.mubr.bf16.mxu0 %v19082_v42  ;;  %v19086_v10 = vld [vmem:[%s26648_s3 + $0x35c] ss:$28 sps:$4 sm:$0xff]  }
 0x646   :  { %v25482_v21 = vadd.f32 %v13164_v5, %v12932_v12  ;;  %v13029_v39 = vpop.f32.mrf.mxu0  ;;  %16933 = vmatprep.mubr.msk.bf16.mxu1 %vm19294_vm1, %v27233_v50 }
 0x647   :  { %v13166_v20 = vpop.f32.mrf.mxu1 }
 0x648   :  { %v25488_v32 = vpop.f32.mrf.mxu0 }
 0x649   :  { %v13167_v58 = vpop.f32.mrf.mxu1 }
 0x64a   :  { %v25499_v42 = vadd.f32 %v13167_v58, %v12935_v53  ;;  %v13032_v49 = vpop.f32.mrf.mxu0  ;;  %v12943_v58 = vadd.f32 %v25255_v38, %v25302_v56  ;;  %v12948_v38 = vadd.f32 %v25271_v51, %v25249_v2  ;;  %v19088_v2 = vld [vmem:[%s26648_s3 + $0x390] ss:$28 sps:$4 sm:$0xff]  }
 0x64b   :  { %v13169_v12 = vpop.f32.mrf.mxu1 }
 0x64c   :  { %v25503_v4 = vpop.f32.mrf.mxu0  ;;  %13492 = vmatmul.mubr.bf16.gmra.mxu0 %v19080_v0  ;;  %v19087_v0 = vld [vmem:[%s26648_s3 + $0xc0] ss:$28 sps:$4 sm:$0xff]  }
 0x64d   :  { %v13172_v5 = vpop.f32.mrf.mxu1  ;;  %16934 = vmatmul.mubr.msk.bf16.gmra.mxu1 %vm12805_vm2, %v19083_v61  ;;  %13499 = vmatprep.mubr.bf16.mxu0 %v19086_v10  ;;  %v19090_v61 = vld [vmem:[%s26648_s3 + $0x394] ss:$28 sps:$4 sm:$0xff]  }
 0x64e   :  { %v25506_v39 = vadd.f32 %v13172_v5, %v12940_v52  ;;  %v13037_v20 = vpop.f32.mrf.mxu0  ;;  %16937 = vmatprep.mubr.msk.bf16.mxu1 %vm19294_vm1, %v27233_v50 }
 0x64f   :  { %v13174_v53 = vpop.f32.mrf.mxu1 }
 0x650   :  { %v25512_v49 = vpop.f32.mrf.mxu0 }
 0x651   :  { %v13175_v34 = vpop.f32.mrf.mxu1 }
 0x652   :  { %v25523_v10 = vadd.f32 %v13175_v34, %v12943_v58  ;;  %v13040_v12 = vpop.f32.mrf.mxu0  ;;  %v12951_v34 = vadd.f32 %v25277_v23, %v25253_v3  ;;  %v12956_v3 = vadd.f32 %v25293_v11, %v25196_v43 }
 0x653   :  { %v13177_v52 = vpop.f32.mrf.mxu1 }
 0x654   :  { %v25527_v56 = vpop.f32.mrf.mxu0  ;;  %13500 = vmatmul.mubr.bf16.gmra.mxu0 %v19084_v13  ;;  %v19091_v13 = vld [vmem:[%s26648_s3 + $0xf8] ss:$28 sps:$4 sm:$0xff]  }
 0x655   :  { %v13180_v5 = vpop.f32.mrf.mxu1  ;;  %16938 = vmatmul.mubr.msk.bf16.gmra.mxu1 %vm12805_vm2, %v19087_v0  ;;  %13507 = vmatprep.mubr.bf16.mxu0 %v19090_v61  ;;  %v19094_v0 = vld [vmem:[%s26648_s3 + $0x3cc] ss:$28 sps:$4 sm:$0xff]  }
 0x656   :  { %v25530_v20 = vadd.f32 %v13180_v5, %v12948_v38  ;;  %v13045_v53 = vpop.f32.mrf.mxu0  ;;  %16941 = vmatprep.mubr.msk.bf16.mxu1 %vm19294_vm1, %v27233_v50 }
 0x657   :  { %v13182_v58 = vpop.f32.mrf.mxu1 }
 0x658   :  { %27234 = vst [vmem:[#allocation6_spill] sm:$0xff] %v25530_v20  ;;  %v25536_v12 = vpop.f32.mrf.mxu0 }
 0x659   :  { %v13183_v51 = vpop.f32.mrf.mxu1 }
 0x65a   :  { %v25547_v61 = vadd.f32 %v13183_v51, %v12951_v34  ;;  %v13048_v52 = vpop.f32.mrf.mxu0  ;;  %v12959_v51 = vadd.f32 %v25297_v7, %v25209_v46 }
 0x65b   :  { %v13185_v38 = vpop.f32.mrf.mxu1  ;;  %v12964_v52 = vadd.f32 %v25315_v22, %v25151_v17  ;;  %v19096_v17 = vld [vmem:[%s26648_s3 + $0x400] ss:$28 sps:$4 sm:$0xff]  }
 0x65c   :  { %v13051_v23 = vpop.f32.mrf.mxu0  ;;  %13508 = vmatmul.mubr.bf16.gmra.mxu0 %v19088_v2 }
 0x65d   :  { %v25552_v5 = vadd.f32 %v13051_v23, %v25399_v24  ;;  %v13188_v53 = vpop.f32.mrf.mxu1  ;;  %16942 = vmatmul.mubr.msk.bf16.gmra.mxu1 %vm12805_vm2, %v19091_v13  ;;  %13515 = vmatprep.mubr.bf16.mxu0 %v19094_v0  ;;  %v19092_v24 = vld [vmem:[%s26648_s3 + $0x3c8] ss:$28 sps:$4 sm:$0xff]  }
 0x65e   :  { %v25555_v58 = vadd.f32 %v13188_v53, %v12956_v3  ;;  %v13053_v20 = vpop.f32.mrf.mxu0  ;;  %16945 = vmatprep.mubr.msk.bf16.mxu1 %vm19294_vm1, %v27233_v50  ;;  %v19098_v13 = vld [vmem:[%s26648_s3 + $0x404] ss:$28 sps:$4 sm:$0xff]  }
 0x65f   :  { %v13190_v34 = vpop.f32.mrf.mxu1  ;;  %v19095_v20 = vld [vmem:[%s26648_s3 + $0x130] ss:$28 sps:$4 sm:$0xff]  }
 0x660   :  { %v13054_v43 = vpop.f32.mrf.mxu0  ;;  %v12967_v34 = vadd.f32 %v25319_v62, %v25163_v48  ;;  %v12972_v48 = vadd.f32 %v25335_v28, %v25108_v35  ;;  %v19100_v35 = vld [vmem:[%s26648_s3 + $0x438] ss:$28 sps:$4 sm:$0xff]  }
 0x661   :  { %v25565_v11 = vadd.f32 %v13054_v43, %v25415_v45  ;;  %v13191_v2 = vpop.f32.mrf.mxu1  ;;  %v19099_v43 = vld [vmem:[%s26648_s3 + $0x168] ss:$28 sps:$4 sm:$0xff]  }
 0x662   :  { %v25573_v0 = vadd.f32 %v13191_v2, %v12959_v51  ;;  %v13056_v46 = vpop.f32.mrf.mxu0 }
 0x663   :  { %v13193_v7 = vpop.f32.mrf.mxu1 }
 0x664   :  { %v25577_v38 = vpop.f32.mrf.mxu0  ;;  %13516 = vmatmul.mubr.bf16.gmra.mxu0 %v19092_v24  ;;  %v19102_v24 = vld [vmem:[%s26648_s3 + $0x43c] ss:$28 sps:$4 sm:$0xff]  }
 0x665   :  { %v13196_v45 = vpop.f32.mrf.mxu1  ;;  %16946 = vmatmul.mubr.msk.bf16.gmra.mxu1 %vm12805_vm2, %v19095_v20  ;;  %13523 = vmatprep.mubr.bf16.mxu0 %v19098_v13 }
 0x666   :  { %v25580_v3 = vadd.f32 %v13196_v45, %v12964_v52  ;;  %v13061_v23 = vpop.f32.mrf.mxu0  ;;  %16949 = vmatprep.mubr.msk.bf16.mxu1 %vm19294_vm1, %v27233_v50 }
 0x667   :  { %v13198_v53 = vpop.f32.mrf.mxu1  ;;  %v12975_v23 = vadd.f32 %v25341_v29, %v25115_v6  ;;  %v12980_v6 = vadd.f32 %v25357_v54, %v25419_v57  ;;  %v19104_v57 = vld [vmem:[%s26648_s3 + $0x470] ss:$28 sps:$4 sm:$0xff]  }
 0x668   :  { %v25586_v51 = vpop.f32.mrf.mxu0 }
 0x669   :  { %v13199_v22 = vpop.f32.mrf.mxu1 }
 0x66a   :  { %v25597_v2 = vadd.f32 %v13199_v22, %v12967_v34  ;;  %v13064_v20 = vpop.f32.mrf.mxu0  ;;  %v19103_v34 = vld [vmem:[%s26648_s3 + $0x1a0] ss:$28 sps:$4 sm:$0xff]  }
 0x66b   :  { %v13201_v13 = vpop.f32.mrf.mxu1 }
 0x66c   :  { %v25601_v62 = vpop.f32.mrf.mxu0  ;;  %13524 = vmatmul.mubr.bf16.gmra.mxu0 %v19096_v17  ;;  %v19106_v17 = vld [vmem:[%s26648_s3 + $0x474] ss:$28 sps:$4 sm:$0xff]  }
 0x66d   :  { %v13204_v46 = vpop.f32.mrf.mxu1  ;;  %16950 = vmatmul.mubr.msk.bf16.gmra.mxu1 %vm12805_vm2, %v19099_v43  ;;  %13531 = vmatprep.mubr.bf16.mxu0 %v19102_v24 }
 0x66e   :  { %v25604_v7 = vadd.f32 %v13204_v46, %v12972_v48  ;;  %v13069_v52 = vpop.f32.mrf.mxu0  ;;  %16953 = vmatprep.mubr.msk.bf16.mxu1 %vm19294_vm1, %v27233_v50 }
 0x66f   :  { %v13206_v45 = vpop.f32.mrf.mxu1  ;;  %v12983_v52 = vadd.f32 %v25361_v26, %v25426_v36  ;;  %v12988_v36 = vadd.f32 %v25379_v14, %v25377_v27  ;;  %v19108_v27 = vld [vmem:[%s26648_s3 + $0x4a8] ss:$28 sps:$4 sm:$0xff]  }
 0x670   :  { %v25610_v53 = vpop.f32.mrf.mxu0 }
 0x671   :  { %v13207_v28 = vpop.f32.mrf.mxu1 }
 0x672   :  { %v25621_v22 = vadd.f32 %v13207_v28, %v12975_v23  ;;  %v13072_v43 = vpop.f32.mrf.mxu0  ;;  %v19107_v23 = vld [vmem:[%s26648_s3 + $0x1d8] ss:$28 sps:$4 sm:$0xff]  }
 0x673   :  { %v13209_v24 = vpop.f32.mrf.mxu1 }
 0x674   :  { %v25625_v29 = vpop.f32.mrf.mxu0  ;;  %13532 = vmatmul.mubr.bf16.gmra.mxu0 %v19100_v35  ;;  %v19110_v35 = vld [vmem:[%s26648_s3 + $0x4ac] ss:$28 sps:$4 sm:$0xff]  }
 0x675   :  { %v13212_v20 = vpop.f32.mrf.mxu1  ;;  %16954 = vmatmul.mubr.msk.bf16.gmra.mxu1 %vm12805_vm2, %v19103_v34  ;;  %13539 = vmatprep.mubr.bf16.mxu0 %v19106_v17 }
 0x676   :  { %v25628_v13 = vadd.f32 %v13212_v20, %v12980_v6  ;;  %v13077_v48 = vpop.f32.mrf.mxu0  ;;  %16957 = vmatprep.mubr.msk.bf16.mxu1 %vm19294_vm1, %v27233_v50 }
 0x677   :  { %v13214_v46 = vpop.f32.mrf.mxu1  ;;  %v12991_v48 = vadd.f32 %v25383_v63, %v25381_v40  ;;  %v12996_v63 = vadd.f32 %v25397_v60, %v25324_v18  ;;  %v19112_v18 = vld [vmem:[%s26648_s3 + $0x4e0] ss:$28 sps:$4 sm:$0xff]  }
 0x678   :  { %v25634_v45 = vpop.f32.mrf.mxu0 }
 0x679   :  { %v13215_v54 = vpop.f32.mrf.mxu1 }
 0x67a   :  { %v25645_v28 = vadd.f32 %v13215_v54, %v12983_v52  ;;  %v13080_v34 = vpop.f32.mrf.mxu0  ;;  %v19111_v52 = vld [vmem:[%s26648_s3 + $0x210] ss:$28 sps:$4 sm:$0xff]  }
 0x67b   :  { %v13217_v17 = vpop.f32.mrf.mxu1 }
 0x67c   :  { %v25649_v26 = vpop.f32.mrf.mxu0  ;;  %13540 = vmatmul.mubr.bf16.gmra.mxu0 %v19104_v57  ;;  %v19114_v57 = vld [vmem:[%s26648_s3 + $0x4e4] ss:$28 sps:$4 sm:$0xff]  }
 0x67d   :  { %v13220_v43 = vpop.f32.mrf.mxu1  ;;  %16958 = vmatmul.mubr.msk.bf16.gmra.mxu1 %vm12805_vm2, %v19107_v23  ;;  %13547 = vmatprep.mubr.bf16.mxu0 %v19110_v35 }
 0x67e   :  { %v25652_v24 = vadd.f32 %v13220_v43, %v12988_v36  ;;  %v13085_v6 = vpop.f32.mrf.mxu0  ;;  %16961 = vmatprep.mubr.msk.bf16.mxu1 %vm19294_vm1, %v27233_v50 }
 0x67f   :  { %v13222_v20 = vpop.f32.mrf.mxu1  ;;  %v12999_v6 = vadd.f32 %v25401_v31, %v25337_v1  ;;  %v13004_v31 = vadd.f32 %v25417_v15, %v25275_v8  ;;  %v19116_v8 = vld [vmem:[%s26648_s3 + $0x518] ss:$28 sps:$4 sm:$0xff]  }
 0x680   :  { %v25658_v46 = vpop.f32.mrf.mxu0 }
 0x681   :  { %v13223_v14 = vpop.f32.mrf.mxu1 }
 0x682   :  { %v25669_v54 = vadd.f32 %v13223_v14, %v12991_v48  ;;  %v13088_v23 = vpop.f32.mrf.mxu0  ;;  %v19115_v48 = vld [vmem:[%s26648_s3 + $0x248] ss:$28 sps:$4 sm:$0xff]  }
 0x683   :  { %v13225_v35 = vpop.f32.mrf.mxu1 }
 0x684   :  { %v25673_v40 = vpop.f32.mrf.mxu0  ;;  %13548 = vmatmul.mubr.bf16.gmra.mxu0 %v19108_v27  ;;  %v19118_v27 = vld [vmem:[%s26648_s3 + $0x51c] ss:$28 sps:$4 sm:$0xff]  }
 0x685   :  { %v13228_v34 = vpop.f32.mrf.mxu1  ;;  %16962 = vmatmul.mubr.msk.bf16.gmra.mxu1 %vm12805_vm2, %v19111_v52  ;;  %13555 = vmatprep.mubr.bf16.mxu0 %v19114_v57 }
 0x686   :  { %v25676_v17 = vadd.f32 %v13228_v34, %v12996_v63  ;;  %v13093_v36 = vpop.f32.mrf.mxu0  ;;  %16965 = vmatprep.mubr.msk.bf16.mxu1 %vm19294_vm1, %v27233_v50 }
 0x687   :  { %v13230_v43 = vpop.f32.mrf.mxu1  ;;  %v13007_v36 = vadd.f32 %v25421_v16, %v25291_v25  ;;  %v13012_v25 = vadd.f32 %v25435_v41, %v25231_v44  ;;  %v19120_v44 = vld [vmem:[%s26648_s3 + $0x550] ss:$28 sps:$4 sm:$0xff]  }
 0x688   :  { %v25682_v20 = vpop.f32.mrf.mxu0 }
 0x689   :  { %v13231_v60 = vpop.f32.mrf.mxu1 }
 0x68a   :  { %v25693_v14 = vadd.f32 %v13231_v60, %v12999_v6  ;;  %v13096_v52 = vpop.f32.mrf.mxu0  ;;  %v19119_v6 = vld [vmem:[%s26648_s3 + $0x280] ss:$28 sps:$4 sm:$0xff]  }
 0x68b   :  { %v13233_v57 = vpop.f32.mrf.mxu1 }
 0x68c   :  { %v25697_v1 = vpop.f32.mrf.mxu0  ;;  %13556 = vmatmul.mubr.bf16.gmra.mxu0 %v19112_v18  ;;  %v19122_v18 = vld [vmem:[%s26648_s3 + $0x554] ss:$28 sps:$4 sm:$0xff]  }
 0x68d   :  { %v13236_v23 = vpop.f32.mrf.mxu1  ;;  %16966 = vmatmul.mubr.msk.bf16.gmra.mxu1 %vm12805_vm2, %v19115_v48  ;;  %13563 = vmatprep.mubr.bf16.mxu0 %v19118_v27 }
 0x68e   :  { %v25700_v35 = vadd.f32 %v13236_v23, %v13004_v31  ;;  %v13101_v63 = vpop.f32.mrf.mxu0  ;;  %16969 = vmatprep.mubr.msk.bf16.mxu1 %vm19294_vm1, %v27233_v50 }
 0x68f   :  { %v13238_v34 = vpop.f32.mrf.mxu1  ;;  %v13015_v63 = vadd.f32 %v25442_v37, %v25238_v33  ;;  %v27236_v33 = vld [vmem:[#allocation86_spill] sm:$0xff] }
 0x690   :  { %v25706_v43 = vpop.f32.mrf.mxu0 }
 0x691   :  { %v13239_v15 = vpop.f32.mrf.mxu1 }
 0x692   :  { %v25717_v60 = vadd.f32 %v13239_v15, %v13007_v36  ;;  %v13104_v48 = vpop.f32.mrf.mxu0  ;;  %v19123_v36 = vld [vmem:[%s26648_s3 + $0x2b8] ss:$28 sps:$4 sm:$0xff]  }
 0x693   :  { %v13241_v27 = vpop.f32.mrf.mxu1 }
 0x694   :  { %v25721_v16 = vpop.f32.mrf.mxu0  ;;  %13564 = vmatmul.mubr.bf16.gmra.mxu0 %v19116_v8 }
 0x695   :  { %v13244_v52 = vpop.f32.mrf.mxu1  ;;  %16970 = vmatmul.mubr.msk.bf16.gmra.mxu1 %vm12805_vm2, %v19119_v6  ;;  %13571 = vmatprep.mubr.bf16.mxu0 %v19122_v18  ;;  %v27235_v18 = vld [vmem:[#allocation163_spill] sm:$0xff] }
 0x696   :  { %v25724_v57 = vadd.f32 %v13244_v52, %v13012_v25  ;;  %v13109_v31 = vpop.f32.mrf.mxu0  ;;  %16973 = vmatprep.mubr.msk.bf16.mxu1 %vm19294_vm1, %v27233_v50  ;;  %v13020_v48 = vadd.f32 %v25456_v30, %v27235_v18 }
 0x697   :  { %v13246_v23 = vpop.f32.mrf.mxu1 }
 0x698   :  { %v25730_v34 = vpop.f32.mrf.mxu0 }
 0x699   :  { %v13247_v41 = vpop.f32.mrf.mxu1 }
 0x69a   :  { %v25738_v8 = vadd.f32 %v13247_v41, %v13015_v63  ;;  %v13112_v15 = vpop.f32.mrf.mxu0  ;;  %v27237_v63 = vld [vmem:[#allocation180_spill] sm:$0xff] }
 0x69b   :  { %v13249_v6 = vpop.f32.mrf.mxu1  ;;  %v13023_v41 = vadd.f32 %v25464_v47, %v27237_v63 }
 0x69c   :  { %v13381_v27 = vpop.f32.mrf.mxu0  ;;  %13572 = vmatmul.mubr.bf16.gmra.mxu0 %v19120_v44  ;;  %v19124_v6 = vld [vmem:[%s26648_s3 + $0x2f0] ss:$28 sps:$4 sm:$0xff]  }
 0x69d   :  { %v13252_v37 = vpop.f32.mrf.mxu1  ;;  %v25743_v25 = vadd.f32 %v13381_v27, %v27236_v33  ;;  %16974 = vmatmul.mubr.msk.bf16.gmra.mxu1 %vm12805_vm2, %v19123_v36  ;;  %v27238_v27 = vld [vmem:[#allocation160_spill] sm:$0xff] }
 0x69e   :  { %v25746_v52 = vadd.f32 %v13252_v37, %v13020_v48  ;;  %v13383_v31 = vpop.f32.mrf.mxu0  ;;  %16977 = vmatprep.mubr.msk.bf16.mxu1 %vm19294_vm1, %v27233_v50  ;;  %v13028_v37 = vadd.f32 %v25479_v55, %v27238_v27 }
 0x69f   :  { %v13254_v23 = vpop.f32.mrf.mxu1 }
 0x6a0   :  { %v13384_v15 = vpop.f32.mrf.mxu0 }
 0x6a1   :  { %v13255_v30 = vpop.f32.mrf.mxu1  ;;  %v25753_v44 = vadd.f32 %v13384_v15, %v25453_v59 }
 0x6a2   :  { %v25758_v36 = vadd.f32 %v13255_v30, %v13023_v41  ;;  %v13386_v18 = vpop.f32.mrf.mxu0  ;;  %v27239_v41 = vld [vmem:[#allocation176_spill] sm:$0xff] }
 0x6a3   :  { %v13257_v48 = vpop.f32.mrf.mxu1  ;;  %v13031_v15 = vadd.f32 %v25488_v32, %v27239_v41 }
 0x6a4   :  { %v13389_v33 = vpop.f32.mrf.mxu0 }
 0x6a5   :  { %v13260_v31 = vpop.f32.mrf.mxu1  ;;  %v25763_v47 = vadd.f32 %v13389_v33, %v25459_v9  ;;  %16978 = vmatmul.mubr.msk.bf16.gmra.mxu1 %vm12805_vm2, %v19124_v6  ;;  %v19125_v9 = vld [vmem:[%s26648_s3 + $0x328] ss:$28 sps:$4 sm:$0xff]  }
 0x6a6   :  { %v25766_v59 = vadd.f32 %v13260_v31, %v13028_v37  ;;  %v13391_v23 = vpop.f32.mrf.mxu0  ;;  %16981 = vmatprep.mubr.msk.bf16.mxu1 %vm19294_vm1, %v27233_v50  ;;  %v27240_v37 = vld [vmem:[#allocation157_spill] sm:$0xff] }
 0x6a7   :  { %v13262_v63 = vpop.f32.mrf.mxu1  ;;  %v13036_v33 = vadd.f32 %v25503_v4, %v27240_v37  ;;  %v11543_v37 = vpop.permute.xlu0 %11542 }
 0x6a8   :  { %v13392_v30 = vpop.f32.mrf.mxu0 }
 0x6a9   :  { %v13263_v18 = vpop.f32.mrf.mxu1  ;;  %v25773_v55 = vadd.f32 %v13392_v30, %v25475_v19 }
 0x6aa   :  { %v25778_v6 = vadd.f32 %v13263_v18, %v13031_v15  ;;  %v13394_v48 = vpop.f32.mrf.mxu0  ;;  %v27241_v15 = vld [vmem:[#allocation172_spill] sm:$0xff] }
 0x6ab   :  { %v13265_v27 = vpop.f32.mrf.mxu1  ;;  %v13039_v30 = vadd.f32 %v25512_v49, %v27241_v15  ;;  %v11548_v15 = vpop.permute.xlu1 %11547 }
 0x6ac   :  { %v13397_v31 = vpop.f32.mrf.mxu0 }
 0x6ad   :  { %v13268_v23 = vpop.f32.mrf.mxu1  ;;  %v25783_v32 = vadd.f32 %v13397_v31, %v25482_v21  ;;  %16982 = vmatmul.mubr.msk.bf16.gmra.mxu1 %vm12805_vm2, %v19125_v9  ;;  %v19126_v21 = vld [vmem:[%s26648_s3 + $0x360] ss:$28 sps:$4 sm:$0xff]   ;;  %v13044_v31 = vadd.f32 %v25527_v56, %v11543_v37 }
 0x6ae   :  { %v25786_v19 = vadd.f32 %v13268_v23, %v13036_v33  ;;  %v13399_v63 = vpop.f32.mrf.mxu0  ;;  %16985 = vmatprep.mubr.msk.bf16.mxu1 %vm19294_vm1, %v27233_v50 }
 0x6af   :  { %v13270_v41 = vpop.f32.mrf.mxu1 }
 0x6b0   :  { %v13400_v18 = vpop.f32.mrf.mxu0 }
 0x6b1   :  { %v13271_v48 = vpop.f32.mrf.mxu1  ;;  %v25793_v4 = vadd.f32 %v13400_v18, %v25499_v42  ;;  %v13047_v18 = vadd.f32 %v25536_v12, %v11548_v15 }
 0x6b2   :  { %v25798_v9 = vadd.f32 %v13271_v48, %v13039_v30  ;;  %v13402_v27 = vpop.f32.mrf.mxu0 }
 0x6b3   :  { %v13273_v33 = vpop.f32.mrf.mxu1 }
 0x6b4   :  { %v13405_v23 = vpop.f32.mrf.mxu0 }
 0x6b5   :  { %v13276_v63 = vpop.f32.mrf.mxu1  ;;  %v25802_v49 = vadd.f32 %v13405_v23, %v25506_v39  ;;  %16986 = vmatmul.mubr.msk.bf16.gmra.mxu1 %vm12805_vm2, %v19126_v21  ;;  %v19127_v39 = vld [vmem:[%s26648_s3 + $0x398] ss:$28 sps:$4 sm:$0xff]  }
 0x6b6   :  { %v25805_v42 = vadd.f32 %v13276_v63, %v13044_v31  ;;  %v13407_v41 = vpop.f32.mrf.mxu0  ;;  %16989 = vmatprep.mubr.msk.bf16.mxu1 %vm19294_vm1, %v27233_v50  ;;  %v27242_v63 = vld [vmem:[#allocation6_spill] sm:$0xff] }
 0x6b7   :  { %v13278_v30 = vpop.f32.mrf.mxu1 }
 0x6b8   :  { %v13408_v48 = vpop.f32.mrf.mxu0 }
 0x6b9   :  { %v13279_v27 = vpop.f32.mrf.mxu1  ;;  %v25811_v56 = vadd.f32 %v13408_v48, %v25523_v10 }
 0x6ba   :  { %v25816_v21 = vadd.f32 %v13279_v27, %v13047_v18  ;;  %v13410_v37 = vpop.f32.mrf.mxu0  ;;  %v19128_v27 = vld [vmem:[%s26648_s3 + $0x3d0] ss:$28 sps:$4 sm:$0xff]  }
 0x6bb   :  { %v13281_v33 = vpop.f32.mrf.mxu1 }
 0x6bc   :  { %v13413_v31 = vpop.f32.mrf.mxu0  ;;  %v27243_v33 = vld [vmem:[#allocation85_spill] sm:$0xff] }
 0x6bd   :  { %v13284_v23 = vpop.f32.mrf.mxu1  ;;  %v25819_v41 = vadd.f32 %v13413_v31, %v27242_v63  ;;  %16990 = vmatmul.mubr.msk.bf16.gmra.mxu1 %vm12805_vm2, %v19127_v39  ;;  %v13060_v31 = vadd.f32 %v25577_v38, %v27243_v33 }
 0x6be   :  { %v25823_v12 = vadd.f32 %v13284_v23, %v25552_v5  ;;  %v13415_v10 = vpop.f32.mrf.mxu0  ;;  %16993 = vmatprep.mubr.msk.bf16.mxu1 %vm19294_vm1, %v27233_v50 }
 0x6bf   :  { %v13286_v15 = vpop.f32.mrf.mxu1 }
 0x6c0   :  { %v13416_v30 = vpop.f32.mrf.mxu0 }
 0x6c1   :  { %v13287_v18 = vpop.f32.mrf.mxu1  ;;  %v25828_v48 = vadd.f32 %v13416_v30, %v25547_v61  ;;  %v27244_v30 = vld [vmem:[#allocation7_spill] sm:$0xff] }
 0x6c2   :  { %v25834_v37 = vadd.f32 %v13287_v18, %v25565_v11  ;;  %v13418_v39 = vpop.f32.mrf.mxu0  ;;  %v13063_v18 = vadd.f32 %v25586_v51, %v27244_v30 }
 0x6c3   :  { %v13289_v5 = vpop.f32.mrf.mxu1 }
 0x6c4   :  { %v13421_v23 = vpop.f32.mrf.mxu0 }
 0x6c5   :  { %v13292_v63 = vpop.f32.mrf.mxu1  ;;  %v25839_v10 = vadd.f32 %v13421_v23, %v25555_v58  ;;  %16994 = vmatmul.mubr.msk.bf16.gmra.mxu1 %vm12805_vm2, %v19128_v27  ;;  %v19129_v58 = vld [vmem:[%s26648_s3 + $0x408] ss:$28 sps:$4 sm:$0xff]   ;;  %v27245_v23 = vld [vmem:[#allocation84_spill] sm:$0xff] }
 0x6c6   :  { %v25842_v61 = vadd.f32 %v13292_v63, %v13060_v31  ;;  %v13423_v15 = vpop.f32.mrf.mxu0  ;;  %16997 = vmatprep.mubr.msk.bf16.mxu1 %vm19294_vm1, %v27233_v50  ;;  %v13068_v63 = vadd.f32 %v25601_v62, %v27245_v23 }
 0x6c7   :  { %v13294_v11 = vpop.f32.mrf.mxu1 }
 0x6c8   :  { %v13424_v39 = vpop.f32.mrf.mxu0 }
 0x6c9   :  { %v13295_v5 = vpop.f32.mrf.mxu1  ;;  %v25849_v38 = vadd.f32 %v13424_v39, %v25573_v0  ;;  %v27246_v39 = vld [vmem:[#allocation3_spill] sm:$0xff] }
 0x6ca   :  { %v25854_v27 = vadd.f32 %v13295_v5, %v13063_v18  ;;  %v13426_v33 = vpop.f32.mrf.mxu0  ;;  %v13071_v5 = vadd.f32 %v25610_v53, %v27246_v39 }
 0x6cb   :  { %v13297_v31 = vpop.f32.mrf.mxu1 }
 0x6cc   :  { %v13429_v15 = vpop.f32.mrf.mxu0 }
 0x6cd   :  { %v13300_v11 = vpop.f32.mrf.mxu1  ;;  %v25859_v51 = vadd.f32 %v13429_v15, %v25580_v3  ;;  %16998 = vmatmul.mubr.msk.bf16.gmra.mxu1 %vm12805_vm2, %v19129_v58  ;;  %v19130_v3 = vld [vmem:[%s26648_s3 + $0x440] ss:$28 sps:$4 sm:$0xff]   ;;  %v27247_v15 = vld [vmem:[#allocation83_spill] sm:$0xff] }
 0x6ce   :  { %v25862_v0 = vadd.f32 %v13300_v11, %v13068_v63  ;;  %v13431_v30 = vpop.f32.mrf.mxu0  ;;  %17001 = vmatprep.mubr.msk.bf16.mxu1 %vm19294_vm1, %v27233_v50  ;;  %v13076_v11 = vadd.f32 %v25625_v29, %v27247_v15 }
 0x6cf   :  { %v13302_v18 = vpop.f32.mrf.mxu1 }
 0x6d0   :  { %v13432_v33 = vpop.f32.mrf.mxu0 }
 0x6d1   :  { %v13303_v31 = vpop.f32.mrf.mxu1  ;;  %v25869_v62 = vadd.f32 %v13432_v33, %v25597_v2  ;;  %v27248_v33 = vld [vmem:[#allocation4_spill] sm:$0xff] }
 0x6d2   :  { %v25874_v58 = vadd.f32 %v13303_v31, %v13071_v5  ;;  %v13434_v23 = vpop.f32.mrf.mxu0  ;;  %v13079_v31 = vadd.f32 %v25634_v45, %v27248_v33 }
 0x6d3   :  { %v13305_v63 = vpop.f32.mrf.mxu1 }
 0x6d4   :  { %v13437_v30 = vpop.f32.mrf.mxu0 }
 0x6d5   :  { %v13308_v18 = vpop.f32.mrf.mxu1  ;;  %v25879_v53 = vadd.f32 %v13437_v30, %v25604_v7  ;;  %17002 = vmatmul.mubr.msk.bf16.gmra.mxu1 %vm12805_vm2, %v19130_v3  ;;  %v19131_v7 = vld [vmem:[%s26648_s3 + $0x478] ss:$28 sps:$4 sm:$0xff]   ;;  %v27249_v30 = vld [vmem:[#allocation178_spill] sm:$0xff] }
 0x6d6   :  { %v25882_v2 = vadd.f32 %v13308_v18, %v13076_v11  ;;  %v13439_v39 = vpop.f32.mrf.mxu0  ;;  %17005 = vmatprep.mubr.msk.bf16.mxu1 %vm19294_vm1, %v27233_v50  ;;  %v13084_v18 = vadd.f32 %v25649_v26, %v27249_v30 }
 0x6d7   :  { %v13310_v5 = vpop.f32.mrf.mxu1 }
 0x6d8   :  { %v13440_v23 = vpop.f32.mrf.mxu0 }
 0x6d9   :  { %v13311_v63 = vpop.f32.mrf.mxu1  ;;  %v25889_v29 = vadd.f32 %v13440_v23, %v25621_v22  ;;  %v27250_v23 = vld [vmem:[#allocation173_spill] sm:$0xff] }
 0x6da   :  { %v25894_v3 = vadd.f32 %v13311_v63, %v13079_v31  ;;  %v13442_v15 = vpop.f32.mrf.mxu0  ;;  %v13087_v63 = vadd.f32 %v25658_v46, %v27250_v23 }
 0x6db   :  { %v13313_v11 = vpop.f32.mrf.mxu1 }
 0x6dc   :  { %v13445_v39 = vpop.f32.mrf.mxu0 }
 0x6dd   :  { %v13316_v5 = vpop.f32.mrf.mxu1  ;;  %v25899_v45 = vadd.f32 %v13445_v39, %v25628_v13  ;;  %17006 = vmatmul.mubr.msk.bf16.gmra.mxu1 %vm12805_vm2, %v19131_v7  ;;  %v19132_v13 = vld [vmem:[%s26648_s3 + $0x4b0] ss:$28 sps:$4 sm:$0xff]  }
 0x6de   :  { %v25902_v22 = vadd.f32 %v13316_v5, %v13084_v18  ;;  %v13447_v33 = vpop.f32.mrf.mxu0  ;;  %17009 = vmatprep.mubr.msk.bf16.mxu1 %vm19294_vm1, %v27233_v50  ;;  %v27251_v39 = vld [vmem:[#allocation174_spill] sm:$0xff] }
 0x6df   :  { %v13318_v31 = vpop.f32.mrf.mxu1  ;;  %v13092_v5 = vadd.f32 %v25673_v40, %v27251_v39 }
 0x6e0   :  { %v13448_v15 = vpop.f32.mrf.mxu0 }
 0x6e1   :  { %v13319_v11 = vpop.f32.mrf.mxu1  ;;  %v25909_v26 = vadd.f32 %v13448_v15, %v25645_v28  ;;  %v27252_v15 = vld [vmem:[#allocation169_spill] sm:$0xff] }
 0x6e2   :  { %v25914_v7 = vadd.f32 %v13319_v11, %v13087_v63  ;;  %v13450_v30 = vpop.f32.mrf.mxu0  ;;  %v13095_v11 = vadd.f32 %v25682_v20, %v27252_v15 }
 0x6e3   :  { %v13321_v18 = vpop.f32.mrf.mxu1 }
 0x6e4   :  { %v13453_v33 = vpop.f32.mrf.mxu0 }
 0x6e5   :  { %v13324_v31 = vpop.f32.mrf.mxu1  ;;  %v25919_v46 = vadd.f32 %v13453_v33, %v25652_v24  ;;  %17010 = vmatmul.mubr.msk.bf16.gmra.mxu1 %vm12805_vm2, %v19132_v13  ;;  %v19133_v24 = vld [vmem:[%s26648_s3 + $0x4e8] ss:$28 sps:$4 sm:$0xff]  }
 0x6e6   :  { %v25922_v28 = vadd.f32 %v13324_v31, %v13092_v5  ;;  %v13455_v23 = vpop.f32.mrf.mxu0  ;;  %17013 = vmatprep.mubr.msk.bf16.mxu1 %vm19294_vm1, %v27233_v50  ;;  %v27253_v33 = vld [vmem:[#allocation170_spill] sm:$0xff] }
 0x6e7   :  { %v13326_v63 = vpop.f32.mrf.mxu1  ;;  %v13100_v31 = vadd.f32 %v25697_v1, %v27253_v33 }
 0x6e8   :  { %v13456_v30 = vpop.f32.mrf.mxu0 }
 0x6e9   :  { %v13327_v18 = vpop.f32.mrf.mxu1  ;;  %v25929_v40 = vadd.f32 %v13456_v30, %v25669_v54  ;;  %v27254_v30 = vld [vmem:[#allocation167_spill] sm:$0xff] }
 0x6ea   :  { %v25934_v13 = vadd.f32 %v13327_v18, %v13095_v11  ;;  %v13458_v39 = vpop.f32.mrf.mxu0  ;;  %v13103_v18 = vadd.f32 %v25706_v43, %v27254_v30 }
 0x6eb   :  { %v13329_v5 = vpop.f32.mrf.mxu1 }
 0x6ec   :  { %v13461_v23 = vpop.f32.mrf.mxu0 }
 0x6ed   :  { %v13332_v63 = vpop.f32.mrf.mxu1  ;;  %v25939_v20 = vadd.f32 %v13461_v23, %v25676_v17  ;;  %17014 = vmatmul.mubr.msk.bf16.gmra.mxu1 %vm12805_vm2, %v19133_v24  ;;  %v19134_v17 = vld [vmem:[%s26648_s3 + $0x520] ss:$28 sps:$4 sm:$0xff]  }
 0x6ee   :  { %v25942_v54 = vadd.f32 %v13332_v63, %v13100_v31  ;;  %v13463_v15 = vpop.f32.mrf.mxu0  ;;  %17017 = vmatprep.mubr.msk.bf16.mxu1 %vm19294_vm1, %v27233_v50  ;;  %v11623_v31 = vpop.permute.xlu0 %11622 }
 0x6ef   :  { %v13334_v11 = vpop.f32.mrf.mxu1  ;;  %v13108_v63 = vadd.f32 %v25721_v16, %v11623_v31 }
 0x6f0   :  { %v13464_v39 = vpop.f32.mrf.mxu0 }
 0x6f1   :  { %v13335_v5 = vpop.f32.mrf.mxu1  ;;  %v25949_v1 = vadd.f32 %v13464_v39, %v25693_v14 }
 0x6f2   :  { %v25954_v24 = vadd.f32 %v13335_v5, %v13103_v18  ;;  %v13466_v33 = vpop.f32.mrf.mxu0  ;;  %v11628_v18 = vpop.permute.xlu1 %11627 }
 0x6f3   :  { %v13337_v23 = vpop.f32.mrf.mxu1  ;;  %v13111_v5 = vadd.f32 %v25730_v34, %v11628_v18 }
 0x6f4   :  { %v13469_v15 = vpop.f32.mrf.mxu0 }
 0x6f5   :  { %v13340_v11 = vpop.f32.mrf.mxu1  ;;  %v25958_v43 = vadd.f32 %v13469_v15, %v25700_v35  ;;  %17018 = vmatmul.mubr.msk.bf16.gmra.mxu1 %vm12805_vm2, %v19134_v17  ;;  %v19135_v35 = vld [vmem:[%s26648_s3 + $0x558] ss:$28 sps:$4 sm:$0xff]  }
 0x6f6   :  { %v25961_v14 = vadd.f32 %v13340_v11, %v13108_v63  ;;  %v13471_v30 = vpop.f32.mrf.mxu0  ;;  %17021 = vmatprep.mubr.msk.bf16.mxu1 %vm19294_vm1, %v27233_v50 }
 0x6f7   :  { %v13342_v39 = vpop.f32.mrf.mxu1 }
 0x6f8   :  { %v13472_v33 = vpop.f32.mrf.mxu0 }
 0x6f9   :  { %v13343_v23 = vpop.f32.mrf.mxu1  ;;  %v25967_v16 = vadd.f32 %v13472_v33, %v25717_v60 }
 0x6fa   :  { %v25972_v17 = vadd.f32 %v13343_v23, %v13111_v5  ;;  %v13474_v31 = vpop.f32.mrf.mxu0 }
 0x6fb   :  { %v13345_v63 = vpop.f32.mrf.mxu1 }
 0x6fc   :  { %27255 = vst [vmem:[#allocation87_spill] sm:$0xff] %v25972_v17  ;;  %v13477_v15 = vpop.f32.mrf.mxu0 }
 0x6fd   :  { %v25975_v50 = vadd.f32 %v13477_v15, %v25724_v57  ;;  %v13614_v11 = vpop.f32.mrf.mxu1  ;;  %17022 = vmatmul.mubr.msk.bf16.gmra.mxu1 %vm12805_vm2, %v19135_v35 }
 0x6fe   :  { %v13615_v34 = vadd.f32 %v13614_v11, %v25743_v25  ;;  %v13479_v30 = vpop.f32.mrf.mxu0 }
 0x6ff   :  { %27256 = vst [vmem:[#allocation10_spill] sm:$0xff] %v25975_v50  ;;  %v16927_v60 = vpop.f32.mrf.mxu1 }
 0x700   :  { %v13480_v18 = vpop.f32.mrf.mxu0  ;;  %v13813_v63 = vmax.f32 %v13615_v34, 0.0 }
 0x701   :  { %v25980_v39 = vadd.f32 %v13480_v18, %v25738_v8  ;;  %v13617_v33 = vpop.f32.mrf.mxu1 }
 0x702   :  { %v13618_v5 = vadd.f32 %v13617_v33, %v25753_v44  ;;  %v13482_v23 = vpop.f32.mrf.mxu0 }
 0x703   :  { %v16928_v31 = vpop.f32.mrf.mxu1 }
 0x704   :  { %v13814_v17 = vmax.f32 %v13618_v5, 0.0  ;;  %v13485_v57 = vpop.f32.mrf.mxu0 }
 0x705   :  { %v25984_v15 = vadd.f32 %v13485_v57, %v25746_v52  ;;  %v13622_v35 = vpop.f32.mrf.mxu1 }
 0x706   :  { %v25986_v50 = vpack.c.bf16 %v13814_v17, %v13813_v63  ;;  %v13623_v25 = vadd.f32 %v13622_v35, %v25763_v47  ;;  %v13487_v11 = vpop.f32.mrf.mxu0 }
 0x707   :  { %v16931_v30 = vpop.f32.mrf.mxu1 }
 0x708   :  { %v13488_v8 = vpop.f32.mrf.mxu0  ;;  %v13815_v5 = vmax.f32 %v13623_v25, 0.0 }
 0x709   :  { %v25990_v60 = vadd.f32 %v13488_v8, %v25758_v36  ;;  %v13625_v44 = vpop.f32.mrf.mxu1 }
 0x70a   :  { %v13626_v18 = vadd.f32 %v13625_v44, %v25773_v55  ;;  %v13490_v34 = vpop.f32.mrf.mxu0 }
 0x70b   :  { %v16932_v33 = vpop.f32.mrf.mxu1 }
 0x70c   :  { %v13816_v23 = vmax.f32 %v13626_v18, 0.0  ;;  %v13493_v52 = vpop.f32.mrf.mxu0 }
 0x70d   :  { %v25994_v31 = vadd.f32 %v13493_v52, %v25766_v59  ;;  %v13630_v17 = vpop.f32.mrf.mxu1 }
 0x70e   :  { %v25996_v63 = vpack.c.bf16 %v13816_v23, %v13815_v5  ;;  %v13631_v47 = vadd.f32 %v13630_v17, %v25783_v32  ;;  %v13495_v57 = vpop.f32.mrf.mxu0 }
 0x70f   :  { %v16935_v35 = vpop.f32.mrf.mxu1 }
 0x710   :  { %v13496_v36 = vpop.f32.mrf.mxu0  ;;  %v13817_v44 = vmax.f32 %v13631_v47, 0.0 }
 0x711   :  { %v26000_v11 = vadd.f32 %v13496_v36, %v25778_v6  ;;  %v13633_v55 = vpop.f32.mrf.mxu1 }
 0x712   :  { %v13634_v30 = vadd.f32 %v13633_v55, %v25793_v4  ;;  %v13498_v25 = vpop.f32.mrf.mxu0 }
 0x713   :  { %v16936_v8 = vpop.f32.mrf.mxu1 }
 0x714   :  { %v13818_v18 = vmax.f32 %v13634_v30, 0.0  ;;  %v13501_v59 = vpop.f32.mrf.mxu0 }
 0x715   :  { %v26004_v34 = vadd.f32 %v13501_v59, %v25786_v19  ;;  %v13638_v33 = vpop.f32.mrf.mxu1 }
 0x716   :  { %v26006_v5 = vpack.c.bf16 %v13818_v18, %v13817_v44  ;;  %v13639_v32 = vadd.f32 %v13638_v33, %v25802_v49  ;;  %v13503_v23 = vpop.f32.mrf.mxu0  ;;  %v19138_v49 = vld [vmem:[%s26649_s5 + $0x4] ss:$16 sps:$4 sm:$0xff]  }
 0x717   :  { %v16939_v52 = vpop.f32.mrf.mxu1  ;;  %14401 = vmatprep.mubr.bf16.mxu0 %v19138_v49 }
 0x718   :  { %v13504_v6 = vpop.f32.mrf.mxu0  ;;  %v13819_v36 = vmax.f32 %v13639_v32, 0.0 }
 0x719   :  { %v26010_v17 = vadd.f32 %v13504_v6, %v25798_v9  ;;  %v13641_v4 = vpop.f32.mrf.mxu1 }
 0x71a   :  { %v13642_v57 = vadd.f32 %v13641_v4, %v25811_v56  ;;  %v13506_v47 = vpop.f32.mrf.mxu0 }
 0x71b   :  { %v16940_v35 = vpop.f32.mrf.mxu1 }
 0x71c   :  { %v13820_v55 = vmax.f32 %v13642_v57, 0.0  ;;  %v13509_v19 = vpop.f32.mrf.mxu0 }
 0x71d   :  { %v26014_v30 = vadd.f32 %v13509_v19, %v25805_v42  ;;  %v13646_v25 = vpop.f32.mrf.mxu1 }
 0x71e   :  { %v26019_v8 = vpack.c.bf16 %v13820_v55, %v13819_v36  ;;  %v13647_v9 = vadd.f32 %v13646_v25, %v25819_v41  ;;  %v13511_v44 = vpop.f32.mrf.mxu0 }
 0x71f   :  { %v16943_v18 = vpop.f32.mrf.mxu1 }
 0x720   :  { %v13512_v56 = vpop.f32.mrf.mxu0  ;;  %v13821_v52 = vmax.f32 %v13647_v9, 0.0 }
 0x721   :  { %v26023_v59 = vadd.f32 %v13512_v56, %v25816_v21  ;;  %v13649_v33 = vpop.f32.mrf.mxu1 }
 0x722   :  { %v13650_v42 = vadd.f32 %v13649_v33, %v25828_v48  ;;  %v13514_v32 = vpop.f32.mrf.mxu0 }
 0x723   :  { %v16944_v23 = vpop.f32.mrf.mxu1 }
 0x724   :  { %v13822_v6 = vmax.f32 %v13650_v42, 0.0  ;;  %v13517_v4 = vpop.f32.mrf.mxu0 }
 0x725   :  { %v26027_v57 = vadd.f32 %v13517_v4, %v25823_v12  ;;  %v13654_v47 = vpop.f32.mrf.mxu1 }
 0x726   :  { %v26029_v41 = vpack.c.bf16 %v13822_v6, %v13821_v52  ;;  %v13655_v35 = vadd.f32 %v13654_v47, %v25839_v10  ;;  %v13519_v36 = vpop.f32.mrf.mxu0 }
 0x727   :  { %v16947_v55 = vpop.f32.mrf.mxu1 }
 0x728   :  { %v13520_v21 = vpop.f32.mrf.mxu0  ;;  %v13823_v44 = vmax.f32 %v13655_v35, 0.0 }
 0x729   :  { %v26033_v19 = vadd.f32 %v13520_v21, %v25834_v37  ;;  %v13657_v48 = vpop.f32.mrf.mxu1 }
 0x72a   :  { %v13658_v25 = vadd.f32 %v13657_v48, %v25849_v38  ;;  %v13522_v49 = vpop.f32.mrf.mxu0 }
 0x72b   :  { %v16948_v9 = vpop.f32.mrf.mxu1 }
 0x72c   :  { %v13824_v18 = vmax.f32 %v13658_v25, 0.0  ;;  %v13525_v12 = vpop.f32.mrf.mxu0 }
 0x72d   :  { %v26037_v56 = vadd.f32 %v13525_v12, %v25842_v61  ;;  %v13662_v33 = vpop.f32.mrf.mxu1 }
 0x72e   :  { %v26039_v42 = vpack.c.bf16 %v13824_v18, %v13823_v44  ;;  %v13663_v10 = vadd.f32 %v13662_v33, %v25859_v51  ;;  %v13527_v32 = vpop.f32.mrf.mxu0 }
 0x72f   :  { %v16951_v23 = vpop.f32.mrf.mxu1 }
 0x730   :  { %v13528_v37 = vpop.f32.mrf.mxu0  ;;  %v13825_v35 = vmax.f32 %v13663_v10, 0.0 }
 0x731   :  { %v26043_v52 = vadd.f32 %v13528_v37, %v25854_v27  ;;  %v13665_v38 = vpop.f32.mrf.mxu1 }
 0x732   :  { %v13666_v6 = vadd.f32 %v13665_v38, %v25869_v62  ;;  %v13530_v4 = vpop.f32.mrf.mxu0 }
 0x733   :  { %v16952_v47 = vpop.f32.mrf.mxu1 }
 0x734   :  { %v13826_v36 = vmax.f32 %v13666_v6, 0.0  ;;  %v13533_v61 = vpop.f32.mrf.mxu0 }
 0x735   :  { %v26047_v55 = vadd.f32 %v13533_v61, %v25862_v0  ;;  %v13670_v21 = vpop.f32.mrf.mxu1 }
 0x736   :  { %v26049_v48 = vpack.c.bf16 %v13826_v36, %v13825_v35  ;;  %v13671_v51 = vadd.f32 %v13670_v21, %v25879_v53  ;;  %v13535_v25 = vpop.f32.mrf.mxu0 }
 0x737   :  { %v16955_v49 = vpop.f32.mrf.mxu1 }
 0x738   :  { %v13536_v27 = vpop.f32.mrf.mxu0  ;;  %v13827_v33 = vmax.f32 %v13671_v51, 0.0 }
 0x739   :  { %v26053_v9 = vadd.f32 %v13536_v27, %v25874_v58  ;;  %v13673_v62 = vpop.f32.mrf.mxu1 }
 0x73a   :  { %v13674_v44 = vadd.f32 %v13673_v62, %v25889_v29  ;;  %v13538_v18 = vpop.f32.mrf.mxu0 }
 0x73b   :  { %v16956_v12 = vpop.f32.mrf.mxu1 }
 0x73c   :  { %v13828_v10 = vmax.f32 %v13674_v44, 0.0  ;;  %v13541_v0 = vpop.f32.mrf.mxu0 }
 0x73d   :  { %v26057_v32 = vadd.f32 %v13541_v0, %v25882_v2  ;;  %v13678_v23 = vpop.f32.mrf.mxu1 }
 0x73e   :  { %v26059_v37 = vpack.c.bf16 %v13828_v10, %v13827_v33  ;;  %v13679_v53 = vadd.f32 %v13678_v23, %v25899_v45  ;;  %v13543_v38 = vpop.f32.mrf.mxu0 }
 0x73f   :  { %v16959_v6 = vpop.f32.mrf.mxu1 }
 0x740   :  { %v13544_v58 = vpop.f32.mrf.mxu0  ;;  %v13829_v61 = vmax.f32 %v13679_v53, 0.0 }
 0x741   :  { %v26063_v4 = vadd.f32 %v13544_v58, %v25894_v3  ;;  %v13681_v29 = vpop.f32.mrf.mxu1 }
 0x742   :  { %v13682_v47 = vadd.f32 %v13681_v29, %v25909_v26  ;;  %v13546_v35 = vpop.f32.mrf.mxu0 }
 0x743   :  { %v16960_v36 = vpop.f32.mrf.mxu1 }
 0x744   :  { %v13830_v21 = vmax.f32 %v13682_v47, 0.0  ;;  %v13549_v2 = vpop.f32.mrf.mxu0 }
 0x745   :  { %v26067_v51 = vadd.f32 %v13549_v2, %v25902_v22  ;;  %v13686_v25 = vpop.f32.mrf.mxu1 }
 0x746   :  { %v26069_v49 = vpack.c.bf16 %v13830_v21, %v13829_v61  ;;  %v13687_v45 = vadd.f32 %v13686_v25, %v25919_v46  ;;  %v13551_v27 = vpop.f32.mrf.mxu0 }
 0x747   :  { %v16963_v62 = vpop.f32.mrf.mxu1 }
 0x748   :  { %v13552_v3 = vpop.f32.mrf.mxu0  ;;  %v13831_v10 = vmax.f32 %v13687_v45, 0.0 }
 0x749   :  { %v26073_v44 = vadd.f32 %v13552_v3, %v25914_v7  ;;  %v13689_v26 = vpop.f32.mrf.mxu1 }
 0x74a   :  { %v13690_v18 = vadd.f32 %v13689_v26, %v25929_v40  ;;  %v13554_v12 = vpop.f32.mrf.mxu0 }
 0x74b   :  { %v16964_v33 = vpop.f32.mrf.mxu1 }
 0x74c   :  { %v13832_v0 = vmax.f32 %v13690_v18, 0.0  ;;  %v13557_v22 = vpop.f32.mrf.mxu0 }
 0x74d   :  { %v26077_v23 = vadd.f32 %v13557_v22, %v25922_v28  ;;  %v13694_v53 = vpop.f32.mrf.mxu1 }
 0x74e   :  { %v26079_v38 = vpack.c.bf16 %v13832_v0, %v13831_v10  ;;  %v13559_v46 = vpop.f32.mrf.mxu0  ;;  %v13695_v58 = vadd.f32 %v13694_v53, %v25939_v20 }
 0x74f   :  { %v16967_v6 = vpop.f32.mrf.mxu1 }
 0x750   :  { %v13560_v7 = vpop.f32.mrf.mxu0  ;;  %v13833_v61 = vmax.f32 %v13695_v58, 0.0  ;;  %v27257_v6 = vld [vmem:[#allocation10_spill] sm:$0xff] }
 0x751   :  { %v26083_v29 = vadd.f32 %v13560_v7, %v25934_v13  ;;  %v13697_v40 = vpop.f32.mrf.mxu1  ;;  %v27258_v7 = vld [vmem:[#allocation87_spill] sm:$0xff] }
 0x752   :  { %v13698_v47 = vadd.f32 %v13697_v40, %v25949_v1  ;;  %v13562_v35 = vpop.f32.mrf.mxu0 }
 0x753   :  { %v16968_v36 = vpop.f32.mrf.mxu1 }
 0x754   :  { %v13834_v21 = vmax.f32 %v13698_v47, 0.0  ;;  %v13565_v28 = vpop.f32.mrf.mxu0 }
 0x755   :  { %v26087_v2 = vadd.f32 %v13565_v28, %v25942_v54  ;;  %v13702_v25 = vpop.f32.mrf.mxu1 }
 0x756   :  { %v26089_v45 = vpack.c.bf16 %v13834_v21, %v13833_v61  ;;  %v13567_v27 = vpop.f32.mrf.mxu0  ;;  %v13703_v62 = vadd.f32 %v13702_v25, %v25958_v43 }
 0x757   :  { %v16971_v20 = vpop.f32.mrf.mxu1 }
 0x758   :  { %v13568_v13 = vpop.f32.mrf.mxu0  ;;  %v13835_v33 = vmax.f32 %v13703_v62, 0.0 }
 0x759   :  { %v26093_v3 = vadd.f32 %v13568_v13, %v25954_v24  ;;  %v13705_v1 = vpop.f32.mrf.mxu1 }
 0x75a   :  { %v13706_v26 = vadd.f32 %v13705_v1, %v25967_v16  ;;  %v13570_v18 = vpop.f32.mrf.mxu0  ;;  %v19165_v16 = vld [vmem:[%s26649_s5 + $0xc] ss:$16 sps:$4 sm:$0xff]  }
 0x75b   :  { %v16972_v12 = vpop.f32.mrf.mxu1  ;;  %16538 = vmatprep.mubr.msk.bf16.mxu1 %vm14329_vm3, %v19165_v16 }
 0x75c   :  { %v13836_v10 = vmax.f32 %v13706_v26, 0.0  ;;  %v13573_v54 = vpop.f32.mrf.mxu0 }
 0x75d   :  { %v26097_v0 = vadd.f32 %v13573_v54, %v25961_v14  ;;  %v13710_v22 = vpop.f32.mrf.mxu1 }
 0x75e   :  { %v26099_v53 = vpack.c.bf16 %v13836_v10, %v13835_v33  ;;  %v13575_v46 = vpop.f32.mrf.mxu0  ;;  %v13711_v58 = vadd.f32 %v13710_v22, %v27257_v6 }
 0x75f   :  { %v16975_v43 = vpop.f32.mrf.mxu1 }
 0x760   :  { %v13576_v24 = vpop.f32.mrf.mxu0  ;;  %v13837_v61 = vmax.f32 %v13711_v58, 0.0 }
 0x761   :  { %v26106_v40 = vadd.f32 %v13576_v24, %v27258_v7  ;;  %v13713_v47 = vpop.f32.mrf.mxu1 }
 0x762   :  { %v13714_v14 = vadd.f32 %v13713_v47, %v25980_v39  ;;  %v13578_v35 = vpop.f32.mrf.mxu0 }
 0x763   :  { %v16976_v36 = vpop.f32.mrf.mxu1 }
 0x764   :  { %v13838_v21 = vmax.f32 %v13714_v14, 0.0 }
 0x765   :  { %v13718_v28 = vpop.f32.mrf.mxu1 }
 0x766   :  { %v13925_v25 = vpack.c.bf16 %v13838_v21, %v13837_v61  ;;  %v13719_v20 = vadd.f32 %v13718_v28, %v25984_v15 }
 0x767   :  { %v16979_v27 = vpop.f32.mrf.mxu1 }
 0x768   :  { %v13839_v26 = vmax.f32 %v13719_v20, 0.0 }
 0x769   :  { %v13721_v62 = vpop.f32.mrf.mxu1 }
 0x76a   :  { %v13722_v13 = vadd.f32 %v13721_v62, %v25990_v60 }
 0x76b   :  { %v16980_v1 = vpop.f32.mrf.mxu1 }
 0x76c   :  { %v13840_v18 = vmax.f32 %v13722_v13, 0.0 }
 0x76d   :  { %v13726_v12 = vpop.f32.mrf.mxu1 }
 0x76e   :  { %v13926_v33 = vpack.c.bf16 %v13840_v18, %v13839_v26  ;;  %v13727_v10 = vadd.f32 %v13726_v12, %v25994_v31 }
 0x76f   :  { %v16983_v39 = vpop.f32.mrf.mxu1 }
 0x770   :  { %v13841_v43 = vmax.f32 %v13727_v10, 0.0 }
 0x771   :  { %v13729_v54 = vpop.f32.mrf.mxu1 }
 0x772   :  { %v13730_v22 = vadd.f32 %v13729_v54, %v26000_v11 }
 0x773   :  { %v16984_v46 = vpop.f32.mrf.mxu1 }
 0x774   :  { %v13842_v6 = vmax.f32 %v13730_v22, 0.0 }
 0x775   :  { %v13734_v58 = vpop.f32.mrf.mxu1 }
 0x776   :  { %v13927_v24 = vpack.c.bf16 %v13842_v6, %v13841_v43  ;;  %v13735_v16 = vadd.f32 %v13734_v58, %v26004_v34 }
 0x777   :  { %v16987_v15 = vpop.f32.mrf.mxu1 }
 0x778   :  { %v13843_v14 = vmax.f32 %v13735_v16, 0.0 }
 0x779   :  { %v13737_v60 = vpop.f32.mrf.mxu1 }
 0x77a   :  { %v13738_v7 = vadd.f32 %v13737_v60, %v26010_v17  ;;  %v19144_v60 = vld [vmem:[%s26649_s5 + $0x44] ss:$16 sps:$4 sm:$0xff]  }
 0x77b   :  { %v16988_v47 = vpop.f32.mrf.mxu1 }
 0x77c   :  { %v13844_v35 = vmax.f32 %v13738_v7, 0.0 }
 0x77d   :  { %v13742_v36 = vpop.f32.mrf.mxu1 }
 0x77e   :  { %v13928_v61 = vpack.c.bf16 %v13844_v35, %v13843_v14  ;;  %v13743_v31 = vadd.f32 %v13742_v36, %v26014_v30 }
 0x77f   :  { %v16991_v21 = vpop.f32.mrf.mxu1 }
 0x780   :  { %16827 = vmatprep.subr.bf16.mxu0 %v13928_v61  ;;  %v13845_v34 = vmax.f32 %v13743_v31, 0.0  ;;  %v19142_v31 = vld [vmem:[%s26649_s5 + $0x40] ss:$16 sps:$4 sm:$0xff]  }
 0x781   :  { %v13745_v11 = vpop.f32.mrf.mxu1  ;;  %16828 = vmatpush3.bf16.msra.mxu0 %v26059_v37 }
 0x782   :  { %v13746_v28 = vadd.f32 %v13745_v11, %v26023_v59  ;;  %16829 = vmatprep.subr.bf16.mxu0 %v13927_v24  ;;  %v19147_v11 = vld [vmem:[%s26649_s5 + $0x64] ss:$16 sps:$4 sm:$0xff]  }
 0x783   :  { %v16992_v27 = vpop.f32.mrf.mxu1 }
 0x784   :  { %v13846_v20 = vmax.f32 %v13746_v28, 0.0 }
 0x785   :  { %v13750_v62 = vpop.f32.mrf.mxu1  ;;  %16830 = vmatpush3.bf16.msra.mxu0 %v26049_v48 }
 0x786   :  { %v26120_v17 = vpack.c.bf16 %v13846_v20, %v13845_v34  ;;  %v13751_v13 = vadd.f32 %v13750_v62, %v26027_v57  ;;  %16831 = vmatprep.subr.bf16.mxu0 %v13926_v33 }
 0x787   :  { %v16995_v30 = vpop.f32.mrf.mxu1 }
 0x788   :  { %v13847_v26 = vmax.f32 %v13751_v13, 0.0  ;;  %v19145_v30 = vld [vmem:[%s26649_s5 + $0x60] ss:$16 sps:$4 sm:$0xff]  }
 0x789   :  { %v13753_v1 = vpop.f32.mrf.mxu1  ;;  %16832 = vmatpush3.bf16.msra.mxu0 %v26039_v42 }
 0x78a   :  { %v13754_v37 = vadd.f32 %v13753_v1, %v26033_v19  ;;  %16833 = vmatprep.subr.bf16.mxu0 %v13925_v25 }
 0x78b   :  { %v16996_v59 = vpop.f32.mrf.mxu1 }
 0x78c   :  { %v13848_v18 = vmax.f32 %v13754_v37, 0.0  ;;  %v19150_v37 = vld [vmem:[%s26649_s5 + $0x84] ss:$16 sps:$4 sm:$0xff]  }
 0x78d   :  { %v13758_v12 = vpop.f32.mrf.mxu1  ;;  %16834 = vmatpush3.bf16.msra.mxu0 %v26029_v41 }
 0x78e   :  { %v26126_v39 = vpack.c.bf16 %v13848_v18, %v13847_v26  ;;  %v13759_v48 = vadd.f32 %v13758_v12, %v26037_v56  ;;  %16835 = vmatprep.subr.bf16.mxu0 %v26099_v53 }
 0x78f   :  { %v16999_v57 = vpop.f32.mrf.mxu1 }
 0x790   :  { %v13849_v25 = vmax.f32 %v13759_v48, 0.0 }
 0x791   :  { %v13761_v33 = vpop.f32.mrf.mxu1  ;;  %16836 = vmatpush3.bf16.msra.mxu0 %v26019_v8 }
 0x792   :  { %v13762_v42 = vadd.f32 %v13761_v33, %v26043_v52  ;;  %16837 = vmatprep.subr.bf16.mxu0 %v26089_v45  ;;  %v19148_v33 = vld [vmem:[%s26649_s5 + $0x80] ss:$16 sps:$4 sm:$0xff]  }
 0x793   :  { %v17000_v19 = vpop.f32.mrf.mxu1 }
 0x794   :  { %v13850_v10 = vmax.f32 %v13762_v42, 0.0  ;;  %v19153_v19 = vld [vmem:[%s26649_s5 + $0xa4] ss:$16 sps:$4 sm:$0xff]  }
 0x795   :  { %v13766_v54 = vpop.f32.mrf.mxu1  ;;  %16838 = vmatpush3.bf16.msra.mxu0 %v26006_v5  ;;  %v19136_v5 = vld [vmem:[%s26649_s5] ss:$16 sps:$4 sm:$0xff]  }
 0x796   :  { %v26134_v41 = vpack.c.bf16 %v13850_v10, %v13849_v25  ;;  %16839 = vmatprep.subr.bf16.mxu0 %v26079_v38  ;;  %v13767_v53 = vadd.f32 %v13766_v54, %v26047_v55  ;;  %v19141_v55 = vld [vmem:[%s26649_s5 + $0x24] ss:$16 sps:$4 sm:$0xff]  }
 0x797   :  { %v17003_v56 = vpop.f32.mrf.mxu1 }
 0x798   :  { %v13851_v45 = vmax.f32 %v13767_v53, 0.0 }
 0x799   :  { %v13769_v22 = vpop.f32.mrf.mxu1  ;;  %16840 = vmatpush3.bf16.msra.mxu0 %v25996_v63 }
 0x79a   :  { %v13770_v8 = vadd.f32 %v13769_v22, %v26053_v9  ;;  %16841 = vmatprep.subr.bf16.mxu0 %v26069_v49 }
 0x79b   :  { %v17004_v52 = vpop.f32.mrf.mxu1 }
 0x79c   :  { %v13852_v46 = vmax.f32 %v13770_v8, 0.0  ;;  %v19151_v52 = vld [vmem:[%s26649_s5 + $0xa0] ss:$16 sps:$4 sm:$0xff]  }
 0x79d   :  { %v13774_v43 = vpop.f32.mrf.mxu1  ;;  %16842 = vmatpush3.bf16.msra.mxu0 %v25986_v50  ;;  %v19139_v50 = vld [vmem:[%s26649_s5 + $0x20] ss:$16 sps:$4 sm:$0xff]  }
 0x79e   :  { %v26148_v38 = vpack.c.bf16 %v13852_v46, %v13851_v45  ;;  %v13775_v9 = vadd.f32 %v13774_v43, %v26057_v32  ;;  %v19159_v46 = vld [vmem:[%s26649_s5 + $0xe4] ss:$16 sps:$4 sm:$0xff]  }
 0x79f   :  { %v17007_v63 = vpop.f32.mrf.mxu1  ;;  %v19162_v43 = vld [vmem:[%s26649_s5 + $0x104] ss:$16 sps:$4 sm:$0xff]  }
 0x7a0   :  { %14402 = vmatmul.mubr.bf16.vlgmr.msra.gmra.mxu0 %v19136_v5  ;;  %v13853_v24 = vmax.f32 %v13775_v9, 0.0  ;;  %v19157_v5 = vld [vmem:[%s26649_s5 + $0xe0] ss:$16 sps:$4 sm:$0xff]   ;;  %v19174_v63 = vld [vmem:[%s26649_s5 + $0x144] ss:$16 sps:$4 sm:$0xff]  }
 0x7a1   :  { %v13777_v49 = vpop.f32.mrf.mxu1  ;;  %14409 = vmatprep.mubr.bf16.mxu0 %v19141_v55  ;;  %v19168_v55 = vld [vmem:[%s26649_s5 + $0x124] ss:$16 sps:$4 sm:$0xff]   ;;  %v19171_v9 = vld [vmem:[%s26649_s5 + $0x28] ss:$16 sps:$4 sm:$0xff]  }
 0x7a2   :  { %v13778_v6 = vadd.f32 %v13777_v49, %v26063_v4  ;;  %v19175_v49 = vld [vmem:[%s26649_s5 + $0x4c] ss:$16 sps:$4 sm:$0xff]  }
 0x7a3   :  { %v17008_v58 = vpop.f32.mrf.mxu1 }
 0x7a4   :  { %v13854_v15 = vmax.f32 %v13778_v6, 0.0  ;;  %v19172_v6 = vld [vmem:[%s26649_s5 + $0x140] ss:$16 sps:$4 sm:$0xff]   ;;  %v19180_v58 = vld [vmem:[%s26649_s5 + $0x164] ss:$16 sps:$4 sm:$0xff]  }
 0x7a5   :  { %v13782_v16 = vpop.f32.mrf.mxu1 }
 0x7a6   :  { %v13933_v7 = vpack.c.bf16 %v13854_v15, %v13853_v24  ;;  %v13783_v32 = vadd.f32 %v13782_v16, %v26067_v51  ;;  %v19177_v24 = vld [vmem:[%s26649_s5 + $0x48] ss:$16 sps:$4 sm:$0xff]   ;;  %v19181_v15 = vld [vmem:[%s26649_s5 + $0x6c] ss:$16 sps:$4 sm:$0xff]   ;;  %v19178_v16 = vld [vmem:[%s26649_s5 + $0x160] ss:$16 sps:$4 sm:$0xff]  }
 0x7a7   :  { %v17011_v47 = vpop.f32.mrf.mxu1 }
 0x7a8   :  { %14410 = vmatmul.mubr.bf16.gmra.mxu0 %v19139_v50  ;;  %v13855_v36 = vmax.f32 %v13783_v32, 0.0  ;;  %v13911_v50 = vld [vmem:[%s26649_s5 + $0x180] sm:$0xff]  ;;  %v19186_v47 = vld [vmem:[%s26649_s5 + $0x8c] ss:$16 sps:$4 sm:$0xff]  }
 0x7a9   :  { %v13785_v14 = vpop.f32.mrf.mxu1  ;;  %14417 = vmatprep.mubr.bf16.mxu0 %v19144_v60  ;;  %v16535_v60 = vcombine.high %v13911_v50, %v13911_v50  ;;  %v16534_v32 = vcombine.low %v13911_v50, %v13911_v50 }
 0x7aa   :  { %v13786_v4 = vadd.f32 %v13785_v14, %v26073_v44  ;;  %v19188_v14 = vld [vmem:[%s26649_s5 + $0x88] ss:$16 sps:$4 sm:$0xff]  }
 0x7ab   :  { %v17012_v35 = vpop.f32.mrf.mxu1 }
 0x7ac   :  { %v13856_v61 = vmax.f32 %v13786_v4, 0.0  ;;  %v19189_v4 = vld [vmem:[%s26649_s5 + $0xac] ss:$16 sps:$4 sm:$0xff]   ;;  %v19191_v35 = vld [vmem:[%s26649_s5 + $0xa8] ss:$16 sps:$4 sm:$0xff]  }
 0x7ad   :  { %v13790_v21 = vpop.f32.mrf.mxu1 }
 0x7ae   :  { %v13934_v28 = vpack.c.bf16 %v13856_v61, %v13855_v36  ;;  %v13791_v51 = vadd.f32 %v13790_v21, %v26077_v23  ;;  %v19192_v36 = vld [vmem:[%s26649_s5 + $0xcc] ss:$16 sps:$4 sm:$0xff]   ;;  %v19194_v61 = vld [vmem:[%s26649_s5 + $0xc8] ss:$16 sps:$4 sm:$0xff]  }
 0x7af   :  { %v17015_v27 = vpop.f32.mrf.mxu1  ;;  %v19197_v21 = vld [vmem:[%s26649_s5 + $0xe8] ss:$16 sps:$4 sm:$0xff]  }
 0x7b0   :  { %14418 = vmatmul.mubr.bf16.gmra.mxu0 %v19142_v31  ;;  %v13857_v62 = vmax.f32 %v13791_v51, 0.0  ;;  %v19195_v31 = vld [vmem:[%s26649_s5 + $0xec] ss:$16 sps:$4 sm:$0xff]   ;;  %v19203_v51 = vld [vmem:[%s26649_s5 + $0x128] ss:$16 sps:$4 sm:$0xff]  }
 0x7b1   :  { %v13793_v34 = vpop.f32.mrf.mxu1  ;;  %14425 = vmatprep.mubr.bf16.mxu0 %v19147_v11  ;;  %v19198_v11 = vld [vmem:[%s26649_s5 + $0x10c] ss:$16 sps:$4 sm:$0xff]  }
 0x7b2   :  { %v13794_v44 = vadd.f32 %v13793_v34, %v26083_v29  ;;  %v19201_v27 = vld [vmem:[%s26649_s5 + $0x12c] ss:$16 sps:$4 sm:$0xff]  }
 0x7b3   :  { %v17016_v20 = vpop.f32.mrf.mxu1  ;;  %v19204_v34 = vld [vmem:[%s26649_s5 + $0x14c] ss:$16 sps:$4 sm:$0xff]  }
 0x7b4   :  { %v13858_v13 = vmax.f32 %v13794_v44, 0.0  ;;  %v19206_v44 = vld [vmem:[%s26649_s5 + $0x148] ss:$16 sps:$4 sm:$0xff]   ;;  %v19207_v20 = vld [vmem:[%s26649_s5 + $0x16c] ss:$16 sps:$4 sm:$0xff]  }
 0x7b5   :  { %v13798_v1 = vpop.f32.mrf.mxu1 }
 0x7b6   :  { %v13935_v59 = vpack.c.bf16 %v13858_v13, %v13857_v62  ;;  %v13799_v23 = vadd.f32 %v13798_v1, %v26087_v2  ;;  %v13912_v62 = vld [vmem:[%s26649_s5 + $0x188] sm:$0xff] }
 0x7b7   :  { %v17019_v26 = vpop.f32.mrf.mxu1  ;;  %v19209_v13 = vld [vmem:[%s26649_s5 + $0x168] ss:$16 sps:$4 sm:$0xff]   ;;  %v16536_v1 = vcombine.low %v13912_v62, %v13912_v62 }
 0x7b8   :  { %14426 = vmatmul.mubr.bf16.gmra.mxu0 %v19145_v30  ;;  %v13859_v48 = vmax.f32 %v13799_v23, 0.0  ;;  %v16537_v30 = vcombine.high %v13912_v62, %v13912_v62 }
 0x7b9   :  { %v13801_v18 = vpop.f32.mrf.mxu1  ;;  %14433 = vmatprep.mubr.bf16.mxu0 %v19150_v37 }
 0x7ba   :  { %v13802_v29 = vadd.f32 %v13801_v18, %v26093_v3  ;;  %v27259_v3 = vmov 0  }
 0x7bb   :  { %v17020_v12 = vpop.f32.mrf.mxu1 }
 0x7bc   :  { %v13860_v57 = vmax.f32 %v13802_v29, 0.0 }
 0x7bd   :  { %v13806_v42 = vpop.f32.mrf.mxu1 }
 0x7be   :  { %v13936_v25 = vpack.c.bf16 %v13860_v57, %v13859_v48  ;;  %v13807_v2 = vadd.f32 %v13806_v42, %v26097_v0  ;;  %v19156_v0 = vld [vmem:[%s26649_s5 + $0xc4] ss:$16 sps:$4 sm:$0xff]  }
 0x7bf   :  { %v17023_v10 = vpop.f32.mrf.mxu1 }
 0x7c0   :  { %14434 = vmatmul.mubr.bf16.gmra.mxu0 %v19148_v33  ;;  %14506 = vmatpush1.bf16.msra.mxu1 %v13936_v25  ;;  %v13861_v22 = vmax.f32 %v13807_v2, 0.0 }
 0x7c1   :  { %v13809_v54 = vpop.f32.mrf.mxu1  ;;  %14507 = vmatprep.subr.bf16.mxu1 %v27259_v3  ;;  %14441 = vmatprep.mubr.bf16.mxu0 %v19153_v19 }
 0x7c2   :  { %v13810_v56 = vadd.f32 %v13809_v54, %v26106_v40  ;;  %v19154_v40 = vld [vmem:[%s26649_s5 + $0xc0] ss:$16 sps:$4 sm:$0xff]  }
 0x7c3   :  { %v17024_v53 = vpop.f32.mrf.mxu1 }
 0x7c4   :  { %v13862_v8 = vmax.f32 %v13810_v56, 0.0  ;;  %14508 = vmatpush1.bf16.msra.mxu1 %v13935_v59 }
 0x7c5   :  { %14509 = vmatprep.subr.bf16.mxu1 %v27259_v3 }
 0x7c6   :  { %v13937_v45 = vpack.c.bf16 %v13862_v8, %v13861_v22 }
 0x7c8   :  { %14442 = vmatmul.mubr.bf16.gmra.mxu0 %v19151_v52  ;;  %14510 = vmatpush1.bf16.msra.mxu1 %v13934_v28  ;;  %v19200_v28 = vld [vmem:[%s26649_s5 + $0x108] ss:$16 sps:$4 sm:$0xff]  }
 0x7c9   :  { %14511 = vmatprep.subr.bf16.mxu1 %v27259_v3  ;;  %14449 = vmatprep.mubr.bf16.mxu0 %v19156_v0 }
 0x7cc   :  { %14512 = vmatpush1.bf16.msra.mxu1 %v13933_v7  ;;  %v19183_v7 = vld [vmem:[%s26649_s5 + $0x68] ss:$16 sps:$4 sm:$0xff]  }
 0x7cd   :  { %14513 = vmatprep.subr.bf16.mxu1 %v27259_v3 }
 0x7d0   :  { %14450 = vmatmul.mubr.bf16.gmra.mxu0 %v19154_v40  ;;  %14514 = vmatpush1.bf16.msra.mxu1 %v26148_v38  ;;  %v19163_v38 = vld [vmem:[%s26649_s5 + $0x8] ss:$16 sps:$4 sm:$0xff]  }
 0x7d1   :  { %14515 = vmatprep.subr.bf16.mxu1 %v27259_v3  ;;  %14457 = vmatprep.mubr.bf16.mxu0 %v19159_v46 }
 0x7d4   :  { %14516 = vmatpush1.bf16.msra.mxu1 %v26134_v41  ;;  %v19160_v41 = vld [vmem:[%s26649_s5 + $0x100] ss:$16 sps:$4 sm:$0xff]  }
 0x7d5   :  { %14517 = vmatprep.subr.bf16.mxu1 %v27259_v3 }
 0x7d8   :  { %14458 = vmatmul.mubr.bf16.gmra.mxu0 %v19157_v5  ;;  %14518 = vmatpush1.bf16.msra.mxu1 %v26126_v39  ;;  %v19166_v39 = vld [vmem:[%s26649_s5 + $0x120] ss:$16 sps:$4 sm:$0xff]  }
 0x7d9   :  { %14519 = vmatprep.subr.bf16.mxu1 %v27259_v3  ;;  %14465 = vmatprep.mubr.bf16.mxu0 %v19162_v43 }
 0x7dc   :  { %14520 = vmatpush1.bf16.msra.mxu1 %v26120_v17  ;;  %v19169_v17 = vld [vmem:[%s26649_s5 + $0x2c] ss:$16 sps:$4 sm:$0xff]  }
 0x7dd   :  { %14535 = vmatprep.subr.bf16.mxu1 %v27259_v3 }
 0x7e0   :  { %14466 = vmatmul.mubr.bf16.gmra.mxu0 %v19160_v41  ;;  %14536 = vmatpush2.bf16.msra.mxu1 %v13937_v45 }
 0x7e1   :  { %14473 = vmatprep.mubr.bf16.mxu0 %v19168_v55 }
 0x7e3   :  { %14538 = vmatmul.mubr.bf16.vlgmr.msra.gmra.mxu1 %v19163_v38 }
 0x7e4   :  { %16539 = vmatprep.mubr.msk.bf16.mxu1 %vm14329_vm3, %v19169_v17 }
 0x7e8   :  { %14474 = vmatmul.mubr.bf16.gmra.mxu0 %v19166_v39 }
 0x7e9   :  { %14481 = vmatprep.mubr.bf16.mxu0 %v19174_v63 }
 0x7eb   :  { %14546 = vmatmul.mubr.bf16.gmra.mxu1 %v19171_v9 }
 0x7ec   :  { %16540 = vmatprep.mubr.msk.bf16.mxu1 %vm14329_vm3, %v19175_v49 }
 0x7f0   :  { %14482 = vmatmul.mubr.bf16.gmra.mxu0 %v19172_v6 }
 0x7f1   :  { %14489 = vmatprep.mubr.bf16.mxu0 %v19180_v58 }
 0x7f3   :  { %14554 = vmatmul.mubr.bf16.gmra.mxu1 %v19177_v24 }
 0x7f4   :  { %16541 = vmatprep.mubr.msk.bf16.mxu1 %vm14329_vm3, %v19181_v15 }
 0x7f8   :  { %14490 = vmatmul.mubr.bf16.gmra.mxu0 %v19178_v16 }
 0x7f9   :  { %14497 = vmatprep.mubr.bf16.mxu0 %v16535_v60 }
 0x7fb   :  { %14562 = vmatmul.mubr.bf16.gmra.mxu1 %v19183_v7 }
 0x7fc   :  { %16542 = vmatprep.mubr.msk.bf16.mxu1 %vm14329_vm3, %v19186_v47 }
 0x800   :  { %14498 = vmatmul.mubr.bf16.gmra.mxu0 %v16534_v32 }
 0x803   :  { %14570 = vmatmul.mubr.bf16.gmra.mxu1 %v19188_v14 }
 0x804   :  { %16543 = vmatprep.mubr.msk.bf16.mxu1 %vm14329_vm3, %v19189_v4  ;;  %v13966_v4 = vpop.permute.xlu0 %13965 }
 0x80b   :  { %14578 = vmatmul.mubr.bf16.gmra.mxu1 %v19191_v35 }
 0x80c   :  { %16544 = vmatprep.mubr.msk.bf16.mxu1 %vm14329_vm3, %v19192_v36 }
 0x813   :  { %14586 = vmatmul.mubr.bf16.gmra.mxu1 %v19194_v61 }
 0x814   :  { %16545 = vmatprep.mubr.msk.bf16.mxu1 %vm14329_vm3, %v19195_v31 }
 0x81b   :  { %14594 = vmatmul.mubr.bf16.gmra.mxu1 %v19197_v21  ;;  %v13986_v21 = vpop.permute.xlu1 %13985 }
 0x81c   :  { %16546 = vmatprep.mubr.msk.bf16.mxu1 %vm14329_vm3, %v19198_v11 }
 0x823   :  { %14602 = vmatmul.mubr.bf16.gmra.mxu1 %v19200_v28 }
 0x824   :  { %16547 = vmatprep.mubr.msk.bf16.mxu1 %vm14329_vm3, %v19201_v27 }
 0x82b   :  { %14610 = vmatmul.mubr.bf16.gmra.mxu1 %v19203_v51 }
 0x82c   :  { %16548 = vmatprep.mubr.msk.bf16.mxu1 %vm14329_vm3, %v19204_v34  ;;  %v13971_v34 = vpop.permute.xlu0 %13970 }
 0x833   :  { %14618 = vmatmul.mubr.bf16.gmra.mxu1 %v19206_v44 }
 0x834   :  { %16549 = vmatprep.mubr.msk.bf16.mxu1 %vm14329_vm3, %v19207_v20 }
 0x83b   :  { %14626 = vmatmul.mubr.bf16.gmra.mxu1 %v19209_v13 }
 0x83c   :  { %16550 = vmatprep.mubr.msk.bf16.mxu1 %vm14329_vm3, %v16537_v30 }
 0x843   :  { %14634 = vmatmul.mubr.bf16.gmra.mxu1 %v16536_v1 }
 0x860   :  { %v16843_v37 = vpop.f32.mrf.mxu0 }
 0x862   :  { %v16844_v59 = vpop.f32.mrf.mxu0 }
 0x863   :  { %v16845_v26 = vadd.f32 %v16844_v59, %v16843_v37  ;;  %v13976_v59 = vpop.permute.xlu1 %13975 }
 0x864   :  { %v16846_v23 = vpop.f32.mrf.mxu0 }
 0x865   :  { %v14404_v31 = vadd.f32 %v16845_v26, %v13966_v4 }
 0x866   :  { %v16847_v18 = vpop.f32.mrf.mxu0 }
 0x867   :  { %v16848_v29 = vadd.f32 %v16847_v18, %v16846_v23 }
 0x868   :  { %v16849_v12 = vpop.f32.mrf.mxu0 }
 0x869   :  { %v14407_v62 = vadd.f32 %v16848_v29, %v13971_v34 }
 0x86a   :  { %v16850_v48 = vpop.f32.mrf.mxu0 }
 0x86b   :  { %v16851_v57 = vadd.f32 %v16850_v48, %v16849_v12 }
 0x86c   :  { %v16852_v33 = vpop.f32.mrf.mxu0 }
 0x86d   :  { %v14412_v18 = vadd.f32 %v16851_v57, %v13976_v59 }
 0x86e   :  { %v16853_v42 = vpop.f32.mrf.mxu0 }
 0x86f   :  { %v26322_v19 = vadd.f32 %v16853_v42, %v16852_v33 }
 0x870   :  { %v16855_v25 = vpop.f32.mrf.mxu0 }
 0x872   :  { %v16856_v10 = vpop.f32.mrf.mxu0 }
 0x873   :  { %v26324_v2 = vadd.f32 %v16856_v10, %v16855_v25  ;;  %v13981_v25 = vpop.permute.xlu0 %13980 }
 0x874   :  { %v16858_v54 = vpop.f32.mrf.mxu0  ;;  %v14415_v29 = vadd.f32 %v26322_v19, %v13981_v25 }
 0x875   :  { %v14420_v57 = vadd.f32 %v26324_v2, %v13986_v21 }
 0x876   :  { %v16859_v3 = vpop.f32.mrf.mxu0 }
 0x877   :  { %v26326_v56 = vadd.f32 %v16859_v3, %v16858_v54 }
 0x878   :  { %v16861_v53 = vpop.f32.mrf.mxu0 }
 0x87a   :  { %v16862_v22 = vpop.f32.mrf.mxu0 }
 0x87b   :  { %v26328_v8 = vadd.f32 %v16862_v22, %v16861_v53 }
 0x87c   :  { %v16864_v52 = vpop.f32.mrf.mxu0 }
 0x87e   :  { %v16865_v0 = vpop.f32.mrf.mxu0 }
 0x87f   :  { %v26330_v45 = vadd.f32 %v16865_v0, %v16864_v52 }
 0x880   :  { %v16867_v40 = vpop.f32.mrf.mxu0 }
 0x882   :  { %v16868_v46 = vpop.f32.mrf.mxu0 }
 0x883   :  { %v26332_v5 = vadd.f32 %v16868_v46, %v16867_v40 }
 0x884   :  { %v16870_v43 = vpop.f32.mrf.mxu0 }
 0x886   :  { %v16871_v41 = vpop.f32.mrf.mxu0 }
 0x887   :  { %v26334_v55 = vadd.f32 %v16871_v41, %v16870_v43 }
 0x888   :  { %v16873_v38 = vpop.f32.mrf.mxu0 }
 0x88a   :  { %v16874_v17 = vpop.f32.mrf.mxu0 }
 0x88b   :  { %v26336_v39 = vadd.f32 %v16874_v17, %v16873_v38  ;;  %v13991_v17 = vpop.permute.xlu1 %13990 }
 0x88c   :  { %v16876_v63 = vpop.f32.mrf.mxu0 }
 0x88e   :  { %v16877_v9 = vpop.f32.mrf.mxu0 }
 0x88f   :  { %v26338_v49 = vadd.f32 %v16877_v9, %v16876_v63  ;;  %v14001_v21 = vpop.permute.xlu1 %14000 }
 0x890   :  { %v16879_v6 = vpop.f32.mrf.mxu0 }
 0x892   :  { %v16880_v58 = vpop.f32.mrf.mxu0 }
 0x893   :  { %v26340_v24 = vadd.f32 %v16880_v58, %v16879_v6  ;;  %v14423_v6 = vadd.f32 %v26326_v56, %v13991_v17 }
 0x894   :  { %v16882_v15 = vpop.f32.mrf.mxu0 }
 0x896   :  { %v16883_v50 = vpop.f32.mrf.mxu0 }
 0x897   :  { %v26342_v16 = vadd.f32 %v16883_v50, %v16882_v15 }
 0x898   :  { %v16885_v60 = vpop.f32.mrf.mxu0 }
 0x89a   :  { %v16886_v7 = vpop.f32.mrf.mxu0 }
 0x89b   :  { %v26344_v47 = vadd.f32 %v16886_v7, %v16885_v60  ;;  %v13996_v60 = vpop.permute.xlu0 %13995 }
 0x89c   :  { %v16888_v32 = vpop.f32.mrf.mxu0  ;;  %v14428_v4 = vadd.f32 %v26328_v8, %v13996_v60 }
 0x89e   :  { %v16889_v14 = vpop.f32.mrf.mxu0 }
 0x89f   :  { %v26346_v35 = vadd.f32 %v16889_v14, %v16888_v32 }
 0x8a0   :  { %v16891_v36 = vpop.f32.mrf.mxu0 }
 0x8a2   :  { %v16892_v61 = vpop.f32.mrf.mxu0 }
 0x8a3   :  { %v26348_v11 = vadd.f32 %v16892_v61, %v16891_v36  ;;  %v14539_v28 = vpop.f32.mrf.mxu1 }
 0x8a4   :  { %v26350_v27 = vadd.f32 %v14539_v28, %v14404_v31  ;;  %v16894_v51 = vpop.f32.mrf.mxu0 }
 0x8a5   :  { %v14541_v44 = vpop.f32.mrf.mxu1 }
 0x8a6   :  { %v16895_v20 = vpop.f32.mrf.mxu0  ;;  %v14431_v44 = vadd.f32 %v26330_v45, %v14001_v21 }
 0x8a7   :  { %v26352_v13 = vadd.f32 %v16895_v20, %v16894_v51  ;;  %v14542_v30 = vpop.f32.mrf.mxu1 }
 0x8a8   :  { %v26354_v1 = vadd.f32 %v14542_v30, %v14407_v62  ;;  %v16897_v37 = vpop.f32.mrf.mxu0 }
 0x8a9   :  { %v14544_v23 = vpop.f32.mrf.mxu1 }
 0x8aa   :  { %v16898_v26 = vpop.f32.mrf.mxu0 }
 0x8ab   :  { %v26356_v12 = vadd.f32 %v16898_v26, %v16897_v37  ;;  %v14547_v48 = vpop.f32.mrf.mxu1  ;;  %v14006_v37 = vpop.permute.xlu0 %14005 }
 0x8ac   :  { %v26358_v33 = vadd.f32 %v14547_v48, %v14412_v18  ;;  %v16900_v42 = vpop.f32.mrf.mxu0  ;;  %v14436_v18 = vadd.f32 %v26332_v5, %v14006_v37 }
 0x8ad   :  { %v14549_v10 = vpop.f32.mrf.mxu1 }
 0x8ae   :  { %v16901_v54 = vpop.f32.mrf.mxu0  ;;  %v14011_v10 = vpop.permute.xlu1 %14010 }
 0x8af   :  { %v26361_v3 = vadd.f32 %v16901_v54, %v16900_v42  ;;  %v14550_v53 = vpop.f32.mrf.mxu1 }
 0x8b0   :  { %v26363_v22 = vadd.f32 %v14550_v53, %v14415_v29  ;;  %v16903_v52 = vpop.f32.mrf.mxu0  ;;  %v14439_v53 = vadd.f32 %v26334_v55, %v14011_v10 }
 0x8b1   :  { %v14552_v0 = vpop.f32.mrf.mxu1 }
 0x8b2   :  { %v16904_v40 = vpop.f32.mrf.mxu0 }
 0x8b3   :  { %v26366_v46 = vadd.f32 %v16904_v40, %v16903_v52  ;;  %v14555_v43 = vpop.f32.mrf.mxu1 }
 0x8b4   :  { %v26368_v41 = vadd.f32 %v14555_v43, %v14420_v57  ;;  %v16906_v38 = vpop.f32.mrf.mxu0  ;;  %v14016_v57 = vpop.permute.xlu0 %14015 }
 0x8b5   :  { %v14557_v63 = vpop.f32.mrf.mxu1 }
 0x8b6   :  { %v14641_v19 = vmax.f32 %v26350_v27, %v26368_v41  ;;  %v16907_v9 = vpop.f32.mrf.mxu0 }
 0x8b7   :  { %v26373_v58 = vadd.f32 %v16907_v9, %v16906_v38  ;;  %v14558_v15 = vpop.f32.mrf.mxu1  ;;  %v14444_v38 = vadd.f32 %v26336_v39, %v14016_v57  ;;  %v14021_v9 = vpop.permute.xlu1 %14020 }
 0x8b8   :  { %v26375_v50 = vadd.f32 %v14558_v15, %v14423_v6  ;;  %v16909_v2 = vpop.f32.mrf.mxu0  ;;  %v14026_v60 = vpop.permute.xlu0 %14025 }
 0x8b9   :  { %v14560_v7 = vpop.f32.mrf.mxu1 }
 0x8ba   :  { %v14642_v32 = vmax.f32 %v26354_v1, %v26375_v50  ;;  %v16910_v14 = vpop.f32.mrf.mxu0 }
 0x8bb   :  { %v26380_v36 = vadd.f32 %v16910_v14, %v16909_v2  ;;  %v14563_v61 = vpop.f32.mrf.mxu1 }
 0x8bc   :  { %v26382_v31 = vadd.f32 %v14563_v61, %v14428_v4  ;;  %v16912_v56 = vpop.f32.mrf.mxu0  ;;  %v14031_v61 = vpop.permute.xlu1 %14030 }
 0x8bd   :  { %v14565_v28 = vpop.f32.mrf.mxu1 }
 0x8be   :  { %v14643_v51 = vmax.f32 %v26358_v33, %v26382_v31  ;;  %v16913_v34 = vpop.f32.mrf.mxu0  ;;  %v14455_v28 = vadd.f32 %v26342_v16, %v14031_v61 }
 0x8bf   :  { %v26387_v20 = vadd.f32 %v16913_v34, %v16912_v56  ;;  %v14566_v62 = vpop.f32.mrf.mxu1  ;;  %v14036_v34 = vpop.permute.xlu0 %14035 }
 0x8c0   :  { %v26389_v30 = vadd.f32 %v14566_v62, %v14431_v44  ;;  %v16915_v8 = vpop.f32.mrf.mxu0 }
 0x8c1   :  { %v14568_v59 = vpop.f32.mrf.mxu1 }
 0x8c2   :  { %v14644_v23 = vmax.f32 %v26363_v22, %v26389_v30  ;;  %v16916_v26 = vpop.f32.mrf.mxu0  ;;  %v14041_v59 = vpop.permute.xlu1 %14040 }
 0x8c3   :  { %v26394_v48 = vadd.f32 %v16916_v26, %v16915_v8  ;;  %v14571_v42 = vpop.f32.mrf.mxu1  ;;  %v14460_v8 = vadd.f32 %v26344_v47, %v14036_v34 }
 0x8c4   :  { %v26396_v25 = vadd.f32 %v14571_v42, %v14436_v18  ;;  %v16918_v45 = vpop.f32.mrf.mxu0  ;;  %v14463_v18 = vadd.f32 %v26346_v35, %v14041_v59 }
 0x8c5   :  { %v14573_v54 = vpop.f32.mrf.mxu1  ;;  %v14046_v45 = vpop.permute.xlu0 %14045 }
 0x8c6   :  { %v14645_v29 = vmax.f32 %v14641_v19, %v26396_v25  ;;  %v16919_v52 = vpop.f32.mrf.mxu0  ;;  %v14447_v19 = vadd.f32 %v26338_v49, %v14021_v9 }
 0x8c7   :  { %v14574_v0 = vpop.f32.mrf.mxu1  ;;  %v14051_v52 = vpop.permute.xlu1 %14050 }
 0x8c8   :  { %v26400_v40 = vadd.f32 %v14574_v0, %v14439_v53 }
 0x8c9   :  { %v14576_v43 = vpop.f32.mrf.mxu1 }
 0x8ca   :  { %v14646_v5 = vmax.f32 %v14642_v32, %v26400_v40  ;;  %v14452_v32 = vadd.f32 %v26340_v24, %v14026_v60  ;;  %v14471_v43 = vadd.f32 %v26352_v13, %v14051_v52 }
 0x8cb   :  { %v14579_v17 = vpop.f32.mrf.mxu1 }
 0x8cc   :  { %v26404_v63 = vadd.f32 %v14579_v17, %v14444_v38  ;;  %v14056_v38 = vpop.permute.xlu0 %14055 }
 0x8cd   :  { %v14581_v6 = vpop.f32.mrf.mxu1 }
 0x8ce   :  { %v14647_v15 = vmax.f32 %v14643_v51, %v26404_v63  ;;  %v14476_v6 = vadd.f32 %v26356_v12, %v14056_v38 }
 0x8cf   :  { %v14582_v55 = vpop.f32.mrf.mxu1 }
 0x8d0   :  { %v26408_v2 = vadd.f32 %v14582_v55, %v14447_v19  ;;  %v14061_v19 = vpop.permute.xlu1 %14060 }
 0x8d1   :  { %v14584_v7 = vpop.f32.mrf.mxu1 }
 0x8d2   :  { %v14648_v14 = vmax.f32 %v14644_v23, %v26408_v2  ;;  %v14479_v7 = vadd.f32 %v26361_v3, %v14061_v19 }
 0x8d3   :  { %v14587_v4 = vpop.f32.mrf.mxu1 }
 0x8d4   :  { %v26412_v39 = vadd.f32 %v14587_v4, %v14452_v32  ;;  %v14066_v32 = vpop.permute.xlu0 %14065 }
 0x8d5   :  { %v14589_v56 = vpop.f32.mrf.mxu1 }
 0x8d6   :  { %v14649_v21 = vmax.f32 %v14645_v29, %v26412_v39  ;;  %v14468_v29 = vadd.f32 %v26348_v11, %v14046_v45  ;;  %v14484_v56 = vadd.f32 %v26366_v46, %v14066_v32 }
 0x8d7   :  { %v14590_v51 = vpop.f32.mrf.mxu1 }
 0x8d8   :  { %v26416_v49 = vadd.f32 %v14590_v51, %v14455_v28  ;;  %v14071_v28 = vpop.permute.xlu1 %14070 }
 0x8d9   :  { %v14592_v44 = vpop.f32.mrf.mxu1 }
 0x8da   :  { %v14650_v62 = vmax.f32 %v14646_v5, %v26416_v49  ;;  %v14487_v44 = vadd.f32 %v26373_v58, %v14071_v28 }
 0x8db   :  { %v14595_v37 = vpop.f32.mrf.mxu1 }
 0x8dc   :  { %v26420_v24 = vadd.f32 %v14595_v37, %v14460_v8  ;;  %v14076_v37 = vpop.permute.xlu0 %14075 }
 0x8dd   :  { %v14597_v23 = vpop.f32.mrf.mxu1 }
 0x8de   :  { %v14651_v26 = vmax.f32 %v14647_v15, %v26420_v24  ;;  %v14492_v23 = vadd.f32 %v26380_v36, %v14076_v37 }
 0x8df   :  { %v14598_v42 = vpop.f32.mrf.mxu1 }
 0x8e0   :  { %v26424_v16 = vadd.f32 %v14598_v42, %v14463_v18  ;;  %v14081_v42 = vpop.permute.xlu1 %14080 }
 0x8e1   :  { %v14600_v10 = vpop.f32.mrf.mxu1  ;;  %v14495_v46 = vadd.f32 %v26387_v20, %v14081_v42 }
 0x8e2   :  { %v14652_v54 = vmax.f32 %v14648_v14, %v26424_v16 }
 0x8e3   :  { %v14603_v53 = vpop.f32.mrf.mxu1 }
 0x8e4   :  { %v26428_v47 = vadd.f32 %v14603_v53, %v14468_v29  ;;  %v14086_v53 = vpop.permute.xlu0 %14085 }
 0x8e5   :  { %v14605_v0 = vpop.f32.mrf.mxu1  ;;  %v14500_v58 = vadd.f32 %v26394_v48, %v14086_v53 }
 0x8e6   :  { %v14653_v57 = vmax.f32 %v14649_v21, %v26428_v47 }
 0x8e7   :  { %v14606_v5 = vpop.f32.mrf.mxu1 }
 0x8e8   :  { %v26432_v35 = vadd.f32 %v14606_v5, %v14471_v43 }
 0x8e9   :  { %v14608_v17 = vpop.f32.mrf.mxu1 }
 0x8ea   :  { %v14654_v9 = vmax.f32 %v14650_v62, %v26432_v35 }
 0x8eb   :  { %v14611_v15 = vpop.f32.mrf.mxu1 }
 0x8ec   :  { %v26436_v11 = vadd.f32 %v14611_v15, %v14476_v6 }
 0x8ed   :  { %v14613_v55 = vpop.f32.mrf.mxu1 }
 0x8ee   :  { %v14655_v60 = vmax.f32 %v14651_v26, %v26436_v11 }
 0x8ef   :  { %v14614_v14 = vpop.f32.mrf.mxu1 }
 0x8f0   :  { %v26440_v13 = vadd.f32 %v14614_v14, %v14479_v7 }
 0x8f1   :  { %v14616_v4 = vpop.f32.mrf.mxu1 }
 0x8f2   :  { %v14656_v61 = vmax.f32 %v14652_v54, %v26440_v13 }
 0x8f3   :  { %v14619_v21 = vpop.f32.mrf.mxu1 }
 0x8f4   :  { %v14620_v12 = vadd.f32 %v14619_v21, %v14484_v56 }
 0x8f5   :  { %v14621_v51 = vpop.f32.mrf.mxu1 }
 0x8f6   :  { %v14657_v34 = vmax.f32 %v14653_v57, %v14620_v12 }
 0x8f7   :  { %v14622_v62 = vpop.f32.mrf.mxu1 }
 0x8f8   :  { %v14623_v8 = vadd.f32 %v14622_v62, %v14487_v44 }
 0x8f9   :  { %v14624_v3 = vpop.f32.mrf.mxu1 }
 0x8fa   :  { %v14658_v59 = vmax.f32 %v14654_v9, %v14623_v8 }
 0x8fb   :  { %v14627_v26 = vpop.f32.mrf.mxu1 }
 0x8fc   :  { %v14628_v18 = vadd.f32 %v14627_v26, %v14492_v23 }
 0x8fd   :  { %v14629_v45 = vpop.f32.mrf.mxu1 }
 0x8fe   :  { %v14659_v10 = vmax.f32 %v14655_v60, %v14628_v18 }
 0x8ff   :  { %v14630_v54 = vpop.f32.mrf.mxu1 }
 0x900   :  { %v14631_v29 = vadd.f32 %v14630_v54, %v14495_v46 }
 0x901   :  { %v14632_v52 = vpop.f32.mrf.mxu1 }
 0x902   :  { %v14660_v0 = vmax.f32 %v14656_v61, %v14631_v29 }
 0x903   :  { %v14635_v57 = vpop.f32.mrf.mxu1 }
 0x904   :  { %v14663_v43 = vmax.f32 %v14659_v10, %v14660_v0  ;;  %v14636_v5 = vadd.f32 %v14635_v57, %v14500_v58 }
 0x905   :  { %v14637_v38 = vpop.f32.mrf.mxu1 }
 0x906   :  { %v14661_v17 = vmax.f32 %v14657_v34, %v14636_v5 }
 0x907   :  { %v14638_v36 = vpop.f32.mrf.mxu1 }
 0x908   :  { %v14662_v9 = vmax.f32 %v14661_v17, %v14658_v59 }
 0x909   :  { %v14639_v6 = vpop.f32.mrf.mxu1 }
 0x90a   :  { %v14664_v15 = vmax.f32 %v14662_v9, %v14663_v43 }
 0x90c   :  { %v14665_v19 = vrot.slane %v14664_v15, 4 }
 0x90e   :  { %v14666_v55 = vmax.f32 %v14664_v15, %v14665_v19 }
 0x910   :  { %v14667_v60 = vrot.slane %v14666_v55, 2 }
 0x912   :  { %v14668_v20 = vmax.f32 %v14666_v55, %v14667_v60 }
 0x914   :  { %v14669_v7 = vrot.slane %v14668_v20, 1 }
 0x916   :  { %v14670_v14 = vmax.f32 %v14668_v20, %v14669_v7 }
 0x918   :  { %v26449_v32 = vsub.f32 %v26350_v27, %v14670_v14  ;;  %v26452_v48 = vsub.f32 %v26354_v1, %v14670_v14  ;;  %v26455_v4 = vsub.f32 %v26358_v33, %v14670_v14  ;;  %v26458_v61 = vsub.f32 %v26363_v22, %v14670_v14 }
 0x919   :  { %v26461_v56 = vsub.f32 %v26368_v41, %v14670_v14  ;;  %v26464_v21 = vsub.f32 %v26375_v50, %v14670_v14  ;;  %v26467_v28 = vsub.f32 %v26382_v31, %v14670_v14  ;;  %v26470_v27 = vsub.f32 %v26389_v30, %v14670_v14 }
 0x91a   :  { %v26473_v1 = vsub.f32 %v26396_v25, %v14670_v14  ;;  %v26476_v33 = vsub.f32 %v26400_v40, %v14670_v14  ;;  %v26479_v22 = vsub.f32 %v26404_v63, %v14670_v14  ;;  %v26482_v41 = vsub.f32 %v26408_v2, %v14670_v14 }
 0x91b   :  { %v26485_v50 = vsub.f32 %v26412_v39, %v14670_v14  ;;  %v26488_v31 = vsub.f32 %v26416_v49, %v14670_v14  ;;  %v26491_v30 = vsub.f32 %v26420_v24, %v14670_v14  ;;  %v26494_v25 = vsub.f32 %v26424_v16, %v14670_v14 }
 0x91c   :  { %v26497_v40 = vsub.f32 %v26428_v47, %v14670_v14  ;;  %v26500_v63 = vsub.f32 %v26432_v35, %v14670_v14  ;;  %v26503_v2 = vsub.f32 %v26436_v11, %v14670_v14  ;;  %v26506_v39 = vsub.f32 %v26440_v13, %v14670_v14 }
 0x91d   :  { %v26508_v49 = vsub.f32 %v14620_v12, %v14670_v14  ;;  %v26510_v51 = vsub.f32 %v14623_v8, %v14670_v14  ;;  %v26512_v24 = vsub.f32 %v14628_v18, %v14670_v14  ;;  %v26514_v16 = vsub.f32 %v14631_v29, %v14670_v14 }
 0x91e   :  { %v26516_v34 = vsub.f32 %v14636_v5, %v14670_v14  ;;  %v14696_v47 = vmul.f32 1.442695, %v26449_v32  ;;  %v14698_v35 = vmul.f32 1.442695, %v26452_v48  ;;  %v14700_v11 = vmul.f32 1.442695, %v26455_v4 }
 0x91f   :  { %v14702_v13 = vmul.f32 1.442695, %v26458_v61  ;;  %v14704_v12 = vmul.f32 1.442695, %v26461_v56  ;;  %v14706_v44 = vmul.f32 1.442695, %v26464_v21 }
 0x920   :  { %19212 = vpow2.f32 %v14696_v47  ;;  %v14708_v62 = vmul.f32 1.442695, %v26467_v28  ;;  %v14710_v8 = vmul.f32 1.442695, %v26470_v27  ;;  %v14712_v37 = vmul.f32 1.442695, %v26473_v1 }
 0x921   :  { %19214 = vpow2.f32 %v14698_v35  ;;  %v14714_v59 = vmul.f32 1.442695, %v26476_v33  ;;  %v14716_v26 = vmul.f32 1.442695, %v26479_v22  ;;  %v14718_v45 = vmul.f32 1.442695, %v26482_v41 }
 0x922   :  { %19216 = vpow2.f32 %v14700_v11  ;;  %v14720_v54 = vmul.f32 1.442695, %v26485_v50  ;;  %v14722_v52 = vmul.f32 1.442695, %v26488_v31  ;;  %v14724_v57 = vmul.f32 1.442695, %v26491_v30 }
 0x923   :  { %19218 = vpow2.f32 %v14702_v13  ;;  %v14726_v38 = vmul.f32 1.442695, %v26494_v25  ;;  %v14728_v9 = vmul.f32 1.442695, %v26497_v40  ;;  %v14730_v19 = vmul.f32 1.442695, %v26500_v63 }
 0x924   :  { %19220 = vpow2.f32 %v14704_v12  ;;  %v14732_v20 = vmul.f32 1.442695, %v26503_v2  ;;  %v14734_v47 = vmul.f32 1.442695, %v26506_v39  ;;  %v14736_v13 = vmul.f32 1.442695, %v26508_v49 }
 0x925   :  { %19222 = vpow2.f32 %v14706_v44 }
 0x926   :  { %19224 = vpow2.f32 %v14708_v62  ;;  %v14738_v62 = vmul.f32 1.442695, %v26510_v51 }
 0x927   :  { %19226 = vpow2.f32 %v14710_v8 }
 0x928   :  { %19228 = vpow2.f32 %v14712_v37 }
 0x929   :  { %19230 = vpow2.f32 %v14714_v59 }
 0x92a   :  { %19232 = vpow2.f32 %v14716_v26  ;;  %v14742_v26 = vmul.f32 1.442695, %v26514_v16 }
 0x92b   :  { %19234 = vpow2.f32 %v14718_v45  ;;  %v14744_v45 = vmul.f32 1.442695, %v26516_v34 }
 0x92c   :  { %19236 = vpow2.f32 %v14720_v54 }
 0x92d   :  { %v19213_v3 = vpop.eup %19212  ;;  %19238 = vpow2.f32 %v14722_v52 }
 0x92e   :  { %v19215_v23 = vpop.eup %19214  ;;  %19240 = vpow2.f32 %v14724_v57 }
 0x92f   :  { %v14746_v18 = vadd.f32 %v19215_v23, %v19213_v3  ;;  %v19217_v42 = vpop.eup %19216  ;;  %19242 = vpow2.f32 %v14726_v38  ;;  %v14740_v3 = vmul.f32 1.442695, %v26512_v24 }
 0x930   :  { %v19219_v46 = vpop.eup %19218  ;;  %19244 = vpow2.f32 %v14728_v9 }
 0x931   :  { %v14747_v10 = vadd.f32 %v19217_v42, %v14746_v18  ;;  %v19221_v53 = vpop.eup %19220  ;;  %19246 = vpow2.f32 %v14730_v19 }
 0x932   :  { %v19223_v58 = vpop.eup %19222  ;;  %19248 = vpow2.f32 %v14732_v20 }
 0x933   :  { %v14748_v29 = vadd.f32 %v19219_v46, %v14747_v10  ;;  %v19225_v5 = vpop.eup %19224  ;;  %19250 = vpow2.f32 %v14734_v47 }
 0x934   :  { %v19227_v36 = vpop.eup %19226  ;;  %19252 = vpow2.f32 %v14736_v13 }
 0x935   :  { %v14749_v0 = vadd.f32 %v19221_v53, %v14748_v29  ;;  %v19229_v15 = vpop.eup %19228  ;;  %19254 = vpow2.f32 %v14738_v62 }
 0x936   :  { %v19231_v60 = vpop.eup %19230  ;;  %19256 = vpow2.f32 %v14740_v3 }
 0x937   :  { %v14750_v43 = vadd.f32 %v19223_v58, %v14749_v0  ;;  %v19233_v14 = vpop.eup %19232  ;;  %19258 = vpow2.f32 %v14742_v26 }
 0x938   :  { %v19235_v11 = vpop.eup %19234  ;;  %19260 = vpow2.f32 %v14744_v45 }
 0x939   :  { %v14751_v17 = vadd.f32 %v19225_v5, %v14750_v43  ;;  %v19237_v44 = vpop.eup %19236 }
 0x93a   :  { %v19239_v37 = vpop.eup %19238 }
 0x93b   :  { %v14752_v6 = vadd.f32 %v19227_v36, %v14751_v17  ;;  %v19241_v23 = vpop.eup %19240 }
 0x93c   :  { %v19243_v42 = vpop.eup %19242 }
 0x93d   :  { %v14753_v55 = vadd.f32 %v19229_v15, %v14752_v6  ;;  %v19245_v46 = vpop.eup %19244 }
 0x93e   :  { %v19247_v29 = vpop.eup %19246 }
 0x93f   :  { %v14754_v7 = vadd.f32 %v19231_v60, %v14753_v55  ;;  %v19249_v52 = vpop.eup %19248 }
 0x940   :  { %v19251_v58 = vpop.eup %19250 }
 0x941   :  { %v14755_v35 = vadd.f32 %v19233_v14, %v14754_v7  ;;  %v19253_v43 = vpop.eup %19252 }
 0x942   :  { %v19255_v38 = vpop.eup %19254 }
 0x943   :  { %v14756_v12 = vadd.f32 %v19235_v11, %v14755_v35  ;;  %v19257_v36 = vpop.eup %19256 }
 0x944   :  { %v19259_v6 = vpop.eup %19258 }
 0x945   :  { %v14757_v8 = vadd.f32 %v19237_v44, %v14756_v12  ;;  %v19261_v19 = vpop.eup %19260 }
 0x947   :  { %v14758_v59 = vadd.f32 %v19239_v37, %v14757_v8 }
 0x949   :  { %v14759_v18 = vadd.f32 %v19241_v23, %v14758_v59 }
 0x94b   :  { %v14760_v10 = vadd.f32 %v19243_v42, %v14759_v18 }
 0x94d   :  { %v14761_v54 = vadd.f32 %v19245_v46, %v14760_v10 }
 0x94f   :  { %v14762_v53 = vadd.f32 %v19247_v29, %v14761_v54 }
 0x951   :  { %v14763_v0 = vadd.f32 %v19249_v52, %v14762_v53 }
 0x953   :  { %v14764_v57 = vadd.f32 %v19251_v58, %v14763_v0 }
 0x955   :  { %v14765_v5 = vadd.f32 %v19253_v43, %v14764_v57 }
 0x957   :  { %v14766_v17 = vadd.f32 %v19255_v38, %v14765_v5 }
 0x959   :  { %v14767_v9 = vadd.f32 %v19257_v36, %v14766_v17 }
 0x95b   :  { %v14768_v15 = vadd.f32 %v19259_v6, %v14767_v9 }
 0x95d   :  { %v14769_v55 = vadd.f32 %v19261_v19, %v14768_v15 }
 0x95f   :  { %v14770_v60 = vrot.slane %v14769_v55, 4 }
 0x961   :  { %v14771_v20 = vadd.f32 %v14770_v60, %v14769_v55 }
 0x963   :  { %v14772_v7 = vrot.slane %v14771_v20, 2 }
 0x965   :  { %v14773_v14 = vadd.f32 %v14772_v7, %v14771_v20 }
 0x967   :  { %v14774_v47 = vrot.slane %v14773_v14, 1 }
 0x969   :  { %v14775_v35 = vadd.f32 %v14774_v47, %v14773_v14 }
 0x96b   :  { %19262 = vlog2.f32 %v14775_v35 }
 0x978   :  { %v19263_v11 = vpop.eup %19262 }
 0x979   :  { %v14777_v13 = vmul.f32 0.6931472, %v19263_v11 }
 0x97b   :  { %v14778_v12 = vsub.f32 %v26449_v32, %v14777_v13  ;;  %v14779_v44 = vsub.f32 %v26452_v48, %v14777_v13  ;;  %v14780_v62 = vsub.f32 %v26455_v4, %v14777_v13  ;;  %v14781_v8 = vsub.f32 %v26458_v61, %v14777_v13 }
 0x97c   :  { %v14782_v37 = vsub.f32 %v26461_v56, %v14777_v13  ;;  %v14783_v3 = vsub.f32 %v26464_v21, %v14777_v13  ;;  %v14784_v59 = vsub.f32 %v26467_v28, %v14777_v13  ;;  %v14785_v23 = vsub.f32 %v26470_v27, %v14777_v13 }
 0x97d   :  { %v14786_v26 = vsub.f32 %v26473_v1, %v14777_v13  ;;  %v14787_v18 = vsub.f32 %v26476_v33, %v14777_v13  ;;  %v14788_v32 = vsub.f32 %v26479_v22, %v14777_v13  ;;  %v14789_v48 = vsub.f32 %v26482_v41, %v14777_v13  ;;  %14803 = vst [vmem:[%s26650_s7] sm:$0xff] %v14778_v12 }
 0x97e   :  { %14804 = vst [vmem:[%s26650_s7 + $0x8] sm:$0xff] %v14779_v44  ;;  %14805 = vst [vmem:[%s26650_s7 + $0x10] sm:$0xff] %v14780_v62  ;;  %v14790_v4 = vsub.f32 %v26485_v50, %v14777_v13  ;;  %v14791_v61 = vsub.f32 %v26488_v31, %v14777_v13  ;;  %v14792_v56 = vsub.f32 %v26491_v30, %v14777_v13 }
 0x97f   :  { %14806 = vst [vmem:[%s26650_s7 + $0x18] sm:$0xff] %v14781_v8  ;;  %v14793_v21 = vsub.f32 %v26494_v25, %v14777_v13  ;;  %14807 = vst [vmem:[%s26650_s7 + $0x20] sm:$0xff] %v14782_v37  ;;  %v14794_v28 = vsub.f32 %v26497_v40, %v14777_v13  ;;  %v14795_v27 = vsub.f32 %v26500_v63, %v14777_v13 }
 0x980   :  { %14808 = vst [vmem:[%s26650_s7 + $0x28] sm:$0xff] %v14783_v3  ;;  %14809 = vst [vmem:[%s26650_s7 + $0x30] sm:$0xff] %v14784_v59  ;;  %v14796_v1 = vsub.f32 %v26503_v2, %v14777_v13  ;;  %v14797_v33 = vsub.f32 %v26506_v39, %v14777_v13  ;;  %v14798_v22 = vsub.f32 %v26508_v49, %v14777_v13 }
 0x981   :  { %14810 = vst [vmem:[%s26650_s7 + $0x38] sm:$0xff] %v14785_v23  ;;  %14811 = vst [vmem:[%s26650_s7 + $0x40] sm:$0xff] %v14786_v26  ;;  %v14799_v41 = vsub.f32 %v26510_v51, %v14777_v13  ;;  %v14800_v50 = vsub.f32 %v26512_v24, %v14777_v13  ;;  %v14801_v31 = vsub.f32 %v26514_v16, %v14777_v13 }
 0x982   :  { %14812 = vst [vmem:[%s26650_s7 + $0x48] sm:$0xff] %v14787_v18  ;;  %14813 = vst [vmem:[%s26650_s7 + $0x50] sm:$0xff] %v14788_v32  ;;  %v14802_v30 = vsub.f32 %v26516_v34, %v14777_v13 }
 0x983   :  { %14814 = vst [vmem:[%s26650_s7 + $0x58] sm:$0xff] %v14789_v48  ;;  %14815 = vst [vmem:[%s26650_s7 + $0x60] sm:$0xff] %v14790_v4 }
 0x984   :  { %14816 = vst [vmem:[%s26650_s7 + $0x68] sm:$0xff] %v14791_v61  ;;  %14817 = vst [vmem:[%s26650_s7 + $0x70] sm:$0xff] %v14792_v56 }
 0x985   :  { %14818 = vst [vmem:[%s26650_s7 + $0x78] sm:$0xff] %v14793_v21  ;;  %14819 = vst [vmem:[%s26650_s7 + $0x80] sm:$0xff] %v14794_v28 }
 0x986   :  { %14820 = vst [vmem:[%s26650_s7 + $0x88] sm:$0xff] %v14795_v27  ;;  %14821 = vst [vmem:[%s26650_s7 + $0x90] sm:$0xff] %v14796_v1 }
 0x987   :  { %14822 = vst [vmem:[%s26650_s7 + $0x98] sm:$0xff] %v14797_v33  ;;  %14823 = vst [vmem:[%s26650_s7 + $0xa0] sm:$0xff] %v14798_v22 }
 0x988   :  { %14824 = vst [vmem:[%s26650_s7 + $0xa8] sm:$0xff] %v14799_v41  ;;  %14825 = vst [vmem:[%s26650_s7 + $0xb0] sm:$0xff] %v14800_v50 }
 0x989   :  { %14826 = vst [vmem:[%s26650_s7 + $0xb8] sm:$0xff] %v14801_v31  ;;  %14827 = vst [vmem:[%s26650_s7 + $0xc0] sm:$0xff] %v14802_v30 }

</bundles_post_ra>
